<compile_context>
chip_gen: v7x
topology: tpu7x:2x2x1
jax: 0.10.0
libtpu: 0.0.40
codegen_flags: <defaults>
</compile_context>

<pallas_src>
import functools
import random

import jax
import jax.numpy as jnp
from jax import lax
from jax.experimental import pallas as pl
from jax.experimental.pallas import tpu as pltpu


def _sigmoid(x):
    # 1 EUP op (tanh) instead of exp+recip.
    return 0.5 * jnp.tanh(0.5 * x) + 0.5


# ----------------------------------------------------------------- fused model kernel

def _vid2seq_kernel(n_layers, L, F, B, T,
                    src_ref, trg_ref, tf_ref,
                    fw_ref, fb_ref,
                    enc_wx_ref, enc_wh_ref, enc_b_ref,
                    emb_ref, dec_wx_ref, dec_wh_ref, dec_b_ref,
                    ow_ref, ob_ref,
                    out_ref,
                    h_scr, c_scr, tok_scr, x_scr):
    Hd = h_scr.shape[-1]
    V = ow_ref.shape[-1]

    # ---- non-recurrent frame embedding, hoisted out of the time loop (one big matmul) ----
    # src rows are frame-major: row = f*(L*B) + t*B + b
    z = jnp.dot(src_ref[...], fw_ref[...],
                preferred_element_type=jnp.float32) + fb_ref[...]
    z = jnp.maximum(z, 0.0)                                   # (F*L*B, feat)
    LB = L * B
    x_all = z[0:LB]
    for f in range(1, F):
        x_all = x_all + z[f * LB:(f + 1) * LB]
    x_scr[...] = x_all * (1.0 / F)                            # (L*B, feat)

    h_scr[...] = jnp.zeros_like(h_scr)
    c_scr[...] = jnp.zeros_like(c_scr)

    def lstm_stack(x, wx_ref, wh_ref, b_ref):
        # stacked LSTM; h/c state shared between encoder and decoder phases via scratch
        for l in range(n_layers):
            h_l = h_scr[l]
            c_l = c_scr[l]
            gates = (jnp.dot(x.astype(jnp.bfloat16), wx_ref[l],
                             preferred_element_type=jnp.float32)
                     + jnp.dot(h_l.astype(jnp.bfloat16), wh_ref[l],
                               preferred_element_type=jnp.float32)
                     + b_ref[l])
            i_g = _sigmoid(gates[:, 0 * Hd:1 * Hd])
            f_g = _sigmoid(gates[:, 1 * Hd:2 * Hd])
            g_g = jnp.tanh(gates[:, 2 * Hd:3 * Hd])
            o_g = _sigmoid(gates[:, 3 * Hd:4 * Hd])
            c_new = f_g * c_l + i_g * g_g
            h_new = o_g * jnp.tanh(c_new)
            h_scr[l] = h_new
            c_scr[l] = c_new
            x = h_new
        return x

    # ---- encoder recurrence over src_length ----
    def enc_body(t, carry):
        start = pl.multiple_of(t * B, B)
        x = x_scr[pl.ds(start, B), :]                         # (B, feat)
        lstm_stack(x, enc_wx_ref, enc_wh_ref, enc_b_ref)
        return carry

    lax.fori_loop(0, L, enc_body, 0, unroll=True)

    # ---- decoder recurrence over trg_length ----
    tok_scr[...] = trg_ref[0]                                 # first decoder input = trg[0, :]
    lane = lax.broadcasted_iota(jnp.int32, (B, V), 1)         # hoisted out of the loop

    def dec_body(t, carry):
        # token embedding gather as a one-hot matmul (stays on-chip, uses the MXU)
        tok = tok_scr[...]                                    # (B, 1) int32
        onehot = (lane == tok).astype(jnp.bfloat16)           # (B, V)
        x = jnp.dot(onehot, emb_ref[...],
                    preferred_element_type=jnp.float32)       # (B, E)
        x = lstm_stack(x, dec_wx_ref, dec_wh_ref, dec_b_ref)
        logits = jnp.dot(x.astype(jnp.bfloat16), ow_ref[...],
                         preferred_element_type=jnp.float32) + ob_ref[...]
        out_ref[t] = logits                                   # (B, V)

        # next input token: trg[t] if teacher forcing at step t else argmax(logits)
        # (argmax = first occurrence of the max, matching torch.argmax semantics)
        m = jnp.max(logits, axis=-1, keepdims=True)
        am = jnp.min(jnp.where(logits == m, lane, V), axis=-1, keepdims=True)
        teacher_force = tf_ref[t] > 0
        tok_scr[...] = jnp.where(teacher_force, trg_ref[t], am)
        return carry

    lax.fori_loop(0, T, dec_body, 0, unroll=True)


# ------------------------------------------------------------------------- model glue

def init_params(key, *, chw, feat_dim, emb_dim, hidden_dim, n_layers, output_dim):
    # uniform stacked layer weights require feat_dim == emb_dim == hidden_dim
    assert feat_dim == hidden_dim and emb_dim == hidden_dim
    keys = iter(jax.random.split(key, 24))

    def rnd(shape, scale=0.1, dtype=jnp.float32):
        return (scale * jax.random.normal(next(keys), shape, jnp.float32)).astype(dtype)

    bf = jnp.bfloat16
    # LSTM weights split as Wih / Whh (gate order i,f,g,o along the 4H axis).
    return {
        "enc_frame_w": rnd((chw, feat_dim), dtype=bf),
        "enc_frame_b": rnd((1, feat_dim)),
        "enc_wx": rnd((n_layers, feat_dim, 4 * hidden_dim), dtype=bf),
        "enc_wh": rnd((n_layers, hidden_dim, 4 * hidden_dim), dtype=bf),
        "enc_b": rnd((n_layers, 1, 4 * hidden_dim)),
        "dec_embed": rnd((output_dim, emb_dim), dtype=bf),
        "dec_wx": rnd((n_layers, emb_dim, 4 * hidden_dim), dtype=bf),
        "dec_wh": rnd((n_layers, hidden_dim, 4 * hidden_dim), dtype=bf),
        "dec_b": rnd((n_layers, 1, 4 * hidden_dim)),
        "dec_out_w": rnd((hidden_dim, output_dim), dtype=bf),
        "dec_out_b": rnd((1, output_dim)),
    }


def vid2seq_forward(params, src, trg, tf_mask):
    """Mirrors Vid2Seq.forward. Returns outputs of shape [trg_length, B, output_dim]."""
    L, B, F, C, Hh, Ww = src.shape
    T = trg.shape[0]
    CHW = C * Hh * Ww
    n_layers = params["enc_wx"].shape[0]
    Hd = params["enc_wh"].shape[1]
    feat = params["enc_frame_w"].shape[1]
    V = params["dec_out_w"].shape[1]

    # frame-major rows: row = f*(L*B) + t*B + b  -> one big embed matmul in-kernel
    src_rows = src.transpose(2, 0, 1, 3, 4, 5).reshape(F * L * B, CHW).astype(jnp.bfloat16)
    trg3 = trg.reshape(T, B, 1).astype(jnp.int32)
    tf_mask = tf_mask.astype(jnp.int32)

    kernel = functools.partial(_vid2seq_kernel, n_layers, L, F, B, T)
    vm = pltpu.MemorySpace.VMEM
    sm = pltpu.MemorySpace.SMEM

    out = pl.pallas_call(
        kernel,
        in_specs=[
            pl.BlockSpec(memory_space=vm),   # src_rows (F*L*B, CHW)
            pl.BlockSpec(memory_space=vm),   # trg (T, B, 1)
            pl.BlockSpec(memory_space=sm),   # tf_mask (T,)
        ] + [pl.BlockSpec(memory_space=vm)] * 11,   # all weights, resident
        out_specs=pl.BlockSpec(memory_space=vm),
        out_shape=jax.ShapeDtypeStruct((T, B, V), jnp.float32),
        scratch_shapes=[
            pltpu.VMEM((n_layers, B, Hd), jnp.float32),   # h
            pltpu.VMEM((n_layers, B, Hd), jnp.float32),   # c
            pltpu.VMEM((B, 1), jnp.int32),                # current token
            pltpu.VMEM((L * B, feat), jnp.float32),       # frame-embedded encoder inputs
        ],
    )(src_rows, trg3, tf_mask,
      params["enc_frame_w"], params["enc_frame_b"],
      params["enc_wx"], params["enc_wh"], params["enc_b"],
      params["dec_embed"],
      params["dec_wx"], params["dec_wh"], params["dec_b"],
      params["dec_out_w"], params["dec_out_b"])
    return out


# ------------------------------------------------------------------------------- main

if __name__ == "__main__":
    random.seed(0)  # deterministic teacher-forcing decisions (same host RNG as reference)

    # [src_length, batch, frames, C, H, W] / [trg_length, batch]
    L, B, F, C, Hh, Ww = 4, 8, 2, 3, 8, 8
    T = 6
    hidden_dim = 128                 # 128-lane-aligned gate slabs
    feat_dim = emb_dim = hidden_dim
    n_layers = 2
    output_dim = 128                 # lane-dense logits store
    teacher_forcing_ratio = 0.5

    key = jax.random.PRNGKey(0)
    kp, ks, kt = jax.random.split(key, 3)
    params = init_params(kp, chw=C * Hh * Ww, feat_dim=feat_dim, emb_dim=emb_dim,
                         hidden_dim=hidden_dim, n_layers=n_layers, output_dim=output_dim)
    src = jax.random.normal(ks, (L, B, F, C, Hh, Ww), jnp.float32)
    trg = jax.random.randint(kt, (T, B), 0, output_dim, dtype=jnp.int32)

    # TODO(synk): teacher-forcing coin flips use the host `random` module (as in the
    # reference); they are precomputed into a mask so the jitted decode loop stays on-chip.
    tf_mask = jnp.asarray([1 if random.random() < teacher_forcing_ratio else 0
                           for _ in range(T)], dtype=jnp.int32)

    fwd = jax.jit(vid2seq_forward)
    out = jax.block_until_ready(fwd(params, src, trg, tf_mask))
    assert out.shape == (T, B, output_dim), out.shape
    assert out.dtype == jnp.float32
    print("KERNEL_OK")
</pallas_src>

<mosaic_0001>
module attributes {stable_mosaic.version = 11 : i64} {
  func.func @_vid2seq_kernel(%arg0: memref<64x192xbf16, #tpu.memory_space<vmem>>, %arg1: memref<6x8x1xi32, #tpu.memory_space<vmem>>, %arg2: memref<6xi32, #tpu.memory_space<smem>>, %arg3: memref<192x128xbf16, #tpu.memory_space<vmem>>, %arg4: memref<1x128xf32, #tpu.memory_space<vmem>>, %arg5: memref<2x128x512xbf16, #tpu.memory_space<vmem>>, %arg6: memref<2x128x512xbf16, #tpu.memory_space<vmem>>, %arg7: memref<2x1x512xf32, #tpu.memory_space<vmem>>, %arg8: memref<128x128xbf16, #tpu.memory_space<vmem>>, %arg9: memref<2x128x512xbf16, #tpu.memory_space<vmem>>, %arg10: memref<2x128x512xbf16, #tpu.memory_space<vmem>>, %arg11: memref<2x1x512xf32, #tpu.memory_space<vmem>>, %arg12: memref<128x128xbf16, #tpu.memory_space<vmem>>, %arg13: memref<1x128xf32, #tpu.memory_space<vmem>>, %arg14: memref<6x8x128xf32, #tpu.memory_space<vmem>>, %arg15: memref<2x8x128xf32, #tpu.memory_space<vmem>>, %arg16: memref<2x8x128xf32, #tpu.memory_space<vmem>>, %arg17: memref<8x1xi32, #tpu.memory_space<vmem>>, %arg18: memref<32x128xf32, #tpu.memory_space<vmem>>) attributes {dimension_semantics = [], scalar_prefetch = 0 : i64, scratch_operands = 4 : i64, tpu.core_type = #tpu.core_type<tc>} {
    %c0 = arith.constant 0 : index
    %c0_0 = arith.constant 0 : index
    %0 = vector.load %arg0[%c0, %c0_0] : memref<64x192xbf16, #tpu.memory_space<vmem>>, vector<64x192xbf16>
    %c0_1 = arith.constant 0 : index
    %c0_2 = arith.constant 0 : index
    %1 = vector.load %arg3[%c0_1, %c0_2] : memref<192x128xbf16, #tpu.memory_space<vmem>>, vector<192x128xbf16>
    %cst = arith.constant dense<0.000000e+00> : vector<64x128xf32>
    %2 = tpu.matmul %0, %1, %cst {dimension_numbers = #tpu.dot_dimension_numbers<[1], [0], [0], [1], [0, 0, 1, 1], [], []>} : vector<64x192xbf16>, vector<192x128xbf16>, vector<64x128xf32> -> vector<64x128xf32>
    %c0_3 = arith.constant 0 : index
    %c0_4 = arith.constant 0 : index
    %3 = vector.load %arg4[%c0_3, %c0_4] : memref<1x128xf32, #tpu.memory_space<vmem>>, vector<1x128xf32>
    %4 = vector.broadcast %3 : vector<1x128xf32> to vector<64x128xf32>
    %5 = arith.addf %2, %4 : vector<64x128xf32>
    %cst_5 = arith.constant 0.000000e+00 : f32
    %6 = vector.broadcast %cst_5 : f32 to vector<64x128xf32>
    %7 = arith.maximumf %5, %6 : vector<64x128xf32>
    %8 = vector.extract_strided_slice %7 {offsets = [0, 0], sizes = [32, 128], strides = [1, 1]} : vector<64x128xf32> to vector<32x128xf32>
    %9 = vector.extract_strided_slice %7 {offsets = [32, 0], sizes = [32, 128], strides = [1, 1]} : vector<64x128xf32> to vector<32x128xf32>
    %10 = arith.addf %8, %9 : vector<32x128xf32>
    %cst_6 = arith.constant 5.000000e-01 : f32
    %11 = vector.broadcast %cst_6 : f32 to vector<32x128xf32>
    %12 = arith.mulf %10, %11 : vector<32x128xf32>
    %c0_7 = arith.constant 0 : index
    %c0_8 = arith.constant 0 : index
    %13 = vector.load %arg18[%c0_7, %c0_8] : memref<32x128xf32, #tpu.memory_space<vmem>>, vector<32x128xf32>
    tpu.vector_store %arg18[%c0_7, %c0_8], %12 {strides = array<i32>} : memref<32x128xf32, #tpu.memory_space<vmem>>, vector<32x128xf32>,
    %cst_9 = arith.constant 0.000000e+00 : f32
    %14 = vector.broadcast %cst_9 : f32 to vector<2x8x128xf32>
    %c0_10 = arith.constant 0 : index
    %c0_11 = arith.constant 0 : index
    %c0_12 = arith.constant 0 : index
    %15 = vector.load %arg15[%c0_10, %c0_11, %c0_12] : memref<2x8x128xf32, #tpu.memory_space<vmem>>, vector<2x8x128xf32>
    tpu.vector_store %arg15[%c0_10, %c0_11, %c0_12], %14 {strides = array<i32>} : memref<2x8x128xf32, #tpu.memory_space<vmem>>, vector<2x8x128xf32>,
    %cst_13 = arith.constant 0.000000e+00 : f32
    %16 = vector.broadcast %cst_13 : f32 to vector<2x8x128xf32>
    %c0_14 = arith.constant 0 : index
    %c0_15 = arith.constant 0 : index
    %c0_16 = arith.constant 0 : index
    %17 = vector.load %arg16[%c0_14, %c0_15, %c0_16] : memref<2x8x128xf32, #tpu.memory_space<vmem>>, vector<2x8x128xf32>
    tpu.vector_store %arg16[%c0_14, %c0_15, %c0_16], %16 {strides = array<i32>} : memref<2x8x128xf32, #tpu.memory_space<vmem>>, vector<2x8x128xf32>,
    %c0_i32 = arith.constant 0 : i32
    %c8_i32 = arith.constant 8 : i32
    %18 = arith.muli %c0_i32, %c8_i32 : i32
    %19 = tpu.assume_multiple %18, 8 : i32
    %20 = arith.index_cast %19 : i32 to index
    %c0_17 = arith.constant 0 : index
    %21 = vector.load %arg18[%20, %c0_17] : memref<32x128xf32, #tpu.memory_space<vmem>>, vector<8x128xf32>
    %c0_18 = arith.constant 0 : index
    %c0_19 = arith.constant 0 : index
    %c0_20 = arith.constant 0 : index
    %22 = vector.load %arg15[%c0_18, %c0_19, %c0_20] : memref<2x8x128xf32, #tpu.memory_space<vmem>>, vector<1x8x128xf32>
    %23 = vector.shape_cast %22 : vector<1x8x128xf32> to vector<8x128xf32>
    %c0_21 = arith.constant 0 : index
    %c0_22 = arith.constant 0 : index
    %c0_23 = arith.constant 0 : index
    %24 = vector.load %arg16[%c0_21, %c0_22, %c0_23] : memref<2x8x128xf32, #tpu.memory_space<vmem>>, vector<1x8x128xf32>
    %25 = vector.shape_cast %24 : vector<1x8x128xf32> to vector<8x128xf32>
    %26 = arith.truncf %21 : vector<8x128xf32> to vector<8x128xbf16>
    %c0_24 = arith.constant 0 : index
    %c0_25 = arith.constant 0 : index
    %c0_26 = arith.constant 0 : index
    %27 = vector.load %arg5[%c0_24, %c0_25, %c0_26] : memref<2x128x512xbf16, #tpu.memory_space<vmem>>, vector<1x128x512xbf16>
    %28 = vector.shape_cast %27 : vector<1x128x512xbf16> to vector<128x512xbf16>
    %cst_27 = arith.constant dense<0.000000e+00> : vector<8x512xf32>
    %29 = tpu.matmul %26, %28, %cst_27 {dimension_numbers = #tpu.dot_dimension_numbers<[1], [0], [0], [1], [0, 0, 1, 1], [], []>} : vector<8x128xbf16>, vector<128x512xbf16>, vector<8x512xf32> -> vector<8x512xf32>
    %30 = arith.truncf %23 : vector<8x128xf32> to vector<8x128xbf16>
    %c0_28 = arith.constant 0 : index
    %c0_29 = arith.constant 0 : index
    %c0_30 = arith.constant 0 : index
    %31 = vector.load %arg6[%c0_28, %c0_29, %c0_30] : memref<2x128x512xbf16, #tpu.memory_space<vmem>>, vector<1x128x512xbf16>
    %32 = vector.shape_cast %31 : vector<1x128x512xbf16> to vector<128x512xbf16>
    %cst_31 = arith.constant dense<0.000000e+00> : vector<8x512xf32>
    %33 = tpu.matmul %30, %32, %cst_31 {dimension_numbers = #tpu.dot_dimension_numbers<[1], [0], [0], [1], [0, 0, 1, 1], [], []>} : vector<8x128xbf16>, vector<128x512xbf16>, vector<8x512xf32> -> vector<8x512xf32>
    %34 = arith.addf %29, %33 : vector<8x512xf32>
    %c0_32 = arith.constant 0 : index
    %c0_33 = arith.constant 0 : index
    %c0_34 = arith.constant 0 : index
    %35 = vector.load %arg7[%c0_32, %c0_33, %c0_34] : memref<2x1x512xf32, #tpu.memory_space<vmem>>, vector<1x1x512xf32>
    %36 = vector.shape_cast %35 : vector<1x1x512xf32> to vector<1x512xf32>
    %37 = vector.broadcast %36 : vector<1x512xf32> to vector<8x512xf32>
    %38 = arith.addf %34, %37 : vector<8x512xf32>
    %39 = vector.extract_strided_slice %38 {offsets = [0, 0], sizes = [8, 128], strides = [1, 1]} : vector<8x512xf32> to vector<8x128xf32>
    %cst_35 = arith.constant 5.000000e-01 : f32
    %40 = vector.broadcast %cst_35 : f32 to vector<8x128xf32>
    %41 = arith.mulf %40, %39 : vector<8x128xf32>
    %42 = math.tanh %41 : vector<8x128xf32>
    %cst_36 = arith.constant 5.000000e-01 : f32
    %43 = vector.broadcast %cst_36 : f32 to vector<8x128xf32>
    %44 = arith.mulf %43, %42 : vector<8x128xf32>
    %cst_37 = arith.constant 5.000000e-01 : f32
    %45 = vector.broadcast %cst_37 : f32 to vector<8x128xf32>
    %46 = arith.addf %44, %45 : vector<8x128xf32>
    %47 = vector.extract_strided_slice %38 {offsets = [0, 128], sizes = [8, 128], strides = [1, 1]} : vector<8x512xf32> to vector<8x128xf32>
    %cst_38 = arith.constant 5.000000e-01 : f32
    %48 = vector.broadcast %cst_38 : f32 to vector<8x128xf32>
    %49 = arith.mulf %48, %47 : vector<8x128xf32>
    %50 = math.tanh %49 : vector<8x128xf32>
    %cst_39 = arith.constant 5.000000e-01 : f32
    %51 = vector.broadcast %cst_39 : f32 to vector<8x128xf32>
    %52 = arith.mulf %51, %50 : vector<8x128xf32>
    %cst_40 = arith.constant 5.000000e-01 : f32
    %53 = vector.broadcast %cst_40 : f32 to vector<8x128xf32>
    %54 = arith.addf %52, %53 : vector<8x128xf32>
    %55 = vector.extract_strided_slice %38 {offsets = [0, 256], sizes = [8, 128], strides = [1, 1]} : vector<8x512xf32> to vector<8x128xf32>
    %56 = math.tanh %55 : vector<8x128xf32>
    %57 = vector.extract_strided_slice %38 {offsets = [0, 384], sizes = [8, 128], strides = [1, 1]} : vector<8x512xf32> to vector<8x128xf32>
    %cst_41 = arith.constant 5.000000e-01 : f32
    %58 = vector.broadcast %cst_41 : f32 to vector<8x128xf32>
    %59 = arith.mulf %58, %57 : vector<8x128xf32>
    %60 = math.tanh %59 : vector<8x128xf32>
    %cst_42 = arith.constant 5.000000e-01 : f32
    %61 = vector.broadcast %cst_42 : f32 to vector<8x128xf32>
    %62 = arith.mulf %61, %60 : vector<8x128xf32>
    %cst_43 = arith.constant 5.000000e-01 : f32
    %63 = vector.broadcast %cst_43 : f32 to vector<8x128xf32>
    %64 = arith.addf %62, %63 : vector<8x128xf32>
    %65 = arith.mulf %54, %25 : vector<8x128xf32>
    %66 = arith.mulf %46, %56 : vector<8x128xf32>
    %67 = arith.addf %65, %66 : vector<8x128xf32>
    %68 = math.tanh %67 : vector<8x128xf32>
    %69 = arith.mulf %64, %68 : vector<8x128xf32>
    %c0_44 = arith.constant 0 : index
    %c0_45 = arith.constant 0 : index
    %c0_46 = arith.constant 0 : index
    %70 = vector.load %arg15[%c0_44, %c0_45, %c0_46] : memref<2x8x128xf32, #tpu.memory_space<vmem>>, vector<1x8x128xf32>
    %71 = vector.shape_cast %70 : vector<1x8x128xf32> to vector<8x128xf32>
    %72 = vector.shape_cast %69 : vector<8x128xf32> to vector<1x8x128xf32>
    tpu.vector_store %arg15[%c0_44, %c0_45, %c0_46], %72 {strides = array<i32>} : memref<2x8x128xf32, #tpu.memory_space<vmem>>, vector<1x8x128xf32>,
    %c0_47 = arith.constant 0 : index
    %c0_48 = arith.constant 0 : index
    %c0_49 = arith.constant 0 : index
    %73 = vector.load %arg16[%c0_47, %c0_48, %c0_49] : memref<2x8x128xf32, #tpu.memory_space<vmem>>, vector<1x8x128xf32>
    %74 = vector.shape_cast %73 : vector<1x8x128xf32> to vector<8x128xf32>
    %75 = vector.shape_cast %67 : vector<8x128xf32> to vector<1x8x128xf32>
    tpu.vector_store %arg16[%c0_47, %c0_48, %c0_49], %75 {strides = array<i32>} : memref<2x8x128xf32, #tpu.memory_space<vmem>>, vector<1x8x128xf32>,
    %c1 = arith.constant 1 : index
    %c0_50 = arith.constant 0 : index
    %c0_51 = arith.constant 0 : index
    %76 = vector.load %arg15[%c1, %c0_50, %c0_51] : memref<2x8x128xf32, #tpu.memory_space<vmem>>, vector<1x8x128xf32>
    %77 = vector.shape_cast %76 : vector<1x8x128xf32> to vector<8x128xf32>
    %c1_52 = arith.constant 1 : index
    %c0_53 = arith.constant 0 : index
    %c0_54 = arith.constant 0 : index
    %78 = vector.load %arg16[%c1_52, %c0_53, %c0_54] : memref<2x8x128xf32, #tpu.memory_space<vmem>>, vector<1x8x128xf32>
    %79 = vector.shape_cast %78 : vector<1x8x128xf32> to vector<8x128xf32>
    %80 = arith.truncf %69 : vector<8x128xf32> to vector<8x128xbf16>
    %c1_55 = arith.constant 1 : index
    %c0_56 = arith.constant 0 : index
    %c0_57 = arith.constant 0 : index
    %81 = vector.load %arg5[%c1_55, %c0_56, %c0_57] : memref<2x128x512xbf16, #tpu.memory_space<vmem>>, vector<1x128x512xbf16>
    %82 = vector.shape_cast %81 : vector<1x128x512xbf16> to vector<128x512xbf16>
    %cst_58 = arith.constant dense<0.000000e+00> : vector<8x512xf32>
    %83 = tpu.matmul %80, %82, %cst_58 {dimension_numbers = #tpu.dot_dimension_numbers<[1], [0], [0], [1], [0, 0, 1, 1], [], []>} : vector<8x128xbf16>, vector<128x512xbf16>, vector<8x512xf32> -> vector<8x512xf32>
    %84 = arith.truncf %77 : vector<8x128xf32> to vector<8x128xbf16>
    %c1_59 = arith.constant 1 : index
    %c0_60 = arith.constant 0 : index
    %c0_61 = arith.constant 0 : index
    %85 = vector.load %arg6[%c1_59, %c0_60, %c0_61] : memref<2x128x512xbf16, #tpu.memory_space<vmem>>, vector<1x128x512xbf16>
    %86 = vector.shape_cast %85 : vector<1x128x512xbf16> to vector<128x512xbf16>
    %cst_62 = arith.constant dense<0.000000e+00> : vector<8x512xf32>
    %87 = tpu.matmul %84, %86, %cst_62 {dimension_numbers = #tpu.dot_dimension_numbers<[1], [0], [0], [1], [0, 0, 1, 1], [], []>} : vector<8x128xbf16>, vector<128x512xbf16>, vector<8x512xf32> -> vector<8x512xf32>
    %88 = arith.addf %83, %87 : vector<8x512xf32>
    %c1_63 = arith.constant 1 : index
    %c0_64 = arith.constant 0 : index
    %c0_65 = arith.constant 0 : index
    %89 = vector.load %arg7[%c1_63, %c0_64, %c0_65] : memref<2x1x512xf32, #tpu.memory_space<vmem>>, vector<1x1x512xf32>
    %90 = vector.shape_cast %89 : vector<1x1x512xf32> to vector<1x512xf32>
    %91 = vector.broadcast %90 : vector<1x512xf32> to vector<8x512xf32>
    %92 = arith.addf %88, %91 : vector<8x512xf32>
    %93 = vector.extract_strided_slice %92 {offsets = [0, 0], sizes = [8, 128], strides = [1, 1]} : vector<8x512xf32> to vector<8x128xf32>
    %cst_66 = arith.constant 5.000000e-01 : f32
    %94 = vector.broadcast %cst_66 : f32 to vector<8x128xf32>
    %95 = arith.mulf %94, %93 : vector<8x128xf32>
    %96 = math.tanh %95 : vector<8x128xf32>
    %cst_67 = arith.constant 5.000000e-01 : f32
    %97 = vector.broadcast %cst_67 : f32 to vector<8x128xf32>
    %98 = arith.mulf %97, %96 : vector<8x128xf32>
    %cst_68 = arith.constant 5.000000e-01 : f32
    %99 = vector.broadcast %cst_68 : f32 to vector<8x128xf32>
    %100 = arith.addf %98, %99 : vector<8x128xf32>
    %101 = vector.extract_strided_slice %92 {offsets = [0, 128], sizes = [8, 128], strides = [1, 1]} : vector<8x512xf32> to vector<8x128xf32>
    %cst_69 = arith.constant 5.000000e-01 : f32
    %102 = vector.broadcast %cst_69 : f32 to vector<8x128xf32>
    %103 = arith.mulf %102, %101 : vector<8x128xf32>
    %104 = math.tanh %103 : vector<8x128xf32>
    %cst_70 = arith.constant 5.000000e-01 : f32
    %105 = vector.broadcast %cst_70 : f32 to vector<8x128xf32>
    %106 = arith.mulf %105, %104 : vector<8x128xf32>
    %cst_71 = arith.constant 5.000000e-01 : f32
    %107 = vector.broadcast %cst_71 : f32 to vector<8x128xf32>
    %108 = arith.addf %106, %107 : vector<8x128xf32>
    %109 = vector.extract_strided_slice %92 {offsets = [0, 256], sizes = [8, 128], strides = [1, 1]} : vector<8x512xf32> to vector<8x128xf32>
    %110 = math.tanh %109 : vector<8x128xf32>
    %111 = vector.extract_strided_slice %92 {offsets = [0, 384], sizes = [8, 128], strides = [1, 1]} : vector<8x512xf32> to vector<8x128xf32>
    %cst_72 = arith.constant 5.000000e-01 : f32
    %112 = vector.broadcast %cst_72 : f32 to vector<8x128xf32>
    %113 = arith.mulf %112, %111 : vector<8x128xf32>
    %114 = math.tanh %113 : vector<8x128xf32>
    %cst_73 = arith.constant 5.000000e-01 : f32
    %115 = vector.broadcast %cst_73 : f32 to vector<8x128xf32>
    %116 = arith.mulf %115, %114 : vector<8x128xf32>
    %cst_74 = arith.constant 5.000000e-01 : f32
    %117 = vector.broadcast %cst_74 : f32 to vector<8x128xf32>
    %118 = arith.addf %116, %117 : vector<8x128xf32>
    %119 = arith.mulf %108, %79 : vector<8x128xf32>
    %120 = arith.mulf %100, %110 : vector<8x128xf32>
    %121 = arith.addf %119, %120 : vector<8x128xf32>
    %122 = math.tanh %121 : vector<8x128xf32>
    %123 = arith.mulf %118, %122 : vector<8x128xf32>
    %c1_75 = arith.constant 1 : index
    %c0_76 = arith.constant 0 : index
    %c0_77 = arith.constant 0 : index
    %124 = vector.load %arg15[%c1_75, %c0_76, %c0_77] : memref<2x8x128xf32, #tpu.memory_space<vmem>>, vector<1x8x128xf32>
    %125 = vector.shape_cast %124 : vector<1x8x128xf32> to vector<8x128xf32>
    %126 = vector.shape_cast %123 : vector<8x128xf32> to vector<1x8x128xf32>
    tpu.vector_store %arg15[%c1_75, %c0_76, %c0_77], %126 {strides = array<i32>} : memref<2x8x128xf32, #tpu.memory_space<vmem>>, vector<1x8x128xf32>,
    %c1_78 = arith.constant 1 : index
    %c0_79 = arith.constant 0 : index
    %c0_80 = arith.constant 0 : index
    %127 = vector.load %arg16[%c1_78, %c0_79, %c0_80] : memref<2x8x128xf32, #tpu.memory_space<vmem>>, vector<1x8x128xf32>
    %128 = vector.shape_cast %127 : vector<1x8x128xf32> to vector<8x128xf32>
    %129 = vector.shape_cast %121 : vector<8x128xf32> to vector<1x8x128xf32>
    tpu.vector_store %arg16[%c1_78, %c0_79, %c0_80], %129 {strides = array<i32>} : memref<2x8x128xf32, #tpu.memory_space<vmem>>, vector<1x8x128xf32>,
    %c1_i32 = arith.constant 1 : i32
    %c8_i32_81 = arith.constant 8 : i32
    %130 = arith.muli %c1_i32, %c8_i32_81 : i32
    %131 = tpu.assume_multiple %130, 8 : i32
    %132 = arith.index_cast %131 : i32 to index
    %c0_82 = arith.constant 0 : index
    %133 = vector.load %arg18[%132, %c0_82] : memref<32x128xf32, #tpu.memory_space<vmem>>, vector<8x128xf32>
    %c0_83 = arith.constant 0 : index
    %c0_84 = arith.constant 0 : index
    %c0_85 = arith.constant 0 : index
    %134 = vector.load %arg15[%c0_83, %c0_84, %c0_85] : memref<2x8x128xf32, #tpu.memory_space<vmem>>, vector<1x8x128xf32>
    %135 = vector.shape_cast %134 : vector<1x8x128xf32> to vector<8x128xf32>
    %c0_86 = arith.constant 0 : index
    %c0_87 = arith.constant 0 : index
    %c0_88 = arith.constant 0 : index
    %136 = vector.load %arg16[%c0_86, %c0_87, %c0_88] : memref<2x8x128xf32, #tpu.memory_space<vmem>>, vector<1x8x128xf32>
    %137 = vector.shape_cast %136 : vector<1x8x128xf32> to vector<8x128xf32>
    %138 = arith.truncf %133 : vector<8x128xf32> to vector<8x128xbf16>
    %c0_89 = arith.constant 0 : index
    %c0_90 = arith.constant 0 : index
    %c0_91 = arith.constant 0 : index
    %139 = vector.load %arg5[%c0_89, %c0_90, %c0_91] : memref<2x128x512xbf16, #tpu.memory_space<vmem>>, vector<1x128x512xbf16>
    %140 = vector.shape_cast %139 : vector<1x128x512xbf16> to vector<128x512xbf16>
    %cst_92 = arith.constant dense<0.000000e+00> : vector<8x512xf32>
    %141 = tpu.matmul %138, %140, %cst_92 {dimension_numbers = #tpu.dot_dimension_numbers<[1], [0], [0], [1], [0, 0, 1, 1], [], []>} : vector<8x128xbf16>, vector<128x512xbf16>, vector<8x512xf32> -> vector<8x512xf32>
    %142 = arith.truncf %135 : vector<8x128xf32> to vector<8x128xbf16>
    %c0_93 = arith.constant 0 : index
    %c0_94 = arith.constant 0 : index
    %c0_95 = arith.constant 0 : index
    %143 = vector.load %arg6[%c0_93, %c0_94, %c0_95] : memref<2x128x512xbf16, #tpu.memory_space<vmem>>, vector<1x128x512xbf16>
    %144 = vector.shape_cast %143 : vector<1x128x512xbf16> to vector<128x512xbf16>
    %cst_96 = arith.constant dense<0.000000e+00> : vector<8x512xf32>
    %145 = tpu.matmul %142, %144, %cst_96 {dimension_numbers = #tpu.dot_dimension_numbers<[1], [0], [0], [1], [0, 0, 1, 1], [], []>} : vector<8x128xbf16>, vector<128x512xbf16>, vector<8x512xf32> -> vector<8x512xf32>
    %146 = arith.addf %141, %145 : vector<8x512xf32>
    %c0_97 = arith.constant 0 : index
    %c0_98 = arith.constant 0 : index
    %c0_99 = arith.constant 0 : index
    %147 = vector.load %arg7[%c0_97, %c0_98, %c0_99] : memref<2x1x512xf32, #tpu.memory_space<vmem>>, vector<1x1x512xf32>
    %148 = vector.shape_cast %147 : vector<1x1x512xf32> to vector<1x512xf32>
    %149 = vector.broadcast %148 : vector<1x512xf32> to vector<8x512xf32>
    %150 = arith.addf %146, %149 : vector<8x512xf32>
    %151 = vector.extract_strided_slice %150 {offsets = [0, 0], sizes = [8, 128], strides = [1, 1]} : vector<8x512xf32> to vector<8x128xf32>
    %cst_100 = arith.constant 5.000000e-01 : f32
    %152 = vector.broadcast %cst_100 : f32 to vector<8x128xf32>
    %153 = arith.mulf %152, %151 : vector<8x128xf32>
    %154 = math.tanh %153 : vector<8x128xf32>
    %cst_101 = arith.constant 5.000000e-01 : f32
    %155 = vector.broadcast %cst_101 : f32 to vector<8x128xf32>
    %156 = arith.mulf %155, %154 : vector<8x128xf32>
    %cst_102 = arith.constant 5.000000e-01 : f32
    %157 = vector.broadcast %cst_102 : f32 to vector<8x128xf32>
    %158 = arith.addf %156, %157 : vector<8x128xf32>
    %159 = vector.extract_strided_slice %150 {offsets = [0, 128], sizes = [8, 128], strides = [1, 1]} : vector<8x512xf32> to vector<8x128xf32>
    %cst_103 = arith.constant 5.000000e-01 : f32
    %160 = vector.broadcast %cst_103 : f32 to vector<8x128xf32>
    %161 = arith.mulf %160, %159 : vector<8x128xf32>
    %162 = math.tanh %161 : vector<8x128xf32>
    %cst_104 = arith.constant 5.000000e-01 : f32
    %163 = vector.broadcast %cst_104 : f32 to vector<8x128xf32>
    %164 = arith.mulf %163, %162 : vector<8x128xf32>
    %cst_105 = arith.constant 5.000000e-01 : f32
    %165 = vector.broadcast %cst_105 : f32 to vector<8x128xf32>
    %166 = arith.addf %164, %165 : vector<8x128xf32>
    %167 = vector.extract_strided_slice %150 {offsets = [0, 256], sizes = [8, 128], strides = [1, 1]} : vector<8x512xf32> to vector<8x128xf32>
    %168 = math.tanh %167 : vector<8x128xf32>
    %169 = vector.extract_strided_slice %150 {offsets = [0, 384], sizes = [8, 128], strides = [1, 1]} : vector<8x512xf32> to vector<8x128xf32>
    %cst_106 = arith.constant 5.000000e-01 : f32
    %170 = vector.broadcast %cst_106 : f32 to vector<8x128xf32>
    %171 = arith.mulf %170, %169 : vector<8x128xf32>
    %172 = math.tanh %171 : vector<8x128xf32>
    %cst_107 = arith.constant 5.000000e-01 : f32
    %173 = vector.broadcast %cst_107 : f32 to vector<8x128xf32>
    %174 = arith.mulf %173, %172 : vector<8x128xf32>
    %cst_108 = arith.constant 5.000000e-01 : f32
    %175 = vector.broadcast %cst_108 : f32 to vector<8x128xf32>
    %176 = arith.addf %174, %175 : vector<8x128xf32>
    %177 = arith.mulf %166, %137 : vector<8x128xf32>
    %178 = arith.mulf %158, %168 : vector<8x128xf32>
    %179 = arith.addf %177, %178 : vector<8x128xf32>
    %180 = math.tanh %179 : vector<8x128xf32>
    %181 = arith.mulf %176, %180 : vector<8x128xf32>
    %c0_109 = arith.constant 0 : index
    %c0_110 = arith.constant 0 : index
    %c0_111 = arith.constant 0 : index
    %182 = vector.load %arg15[%c0_109, %c0_110, %c0_111] : memref<2x8x128xf32, #tpu.memory_space<vmem>>, vector<1x8x128xf32>
    %183 = vector.shape_cast %182 : vector<1x8x128xf32> to vector<8x128xf32>
    %184 = vector.shape_cast %181 : vector<8x128xf32> to vector<1x8x128xf32>
    tpu.vector_store %arg15[%c0_109, %c0_110, %c0_111], %184 {strides = array<i32>} : memref<2x8x128xf32, #tpu.memory_space<vmem>>, vector<1x8x128xf32>,
    %c0_112 = arith.constant 0 : index
    %c0_113 = arith.constant 0 : index
    %c0_114 = arith.constant 0 : index
    %185 = vector.load %arg16[%c0_112, %c0_113, %c0_114] : memref<2x8x128xf32, #tpu.memory_space<vmem>>, vector<1x8x128xf32>
    %186 = vector.shape_cast %185 : vector<1x8x128xf32> to vector<8x128xf32>
    %187 = vector.shape_cast %179 : vector<8x128xf32> to vector<1x8x128xf32>
    tpu.vector_store %arg16[%c0_112, %c0_113, %c0_114], %187 {strides = array<i32>} : memref<2x8x128xf32, #tpu.memory_space<vmem>>, vector<1x8x128xf32>,
    %c1_115 = arith.constant 1 : index
    %c0_116 = arith.constant 0 : index
    %c0_117 = arith.constant 0 : index
    %188 = vector.load %arg15[%c1_115, %c0_116, %c0_117] : memref<2x8x128xf32, #tpu.memory_space<vmem>>, vector<1x8x128xf32>
    %189 = vector.shape_cast %188 : vector<1x8x128xf32> to vector<8x128xf32>
    %c1_118 = arith.constant 1 : index
    %c0_119 = arith.constant 0 : index
    %c0_120 = arith.constant 0 : index
    %190 = vector.load %arg16[%c1_118, %c0_119, %c0_120] : memref<2x8x128xf32, #tpu.memory_space<vmem>>, vector<1x8x128xf32>
    %191 = vector.shape_cast %190 : vector<1x8x128xf32> to vector<8x128xf32>
    %192 = arith.truncf %181 : vector<8x128xf32> to vector<8x128xbf16>
    %c1_121 = arith.constant 1 : index
    %c0_122 = arith.constant 0 : index
    %c0_123 = arith.constant 0 : index
    %193 = vector.load %arg5[%c1_121, %c0_122, %c0_123] : memref<2x128x512xbf16, #tpu.memory_space<vmem>>, vector<1x128x512xbf16>
    %194 = vector.shape_cast %193 : vector<1x128x512xbf16> to vector<128x512xbf16>
    %cst_124 = arith.constant dense<0.000000e+00> : vector<8x512xf32>
    %195 = tpu.matmul %192, %194, %cst_124 {dimension_numbers = #tpu.dot_dimension_numbers<[1], [0], [0], [1], [0, 0, 1, 1], [], []>} : vector<8x128xbf16>, vector<128x512xbf16>, vector<8x512xf32> -> vector<8x512xf32>
    %196 = arith.truncf %189 : vector<8x128xf32> to vector<8x128xbf16>
    %c1_125 = arith.constant 1 : index
    %c0_126 = arith.constant 0 : index
    %c0_127 = arith.constant 0 : index
    %197 = vector.load %arg6[%c1_125, %c0_126, %c0_127] : memref<2x128x512xbf16, #tpu.memory_space<vmem>>, vector<1x128x512xbf16>
    %198 = vector.shape_cast %197 : vector<1x128x512xbf16> to vector<128x512xbf16>
    %cst_128 = arith.constant dense<0.000000e+00> : vector<8x512xf32>
    %199 = tpu.matmul %196, %198, %cst_128 {dimension_numbers = #tpu.dot_dimension_numbers<[1], [0], [0], [1], [0, 0, 1, 1], [], []>} : vector<8x128xbf16>, vector<128x512xbf16>, vector<8x512xf32> -> vector<8x512xf32>
    %200 = arith.addf %195, %199 : vector<8x512xf32>
    %c1_129 = arith.constant 1 : index
    %c0_130 = arith.constant 0 : index
    %c0_131 = arith.constant 0 : index
    %201 = vector.load %arg7[%c1_129, %c0_130, %c0_131] : memref<2x1x512xf32, #tpu.memory_space<vmem>>, vector<1x1x512xf32>
    %202 = vector.shape_cast %201 : vector<1x1x512xf32> to vector<1x512xf32>
    %203 = vector.broadcast %202 : vector<1x512xf32> to vector<8x512xf32>
    %204 = arith.addf %200, %203 : vector<8x512xf32>
    %205 = vector.extract_strided_slice %204 {offsets = [0, 0], sizes = [8, 128], strides = [1, 1]} : vector<8x512xf32> to vector<8x128xf32>
    %cst_132 = arith.constant 5.000000e-01 : f32
    %206 = vector.broadcast %cst_132 : f32 to vector<8x128xf32>
    %207 = arith.mulf %206, %205 : vector<8x128xf32>
    %208 = math.tanh %207 : vector<8x128xf32>
    %cst_133 = arith.constant 5.000000e-01 : f32
    %209 = vector.broadcast %cst_133 : f32 to vector<8x128xf32>
    %210 = arith.mulf %209, %208 : vector<8x128xf32>
    %cst_134 = arith.constant 5.000000e-01 : f32
    %211 = vector.broadcast %cst_134 : f32 to vector<8x128xf32>
    %212 = arith.addf %210, %211 : vector<8x128xf32>
    %213 = vector.extract_strided_slice %204 {offsets = [0, 128], sizes = [8, 128], strides = [1, 1]} : vector<8x512xf32> to vector<8x128xf32>
    %cst_135 = arith.constant 5.000000e-01 : f32
    %214 = vector.broadcast %cst_135 : f32 to vector<8x128xf32>
    %215 = arith.mulf %214, %213 : vector<8x128xf32>
    %216 = math.tanh %215 : vector<8x128xf32>
    %cst_136 = arith.constant 5.000000e-01 : f32
    %217 = vector.broadcast %cst_136 : f32 to vector<8x128xf32>
    %218 = arith.mulf %217, %216 : vector<8x128xf32>
    %cst_137 = arith.constant 5.000000e-01 : f32
    %219 = vector.broadcast %cst_137 : f32 to vector<8x128xf32>
    %220 = arith.addf %218, %219 : vector<8x128xf32>
    %221 = vector.extract_strided_slice %204 {offsets = [0, 256], sizes = [8, 128], strides = [1, 1]} : vector<8x512xf32> to vector<8x128xf32>
    %222 = math.tanh %221 : vector<8x128xf32>
    %223 = vector.extract_strided_slice %204 {offsets = [0, 384], sizes = [8, 128], strides = [1, 1]} : vector<8x512xf32> to vector<8x128xf32>
    %cst_138 = arith.constant 5.000000e-01 : f32
    %224 = vector.broadcast %cst_138 : f32 to vector<8x128xf32>
    %225 = arith.mulf %224, %223 : vector<8x128xf32>
    %226 = math.tanh %225 : vector<8x128xf32>
    %cst_139 = arith.constant 5.000000e-01 : f32
    %227 = vector.broadcast %cst_139 : f32 to vector<8x128xf32>
    %228 = arith.mulf %227, %226 : vector<8x128xf32>
    %cst_140 = arith.constant 5.000000e-01 : f32
    %229 = vector.broadcast %cst_140 : f32 to vector<8x128xf32>
    %230 = arith.addf %228, %229 : vector<8x128xf32>
    %231 = arith.mulf %220, %191 : vector<8x128xf32>
    %232 = arith.mulf %212, %222 : vector<8x128xf32>
    %233 = arith.addf %231, %232 : vector<8x128xf32>
    %234 = math.tanh %233 : vector<8x128xf32>
    %235 = arith.mulf %230, %234 : vector<8x128xf32>
    %c1_141 = arith.constant 1 : index
    %c0_142 = arith.constant 0 : index
    %c0_143 = arith.constant 0 : index
    %236 = vector.load %arg15[%c1_141, %c0_142, %c0_143] : memref<2x8x128xf32, #tpu.memory_space<vmem>>, vector<1x8x128xf32>
    %237 = vector.shape_cast %236 : vector<1x8x128xf32> to vector<8x128xf32>
    %238 = vector.shape_cast %235 : vector<8x128xf32> to vector<1x8x128xf32>
    tpu.vector_store %arg15[%c1_141, %c0_142, %c0_143], %238 {strides = array<i32>} : memref<2x8x128xf32, #tpu.memory_space<vmem>>, vector<1x8x128xf32>,
    %c1_144 = arith.constant 1 : index
    %c0_145 = arith.constant 0 : index
    %c0_146 = arith.constant 0 : index
    %239 = vector.load %arg16[%c1_144, %c0_145, %c0_146] : memref<2x8x128xf32, #tpu.memory_space<vmem>>, vector<1x8x128xf32>
    %240 = vector.shape_cast %239 : vector<1x8x128xf32> to vector<8x128xf32>
    %241 = vector.shape_cast %233 : vector<8x128xf32> to vector<1x8x128xf32>
    tpu.vector_store %arg16[%c1_144, %c0_145, %c0_146], %241 {strides = array<i32>} : memref<2x8x128xf32, #tpu.memory_space<vmem>>, vector<1x8x128xf32>,
    %c2_i32 = arith.constant 2 : i32
    %c8_i32_147 = arith.constant 8 : i32
    %242 = arith.muli %c2_i32, %c8_i32_147 : i32
    %243 = tpu.assume_multiple %242, 8 : i32
    %244 = arith.index_cast %243 : i32 to index
    %c0_148 = arith.constant 0 : index
    %245 = vector.load %arg18[%244, %c0_148] : memref<32x128xf32, #tpu.memory_space<vmem>>, vector<8x128xf32>
    %c0_149 = arith.constant 0 : index
    %c0_150 = arith.constant 0 : index
    %c0_151 = arith.constant 0 : index
    %246 = vector.load %arg15[%c0_149, %c0_150, %c0_151] : memref<2x8x128xf32, #tpu.memory_space<vmem>>, vector<1x8x128xf32>
    %247 = vector.shape_cast %246 : vector<1x8x128xf32> to vector<8x128xf32>
    %c0_152 = arith.constant 0 : index
    %c0_153 = arith.constant 0 : index
    %c0_154 = arith.constant 0 : index
    %248 = vector.load %arg16[%c0_152, %c0_153, %c0_154] : memref<2x8x128xf32, #tpu.memory_space<vmem>>, vector<1x8x128xf32>
    %249 = vector.shape_cast %248 : vector<1x8x128xf32> to vector<8x128xf32>
    %250 = arith.truncf %245 : vector<8x128xf32> to vector<8x128xbf16>
    %c0_155 = arith.constant 0 : index
    %c0_156 = arith.constant 0 : index
    %c0_157 = arith.constant 0 : index
    %251 = vector.load %arg5[%c0_155, %c0_156, %c0_157] : memref<2x128x512xbf16, #tpu.memory_space<vmem>>, vector<1x128x512xbf16>
    %252 = vector.shape_cast %251 : vector<1x128x512xbf16> to vector<128x512xbf16>
    %cst_158 = arith.constant dense<0.000000e+00> : vector<8x512xf32>
    %253 = tpu.matmul %250, %252, %cst_158 {dimension_numbers = #tpu.dot_dimension_numbers<[1], [0], [0], [1], [0, 0, 1, 1], [], []>} : vector<8x128xbf16>, vector<128x512xbf16>, vector<8x512xf32> -> vector<8x512xf32>
    %254 = arith.truncf %247 : vector<8x128xf32> to vector<8x128xbf16>
    %c0_159 = arith.constant 0 : index
    %c0_160 = arith.constant 0 : index
    %c0_161 = arith.constant 0 : index
    %255 = vector.load %arg6[%c0_159, %c0_160, %c0_161] : memref<2x128x512xbf16, #tpu.memory_space<vmem>>, vector<1x128x512xbf16>
    %256 = vector.shape_cast %255 : vector<1x128x512xbf16> to vector<128x512xbf16>
    %cst_162 = arith.constant dense<0.000000e+00> : vector<8x512xf32>
    %257 = tpu.matmul %254, %256, %cst_162 {dimension_numbers = #tpu.dot_dimension_numbers<[1], [0], [0], [1], [0, 0, 1, 1], [], []>} : vector<8x128xbf16>, vector<128x512xbf16>, vector<8x512xf32> -> vector<8x512xf32>
    %258 = arith.addf %253, %257 : vector<8x512xf32>
    %c0_163 = arith.constant 0 : index
    %c0_164 = arith.constant 0 : index
    %c0_165 = arith.constant 0 : index
    %259 = vector.load %arg7[%c0_163, %c0_164, %c0_165] : memref<2x1x512xf32, #tpu.memory_space<vmem>>, vector<1x1x512xf32>
    %260 = vector.shape_cast %259 : vector<1x1x512xf32> to vector<1x512xf32>
    %261 = vector.broadcast %260 : vector<1x512xf32> to vector<8x512xf32>
    %262 = arith.addf %258, %261 : vector<8x512xf32>
    %263 = vector.extract_strided_slice %262 {offsets = [0, 0], sizes = [8, 128], strides = [1, 1]} : vector<8x512xf32> to vector<8x128xf32>
    %cst_166 = arith.constant 5.000000e-01 : f32
    %264 = vector.broadcast %cst_166 : f32 to vector<8x128xf32>
    %265 = arith.mulf %264, %263 : vector<8x128xf32>
    %266 = math.tanh %265 : vector<8x128xf32>
    %cst_167 = arith.constant 5.000000e-01 : f32
    %267 = vector.broadcast %cst_167 : f32 to vector<8x128xf32>
    %268 = arith.mulf %267, %266 : vector<8x128xf32>
    %cst_168 = arith.constant 5.000000e-01 : f32
    %269 = vector.broadcast %cst_168 : f32 to vector<8x128xf32>
    %270 = arith.addf %268, %269 : vector<8x128xf32>
    %271 = vector.extract_strided_slice %262 {offsets = [0, 128], sizes = [8, 128], strides = [1, 1]} : vector<8x512xf32> to vector<8x128xf32>
    %cst_169 = arith.constant 5.000000e-01 : f32
    %272 = vector.broadcast %cst_169 : f32 to vector<8x128xf32>
    %273 = arith.mulf %272, %271 : vector<8x128xf32>
    %274 = math.tanh %273 : vector<8x128xf32>
    %cst_170 = arith.constant 5.000000e-01 : f32
    %275 = vector.broadcast %cst_170 : f32 to vector<8x128xf32>
    %276 = arith.mulf %275, %274 : vector<8x128xf32>
    %cst_171 = arith.constant 5.000000e-01 : f32
    %277 = vector.broadcast %cst_171 : f32 to vector<8x128xf32>
    %278 = arith.addf %276, %277 : vector<8x128xf32>
    %279 = vector.extract_strided_slice %262 {offsets = [0, 256], sizes = [8, 128], strides = [1, 1]} : vector<8x512xf32> to vector<8x128xf32>
    %280 = math.tanh %279 : vector<8x128xf32>
    %281 = vector.extract_strided_slice %262 {offsets = [0, 384], sizes = [8, 128], strides = [1, 1]} : vector<8x512xf32> to vector<8x128xf32>
    %cst_172 = arith.constant 5.000000e-01 : f32
    %282 = vector.broadcast %cst_172 : f32 to vector<8x128xf32>
    %283 = arith.mulf %282, %281 : vector<8x128xf32>
    %284 = math.tanh %283 : vector<8x128xf32>
    %cst_173 = arith.constant 5.000000e-01 : f32
    %285 = vector.broadcast %cst_173 : f32 to vector<8x128xf32>
    %286 = arith.mulf %285, %284 : vector<8x128xf32>
    %cst_174 = arith.constant 5.000000e-01 : f32
    %287 = vector.broadcast %cst_174 : f32 to vector<8x128xf32>
    %288 = arith.addf %286, %287 : vector<8x128xf32>
    %289 = arith.mulf %278, %249 : vector<8x128xf32>
    %290 = arith.mulf %270, %280 : vector<8x128xf32>
    %291 = arith.addf %289, %290 : vector<8x128xf32>
    %292 = math.tanh %291 : vector<8x128xf32>
    %293 = arith.mulf %288, %292 : vector<8x128xf32>
    %c0_175 = arith.constant 0 : index
    %c0_176 = arith.constant 0 : index
    %c0_177 = arith.constant 0 : index
    %294 = vector.load %arg15[%c0_175, %c0_176, %c0_177] : memref<2x8x128xf32, #tpu.memory_space<vmem>>, vector<1x8x128xf32>
    %295 = vector.shape_cast %294 : vector<1x8x128xf32> to vector<8x128xf32>
    %296 = vector.shape_cast %293 : vector<8x128xf32> to vector<1x8x128xf32>
    tpu.vector_store %arg15[%c0_175, %c0_176, %c0_177], %296 {strides = array<i32>} : memref<2x8x128xf32, #tpu.memory_space<vmem>>, vector<1x8x128xf32>,
    %c0_178 = arith.constant 0 : index
    %c0_179 = arith.constant 0 : index
    %c0_180 = arith.constant 0 : index
    %297 = vector.load %arg16[%c0_178, %c0_179, %c0_180] : memref<2x8x128xf32, #tpu.memory_space<vmem>>, vector<1x8x128xf32>
    %298 = vector.shape_cast %297 : vector<1x8x128xf32> to vector<8x128xf32>
    %299 = vector.shape_cast %291 : vector<8x128xf32> to vector<1x8x128xf32>
    tpu.vector_store %arg16[%c0_178, %c0_179, %c0_180], %299 {strides = array<i32>} : memref<2x8x128xf32, #tpu.memory_space<vmem>>, vector<1x8x128xf32>,
    %c1_181 = arith.constant 1 : index
    %c0_182 = arith.constant 0 : index
    %c0_183 = arith.constant 0 : index
    %300 = vector.load %arg15[%c1_181, %c0_182, %c0_183] : memref<2x8x128xf32, #tpu.memory_space<vmem>>, vector<1x8x128xf32>
    %301 = vector.shape_cast %300 : vector<1x8x128xf32> to vector<8x128xf32>
    %c1_184 = arith.constant 1 : index
    %c0_185 = arith.constant 0 : index
    %c0_186 = arith.constant 0 : index
    %302 = vector.load %arg16[%c1_184, %c0_185, %c0_186] : memref<2x8x128xf32, #tpu.memory_space<vmem>>, vector<1x8x128xf32>
    %303 = vector.shape_cast %302 : vector<1x8x128xf32> to vector<8x128xf32>
    %304 = arith.truncf %293 : vector<8x128xf32> to vector<8x128xbf16>
    %c1_187 = arith.constant 1 : index
    %c0_188 = arith.constant 0 : index
    %c0_189 = arith.constant 0 : index
    %305 = vector.load %arg5[%c1_187, %c0_188, %c0_189] : memref<2x128x512xbf16, #tpu.memory_space<vmem>>, vector<1x128x512xbf16>
    %306 = vector.shape_cast %305 : vector<1x128x512xbf16> to vector<128x512xbf16>
    %cst_190 = arith.constant dense<0.000000e+00> : vector<8x512xf32>
    %307 = tpu.matmul %304, %306, %cst_190 {dimension_numbers = #tpu.dot_dimension_numbers<[1], [0], [0], [1], [0, 0, 1, 1], [], []>} : vector<8x128xbf16>, vector<128x512xbf16>, vector<8x512xf32> -> vector<8x512xf32>
    %308 = arith.truncf %301 : vector<8x128xf32> to vector<8x128xbf16>
    %c1_191 = arith.constant 1 : index
    %c0_192 = arith.constant 0 : index
    %c0_193 = arith.constant 0 : index
    %309 = vector.load %arg6[%c1_191, %c0_192, %c0_193] : memref<2x128x512xbf16, #tpu.memory_space<vmem>>, vector<1x128x512xbf16>
    %310 = vector.shape_cast %309 : vector<1x128x512xbf16> to vector<128x512xbf16>
    %cst_194 = arith.constant dense<0.000000e+00> : vector<8x512xf32>
    %311 = tpu.matmul %308, %310, %cst_194 {dimension_numbers = #tpu.dot_dimension_numbers<[1], [0], [0], [1], [0, 0, 1, 1], [], []>} : vector<8x128xbf16>, vector<128x512xbf16>, vector<8x512xf32> -> vector<8x512xf32>
    %312 = arith.addf %307, %311 : vector<8x512xf32>
    %c1_195 = arith.constant 1 : index
    %c0_196 = arith.constant 0 : index
    %c0_197 = arith.constant 0 : index
    %313 = vector.load %arg7[%c1_195, %c0_196, %c0_197] : memref<2x1x512xf32, #tpu.memory_space<vmem>>, vector<1x1x512xf32>
    %314 = vector.shape_cast %313 : vector<1x1x512xf32> to vector<1x512xf32>
    %315 = vector.broadcast %314 : vector<1x512xf32> to vector<8x512xf32>
    %316 = arith.addf %312, %315 : vector<8x512xf32>
    %317 = vector.extract_strided_slice %316 {offsets = [0, 0], sizes = [8, 128], strides = [1, 1]} : vector<8x512xf32> to vector<8x128xf32>
    %cst_198 = arith.constant 5.000000e-01 : f32
    %318 = vector.broadcast %cst_198 : f32 to vector<8x128xf32>
    %319 = arith.mulf %318, %317 : vector<8x128xf32>
    %320 = math.tanh %319 : vector<8x128xf32>
    %cst_199 = arith.constant 5.000000e-01 : f32
    %321 = vector.broadcast %cst_199 : f32 to vector<8x128xf32>
    %322 = arith.mulf %321, %320 : vector<8x128xf32>
    %cst_200 = arith.constant 5.000000e-01 : f32
    %323 = vector.broadcast %cst_200 : f32 to vector<8x128xf32>
    %324 = arith.addf %322, %323 : vector<8x128xf32>
    %325 = vector.extract_strided_slice %316 {offsets = [0, 128], sizes = [8, 128], strides = [1, 1]} : vector<8x512xf32> to vector<8x128xf32>
    %cst_201 = arith.constant 5.000000e-01 : f32
    %326 = vector.broadcast %cst_201 : f32 to vector<8x128xf32>
    %327 = arith.mulf %326, %325 : vector<8x128xf32>
    %328 = math.tanh %327 : vector<8x128xf32>
    %cst_202 = arith.constant 5.000000e-01 : f32
    %329 = vector.broadcast %cst_202 : f32 to vector<8x128xf32>
    %330 = arith.mulf %329, %328 : vector<8x128xf32>
    %cst_203 = arith.constant 5.000000e-01 : f32
    %331 = vector.broadcast %cst_203 : f32 to vector<8x128xf32>
    %332 = arith.addf %330, %331 : vector<8x128xf32>
    %333 = vector.extract_strided_slice %316 {offsets = [0, 256], sizes = [8, 128], strides = [1, 1]} : vector<8x512xf32> to vector<8x128xf32>
    %334 = math.tanh %333 : vector<8x128xf32>
    %335 = vector.extract_strided_slice %316 {offsets = [0, 384], sizes = [8, 128], strides = [1, 1]} : vector<8x512xf32> to vector<8x128xf32>
    %cst_204 = arith.constant 5.000000e-01 : f32
    %336 = vector.broadcast %cst_204 : f32 to vector<8x128xf32>
    %337 = arith.mulf %336, %335 : vector<8x128xf32>
    %338 = math.tanh %337 : vector<8x128xf32>
    %cst_205 = arith.constant 5.000000e-01 : f32
    %339 = vector.broadcast %cst_205 : f32 to vector<8x128xf32>
    %340 = arith.mulf %339, %338 : vector<8x128xf32>
    %cst_206 = arith.constant 5.000000e-01 : f32
    %341 = vector.broadcast %cst_206 : f32 to vector<8x128xf32>
    %342 = arith.addf %340, %341 : vector<8x128xf32>
    %343 = arith.mulf %332, %303 : vector<8x128xf32>
    %344 = arith.mulf %324, %334 : vector<8x128xf32>
    %345 = arith.addf %343, %344 : vector<8x128xf32>
    %346 = math.tanh %345 : vector<8x128xf32>
    %347 = arith.mulf %342, %346 : vector<8x128xf32>
    %c1_207 = arith.constant 1 : index
    %c0_208 = arith.constant 0 : index
    %c0_209 = arith.constant 0 : index
    %348 = vector.load %arg15[%c1_207, %c0_208, %c0_209] : memref<2x8x128xf32, #tpu.memory_space<vmem>>, vector<1x8x128xf32>
    %349 = vector.shape_cast %348 : vector<1x8x128xf32> to vector<8x128xf32>
    %350 = vector.shape_cast %347 : vector<8x128xf32> to vector<1x8x128xf32>
    tpu.vector_store %arg15[%c1_207, %c0_208, %c0_209], %350 {strides = array<i32>} : memref<2x8x128xf32, #tpu.memory_space<vmem>>, vector<1x8x128xf32>,
    %c1_210 = arith.constant 1 : index
    %c0_211 = arith.constant 0 : index
    %c0_212 = arith.constant 0 : index
    %351 = vector.load %arg16[%c1_210, %c0_211, %c0_212] : memref<2x8x128xf32, #tpu.memory_space<vmem>>, vector<1x8x128xf32>
    %352 = vector.shape_cast %351 : vector<1x8x128xf32> to vector<8x128xf32>
    %353 = vector.shape_cast %345 : vector<8x128xf32> to vector<1x8x128xf32>
    tpu.vector_store %arg16[%c1_210, %c0_211, %c0_212], %353 {strides = array<i32>} : memref<2x8x128xf32, #tpu.memory_space<vmem>>, vector<1x8x128xf32>,
    %c3_i32 = arith.constant 3 : i32
    %c8_i32_213 = arith.constant 8 : i32
    %354 = arith.muli %c3_i32, %c8_i32_213 : i32
    %355 = tpu.assume_multiple %354, 8 : i32
    %356 = arith.index_cast %355 : i32 to index
    %c0_214 = arith.constant 0 : index
    %357 = vector.load %arg18[%356, %c0_214] : memref<32x128xf32, #tpu.memory_space<vmem>>, vector<8x128xf32>
    %c0_215 = arith.constant 0 : index
    %c0_216 = arith.constant 0 : index
    %c0_217 = arith.constant 0 : index
    %358 = vector.load %arg15[%c0_215, %c0_216, %c0_217] : memref<2x8x128xf32, #tpu.memory_space<vmem>>, vector<1x8x128xf32>
    %359 = vector.shape_cast %358 : vector<1x8x128xf32> to vector<8x128xf32>
    %c0_218 = arith.constant 0 : index
    %c0_219 = arith.constant 0 : index
    %c0_220 = arith.constant 0 : index
    %360 = vector.load %arg16[%c0_218, %c0_219, %c0_220] : memref<2x8x128xf32, #tpu.memory_space<vmem>>, vector<1x8x128xf32>
    %361 = vector.shape_cast %360 : vector<1x8x128xf32> to vector<8x128xf32>
    %362 = arith.truncf %357 : vector<8x128xf32> to vector<8x128xbf16>
    %c0_221 = arith.constant 0 : index
    %c0_222 = arith.constant 0 : index
    %c0_223 = arith.constant 0 : index
    %363 = vector.load %arg5[%c0_221, %c0_222, %c0_223] : memref<2x128x512xbf16, #tpu.memory_space<vmem>>, vector<1x128x512xbf16>
    %364 = vector.shape_cast %363 : vector<1x128x512xbf16> to vector<128x512xbf16>
    %cst_224 = arith.constant dense<0.000000e+00> : vector<8x512xf32>
    %365 = tpu.matmul %362, %364, %cst_224 {dimension_numbers = #tpu.dot_dimension_numbers<[1], [0], [0], [1], [0, 0, 1, 1], [], []>} : vector<8x128xbf16>, vector<128x512xbf16>, vector<8x512xf32> -> vector<8x512xf32>
    %366 = arith.truncf %359 : vector<8x128xf32> to vector<8x128xbf16>
    %c0_225 = arith.constant 0 : index
    %c0_226 = arith.constant 0 : index
    %c0_227 = arith.constant 0 : index
    %367 = vector.load %arg6[%c0_225, %c0_226, %c0_227] : memref<2x128x512xbf16, #tpu.memory_space<vmem>>, vector<1x128x512xbf16>
    %368 = vector.shape_cast %367 : vector<1x128x512xbf16> to vector<128x512xbf16>
    %cst_228 = arith.constant dense<0.000000e+00> : vector<8x512xf32>
    %369 = tpu.matmul %366, %368, %cst_228 {dimension_numbers = #tpu.dot_dimension_numbers<[1], [0], [0], [1], [0, 0, 1, 1], [], []>} : vector<8x128xbf16>, vector<128x512xbf16>, vector<8x512xf32> -> vector<8x512xf32>
    %370 = arith.addf %365, %369 : vector<8x512xf32>
    %c0_229 = arith.constant 0 : index
    %c0_230 = arith.constant 0 : index
    %c0_231 = arith.constant 0 : index
    %371 = vector.load %arg7[%c0_229, %c0_230, %c0_231] : memref<2x1x512xf32, #tpu.memory_space<vmem>>, vector<1x1x512xf32>
    %372 = vector.shape_cast %371 : vector<1x1x512xf32> to vector<1x512xf32>
    %373 = vector.broadcast %372 : vector<1x512xf32> to vector<8x512xf32>
    %374 = arith.addf %370, %373 : vector<8x512xf32>
    %375 = vector.extract_strided_slice %374 {offsets = [0, 0], sizes = [8, 128], strides = [1, 1]} : vector<8x512xf32> to vector<8x128xf32>
    %cst_232 = arith.constant 5.000000e-01 : f32
    %376 = vector.broadcast %cst_232 : f32 to vector<8x128xf32>
    %377 = arith.mulf %376, %375 : vector<8x128xf32>
    %378 = math.tanh %377 : vector<8x128xf32>
    %cst_233 = arith.constant 5.000000e-01 : f32
    %379 = vector.broadcast %cst_233 : f32 to vector<8x128xf32>
    %380 = arith.mulf %379, %378 : vector<8x128xf32>
    %cst_234 = arith.constant 5.000000e-01 : f32
    %381 = vector.broadcast %cst_234 : f32 to vector<8x128xf32>
    %382 = arith.addf %380, %381 : vector<8x128xf32>
    %383 = vector.extract_strided_slice %374 {offsets = [0, 128], sizes = [8, 128], strides = [1, 1]} : vector<8x512xf32> to vector<8x128xf32>
    %cst_235 = arith.constant 5.000000e-01 : f32
    %384 = vector.broadcast %cst_235 : f32 to vector<8x128xf32>
    %385 = arith.mulf %384, %383 : vector<8x128xf32>
    %386 = math.tanh %385 : vector<8x128xf32>
    %cst_236 = arith.constant 5.000000e-01 : f32
    %387 = vector.broadcast %cst_236 : f32 to vector<8x128xf32>
    %388 = arith.mulf %387, %386 : vector<8x128xf32>
    %cst_237 = arith.constant 5.000000e-01 : f32
    %389 = vector.broadcast %cst_237 : f32 to vector<8x128xf32>
    %390 = arith.addf %388, %389 : vector<8x128xf32>
    %391 = vector.extract_strided_slice %374 {offsets = [0, 256], sizes = [8, 128], strides = [1, 1]} : vector<8x512xf32> to vector<8x128xf32>
    %392 = math.tanh %391 : vector<8x128xf32>
    %393 = vector.extract_strided_slice %374 {offsets = [0, 384], sizes = [8, 128], strides = [1, 1]} : vector<8x512xf32> to vector<8x128xf32>
    %cst_238 = arith.constant 5.000000e-01 : f32
    %394 = vector.broadcast %cst_238 : f32 to vector<8x128xf32>
    %395 = arith.mulf %394, %393 : vector<8x128xf32>
    %396 = math.tanh %395 : vector<8x128xf32>
    %cst_239 = arith.constant 5.000000e-01 : f32
    %397 = vector.broadcast %cst_239 : f32 to vector<8x128xf32>
    %398 = arith.mulf %397, %396 : vector<8x128xf32>
    %cst_240 = arith.constant 5.000000e-01 : f32
    %399 = vector.broadcast %cst_240 : f32 to vector<8x128xf32>
    %400 = arith.addf %398, %399 : vector<8x128xf32>
    %401 = arith.mulf %390, %361 : vector<8x128xf32>
    %402 = arith.mulf %382, %392 : vector<8x128xf32>
    %403 = arith.addf %401, %402 : vector<8x128xf32>
    %404 = math.tanh %403 : vector<8x128xf32>
    %405 = arith.mulf %400, %404 : vector<8x128xf32>
    %c0_241 = arith.constant 0 : index
    %c0_242 = arith.constant 0 : index
    %c0_243 = arith.constant 0 : index
    %406 = vector.load %arg15[%c0_241, %c0_242, %c0_243] : memref<2x8x128xf32, #tpu.memory_space<vmem>>, vector<1x8x128xf32>
    %407 = vector.shape_cast %406 : vector<1x8x128xf32> to vector<8x128xf32>
    %408 = vector.shape_cast %405 : vector<8x128xf32> to vector<1x8x128xf32>
    tpu.vector_store %arg15[%c0_241, %c0_242, %c0_243], %408 {strides = array<i32>} : memref<2x8x128xf32, #tpu.memory_space<vmem>>, vector<1x8x128xf32>,
    %c0_244 = arith.constant 0 : index
    %c0_245 = arith.constant 0 : index
    %c0_246 = arith.constant 0 : index
    %409 = vector.load %arg16[%c0_244, %c0_245, %c0_246] : memref<2x8x128xf32, #tpu.memory_space<vmem>>, vector<1x8x128xf32>
    %410 = vector.shape_cast %409 : vector<1x8x128xf32> to vector<8x128xf32>
    %411 = vector.shape_cast %403 : vector<8x128xf32> to vector<1x8x128xf32>
    tpu.vector_store %arg16[%c0_244, %c0_245, %c0_246], %411 {strides = array<i32>} : memref<2x8x128xf32, #tpu.memory_space<vmem>>, vector<1x8x128xf32>,
    %c1_247 = arith.constant 1 : index
    %c0_248 = arith.constant 0 : index
    %c0_249 = arith.constant 0 : index
    %412 = vector.load %arg15[%c1_247, %c0_248, %c0_249] : memref<2x8x128xf32, #tpu.memory_space<vmem>>, vector<1x8x128xf32>
    %413 = vector.shape_cast %412 : vector<1x8x128xf32> to vector<8x128xf32>
    %c1_250 = arith.constant 1 : index
    %c0_251 = arith.constant 0 : index
    %c0_252 = arith.constant 0 : index
    %414 = vector.load %arg16[%c1_250, %c0_251, %c0_252] : memref<2x8x128xf32, #tpu.memory_space<vmem>>, vector<1x8x128xf32>
    %415 = vector.shape_cast %414 : vector<1x8x128xf32> to vector<8x128xf32>
    %416 = arith.truncf %405 : vector<8x128xf32> to vector<8x128xbf16>
    %c1_253 = arith.constant 1 : index
    %c0_254 = arith.constant 0 : index
    %c0_255 = arith.constant 0 : index
    %417 = vector.load %arg5[%c1_253, %c0_254, %c0_255] : memref<2x128x512xbf16, #tpu.memory_space<vmem>>, vector<1x128x512xbf16>
    %418 = vector.shape_cast %417 : vector<1x128x512xbf16> to vector<128x512xbf16>
    %cst_256 = arith.constant dense<0.000000e+00> : vector<8x512xf32>
    %419 = tpu.matmul %416, %418, %cst_256 {dimension_numbers = #tpu.dot_dimension_numbers<[1], [0], [0], [1], [0, 0, 1, 1], [], []>} : vector<8x128xbf16>, vector<128x512xbf16>, vector<8x512xf32> -> vector<8x512xf32>
    %420 = arith.truncf %413 : vector<8x128xf32> to vector<8x128xbf16>
    %c1_257 = arith.constant 1 : index
    %c0_258 = arith.constant 0 : index
    %c0_259 = arith.constant 0 : index
    %421 = vector.load %arg6[%c1_257, %c0_258, %c0_259] : memref<2x128x512xbf16, #tpu.memory_space<vmem>>, vector<1x128x512xbf16>
    %422 = vector.shape_cast %421 : vector<1x128x512xbf16> to vector<128x512xbf16>
    %cst_260 = arith.constant dense<0.000000e+00> : vector<8x512xf32>
    %423 = tpu.matmul %420, %422, %cst_260 {dimension_numbers = #tpu.dot_dimension_numbers<[1], [0], [0], [1], [0, 0, 1, 1], [], []>} : vector<8x128xbf16>, vector<128x512xbf16>, vector<8x512xf32> -> vector<8x512xf32>
    %424 = arith.addf %419, %423 : vector<8x512xf32>
    %c1_261 = arith.constant 1 : index
    %c0_262 = arith.constant 0 : index
    %c0_263 = arith.constant 0 : index
    %425 = vector.load %arg7[%c1_261, %c0_262, %c0_263] : memref<2x1x512xf32, #tpu.memory_space<vmem>>, vector<1x1x512xf32>
    %426 = vector.shape_cast %425 : vector<1x1x512xf32> to vector<1x512xf32>
    %427 = vector.broadcast %426 : vector<1x512xf32> to vector<8x512xf32>
    %428 = arith.addf %424, %427 : vector<8x512xf32>
    %429 = vector.extract_strided_slice %428 {offsets = [0, 0], sizes = [8, 128], strides = [1, 1]} : vector<8x512xf32> to vector<8x128xf32>
    %cst_264 = arith.constant 5.000000e-01 : f32
    %430 = vector.broadcast %cst_264 : f32 to vector<8x128xf32>
    %431 = arith.mulf %430, %429 : vector<8x128xf32>
    %432 = math.tanh %431 : vector<8x128xf32>
    %cst_265 = arith.constant 5.000000e-01 : f32
    %433 = vector.broadcast %cst_265 : f32 to vector<8x128xf32>
    %434 = arith.mulf %433, %432 : vector<8x128xf32>
    %cst_266 = arith.constant 5.000000e-01 : f32
    %435 = vector.broadcast %cst_266 : f32 to vector<8x128xf32>
    %436 = arith.addf %434, %435 : vector<8x128xf32>
    %437 = vector.extract_strided_slice %428 {offsets = [0, 128], sizes = [8, 128], strides = [1, 1]} : vector<8x512xf32> to vector<8x128xf32>
    %cst_267 = arith.constant 5.000000e-01 : f32
    %438 = vector.broadcast %cst_267 : f32 to vector<8x128xf32>
    %439 = arith.mulf %438, %437 : vector<8x128xf32>
    %440 = math.tanh %439 : vector<8x128xf32>
    %cst_268 = arith.constant 5.000000e-01 : f32
    %441 = vector.broadcast %cst_268 : f32 to vector<8x128xf32>
    %442 = arith.mulf %441, %440 : vector<8x128xf32>
    %cst_269 = arith.constant 5.000000e-01 : f32
    %443 = vector.broadcast %cst_269 : f32 to vector<8x128xf32>
    %444 = arith.addf %442, %443 : vector<8x128xf32>
    %445 = vector.extract_strided_slice %428 {offsets = [0, 256], sizes = [8, 128], strides = [1, 1]} : vector<8x512xf32> to vector<8x128xf32>
    %446 = math.tanh %445 : vector<8x128xf32>
    %447 = vector.extract_strided_slice %428 {offsets = [0, 384], sizes = [8, 128], strides = [1, 1]} : vector<8x512xf32> to vector<8x128xf32>
    %cst_270 = arith.constant 5.000000e-01 : f32
    %448 = vector.broadcast %cst_270 : f32 to vector<8x128xf32>
    %449 = arith.mulf %448, %447 : vector<8x128xf32>
    %450 = math.tanh %449 : vector<8x128xf32>
    %cst_271 = arith.constant 5.000000e-01 : f32
    %451 = vector.broadcast %cst_271 : f32 to vector<8x128xf32>
    %452 = arith.mulf %451, %450 : vector<8x128xf32>
    %cst_272 = arith.constant 5.000000e-01 : f32
    %453 = vector.broadcast %cst_272 : f32 to vector<8x128xf32>
    %454 = arith.addf %452, %453 : vector<8x128xf32>
    %455 = arith.mulf %444, %415 : vector<8x128xf32>
    %456 = arith.mulf %436, %446 : vector<8x128xf32>
    %457 = arith.addf %455, %456 : vector<8x128xf32>
    %458 = math.tanh %457 : vector<8x128xf32>
    %459 = arith.mulf %454, %458 : vector<8x128xf32>
    %c1_273 = arith.constant 1 : index
    %c0_274 = arith.constant 0 : index
    %c0_275 = arith.constant 0 : index
    %460 = vector.load %arg15[%c1_273, %c0_274, %c0_275] : memref<2x8x128xf32, #tpu.memory_space<vmem>>, vector<1x8x128xf32>
    %461 = vector.shape_cast %460 : vector<1x8x128xf32> to vector<8x128xf32>
    %462 = vector.shape_cast %459 : vector<8x128xf32> to vector<1x8x128xf32>
    tpu.vector_store %arg15[%c1_273, %c0_274, %c0_275], %462 {strides = array<i32>} : memref<2x8x128xf32, #tpu.memory_space<vmem>>, vector<1x8x128xf32>,
    %c1_276 = arith.constant 1 : index
    %c0_277 = arith.constant 0 : index
    %c0_278 = arith.constant 0 : index
    %463 = vector.load %arg16[%c1_276, %c0_277, %c0_278] : memref<2x8x128xf32, #tpu.memory_space<vmem>>, vector<1x8x128xf32>
    %464 = vector.shape_cast %463 : vector<1x8x128xf32> to vector<8x128xf32>
    %465 = vector.shape_cast %457 : vector<8x128xf32> to vector<1x8x128xf32>
    tpu.vector_store %arg16[%c1_276, %c0_277, %c0_278], %465 {strides = array<i32>} : memref<2x8x128xf32, #tpu.memory_space<vmem>>, vector<1x8x128xf32>,
    %c4_i32 = arith.constant 4 : i32
    %c0_279 = arith.constant 0 : index
    %c0_280 = arith.constant 0 : index
    %c0_281 = arith.constant 0 : index
    %466 = vector.load %arg1[%c0_279, %c0_280, %c0_281] : memref<6x8x1xi32, #tpu.memory_space<vmem>>, vector<1x8x1xi32>
    %467 = vector.shape_cast %466 : vector<1x8x1xi32> to vector<8x1xi32>
    %c0_282 = arith.constant 0 : index
    %c0_283 = arith.constant 0 : index
    %468 = vector.load %arg17[%c0_282, %c0_283] : memref<8x1xi32, #tpu.memory_space<vmem>>, vector<8x1xi32>
    tpu.vector_store %arg17[%c0_282, %c0_283], %467 {strides = array<i32>} : memref<8x1xi32, #tpu.memory_space<vmem>>, vector<8x1xi32>,
    %469 = tpu.iota {dimensions = array<i32: 1>} : vector<8x128xi32>
    %c0_i32_284 = arith.constant 0 : i32
    %c0_285 = arith.constant 0 : index
    %c0_286 = arith.constant 0 : index
    %470 = vector.load %arg17[%c0_285, %c0_286] : memref<8x1xi32, #tpu.memory_space<vmem>>, vector<8x1xi32>
    %471 = vector.broadcast %470 : vector<8x1xi32> to vector<8x128xi32>
    %472 = arith.cmpi eq, %469, %471 : vector<8x128xi32>
    %473 = arith.extui %472 : vector<8x128xi1> to vector<8x128xi32>
    %474 = arith.sitofp %473 : vector<8x128xi32> to vector<8x128xf32>
    %475 = arith.truncf %474 : vector<8x128xf32> to vector<8x128xbf16>
    %c0_287 = arith.constant 0 : index
    %c0_288 = arith.constant 0 : index
    %476 = vector.load %arg8[%c0_287, %c0_288] : memref<128x128xbf16, #tpu.memory_space<vmem>>, vector<128x128xbf16>
    %cst_289 = arith.constant dense<0.000000e+00> : vector<8x128xf32>
    %477 = tpu.matmul %475, %476, %cst_289 {dimension_numbers = #tpu.dot_dimension_numbers<[1], [0], [0], [1], [0, 0, 1, 1], [], []>} : vector<8x128xbf16>, vector<128x128xbf16>, vector<8x128xf32> -> vector<8x128xf32>
    %c0_290 = arith.constant 0 : index
    %c0_291 = arith.constant 0 : index
    %c0_292 = arith.constant 0 : index
    %478 = vector.load %arg15[%c0_290, %c0_291, %c0_292] : memref<2x8x128xf32, #tpu.memory_space<vmem>>, vector<1x8x128xf32>
    %479 = vector.shape_cast %478 : vector<1x8x128xf32> to vector<8x128xf32>
    %c0_293 = arith.constant 0 : index
    %c0_294 = arith.constant 0 : index
    %c0_295 = arith.constant 0 : index
    %480 = vector.load %arg16[%c0_293, %c0_294, %c0_295] : memref<2x8x128xf32, #tpu.memory_space<vmem>>, vector<1x8x128xf32>
    %481 = vector.shape_cast %480 : vector<1x8x128xf32> to vector<8x128xf32>
    %482 = arith.truncf %477 : vector<8x128xf32> to vector<8x128xbf16>
    %c0_296 = arith.constant 0 : index
    %c0_297 = arith.constant 0 : index
    %c0_298 = arith.constant 0 : index
    %483 = vector.load %arg9[%c0_296, %c0_297, %c0_298] : memref<2x128x512xbf16, #tpu.memory_space<vmem>>, vector<1x128x512xbf16>
    %484 = vector.shape_cast %483 : vector<1x128x512xbf16> to vector<128x512xbf16>
    %cst_299 = arith.constant dense<0.000000e+00> : vector<8x512xf32>
    %485 = tpu.matmul %482, %484, %cst_299 {dimension_numbers = #tpu.dot_dimension_numbers<[1], [0], [0], [1], [0, 0, 1, 1], [], []>} : vector<8x128xbf16>, vector<128x512xbf16>, vector<8x512xf32> -> vector<8x512xf32>
    %486 = arith.truncf %479 : vector<8x128xf32> to vector<8x128xbf16>
    %c0_300 = arith.constant 0 : index
    %c0_301 = arith.constant 0 : index
    %c0_302 = arith.constant 0 : index
    %487 = vector.load %arg10[%c0_300, %c0_301, %c0_302] : memref<2x128x512xbf16, #tpu.memory_space<vmem>>, vector<1x128x512xbf16>
    %488 = vector.shape_cast %487 : vector<1x128x512xbf16> to vector<128x512xbf16>
    %cst_303 = arith.constant dense<0.000000e+00> : vector<8x512xf32>
    %489 = tpu.matmul %486, %488, %cst_303 {dimension_numbers = #tpu.dot_dimension_numbers<[1], [0], [0], [1], [0, 0, 1, 1], [], []>} : vector<8x128xbf16>, vector<128x512xbf16>, vector<8x512xf32> -> vector<8x512xf32>
    %490 = arith.addf %485, %489 : vector<8x512xf32>
    %c0_304 = arith.constant 0 : index
    %c0_305 = arith.constant 0 : index
    %c0_306 = arith.constant 0 : index
    %491 = vector.load %arg11[%c0_304, %c0_305, %c0_306] : memref<2x1x512xf32, #tpu.memory_space<vmem>>, vector<1x1x512xf32>
    %492 = vector.shape_cast %491 : vector<1x1x512xf32> to vector<1x512xf32>
    %493 = vector.broadcast %492 : vector<1x512xf32> to vector<8x512xf32>
    %494 = arith.addf %490, %493 : vector<8x512xf32>
    %495 = vector.extract_strided_slice %494 {offsets = [0, 0], sizes = [8, 128], strides = [1, 1]} : vector<8x512xf32> to vector<8x128xf32>
    %cst_307 = arith.constant 5.000000e-01 : f32
    %496 = vector.broadcast %cst_307 : f32 to vector<8x128xf32>
    %497 = arith.mulf %496, %495 : vector<8x128xf32>
    %498 = math.tanh %497 : vector<8x128xf32>
    %cst_308 = arith.constant 5.000000e-01 : f32
    %499 = vector.broadcast %cst_308 : f32 to vector<8x128xf32>
    %500 = arith.mulf %499, %498 : vector<8x128xf32>
    %cst_309 = arith.constant 5.000000e-01 : f32
    %501 = vector.broadcast %cst_309 : f32 to vector<8x128xf32>
    %502 = arith.addf %500, %501 : vector<8x128xf32>
    %503 = vector.extract_strided_slice %494 {offsets = [0, 128], sizes = [8, 128], strides = [1, 1]} : vector<8x512xf32> to vector<8x128xf32>
    %cst_310 = arith.constant 5.000000e-01 : f32
    %504 = vector.broadcast %cst_310 : f32 to vector<8x128xf32>
    %505 = arith.mulf %504, %503 : vector<8x128xf32>
    %506 = math.tanh %505 : vector<8x128xf32>
    %cst_311 = arith.constant 5.000000e-01 : f32
    %507 = vector.broadcast %cst_311 : f32 to vector<8x128xf32>
    %508 = arith.mulf %507, %506 : vector<8x128xf32>
    %cst_312 = arith.constant 5.000000e-01 : f32
    %509 = vector.broadcast %cst_312 : f32 to vector<8x128xf32>
    %510 = arith.addf %508, %509 : vector<8x128xf32>
    %511 = vector.extract_strided_slice %494 {offsets = [0, 256], sizes = [8, 128], strides = [1, 1]} : vector<8x512xf32> to vector<8x128xf32>
    %512 = math.tanh %511 : vector<8x128xf32>
    %513 = vector.extract_strided_slice %494 {offsets = [0, 384], sizes = [8, 128], strides = [1, 1]} : vector<8x512xf32> to vector<8x128xf32>
    %cst_313 = arith.constant 5.000000e-01 : f32
    %514 = vector.broadcast %cst_313 : f32 to vector<8x128xf32>
    %515 = arith.mulf %514, %513 : vector<8x128xf32>
    %516 = math.tanh %515 : vector<8x128xf32>
    %cst_314 = arith.constant 5.000000e-01 : f32
    %517 = vector.broadcast %cst_314 : f32 to vector<8x128xf32>
    %518 = arith.mulf %517, %516 : vector<8x128xf32>
    %cst_315 = arith.constant 5.000000e-01 : f32
    %519 = vector.broadcast %cst_315 : f32 to vector<8x128xf32>
    %520 = arith.addf %518, %519 : vector<8x128xf32>
    %521 = arith.mulf %510, %481 : vector<8x128xf32>
    %522 = arith.mulf %502, %512 : vector<8x128xf32>
    %523 = arith.addf %521, %522 : vector<8x128xf32>
    %524 = math.tanh %523 : vector<8x128xf32>
    %525 = arith.mulf %520, %524 : vector<8x128xf32>
    %c0_316 = arith.constant 0 : index
    %c0_317 = arith.constant 0 : index
    %c0_318 = arith.constant 0 : index
    %526 = vector.load %arg15[%c0_316, %c0_317, %c0_318] : memref<2x8x128xf32, #tpu.memory_space<vmem>>, vector<1x8x128xf32>
    %527 = vector.shape_cast %526 : vector<1x8x128xf32> to vector<8x128xf32>
    %528 = vector.shape_cast %525 : vector<8x128xf32> to vector<1x8x128xf32>
    tpu.vector_store %arg15[%c0_316, %c0_317, %c0_318], %528 {strides = array<i32>} : memref<2x8x128xf32, #tpu.memory_space<vmem>>, vector<1x8x128xf32>,
    %c0_319 = arith.constant 0 : index
    %c0_320 = arith.constant 0 : index
    %c0_321 = arith.constant 0 : index
    %529 = vector.load %arg16[%c0_319, %c0_320, %c0_321] : memref<2x8x128xf32, #tpu.memory_space<vmem>>, vector<1x8x128xf32>
    %530 = vector.shape_cast %529 : vector<1x8x128xf32> to vector<8x128xf32>
    %531 = vector.shape_cast %523 : vector<8x128xf32> to vector<1x8x128xf32>
    tpu.vector_store %arg16[%c0_319, %c0_320, %c0_321], %531 {strides = array<i32>} : memref<2x8x128xf32, #tpu.memory_space<vmem>>, vector<1x8x128xf32>,
    %c1_322 = arith.constant 1 : index
    %c0_323 = arith.constant 0 : index
    %c0_324 = arith.constant 0 : index
    %532 = vector.load %arg15[%c1_322, %c0_323, %c0_324] : memref<2x8x128xf32, #tpu.memory_space<vmem>>, vector<1x8x128xf32>
    %533 = vector.shape_cast %532 : vector<1x8x128xf32> to vector<8x128xf32>
    %c1_325 = arith.constant 1 : index
    %c0_326 = arith.constant 0 : index
    %c0_327 = arith.constant 0 : index
    %534 = vector.load %arg16[%c1_325, %c0_326, %c0_327] : memref<2x8x128xf32, #tpu.memory_space<vmem>>, vector<1x8x128xf32>
    %535 = vector.shape_cast %534 : vector<1x8x128xf32> to vector<8x128xf32>
    %536 = arith.truncf %525 : vector<8x128xf32> to vector<8x128xbf16>
    %c1_328 = arith.constant 1 : index
    %c0_329 = arith.constant 0 : index
    %c0_330 = arith.constant 0 : index
    %537 = vector.load %arg9[%c1_328, %c0_329, %c0_330] : memref<2x128x512xbf16, #tpu.memory_space<vmem>>, vector<1x128x512xbf16>
    %538 = vector.shape_cast %537 : vector<1x128x512xbf16> to vector<128x512xbf16>
    %cst_331 = arith.constant dense<0.000000e+00> : vector<8x512xf32>
    %539 = tpu.matmul %536, %538, %cst_331 {dimension_numbers = #tpu.dot_dimension_numbers<[1], [0], [0], [1], [0, 0, 1, 1], [], []>} : vector<8x128xbf16>, vector<128x512xbf16>, vector<8x512xf32> -> vector<8x512xf32>
    %540 = arith.truncf %533 : vector<8x128xf32> to vector<8x128xbf16>
    %c1_332 = arith.constant 1 : index
    %c0_333 = arith.constant 0 : index
    %c0_334 = arith.constant 0 : index
    %541 = vector.load %arg10[%c1_332, %c0_333, %c0_334] : memref<2x128x512xbf16, #tpu.memory_space<vmem>>, vector<1x128x512xbf16>
    %542 = vector.shape_cast %541 : vector<1x128x512xbf16> to vector<128x512xbf16>
    %cst_335 = arith.constant dense<0.000000e+00> : vector<8x512xf32>
    %543 = tpu.matmul %540, %542, %cst_335 {dimension_numbers = #tpu.dot_dimension_numbers<[1], [0], [0], [1], [0, 0, 1, 1], [], []>} : vector<8x128xbf16>, vector<128x512xbf16>, vector<8x512xf32> -> vector<8x512xf32>
    %544 = arith.addf %539, %543 : vector<8x512xf32>
    %c1_336 = arith.constant 1 : index
    %c0_337 = arith.constant 0 : index
    %c0_338 = arith.constant 0 : index
    %545 = vector.load %arg11[%c1_336, %c0_337, %c0_338] : memref<2x1x512xf32, #tpu.memory_space<vmem>>, vector<1x1x512xf32>
    %546 = vector.shape_cast %545 : vector<1x1x512xf32> to vector<1x512xf32>
    %547 = vector.broadcast %546 : vector<1x512xf32> to vector<8x512xf32>
    %548 = arith.addf %544, %547 : vector<8x512xf32>
    %549 = vector.extract_strided_slice %548 {offsets = [0, 0], sizes = [8, 128], strides = [1, 1]} : vector<8x512xf32> to vector<8x128xf32>
    %cst_339 = arith.constant 5.000000e-01 : f32
    %550 = vector.broadcast %cst_339 : f32 to vector<8x128xf32>
    %551 = arith.mulf %550, %549 : vector<8x128xf32>
    %552 = math.tanh %551 : vector<8x128xf32>
    %cst_340 = arith.constant 5.000000e-01 : f32
    %553 = vector.broadcast %cst_340 : f32 to vector<8x128xf32>
    %554 = arith.mulf %553, %552 : vector<8x128xf32>
    %cst_341 = arith.constant 5.000000e-01 : f32
    %555 = vector.broadcast %cst_341 : f32 to vector<8x128xf32>
    %556 = arith.addf %554, %555 : vector<8x128xf32>
    %557 = vector.extract_strided_slice %548 {offsets = [0, 128], sizes = [8, 128], strides = [1, 1]} : vector<8x512xf32> to vector<8x128xf32>
    %cst_342 = arith.constant 5.000000e-01 : f32
    %558 = vector.broadcast %cst_342 : f32 to vector<8x128xf32>
    %559 = arith.mulf %558, %557 : vector<8x128xf32>
    %560 = math.tanh %559 : vector<8x128xf32>
    %cst_343 = arith.constant 5.000000e-01 : f32
    %561 = vector.broadcast %cst_343 : f32 to vector<8x128xf32>
    %562 = arith.mulf %561, %560 : vector<8x128xf32>
    %cst_344 = arith.constant 5.000000e-01 : f32
    %563 = vector.broadcast %cst_344 : f32 to vector<8x128xf32>
    %564 = arith.addf %562, %563 : vector<8x128xf32>
    %565 = vector.extract_strided_slice %548 {offsets = [0, 256], sizes = [8, 128], strides = [1, 1]} : vector<8x512xf32> to vector<8x128xf32>
    %566 = math.tanh %565 : vector<8x128xf32>
    %567 = vector.extract_strided_slice %548 {offsets = [0, 384], sizes = [8, 128], strides = [1, 1]} : vector<8x512xf32> to vector<8x128xf32>
    %cst_345 = arith.constant 5.000000e-01 : f32
    %568 = vector.broadcast %cst_345 : f32 to vector<8x128xf32>
    %569 = arith.mulf %568, %567 : vector<8x128xf32>
    %570 = math.tanh %569 : vector<8x128xf32>
    %cst_346 = arith.constant 5.000000e-01 : f32
    %571 = vector.broadcast %cst_346 : f32 to vector<8x128xf32>
    %572 = arith.mulf %571, %570 : vector<8x128xf32>
    %cst_347 = arith.constant 5.000000e-01 : f32
    %573 = vector.broadcast %cst_347 : f32 to vector<8x128xf32>
    %574 = arith.addf %572, %573 : vector<8x128xf32>
    %575 = arith.mulf %564, %535 : vector<8x128xf32>
    %576 = arith.mulf %556, %566 : vector<8x128xf32>
    %577 = arith.addf %575, %576 : vector<8x128xf32>
    %578 = math.tanh %577 : vector<8x128xf32>
    %579 = arith.mulf %574, %578 : vector<8x128xf32>
    %c1_348 = arith.constant 1 : index
    %c0_349 = arith.constant 0 : index
    %c0_350 = arith.constant 0 : index
    %580 = vector.load %arg15[%c1_348, %c0_349, %c0_350] : memref<2x8x128xf32, #tpu.memory_space<vmem>>, vector<1x8x128xf32>
    %581 = vector.shape_cast %580 : vector<1x8x128xf32> to vector<8x128xf32>
    %582 = vector.shape_cast %579 : vector<8x128xf32> to vector<1x8x128xf32>
    tpu.vector_store %arg15[%c1_348, %c0_349, %c0_350], %582 {strides = array<i32>} : memref<2x8x128xf32, #tpu.memory_space<vmem>>, vector<1x8x128xf32>,
    %c1_351 = arith.constant 1 : index
    %c0_352 = arith.constant 0 : index
    %c0_353 = arith.constant 0 : index
    %583 = vector.load %arg16[%c1_351, %c0_352, %c0_353] : memref<2x8x128xf32, #tpu.memory_space<vmem>>, vector<1x8x128xf32>
    %584 = vector.shape_cast %583 : vector<1x8x128xf32> to vector<8x128xf32>
    %585 = vector.shape_cast %577 : vector<8x128xf32> to vector<1x8x128xf32>
    tpu.vector_store %arg16[%c1_351, %c0_352, %c0_353], %585 {strides = array<i32>} : memref<2x8x128xf32, #tpu.memory_space<vmem>>, vector<1x8x128xf32>,
    %586 = arith.truncf %579 : vector<8x128xf32> to vector<8x128xbf16>
    %c0_354 = arith.constant 0 : index
    %c0_355 = arith.constant 0 : index
    %587 = vector.load %arg12[%c0_354, %c0_355] : memref<128x128xbf16, #tpu.memory_space<vmem>>, vector<128x128xbf16>
    %cst_356 = arith.constant dense<0.000000e+00> : vector<8x128xf32>
    %588 = tpu.matmul %586, %587, %cst_356 {dimension_numbers = #tpu.dot_dimension_numbers<[1], [0], [0], [1], [0, 0, 1, 1], [], []>} : vector<8x128xbf16>, vector<128x128xbf16>, vector<8x128xf32> -> vector<8x128xf32>
    %c0_357 = arith.constant 0 : index
    %c0_358 = arith.constant 0 : index
    %589 = vector.load %arg13[%c0_357, %c0_358] : memref<1x128xf32, #tpu.memory_space<vmem>>, vector<1x128xf32>
    %590 = vector.broadcast %589 : vector<1x128xf32> to vector<8x128xf32>
    %591 = arith.addf %588, %590 : vector<8x128xf32>
    %592 = arith.index_cast %c0_i32_284 : i32 to index
    %c0_359 = arith.constant 0 : index
    %c0_360 = arith.constant 0 : index
    %593 = vector.load %arg14[%592, %c0_359, %c0_360] : memref<6x8x128xf32, #tpu.memory_space<vmem>>, vector<1x8x128xf32>
    %594 = vector.shape_cast %593 : vector<1x8x128xf32> to vector<8x128xf32>
    %595 = vector.shape_cast %591 : vector<8x128xf32> to vector<1x8x128xf32>
    tpu.vector_store %arg14[%592, %c0_359, %c0_360], %595 {strides = array<i32>} : memref<6x8x128xf32, #tpu.memory_space<vmem>>, vector<1x8x128xf32>,
    %cst_361 = arith.constant dense<0xFF800000> : vector<8xf32>
    %596 = vector.multi_reduction <maximumf>, %591, %cst_361 [1] : vector<8x128xf32> to vector<8xf32>
    %597 = vector.shape_cast %596 : vector<8xf32> to vector<8x1xf32>
    %598 = vector.broadcast %597 : vector<8x1xf32> to vector<8x128xf32>
    %599 = arith.cmpf oeq, %591, %598 : vector<8x128xf32>
    %c128_i32 = arith.constant 128 : i32
    %600 = vector.broadcast %c128_i32 : i32 to vector<8x128xi32>
    %601 = arith.select %599, %469, %600 : vector<8x128xi1>, vector<8x128xi32>
    %cst_362 = arith.constant dense<2147483647> : vector<8xi32>
    %602 = vector.multi_reduction <minsi>, %601, %cst_362 [1] : vector<8x128xi32> to vector<8xi32>
    %603 = vector.shape_cast %602 : vector<8xi32> to vector<8x1xi32>
    %604 = arith.index_cast %c0_i32_284 : i32 to index
    %605 = memref.load %arg2[%604] : memref<6xi32, #tpu.memory_space<smem>>
    %c0_i32_363 = arith.constant 0 : i32
    %606 = arith.cmpi sgt, %605, %c0_i32_363 : i32
    %607 = arith.index_cast %c0_i32_284 : i32 to index
    %c0_364 = arith.constant 0 : index
    %c0_365 = arith.constant 0 : index
    %608 = vector.load %arg1[%607, %c0_364, %c0_365] : memref<6x8x1xi32, #tpu.memory_space<vmem>>, vector<1x8x1xi32>
    %609 = vector.shape_cast %608 : vector<1x8x1xi32> to vector<8x1xi32>
    %610 = arith.select %606, %609, %603 : vector<8x1xi32>
    %c0_366 = arith.constant 0 : index
    %c0_367 = arith.constant 0 : index
    %611 = vector.load %arg17[%c0_366, %c0_367] : memref<8x1xi32, #tpu.memory_space<vmem>>, vector<8x1xi32>
    tpu.vector_store %arg17[%c0_366, %c0_367], %610 {strides = array<i32>} : memref<8x1xi32, #tpu.memory_space<vmem>>, vector<8x1xi32>,
    %c1_i32_368 = arith.constant 1 : i32
    %c0_369 = arith.constant 0 : index
    %c0_370 = arith.constant 0 : index
    %612 = vector.load %arg17[%c0_369, %c0_370] : memref<8x1xi32, #tpu.memory_space<vmem>>, vector<8x1xi32>
    %613 = vector.broadcast %612 : vector<8x1xi32> to vector<8x128xi32>
    %614 = arith.cmpi eq, %469, %613 : vector<8x128xi32>
    %615 = arith.extui %614 : vector<8x128xi1> to vector<8x128xi32>
    %616 = arith.sitofp %615 : vector<8x128xi32> to vector<8x128xf32>
    %617 = arith.truncf %616 : vector<8x128xf32> to vector<8x128xbf16>
    %c0_371 = arith.constant 0 : index
    %c0_372 = arith.constant 0 : index
    %618 = vector.load %arg8[%c0_371, %c0_372] : memref<128x128xbf16, #tpu.memory_space<vmem>>, vector<128x128xbf16>
    %cst_373 = arith.constant dense<0.000000e+00> : vector<8x128xf32>
    %619 = tpu.matmul %617, %618, %cst_373 {dimension_numbers = #tpu.dot_dimension_numbers<[1], [0], [0], [1], [0, 0, 1, 1], [], []>} : vector<8x128xbf16>, vector<128x128xbf16>, vector<8x128xf32> -> vector<8x128xf32>
    %c0_374 = arith.constant 0 : index
    %c0_375 = arith.constant 0 : index
    %c0_376 = arith.constant 0 : index
    %620 = vector.load %arg15[%c0_374, %c0_375, %c0_376] : memref<2x8x128xf32, #tpu.memory_space<vmem>>, vector<1x8x128xf32>
    %621 = vector.shape_cast %620 : vector<1x8x128xf32> to vector<8x128xf32>
    %c0_377 = arith.constant 0 : index
    %c0_378 = arith.constant 0 : index
    %c0_379 = arith.constant 0 : index
    %622 = vector.load %arg16[%c0_377, %c0_378, %c0_379] : memref<2x8x128xf32, #tpu.memory_space<vmem>>, vector<1x8x128xf32>
    %623 = vector.shape_cast %622 : vector<1x8x128xf32> to vector<8x128xf32>
    %624 = arith.truncf %619 : vector<8x128xf32> to vector<8x128xbf16>
    %c0_380 = arith.constant 0 : index
    %c0_381 = arith.constant 0 : index
    %c0_382 = arith.constant 0 : index
    %625 = vector.load %arg9[%c0_380, %c0_381, %c0_382] : memref<2x128x512xbf16, #tpu.memory_space<vmem>>, vector<1x128x512xbf16>
    %626 = vector.shape_cast %625 : vector<1x128x512xbf16> to vector<128x512xbf16>
    %cst_383 = arith.constant dense<0.000000e+00> : vector<8x512xf32>
    %627 = tpu.matmul %624, %626, %cst_383 {dimension_numbers = #tpu.dot_dimension_numbers<[1], [0], [0], [1], [0, 0, 1, 1], [], []>} : vector<8x128xbf16>, vector<128x512xbf16>, vector<8x512xf32> -> vector<8x512xf32>
    %628 = arith.truncf %621 : vector<8x128xf32> to vector<8x128xbf16>
    %c0_384 = arith.constant 0 : index
    %c0_385 = arith.constant 0 : index
    %c0_386 = arith.constant 0 : index
    %629 = vector.load %arg10[%c0_384, %c0_385, %c0_386] : memref<2x128x512xbf16, #tpu.memory_space<vmem>>, vector<1x128x512xbf16>
    %630 = vector.shape_cast %629 : vector<1x128x512xbf16> to vector<128x512xbf16>
    %cst_387 = arith.constant dense<0.000000e+00> : vector<8x512xf32>
    %631 = tpu.matmul %628, %630, %cst_387 {dimension_numbers = #tpu.dot_dimension_numbers<[1], [0], [0], [1], [0, 0, 1, 1], [], []>} : vector<8x128xbf16>, vector<128x512xbf16>, vector<8x512xf32> -> vector<8x512xf32>
    %632 = arith.addf %627, %631 : vector<8x512xf32>
    %c0_388 = arith.constant 0 : index
    %c0_389 = arith.constant 0 : index
    %c0_390 = arith.constant 0 : index
    %633 = vector.load %arg11[%c0_388, %c0_389, %c0_390] : memref<2x1x512xf32, #tpu.memory_space<vmem>>, vector<1x1x512xf32>
    %634 = vector.shape_cast %633 : vector<1x1x512xf32> to vector<1x512xf32>
    %635 = vector.broadcast %634 : vector<1x512xf32> to vector<8x512xf32>
    %636 = arith.addf %632, %635 : vector<8x512xf32>
    %637 = vector.extract_strided_slice %636 {offsets = [0, 0], sizes = [8, 128], strides = [1, 1]} : vector<8x512xf32> to vector<8x128xf32>
    %cst_391 = arith.constant 5.000000e-01 : f32
    %638 = vector.broadcast %cst_391 : f32 to vector<8x128xf32>
    %639 = arith.mulf %638, %637 : vector<8x128xf32>
    %640 = math.tanh %639 : vector<8x128xf32>
    %cst_392 = arith.constant 5.000000e-01 : f32
    %641 = vector.broadcast %cst_392 : f32 to vector<8x128xf32>
    %642 = arith.mulf %641, %640 : vector<8x128xf32>
    %cst_393 = arith.constant 5.000000e-01 : f32
    %643 = vector.broadcast %cst_393 : f32 to vector<8x128xf32>
    %644 = arith.addf %642, %643 : vector<8x128xf32>
    %645 = vector.extract_strided_slice %636 {offsets = [0, 128], sizes = [8, 128], strides = [1, 1]} : vector<8x512xf32> to vector<8x128xf32>
    %cst_394 = arith.constant 5.000000e-01 : f32
    %646 = vector.broadcast %cst_394 : f32 to vector<8x128xf32>
    %647 = arith.mulf %646, %645 : vector<8x128xf32>
    %648 = math.tanh %647 : vector<8x128xf32>
    %cst_395 = arith.constant 5.000000e-01 : f32
    %649 = vector.broadcast %cst_395 : f32 to vector<8x128xf32>
    %650 = arith.mulf %649, %648 : vector<8x128xf32>
    %cst_396 = arith.constant 5.000000e-01 : f32
    %651 = vector.broadcast %cst_396 : f32 to vector<8x128xf32>
    %652 = arith.addf %650, %651 : vector<8x128xf32>
    %653 = vector.extract_strided_slice %636 {offsets = [0, 256], sizes = [8, 128], strides = [1, 1]} : vector<8x512xf32> to vector<8x128xf32>
    %654 = math.tanh %653 : vector<8x128xf32>
    %655 = vector.extract_strided_slice %636 {offsets = [0, 384], sizes = [8, 128], strides = [1, 1]} : vector<8x512xf32> to vector<8x128xf32>
    %cst_397 = arith.constant 5.000000e-01 : f32
    %656 = vector.broadcast %cst_397 : f32 to vector<8x128xf32>
    %657 = arith.mulf %656, %655 : vector<8x128xf32>
    %658 = math.tanh %657 : vector<8x128xf32>
    %cst_398 = arith.constant 5.000000e-01 : f32
    %659 = vector.broadcast %cst_398 : f32 to vector<8x128xf32>
    %660 = arith.mulf %659, %658 : vector<8x128xf32>
    %cst_399 = arith.constant 5.000000e-01 : f32
    %661 = vector.broadcast %cst_399 : f32 to vector<8x128xf32>
    %662 = arith.addf %660, %661 : vector<8x128xf32>
    %663 = arith.mulf %652, %623 : vector<8x128xf32>
    %664 = arith.mulf %644, %654 : vector<8x128xf32>
    %665 = arith.addf %663, %664 : vector<8x128xf32>
    %666 = math.tanh %665 : vector<8x128xf32>
    %667 = arith.mulf %662, %666 : vector<8x128xf32>
    %c0_400 = arith.constant 0 : index
    %c0_401 = arith.constant 0 : index
    %c0_402 = arith.constant 0 : index
    %668 = vector.load %arg15[%c0_400, %c0_401, %c0_402] : memref<2x8x128xf32, #tpu.memory_space<vmem>>, vector<1x8x128xf32>
    %669 = vector.shape_cast %668 : vector<1x8x128xf32> to vector<8x128xf32>
    %670 = vector.shape_cast %667 : vector<8x128xf32> to vector<1x8x128xf32>
    tpu.vector_store %arg15[%c0_400, %c0_401, %c0_402], %670 {strides = array<i32>} : memref<2x8x128xf32, #tpu.memory_space<vmem>>, vector<1x8x128xf32>,
    %c0_403 = arith.constant 0 : index
    %c0_404 = arith.constant 0 : index
    %c0_405 = arith.constant 0 : index
    %671 = vector.load %arg16[%c0_403, %c0_404, %c0_405] : memref<2x8x128xf32, #tpu.memory_space<vmem>>, vector<1x8x128xf32>
    %672 = vector.shape_cast %671 : vector<1x8x128xf32> to vector<8x128xf32>
    %673 = vector.shape_cast %665 : vector<8x128xf32> to vector<1x8x128xf32>
    tpu.vector_store %arg16[%c0_403, %c0_404, %c0_405], %673 {strides = array<i32>} : memref<2x8x128xf32, #tpu.memory_space<vmem>>, vector<1x8x128xf32>,
    %c1_406 = arith.constant 1 : index
    %c0_407 = arith.constant 0 : index
    %c0_408 = arith.constant 0 : index
    %674 = vector.load %arg15[%c1_406, %c0_407, %c0_408] : memref<2x8x128xf32, #tpu.memory_space<vmem>>, vector<1x8x128xf32>
    %675 = vector.shape_cast %674 : vector<1x8x128xf32> to vector<8x128xf32>
    %c1_409 = arith.constant 1 : index
    %c0_410 = arith.constant 0 : index
    %c0_411 = arith.constant 0 : index
    %676 = vector.load %arg16[%c1_409, %c0_410, %c0_411] : memref<2x8x128xf32, #tpu.memory_space<vmem>>, vector<1x8x128xf32>
    %677 = vector.shape_cast %676 : vector<1x8x128xf32> to vector<8x128xf32>
    %678 = arith.truncf %667 : vector<8x128xf32> to vector<8x128xbf16>
    %c1_412 = arith.constant 1 : index
    %c0_413 = arith.constant 0 : index
    %c0_414 = arith.constant 0 : index
    %679 = vector.load %arg9[%c1_412, %c0_413, %c0_414] : memref<2x128x512xbf16, #tpu.memory_space<vmem>>, vector<1x128x512xbf16>
    %680 = vector.shape_cast %679 : vector<1x128x512xbf16> to vector<128x512xbf16>
    %cst_415 = arith.constant dense<0.000000e+00> : vector<8x512xf32>
    %681 = tpu.matmul %678, %680, %cst_415 {dimension_numbers = #tpu.dot_dimension_numbers<[1], [0], [0], [1], [0, 0, 1, 1], [], []>} : vector<8x128xbf16>, vector<128x512xbf16>, vector<8x512xf32> -> vector<8x512xf32>
    %682 = arith.truncf %675 : vector<8x128xf32> to vector<8x128xbf16>
    %c1_416 = arith.constant 1 : index
    %c0_417 = arith.constant 0 : index
    %c0_418 = arith.constant 0 : index
    %683 = vector.load %arg10[%c1_416, %c0_417, %c0_418] : memref<2x128x512xbf16, #tpu.memory_space<vmem>>, vector<1x128x512xbf16>
    %684 = vector.shape_cast %683 : vector<1x128x512xbf16> to vector<128x512xbf16>
    %cst_419 = arith.constant dense<0.000000e+00> : vector<8x512xf32>
    %685 = tpu.matmul %682, %684, %cst_419 {dimension_numbers = #tpu.dot_dimension_numbers<[1], [0], [0], [1], [0, 0, 1, 1], [], []>} : vector<8x128xbf16>, vector<128x512xbf16>, vector<8x512xf32> -> vector<8x512xf32>
    %686 = arith.addf %681, %685 : vector<8x512xf32>
    %c1_420 = arith.constant 1 : index
    %c0_421 = arith.constant 0 : index
    %c0_422 = arith.constant 0 : index
    %687 = vector.load %arg11[%c1_420, %c0_421, %c0_422] : memref<2x1x512xf32, #tpu.memory_space<vmem>>, vector<1x1x512xf32>
    %688 = vector.shape_cast %687 : vector<1x1x512xf32> to vector<1x512xf32>
    %689 = vector.broadcast %688 : vector<1x512xf32> to vector<8x512xf32>
    %690 = arith.addf %686, %689 : vector<8x512xf32>
    %691 = vector.extract_strided_slice %690 {offsets = [0, 0], sizes = [8, 128], strides = [1, 1]} : vector<8x512xf32> to vector<8x128xf32>
    %cst_423 = arith.constant 5.000000e-01 : f32
    %692 = vector.broadcast %cst_423 : f32 to vector<8x128xf32>
    %693 = arith.mulf %692, %691 : vector<8x128xf32>
    %694 = math.tanh %693 : vector<8x128xf32>
    %cst_424 = arith.constant 5.000000e-01 : f32
    %695 = vector.broadcast %cst_424 : f32 to vector<8x128xf32>
    %696 = arith.mulf %695, %694 : vector<8x128xf32>
    %cst_425 = arith.constant 5.000000e-01 : f32
    %697 = vector.broadcast %cst_425 : f32 to vector<8x128xf32>
    %698 = arith.addf %696, %697 : vector<8x128xf32>
    %699 = vector.extract_strided_slice %690 {offsets = [0, 128], sizes = [8, 128], strides = [1, 1]} : vector<8x512xf32> to vector<8x128xf32>
    %cst_426 = arith.constant 5.000000e-01 : f32
    %700 = vector.broadcast %cst_426 : f32 to vector<8x128xf32>
    %701 = arith.mulf %700, %699 : vector<8x128xf32>
    %702 = math.tanh %701 : vector<8x128xf32>
    %cst_427 = arith.constant 5.000000e-01 : f32
    %703 = vector.broadcast %cst_427 : f32 to vector<8x128xf32>
    %704 = arith.mulf %703, %702 : vector<8x128xf32>
    %cst_428 = arith.constant 5.000000e-01 : f32
    %705 = vector.broadcast %cst_428 : f32 to vector<8x128xf32>
    %706 = arith.addf %704, %705 : vector<8x128xf32>
    %707 = vector.extract_strided_slice %690 {offsets = [0, 256], sizes = [8, 128], strides = [1, 1]} : vector<8x512xf32> to vector<8x128xf32>
    %708 = math.tanh %707 : vector<8x128xf32>
    %709 = vector.extract_strided_slice %690 {offsets = [0, 384], sizes = [8, 128], strides = [1, 1]} : vector<8x512xf32> to vector<8x128xf32>
    %cst_429 = arith.constant 5.000000e-01 : f32
    %710 = vector.broadcast %cst_429 : f32 to vector<8x128xf32>
    %711 = arith.mulf %710, %709 : vector<8x128xf32>
    %712 = math.tanh %711 : vector<8x128xf32>
    %cst_430 = arith.constant 5.000000e-01 : f32
    %713 = vector.broadcast %cst_430 : f32 to vector<8x128xf32>
    %714 = arith.mulf %713, %712 : vector<8x128xf32>
    %cst_431 = arith.constant 5.000000e-01 : f32
    %715 = vector.broadcast %cst_431 : f32 to vector<8x128xf32>
    %716 = arith.addf %714, %715 : vector<8x128xf32>
    %717 = arith.mulf %706, %677 : vector<8x128xf32>
    %718 = arith.mulf %698, %708 : vector<8x128xf32>
    %719 = arith.addf %717, %718 : vector<8x128xf32>
    %720 = math.tanh %719 : vector<8x128xf32>
    %721 = arith.mulf %716, %720 : vector<8x128xf32>
    %c1_432 = arith.constant 1 : index
    %c0_433 = arith.constant 0 : index
    %c0_434 = arith.constant 0 : index
    %722 = vector.load %arg15[%c1_432, %c0_433, %c0_434] : memref<2x8x128xf32, #tpu.memory_space<vmem>>, vector<1x8x128xf32>
    %723 = vector.shape_cast %722 : vector<1x8x128xf32> to vector<8x128xf32>
    %724 = vector.shape_cast %721 : vector<8x128xf32> to vector<1x8x128xf32>
    tpu.vector_store %arg15[%c1_432, %c0_433, %c0_434], %724 {strides = array<i32>} : memref<2x8x128xf32, #tpu.memory_space<vmem>>, vector<1x8x128xf32>,
    %c1_435 = arith.constant 1 : index
    %c0_436 = arith.constant 0 : index
    %c0_437 = arith.constant 0 : index
    %725 = vector.load %arg16[%c1_435, %c0_436, %c0_437] : memref<2x8x128xf32, #tpu.memory_space<vmem>>, vector<1x8x128xf32>
    %726 = vector.shape_cast %725 : vector<1x8x128xf32> to vector<8x128xf32>
    %727 = vector.shape_cast %719 : vector<8x128xf32> to vector<1x8x128xf32>
    tpu.vector_store %arg16[%c1_435, %c0_436, %c0_437], %727 {strides = array<i32>} : memref<2x8x128xf32, #tpu.memory_space<vmem>>, vector<1x8x128xf32>,
    %728 = arith.truncf %721 : vector<8x128xf32> to vector<8x128xbf16>
    %c0_438 = arith.constant 0 : index
    %c0_439 = arith.constant 0 : index
    %729 = vector.load %arg12[%c0_438, %c0_439] : memref<128x128xbf16, #tpu.memory_space<vmem>>, vector<128x128xbf16>
    %cst_440 = arith.constant dense<0.000000e+00> : vector<8x128xf32>
    %730 = tpu.matmul %728, %729, %cst_440 {dimension_numbers = #tpu.dot_dimension_numbers<[1], [0], [0], [1], [0, 0, 1, 1], [], []>} : vector<8x128xbf16>, vector<128x128xbf16>, vector<8x128xf32> -> vector<8x128xf32>
    %c0_441 = arith.constant 0 : index
    %c0_442 = arith.constant 0 : index
    %731 = vector.load %arg13[%c0_441, %c0_442] : memref<1x128xf32, #tpu.memory_space<vmem>>, vector<1x128xf32>
    %732 = vector.broadcast %731 : vector<1x128xf32> to vector<8x128xf32>
    %733 = arith.addf %730, %732 : vector<8x128xf32>
    %734 = arith.index_cast %c1_i32_368 : i32 to index
    %c0_443 = arith.constant 0 : index
    %c0_444 = arith.constant 0 : index
    %735 = vector.load %arg14[%734, %c0_443, %c0_444] : memref<6x8x128xf32, #tpu.memory_space<vmem>>, vector<1x8x128xf32>
    %736 = vector.shape_cast %735 : vector<1x8x128xf32> to vector<8x128xf32>
    %737 = vector.shape_cast %733 : vector<8x128xf32> to vector<1x8x128xf32>
    tpu.vector_store %arg14[%734, %c0_443, %c0_444], %737 {strides = array<i32>} : memref<6x8x128xf32, #tpu.memory_space<vmem>>, vector<1x8x128xf32>,
    %cst_445 = arith.constant dense<0xFF800000> : vector<8xf32>
    %738 = vector.multi_reduction <maximumf>, %733, %cst_445 [1] : vector<8x128xf32> to vector<8xf32>
    %739 = vector.shape_cast %738 : vector<8xf32> to vector<8x1xf32>
    %740 = vector.broadcast %739 : vector<8x1xf32> to vector<8x128xf32>
    %741 = arith.cmpf oeq, %733, %740 : vector<8x128xf32>
    %c128_i32_446 = arith.constant 128 : i32
    %742 = vector.broadcast %c128_i32_446 : i32 to vector<8x128xi32>
    %743 = arith.select %741, %469, %742 : vector<8x128xi1>, vector<8x128xi32>
    %cst_447 = arith.constant dense<2147483647> : vector<8xi32>
    %744 = vector.multi_reduction <minsi>, %743, %cst_447 [1] : vector<8x128xi32> to vector<8xi32>
    %745 = vector.shape_cast %744 : vector<8xi32> to vector<8x1xi32>
    %746 = arith.index_cast %c1_i32_368 : i32 to index
    %747 = memref.load %arg2[%746] : memref<6xi32, #tpu.memory_space<smem>>
    %c0_i32_448 = arith.constant 0 : i32
    %748 = arith.cmpi sgt, %747, %c0_i32_448 : i32
    %749 = arith.index_cast %c1_i32_368 : i32 to index
    %c0_449 = arith.constant 0 : index
    %c0_450 = arith.constant 0 : index
    %750 = vector.load %arg1[%749, %c0_449, %c0_450] : memref<6x8x1xi32, #tpu.memory_space<vmem>>, vector<1x8x1xi32>
    %751 = vector.shape_cast %750 : vector<1x8x1xi32> to vector<8x1xi32>
    %752 = arith.select %748, %751, %745 : vector<8x1xi32>
    %c0_451 = arith.constant 0 : index
    %c0_452 = arith.constant 0 : index
    %753 = vector.load %arg17[%c0_451, %c0_452] : memref<8x1xi32, #tpu.memory_space<vmem>>, vector<8x1xi32>
    tpu.vector_store %arg17[%c0_451, %c0_452], %752 {strides = array<i32>} : memref<8x1xi32, #tpu.memory_space<vmem>>, vector<8x1xi32>,
    %c2_i32_453 = arith.constant 2 : i32
    %c0_454 = arith.constant 0 : index
    %c0_455 = arith.constant 0 : index
    %754 = vector.load %arg17[%c0_454, %c0_455] : memref<8x1xi32, #tpu.memory_space<vmem>>, vector<8x1xi32>
    %755 = vector.broadcast %754 : vector<8x1xi32> to vector<8x128xi32>
    %756 = arith.cmpi eq, %469, %755 : vector<8x128xi32>
    %757 = arith.extui %756 : vector<8x128xi1> to vector<8x128xi32>
    %758 = arith.sitofp %757 : vector<8x128xi32> to vector<8x128xf32>
    %759 = arith.truncf %758 : vector<8x128xf32> to vector<8x128xbf16>
    %c0_456 = arith.constant 0 : index
    %c0_457 = arith.constant 0 : index
    %760 = vector.load %arg8[%c0_456, %c0_457] : memref<128x128xbf16, #tpu.memory_space<vmem>>, vector<128x128xbf16>
    %cst_458 = arith.constant dense<0.000000e+00> : vector<8x128xf32>
    %761 = tpu.matmul %759, %760, %cst_458 {dimension_numbers = #tpu.dot_dimension_numbers<[1], [0], [0], [1], [0, 0, 1, 1], [], []>} : vector<8x128xbf16>, vector<128x128xbf16>, vector<8x128xf32> -> vector<8x128xf32>
    %c0_459 = arith.constant 0 : index
    %c0_460 = arith.constant 0 : index
    %c0_461 = arith.constant 0 : index
    %762 = vector.load %arg15[%c0_459, %c0_460, %c0_461] : memref<2x8x128xf32, #tpu.memory_space<vmem>>, vector<1x8x128xf32>
    %763 = vector.shape_cast %762 : vector<1x8x128xf32> to vector<8x128xf32>
    %c0_462 = arith.constant 0 : index
    %c0_463 = arith.constant 0 : index
    %c0_464 = arith.constant 0 : index
    %764 = vector.load %arg16[%c0_462, %c0_463, %c0_464] : memref<2x8x128xf32, #tpu.memory_space<vmem>>, vector<1x8x128xf32>
    %765 = vector.shape_cast %764 : vector<1x8x128xf32> to vector<8x128xf32>
    %766 = arith.truncf %761 : vector<8x128xf32> to vector<8x128xbf16>
    %c0_465 = arith.constant 0 : index
    %c0_466 = arith.constant 0 : index
    %c0_467 = arith.constant 0 : index
    %767 = vector.load %arg9[%c0_465, %c0_466, %c0_467] : memref<2x128x512xbf16, #tpu.memory_space<vmem>>, vector<1x128x512xbf16>
    %768 = vector.shape_cast %767 : vector<1x128x512xbf16> to vector<128x512xbf16>
    %cst_468 = arith.constant dense<0.000000e+00> : vector<8x512xf32>
    %769 = tpu.matmul %766, %768, %cst_468 {dimension_numbers = #tpu.dot_dimension_numbers<[1], [0], [0], [1], [0, 0, 1, 1], [], []>} : vector<8x128xbf16>, vector<128x512xbf16>, vector<8x512xf32> -> vector<8x512xf32>
    %770 = arith.truncf %763 : vector<8x128xf32> to vector<8x128xbf16>
    %c0_469 = arith.constant 0 : index
    %c0_470 = arith.constant 0 : index
    %c0_471 = arith.constant 0 : index
    %771 = vector.load %arg10[%c0_469, %c0_470, %c0_471] : memref<2x128x512xbf16, #tpu.memory_space<vmem>>, vector<1x128x512xbf16>
    %772 = vector.shape_cast %771 : vector<1x128x512xbf16> to vector<128x512xbf16>
    %cst_472 = arith.constant dense<0.000000e+00> : vector<8x512xf32>
    %773 = tpu.matmul %770, %772, %cst_472 {dimension_numbers = #tpu.dot_dimension_numbers<[1], [0], [0], [1], [0, 0, 1, 1], [], []>} : vector<8x128xbf16>, vector<128x512xbf16>, vector<8x512xf32> -> vector<8x512xf32>
    %774 = arith.addf %769, %773 : vector<8x512xf32>
    %c0_473 = arith.constant 0 : index
    %c0_474 = arith.constant 0 : index
    %c0_475 = arith.constant 0 : index
    %775 = vector.load %arg11[%c0_473, %c0_474, %c0_475] : memref<2x1x512xf32, #tpu.memory_space<vmem>>, vector<1x1x512xf32>
    %776 = vector.shape_cast %775 : vector<1x1x512xf32> to vector<1x512xf32>
    %777 = vector.broadcast %776 : vector<1x512xf32> to vector<8x512xf32>
    %778 = arith.addf %774, %777 : vector<8x512xf32>
    %779 = vector.extract_strided_slice %778 {offsets = [0, 0], sizes = [8, 128], strides = [1, 1]} : vector<8x512xf32> to vector<8x128xf32>
    %cst_476 = arith.constant 5.000000e-01 : f32
    %780 = vector.broadcast %cst_476 : f32 to vector<8x128xf32>
    %781 = arith.mulf %780, %779 : vector<8x128xf32>
    %782 = math.tanh %781 : vector<8x128xf32>
    %cst_477 = arith.constant 5.000000e-01 : f32
    %783 = vector.broadcast %cst_477 : f32 to vector<8x128xf32>
    %784 = arith.mulf %783, %782 : vector<8x128xf32>
    %cst_478 = arith.constant 5.000000e-01 : f32
    %785 = vector.broadcast %cst_478 : f32 to vector<8x128xf32>
    %786 = arith.addf %784, %785 : vector<8x128xf32>
    %787 = vector.extract_strided_slice %778 {offsets = [0, 128], sizes = [8, 128], strides = [1, 1]} : vector<8x512xf32> to vector<8x128xf32>
    %cst_479 = arith.constant 5.000000e-01 : f32
    %788 = vector.broadcast %cst_479 : f32 to vector<8x128xf32>
    %789 = arith.mulf %788, %787 : vector<8x128xf32>
    %790 = math.tanh %789 : vector<8x128xf32>
    %cst_480 = arith.constant 5.000000e-01 : f32
    %791 = vector.broadcast %cst_480 : f32 to vector<8x128xf32>
    %792 = arith.mulf %791, %790 : vector<8x128xf32>
    %cst_481 = arith.constant 5.000000e-01 : f32
    %793 = vector.broadcast %cst_481 : f32 to vector<8x128xf32>
    %794 = arith.addf %792, %793 : vector<8x128xf32>
    %795 = vector.extract_strided_slice %778 {offsets = [0, 256], sizes = [8, 128], strides = [1, 1]} : vector<8x512xf32> to vector<8x128xf32>
    %796 = math.tanh %795 : vector<8x128xf32>
    %797 = vector.extract_strided_slice %778 {offsets = [0, 384], sizes = [8, 128], strides = [1, 1]} : vector<8x512xf32> to vector<8x128xf32>
    %cst_482 = arith.constant 5.000000e-01 : f32
    %798 = vector.broadcast %cst_482 : f32 to vector<8x128xf32>
    %799 = arith.mulf %798, %797 : vector<8x128xf32>
    %800 = math.tanh %799 : vector<8x128xf32>
    %cst_483 = arith.constant 5.000000e-01 : f32
    %801 = vector.broadcast %cst_483 : f32 to vector<8x128xf32>
    %802 = arith.mulf %801, %800 : vector<8x128xf32>
    %cst_484 = arith.constant 5.000000e-01 : f32
    %803 = vector.broadcast %cst_484 : f32 to vector<8x128xf32>
    %804 = arith.addf %802, %803 : vector<8x128xf32>
    %805 = arith.mulf %794, %765 : vector<8x128xf32>
    %806 = arith.mulf %786, %796 : vector<8x128xf32>
    %807 = arith.addf %805, %806 : vector<8x128xf32>
    %808 = math.tanh %807 : vector<8x128xf32>
    %809 = arith.mulf %804, %808 : vector<8x128xf32>
    %c0_485 = arith.constant 0 : index
    %c0_486 = arith.constant 0 : index
    %c0_487 = arith.constant 0 : index
    %810 = vector.load %arg15[%c0_485, %c0_486, %c0_487] : memref<2x8x128xf32, #tpu.memory_space<vmem>>, vector<1x8x128xf32>
    %811 = vector.shape_cast %810 : vector<1x8x128xf32> to vector<8x128xf32>
    %812 = vector.shape_cast %809 : vector<8x128xf32> to vector<1x8x128xf32>
    tpu.vector_store %arg15[%c0_485, %c0_486, %c0_487], %812 {strides = array<i32>} : memref<2x8x128xf32, #tpu.memory_space<vmem>>, vector<1x8x128xf32>,
    %c0_488 = arith.constant 0 : index
    %c0_489 = arith.constant 0 : index
    %c0_490 = arith.constant 0 : index
    %813 = vector.load %arg16[%c0_488, %c0_489, %c0_490] : memref<2x8x128xf32, #tpu.memory_space<vmem>>, vector<1x8x128xf32>
    %814 = vector.shape_cast %813 : vector<1x8x128xf32> to vector<8x128xf32>
    %815 = vector.shape_cast %807 : vector<8x128xf32> to vector<1x8x128xf32>
    tpu.vector_store %arg16[%c0_488, %c0_489, %c0_490], %815 {strides = array<i32>} : memref<2x8x128xf32, #tpu.memory_space<vmem>>, vector<1x8x128xf32>,
    %c1_491 = arith.constant 1 : index
    %c0_492 = arith.constant 0 : index
    %c0_493 = arith.constant 0 : index
    %816 = vector.load %arg15[%c1_491, %c0_492, %c0_493] : memref<2x8x128xf32, #tpu.memory_space<vmem>>, vector<1x8x128xf32>
    %817 = vector.shape_cast %816 : vector<1x8x128xf32> to vector<8x128xf32>
    %c1_494 = arith.constant 1 : index
    %c0_495 = arith.constant 0 : index
    %c0_496 = arith.constant 0 : index
    %818 = vector.load %arg16[%c1_494, %c0_495, %c0_496] : memref<2x8x128xf32, #tpu.memory_space<vmem>>, vector<1x8x128xf32>
    %819 = vector.shape_cast %818 : vector<1x8x128xf32> to vector<8x128xf32>
    %820 = arith.truncf %809 : vector<8x128xf32> to vector<8x128xbf16>
    %c1_497 = arith.constant 1 : index
    %c0_498 = arith.constant 0 : index
    %c0_499 = arith.constant 0 : index
    %821 = vector.load %arg9[%c1_497, %c0_498, %c0_499] : memref<2x128x512xbf16, #tpu.memory_space<vmem>>, vector<1x128x512xbf16>
    %822 = vector.shape_cast %821 : vector<1x128x512xbf16> to vector<128x512xbf16>
    %cst_500 = arith.constant dense<0.000000e+00> : vector<8x512xf32>
    %823 = tpu.matmul %820, %822, %cst_500 {dimension_numbers = #tpu.dot_dimension_numbers<[1], [0], [0], [1], [0, 0, 1, 1], [], []>} : vector<8x128xbf16>, vector<128x512xbf16>, vector<8x512xf32> -> vector<8x512xf32>
    %824 = arith.truncf %817 : vector<8x128xf32> to vector<8x128xbf16>
    %c1_501 = arith.constant 1 : index
    %c0_502 = arith.constant 0 : index
    %c0_503 = arith.constant 0 : index
    %825 = vector.load %arg10[%c1_501, %c0_502, %c0_503] : memref<2x128x512xbf16, #tpu.memory_space<vmem>>, vector<1x128x512xbf16>
    %826 = vector.shape_cast %825 : vector<1x128x512xbf16> to vector<128x512xbf16>
    %cst_504 = arith.constant dense<0.000000e+00> : vector<8x512xf32>
    %827 = tpu.matmul %824, %826, %cst_504 {dimension_numbers = #tpu.dot_dimension_numbers<[1], [0], [0], [1], [0, 0, 1, 1], [], []>} : vector<8x128xbf16>, vector<128x512xbf16>, vector<8x512xf32> -> vector<8x512xf32>
    %828 = arith.addf %823, %827 : vector<8x512xf32>
    %c1_505 = arith.constant 1 : index
    %c0_506 = arith.constant 0 : index
    %c0_507 = arith.constant 0 : index
    %829 = vector.load %arg11[%c1_505, %c0_506, %c0_507] : memref<2x1x512xf32, #tpu.memory_space<vmem>>, vector<1x1x512xf32>
    %830 = vector.shape_cast %829 : vector<1x1x512xf32> to vector<1x512xf32>
    %831 = vector.broadcast %830 : vector<1x512xf32> to vector<8x512xf32>
    %832 = arith.addf %828, %831 : vector<8x512xf32>
    %833 = vector.extract_strided_slice %832 {offsets = [0, 0], sizes = [8, 128], strides = [1, 1]} : vector<8x512xf32> to vector<8x128xf32>
    %cst_508 = arith.constant 5.000000e-01 : f32
    %834 = vector.broadcast %cst_508 : f32 to vector<8x128xf32>
    %835 = arith.mulf %834, %833 : vector<8x128xf32>
    %836 = math.tanh %835 : vector<8x128xf32>
    %cst_509 = arith.constant 5.000000e-01 : f32
    %837 = vector.broadcast %cst_509 : f32 to vector<8x128xf32>
    %838 = arith.mulf %837, %836 : vector<8x128xf32>
    %cst_510 = arith.constant 5.000000e-01 : f32
    %839 = vector.broadcast %cst_510 : f32 to vector<8x128xf32>
    %840 = arith.addf %838, %839 : vector<8x128xf32>
    %841 = vector.extract_strided_slice %832 {offsets = [0, 128], sizes = [8, 128], strides = [1, 1]} : vector<8x512xf32> to vector<8x128xf32>
    %cst_511 = arith.constant 5.000000e-01 : f32
    %842 = vector.broadcast %cst_511 : f32 to vector<8x128xf32>
    %843 = arith.mulf %842, %841 : vector<8x128xf32>
    %844 = math.tanh %843 : vector<8x128xf32>
    %cst_512 = arith.constant 5.000000e-01 : f32
    %845 = vector.broadcast %cst_512 : f32 to vector<8x128xf32>
    %846 = arith.mulf %845, %844 : vector<8x128xf32>
    %cst_513 = arith.constant 5.000000e-01 : f32
    %847 = vector.broadcast %cst_513 : f32 to vector<8x128xf32>
    %848 = arith.addf %846, %847 : vector<8x128xf32>
    %849 = vector.extract_strided_slice %832 {offsets = [0, 256], sizes = [8, 128], strides = [1, 1]} : vector<8x512xf32> to vector<8x128xf32>
    %850 = math.tanh %849 : vector<8x128xf32>
    %851 = vector.extract_strided_slice %832 {offsets = [0, 384], sizes = [8, 128], strides = [1, 1]} : vector<8x512xf32> to vector<8x128xf32>
    %cst_514 = arith.constant 5.000000e-01 : f32
    %852 = vector.broadcast %cst_514 : f32 to vector<8x128xf32>
    %853 = arith.mulf %852, %851 : vector<8x128xf32>
    %854 = math.tanh %853 : vector<8x128xf32>
    %cst_515 = arith.constant 5.000000e-01 : f32
    %855 = vector.broadcast %cst_515 : f32 to vector<8x128xf32>
    %856 = arith.mulf %855, %854 : vector<8x128xf32>
    %cst_516 = arith.constant 5.000000e-01 : f32
    %857 = vector.broadcast %cst_516 : f32 to vector<8x128xf32>
    %858 = arith.addf %856, %857 : vector<8x128xf32>
    %859 = arith.mulf %848, %819 : vector<8x128xf32>
    %860 = arith.mulf %840, %850 : vector<8x128xf32>
    %861 = arith.addf %859, %860 : vector<8x128xf32>
    %862 = math.tanh %861 : vector<8x128xf32>
    %863 = arith.mulf %858, %862 : vector<8x128xf32>
    %c1_517 = arith.constant 1 : index
    %c0_518 = arith.constant 0 : index
    %c0_519 = arith.constant 0 : index
    %864 = vector.load %arg15[%c1_517, %c0_518, %c0_519] : memref<2x8x128xf32, #tpu.memory_space<vmem>>, vector<1x8x128xf32>
    %865 = vector.shape_cast %864 : vector<1x8x128xf32> to vector<8x128xf32>
    %866 = vector.shape_cast %863 : vector<8x128xf32> to vector<1x8x128xf32>
    tpu.vector_store %arg15[%c1_517, %c0_518, %c0_519], %866 {strides = array<i32>} : memref<2x8x128xf32, #tpu.memory_space<vmem>>, vector<1x8x128xf32>,
    %c1_520 = arith.constant 1 : index
    %c0_521 = arith.constant 0 : index
    %c0_522 = arith.constant 0 : index
    %867 = vector.load %arg16[%c1_520, %c0_521, %c0_522] : memref<2x8x128xf32, #tpu.memory_space<vmem>>, vector<1x8x128xf32>
    %868 = vector.shape_cast %867 : vector<1x8x128xf32> to vector<8x128xf32>
    %869 = vector.shape_cast %861 : vector<8x128xf32> to vector<1x8x128xf32>
    tpu.vector_store %arg16[%c1_520, %c0_521, %c0_522], %869 {strides = array<i32>} : memref<2x8x128xf32, #tpu.memory_space<vmem>>, vector<1x8x128xf32>,
    %870 = arith.truncf %863 : vector<8x128xf32> to vector<8x128xbf16>
    %c0_523 = arith.constant 0 : index
    %c0_524 = arith.constant 0 : index
    %871 = vector.load %arg12[%c0_523, %c0_524] : memref<128x128xbf16, #tpu.memory_space<vmem>>, vector<128x128xbf16>
    %cst_525 = arith.constant dense<0.000000e+00> : vector<8x128xf32>
    %872 = tpu.matmul %870, %871, %cst_525 {dimension_numbers = #tpu.dot_dimension_numbers<[1], [0], [0], [1], [0, 0, 1, 1], [], []>} : vector<8x128xbf16>, vector<128x128xbf16>, vector<8x128xf32> -> vector<8x128xf32>
    %c0_526 = arith.constant 0 : index
    %c0_527 = arith.constant 0 : index
    %873 = vector.load %arg13[%c0_526, %c0_527] : memref<1x128xf32, #tpu.memory_space<vmem>>, vector<1x128xf32>
    %874 = vector.broadcast %873 : vector<1x128xf32> to vector<8x128xf32>
    %875 = arith.addf %872, %874 : vector<8x128xf32>
    %876 = arith.index_cast %c2_i32_453 : i32 to index
    %c0_528 = arith.constant 0 : index
    %c0_529 = arith.constant 0 : index
    %877 = vector.load %arg14[%876, %c0_528, %c0_529] : memref<6x8x128xf32, #tpu.memory_space<vmem>>, vector<1x8x128xf32>
    %878 = vector.shape_cast %877 : vector<1x8x128xf32> to vector<8x128xf32>
    %879 = vector.shape_cast %875 : vector<8x128xf32> to vector<1x8x128xf32>
    tpu.vector_store %arg14[%876, %c0_528, %c0_529], %879 {strides = array<i32>} : memref<6x8x128xf32, #tpu.memory_space<vmem>>, vector<1x8x128xf32>,
    %cst_530 = arith.constant dense<0xFF800000> : vector<8xf32>
    %880 = vector.multi_reduction <maximumf>, %875, %cst_530 [1] : vector<8x128xf32> to vector<8xf32>
    %881 = vector.shape_cast %880 : vector<8xf32> to vector<8x1xf32>
    %882 = vector.broadcast %881 : vector<8x1xf32> to vector<8x128xf32>
    %883 = arith.cmpf oeq, %875, %882 : vector<8x128xf32>
    %c128_i32_531 = arith.constant 128 : i32
    %884 = vector.broadcast %c128_i32_531 : i32 to vector<8x128xi32>
    %885 = arith.select %883, %469, %884 : vector<8x128xi1>, vector<8x128xi32>
    %cst_532 = arith.constant dense<2147483647> : vector<8xi32>
    %886 = vector.multi_reduction <minsi>, %885, %cst_532 [1] : vector<8x128xi32> to vector<8xi32>
    %887 = vector.shape_cast %886 : vector<8xi32> to vector<8x1xi32>
    %888 = arith.index_cast %c2_i32_453 : i32 to index
    %889 = memref.load %arg2[%888] : memref<6xi32, #tpu.memory_space<smem>>
    %c0_i32_533 = arith.constant 0 : i32
    %890 = arith.cmpi sgt, %889, %c0_i32_533 : i32
    %891 = arith.index_cast %c2_i32_453 : i32 to index
    %c0_534 = arith.constant 0 : index
    %c0_535 = arith.constant 0 : index
    %892 = vector.load %arg1[%891, %c0_534, %c0_535] : memref<6x8x1xi32, #tpu.memory_space<vmem>>, vector<1x8x1xi32>
    %893 = vector.shape_cast %892 : vector<1x8x1xi32> to vector<8x1xi32>
    %894 = arith.select %890, %893, %887 : vector<8x1xi32>
    %c0_536 = arith.constant 0 : index
    %c0_537 = arith.constant 0 : index
    %895 = vector.load %arg17[%c0_536, %c0_537] : memref<8x1xi32, #tpu.memory_space<vmem>>, vector<8x1xi32>
    tpu.vector_store %arg17[%c0_536, %c0_537], %894 {strides = array<i32>} : memref<8x1xi32, #tpu.memory_space<vmem>>, vector<8x1xi32>,
    %c3_i32_538 = arith.constant 3 : i32
    %c0_539 = arith.constant 0 : index
    %c0_540 = arith.constant 0 : index
    %896 = vector.load %arg17[%c0_539, %c0_540] : memref<8x1xi32, #tpu.memory_space<vmem>>, vector<8x1xi32>
    %897 = vector.broadcast %896 : vector<8x1xi32> to vector<8x128xi32>
    %898 = arith.cmpi eq, %469, %897 : vector<8x128xi32>
    %899 = arith.extui %898 : vector<8x128xi1> to vector<8x128xi32>
    %900 = arith.sitofp %899 : vector<8x128xi32> to vector<8x128xf32>
    %901 = arith.truncf %900 : vector<8x128xf32> to vector<8x128xbf16>
    %c0_541 = arith.constant 0 : index
    %c0_542 = arith.constant 0 : index
    %902 = vector.load %arg8[%c0_541, %c0_542] : memref<128x128xbf16, #tpu.memory_space<vmem>>, vector<128x128xbf16>
    %cst_543 = arith.constant dense<0.000000e+00> : vector<8x128xf32>
    %903 = tpu.matmul %901, %902, %cst_543 {dimension_numbers = #tpu.dot_dimension_numbers<[1], [0], [0], [1], [0, 0, 1, 1], [], []>} : vector<8x128xbf16>, vector<128x128xbf16>, vector<8x128xf32> -> vector<8x128xf32>
    %c0_544 = arith.constant 0 : index
    %c0_545 = arith.constant 0 : index
    %c0_546 = arith.constant 0 : index
    %904 = vector.load %arg15[%c0_544, %c0_545, %c0_546] : memref<2x8x128xf32, #tpu.memory_space<vmem>>, vector<1x8x128xf32>
    %905 = vector.shape_cast %904 : vector<1x8x128xf32> to vector<8x128xf32>
    %c0_547 = arith.constant 0 : index
    %c0_548 = arith.constant 0 : index
    %c0_549 = arith.constant 0 : index
    %906 = vector.load %arg16[%c0_547, %c0_548, %c0_549] : memref<2x8x128xf32, #tpu.memory_space<vmem>>, vector<1x8x128xf32>
    %907 = vector.shape_cast %906 : vector<1x8x128xf32> to vector<8x128xf32>
    %908 = arith.truncf %903 : vector<8x128xf32> to vector<8x128xbf16>
    %c0_550 = arith.constant 0 : index
    %c0_551 = arith.constant 0 : index
    %c0_552 = arith.constant 0 : index
    %909 = vector.load %arg9[%c0_550, %c0_551, %c0_552] : memref<2x128x512xbf16, #tpu.memory_space<vmem>>, vector<1x128x512xbf16>
    %910 = vector.shape_cast %909 : vector<1x128x512xbf16> to vector<128x512xbf16>
    %cst_553 = arith.constant dense<0.000000e+00> : vector<8x512xf32>
    %911 = tpu.matmul %908, %910, %cst_553 {dimension_numbers = #tpu.dot_dimension_numbers<[1], [0], [0], [1], [0, 0, 1, 1], [], []>} : vector<8x128xbf16>, vector<128x512xbf16>, vector<8x512xf32> -> vector<8x512xf32>
    %912 = arith.truncf %905 : vector<8x128xf32> to vector<8x128xbf16>
    %c0_554 = arith.constant 0 : index
    %c0_555 = arith.constant 0 : index
    %c0_556 = arith.constant 0 : index
    %913 = vector.load %arg10[%c0_554, %c0_555, %c0_556] : memref<2x128x512xbf16, #tpu.memory_space<vmem>>, vector<1x128x512xbf16>
    %914 = vector.shape_cast %913 : vector<1x128x512xbf16> to vector<128x512xbf16>
    %cst_557 = arith.constant dense<0.000000e+00> : vector<8x512xf32>
    %915 = tpu.matmul %912, %914, %cst_557 {dimension_numbers = #tpu.dot_dimension_numbers<[1], [0], [0], [1], [0, 0, 1, 1], [], []>} : vector<8x128xbf16>, vector<128x512xbf16>, vector<8x512xf32> -> vector<8x512xf32>
    %916 = arith.addf %911, %915 : vector<8x512xf32>
    %c0_558 = arith.constant 0 : index
    %c0_559 = arith.constant 0 : index
    %c0_560 = arith.constant 0 : index
    %917 = vector.load %arg11[%c0_558, %c0_559, %c0_560] : memref<2x1x512xf32, #tpu.memory_space<vmem>>, vector<1x1x512xf32>
    %918 = vector.shape_cast %917 : vector<1x1x512xf32> to vector<1x512xf32>
    %919 = vector.broadcast %918 : vector<1x512xf32> to vector<8x512xf32>
    %920 = arith.addf %916, %919 : vector<8x512xf32>
    %921 = vector.extract_strided_slice %920 {offsets = [0, 0], sizes = [8, 128], strides = [1, 1]} : vector<8x512xf32> to vector<8x128xf32>
    %cst_561 = arith.constant 5.000000e-01 : f32
    %922 = vector.broadcast %cst_561 : f32 to vector<8x128xf32>
    %923 = arith.mulf %922, %921 : vector<8x128xf32>
    %924 = math.tanh %923 : vector<8x128xf32>
    %cst_562 = arith.constant 5.000000e-01 : f32
    %925 = vector.broadcast %cst_562 : f32 to vector<8x128xf32>
    %926 = arith.mulf %925, %924 : vector<8x128xf32>
    %cst_563 = arith.constant 5.000000e-01 : f32
    %927 = vector.broadcast %cst_563 : f32 to vector<8x128xf32>
    %928 = arith.addf %926, %927 : vector<8x128xf32>
    %929 = vector.extract_strided_slice %920 {offsets = [0, 128], sizes = [8, 128], strides = [1, 1]} : vector<8x512xf32> to vector<8x128xf32>
    %cst_564 = arith.constant 5.000000e-01 : f32
    %930 = vector.broadcast %cst_564 : f32 to vector<8x128xf32>
    %931 = arith.mulf %930, %929 : vector<8x128xf32>
    %932 = math.tanh %931 : vector<8x128xf32>
    %cst_565 = arith.constant 5.000000e-01 : f32
    %933 = vector.broadcast %cst_565 : f32 to vector<8x128xf32>
    %934 = arith.mulf %933, %932 : vector<8x128xf32>
    %cst_566 = arith.constant 5.000000e-01 : f32
    %935 = vector.broadcast %cst_566 : f32 to vector<8x128xf32>
    %936 = arith.addf %934, %935 : vector<8x128xf32>
    %937 = vector.extract_strided_slice %920 {offsets = [0, 256], sizes = [8, 128], strides = [1, 1]} : vector<8x512xf32> to vector<8x128xf32>
    %938 = math.tanh %937 : vector<8x128xf32>
    %939 = vector.extract_strided_slice %920 {offsets = [0, 384], sizes = [8, 128], strides = [1, 1]} : vector<8x512xf32> to vector<8x128xf32>
    %cst_567 = arith.constant 5.000000e-01 : f32
    %940 = vector.broadcast %cst_567 : f32 to vector<8x128xf32>
    %941 = arith.mulf %940, %939 : vector<8x128xf32>
    %942 = math.tanh %941 : vector<8x128xf32>
    %cst_568 = arith.constant 5.000000e-01 : f32
    %943 = vector.broadcast %cst_568 : f32 to vector<8x128xf32>
    %944 = arith.mulf %943, %942 : vector<8x128xf32>
    %cst_569 = arith.constant 5.000000e-01 : f32
    %945 = vector.broadcast %cst_569 : f32 to vector<8x128xf32>
    %946 = arith.addf %944, %945 : vector<8x128xf32>
    %947 = arith.mulf %936, %907 : vector<8x128xf32>
    %948 = arith.mulf %928, %938 : vector<8x128xf32>
    %949 = arith.addf %947, %948 : vector<8x128xf32>
    %950 = math.tanh %949 : vector<8x128xf32>
    %951 = arith.mulf %946, %950 : vector<8x128xf32>
    %c0_570 = arith.constant 0 : index
    %c0_571 = arith.constant 0 : index
    %c0_572 = arith.constant 0 : index
    %952 = vector.load %arg15[%c0_570, %c0_571, %c0_572] : memref<2x8x128xf32, #tpu.memory_space<vmem>>, vector<1x8x128xf32>
    %953 = vector.shape_cast %952 : vector<1x8x128xf32> to vector<8x128xf32>
    %954 = vector.shape_cast %951 : vector<8x128xf32> to vector<1x8x128xf32>
    tpu.vector_store %arg15[%c0_570, %c0_571, %c0_572], %954 {strides = array<i32>} : memref<2x8x128xf32, #tpu.memory_space<vmem>>, vector<1x8x128xf32>,
    %c0_573 = arith.constant 0 : index
    %c0_574 = arith.constant 0 : index
    %c0_575 = arith.constant 0 : index
    %955 = vector.load %arg16[%c0_573, %c0_574, %c0_575] : memref<2x8x128xf32, #tpu.memory_space<vmem>>, vector<1x8x128xf32>
    %956 = vector.shape_cast %955 : vector<1x8x128xf32> to vector<8x128xf32>
    %957 = vector.shape_cast %949 : vector<8x128xf32> to vector<1x8x128xf32>
    tpu.vector_store %arg16[%c0_573, %c0_574, %c0_575], %957 {strides = array<i32>} : memref<2x8x128xf32, #tpu.memory_space<vmem>>, vector<1x8x128xf32>,
    %c1_576 = arith.constant 1 : index
    %c0_577 = arith.constant 0 : index
    %c0_578 = arith.constant 0 : index
    %958 = vector.load %arg15[%c1_576, %c0_577, %c0_578] : memref<2x8x128xf32, #tpu.memory_space<vmem>>, vector<1x8x128xf32>
    %959 = vector.shape_cast %958 : vector<1x8x128xf32> to vector<8x128xf32>
    %c1_579 = arith.constant 1 : index
    %c0_580 = arith.constant 0 : index
    %c0_581 = arith.constant 0 : index
    %960 = vector.load %arg16[%c1_579, %c0_580, %c0_581] : memref<2x8x128xf32, #tpu.memory_space<vmem>>, vector<1x8x128xf32>
    %961 = vector.shape_cast %960 : vector<1x8x128xf32> to vector<8x128xf32>
    %962 = arith.truncf %951 : vector<8x128xf32> to vector<8x128xbf16>
    %c1_582 = arith.constant 1 : index
    %c0_583 = arith.constant 0 : index
    %c0_584 = arith.constant 0 : index
    %963 = vector.load %arg9[%c1_582, %c0_583, %c0_584] : memref<2x128x512xbf16, #tpu.memory_space<vmem>>, vector<1x128x512xbf16>
    %964 = vector.shape_cast %963 : vector<1x128x512xbf16> to vector<128x512xbf16>
    %cst_585 = arith.constant dense<0.000000e+00> : vector<8x512xf32>
    %965 = tpu.matmul %962, %964, %cst_585 {dimension_numbers = #tpu.dot_dimension_numbers<[1], [0], [0], [1], [0, 0, 1, 1], [], []>} : vector<8x128xbf16>, vector<128x512xbf16>, vector<8x512xf32> -> vector<8x512xf32>
    %966 = arith.truncf %959 : vector<8x128xf32> to vector<8x128xbf16>
    %c1_586 = arith.constant 1 : index
    %c0_587 = arith.constant 0 : index
    %c0_588 = arith.constant 0 : index
    %967 = vector.load %arg10[%c1_586, %c0_587, %c0_588] : memref<2x128x512xbf16, #tpu.memory_space<vmem>>, vector<1x128x512xbf16>
    %968 = vector.shape_cast %967 : vector<1x128x512xbf16> to vector<128x512xbf16>
    %cst_589 = arith.constant dense<0.000000e+00> : vector<8x512xf32>
    %969 = tpu.matmul %966, %968, %cst_589 {dimension_numbers = #tpu.dot_dimension_numbers<[1], [0], [0], [1], [0, 0, 1, 1], [], []>} : vector<8x128xbf16>, vector<128x512xbf16>, vector<8x512xf32> -> vector<8x512xf32>
    %970 = arith.addf %965, %969 : vector<8x512xf32>
    %c1_590 = arith.constant 1 : index
    %c0_591 = arith.constant 0 : index
    %c0_592 = arith.constant 0 : index
    %971 = vector.load %arg11[%c1_590, %c0_591, %c0_592] : memref<2x1x512xf32, #tpu.memory_space<vmem>>, vector<1x1x512xf32>
    %972 = vector.shape_cast %971 : vector<1x1x512xf32> to vector<1x512xf32>
    %973 = vector.broadcast %972 : vector<1x512xf32> to vector<8x512xf32>
    %974 = arith.addf %970, %973 : vector<8x512xf32>
    %975 = vector.extract_strided_slice %974 {offsets = [0, 0], sizes = [8, 128], strides = [1, 1]} : vector<8x512xf32> to vector<8x128xf32>
    %cst_593 = arith.constant 5.000000e-01 : f32
    %976 = vector.broadcast %cst_593 : f32 to vector<8x128xf32>
    %977 = arith.mulf %976, %975 : vector<8x128xf32>
    %978 = math.tanh %977 : vector<8x128xf32>
    %cst_594 = arith.constant 5.000000e-01 : f32
    %979 = vector.broadcast %cst_594 : f32 to vector<8x128xf32>
    %980 = arith.mulf %979, %978 : vector<8x128xf32>
    %cst_595 = arith.constant 5.000000e-01 : f32
    %981 = vector.broadcast %cst_595 : f32 to vector<8x128xf32>
    %982 = arith.addf %980, %981 : vector<8x128xf32>
    %983 = vector.extract_strided_slice %974 {offsets = [0, 128], sizes = [8, 128], strides = [1, 1]} : vector<8x512xf32> to vector<8x128xf32>
    %cst_596 = arith.constant 5.000000e-01 : f32
    %984 = vector.broadcast %cst_596 : f32 to vector<8x128xf32>
    %985 = arith.mulf %984, %983 : vector<8x128xf32>
    %986 = math.tanh %985 : vector<8x128xf32>
    %cst_597 = arith.constant 5.000000e-01 : f32
    %987 = vector.broadcast %cst_597 : f32 to vector<8x128xf32>
    %988 = arith.mulf %987, %986 : vector<8x128xf32>
    %cst_598 = arith.constant 5.000000e-01 : f32
    %989 = vector.broadcast %cst_598 : f32 to vector<8x128xf32>
    %990 = arith.addf %988, %989 : vector<8x128xf32>
    %991 = vector.extract_strided_slice %974 {offsets = [0, 256], sizes = [8, 128], strides = [1, 1]} : vector<8x512xf32> to vector<8x128xf32>
    %992 = math.tanh %991 : vector<8x128xf32>
    %993 = vector.extract_strided_slice %974 {offsets = [0, 384], sizes = [8, 128], strides = [1, 1]} : vector<8x512xf32> to vector<8x128xf32>
    %cst_599 = arith.constant 5.000000e-01 : f32
    %994 = vector.broadcast %cst_599 : f32 to vector<8x128xf32>
    %995 = arith.mulf %994, %993 : vector<8x128xf32>
    %996 = math.tanh %995 : vector<8x128xf32>
    %cst_600 = arith.constant 5.000000e-01 : f32
    %997 = vector.broadcast %cst_600 : f32 to vector<8x128xf32>
    %998 = arith.mulf %997, %996 : vector<8x128xf32>
    %cst_601 = arith.constant 5.000000e-01 : f32
    %999 = vector.broadcast %cst_601 : f32 to vector<8x128xf32>
    %1000 = arith.addf %998, %999 : vector<8x128xf32>
    %1001 = arith.mulf %990, %961 : vector<8x128xf32>
    %1002 = arith.mulf %982, %992 : vector<8x128xf32>
    %1003 = arith.addf %1001, %1002 : vector<8x128xf32>
    %1004 = math.tanh %1003 : vector<8x128xf32>
    %1005 = arith.mulf %1000, %1004 : vector<8x128xf32>
    %c1_602 = arith.constant 1 : index
    %c0_603 = arith.constant 0 : index
    %c0_604 = arith.constant 0 : index
    %1006 = vector.load %arg15[%c1_602, %c0_603, %c0_604] : memref<2x8x128xf32, #tpu.memory_space<vmem>>, vector<1x8x128xf32>
    %1007 = vector.shape_cast %1006 : vector<1x8x128xf32> to vector<8x128xf32>
    %1008 = vector.shape_cast %1005 : vector<8x128xf32> to vector<1x8x128xf32>
    tpu.vector_store %arg15[%c1_602, %c0_603, %c0_604], %1008 {strides = array<i32>} : memref<2x8x128xf32, #tpu.memory_space<vmem>>, vector<1x8x128xf32>,
    %c1_605 = arith.constant 1 : index
    %c0_606 = arith.constant 0 : index
    %c0_607 = arith.constant 0 : index
    %1009 = vector.load %arg16[%c1_605, %c0_606, %c0_607] : memref<2x8x128xf32, #tpu.memory_space<vmem>>, vector<1x8x128xf32>
    %1010 = vector.shape_cast %1009 : vector<1x8x128xf32> to vector<8x128xf32>
    %1011 = vector.shape_cast %1003 : vector<8x128xf32> to vector<1x8x128xf32>
    tpu.vector_store %arg16[%c1_605, %c0_606, %c0_607], %1011 {strides = array<i32>} : memref<2x8x128xf32, #tpu.memory_space<vmem>>, vector<1x8x128xf32>,
    %1012 = arith.truncf %1005 : vector<8x128xf32> to vector<8x128xbf16>
    %c0_608 = arith.constant 0 : index
    %c0_609 = arith.constant 0 : index
    %1013 = vector.load %arg12[%c0_608, %c0_609] : memref<128x128xbf16, #tpu.memory_space<vmem>>, vector<128x128xbf16>
    %cst_610 = arith.constant dense<0.000000e+00> : vector<8x128xf32>
    %1014 = tpu.matmul %1012, %1013, %cst_610 {dimension_numbers = #tpu.dot_dimension_numbers<[1], [0], [0], [1], [0, 0, 1, 1], [], []>} : vector<8x128xbf16>, vector<128x128xbf16>, vector<8x128xf32> -> vector<8x128xf32>
    %c0_611 = arith.constant 0 : index
    %c0_612 = arith.constant 0 : index
    %1015 = vector.load %arg13[%c0_611, %c0_612] : memref<1x128xf32, #tpu.memory_space<vmem>>, vector<1x128xf32>
    %1016 = vector.broadcast %1015 : vector<1x128xf32> to vector<8x128xf32>
    %1017 = arith.addf %1014, %1016 : vector<8x128xf32>
    %1018 = arith.index_cast %c3_i32_538 : i32 to index
    %c0_613 = arith.constant 0 : index
    %c0_614 = arith.constant 0 : index
    %1019 = vector.load %arg14[%1018, %c0_613, %c0_614] : memref<6x8x128xf32, #tpu.memory_space<vmem>>, vector<1x8x128xf32>
    %1020 = vector.shape_cast %1019 : vector<1x8x128xf32> to vector<8x128xf32>
    %1021 = vector.shape_cast %1017 : vector<8x128xf32> to vector<1x8x128xf32>
    tpu.vector_store %arg14[%1018, %c0_613, %c0_614], %1021 {strides = array<i32>} : memref<6x8x128xf32, #tpu.memory_space<vmem>>, vector<1x8x128xf32>,
    %cst_615 = arith.constant dense<0xFF800000> : vector<8xf32>
    %1022 = vector.multi_reduction <maximumf>, %1017, %cst_615 [1] : vector<8x128xf32> to vector<8xf32>
    %1023 = vector.shape_cast %1022 : vector<8xf32> to vector<8x1xf32>
    %1024 = vector.broadcast %1023 : vector<8x1xf32> to vector<8x128xf32>
    %1025 = arith.cmpf oeq, %1017, %1024 : vector<8x128xf32>
    %c128_i32_616 = arith.constant 128 : i32
    %1026 = vector.broadcast %c128_i32_616 : i32 to vector<8x128xi32>
    %1027 = arith.select %1025, %469, %1026 : vector<8x128xi1>, vector<8x128xi32>
    %cst_617 = arith.constant dense<2147483647> : vector<8xi32>
    %1028 = vector.multi_reduction <minsi>, %1027, %cst_617 [1] : vector<8x128xi32> to vector<8xi32>
    %1029 = vector.shape_cast %1028 : vector<8xi32> to vector<8x1xi32>
    %1030 = arith.index_cast %c3_i32_538 : i32 to index
    %1031 = memref.load %arg2[%1030] : memref<6xi32, #tpu.memory_space<smem>>
    %c0_i32_618 = arith.constant 0 : i32
    %1032 = arith.cmpi sgt, %1031, %c0_i32_618 : i32
    %1033 = arith.index_cast %c3_i32_538 : i32 to index
    %c0_619 = arith.constant 0 : index
    %c0_620 = arith.constant 0 : index
    %1034 = vector.load %arg1[%1033, %c0_619, %c0_620] : memref<6x8x1xi32, #tpu.memory_space<vmem>>, vector<1x8x1xi32>
    %1035 = vector.shape_cast %1034 : vector<1x8x1xi32> to vector<8x1xi32>
    %1036 = arith.select %1032, %1035, %1029 : vector<8x1xi32>
    %c0_621 = arith.constant 0 : index
    %c0_622 = arith.constant 0 : index
    %1037 = vector.load %arg17[%c0_621, %c0_622] : memref<8x1xi32, #tpu.memory_space<vmem>>, vector<8x1xi32>
    tpu.vector_store %arg17[%c0_621, %c0_622], %1036 {strides = array<i32>} : memref<8x1xi32, #tpu.memory_space<vmem>>, vector<8x1xi32>,
    %c4_i32_623 = arith.constant 4 : i32
    %c0_624 = arith.constant 0 : index
    %c0_625 = arith.constant 0 : index
    %1038 = vector.load %arg17[%c0_624, %c0_625] : memref<8x1xi32, #tpu.memory_space<vmem>>, vector<8x1xi32>
    %1039 = vector.broadcast %1038 : vector<8x1xi32> to vector<8x128xi32>
    %1040 = arith.cmpi eq, %469, %1039 : vector<8x128xi32>
    %1041 = arith.extui %1040 : vector<8x128xi1> to vector<8x128xi32>
    %1042 = arith.sitofp %1041 : vector<8x128xi32> to vector<8x128xf32>
    %1043 = arith.truncf %1042 : vector<8x128xf32> to vector<8x128xbf16>
    %c0_626 = arith.constant 0 : index
    %c0_627 = arith.constant 0 : index
    %1044 = vector.load %arg8[%c0_626, %c0_627] : memref<128x128xbf16, #tpu.memory_space<vmem>>, vector<128x128xbf16>
    %cst_628 = arith.constant dense<0.000000e+00> : vector<8x128xf32>
    %1045 = tpu.matmul %1043, %1044, %cst_628 {dimension_numbers = #tpu.dot_dimension_numbers<[1], [0], [0], [1], [0, 0, 1, 1], [], []>} : vector<8x128xbf16>, vector<128x128xbf16>, vector<8x128xf32> -> vector<8x128xf32>
    %c0_629 = arith.constant 0 : index
    %c0_630 = arith.constant 0 : index
    %c0_631 = arith.constant 0 : index
    %1046 = vector.load %arg15[%c0_629, %c0_630, %c0_631] : memref<2x8x128xf32, #tpu.memory_space<vmem>>, vector<1x8x128xf32>
    %1047 = vector.shape_cast %1046 : vector<1x8x128xf32> to vector<8x128xf32>
    %c0_632 = arith.constant 0 : index
    %c0_633 = arith.constant 0 : index
    %c0_634 = arith.constant 0 : index
    %1048 = vector.load %arg16[%c0_632, %c0_633, %c0_634] : memref<2x8x128xf32, #tpu.memory_space<vmem>>, vector<1x8x128xf32>
    %1049 = vector.shape_cast %1048 : vector<1x8x128xf32> to vector<8x128xf32>
    %1050 = arith.truncf %1045 : vector<8x128xf32> to vector<8x128xbf16>
    %c0_635 = arith.constant 0 : index
    %c0_636 = arith.constant 0 : index
    %c0_637 = arith.constant 0 : index
    %1051 = vector.load %arg9[%c0_635, %c0_636, %c0_637] : memref<2x128x512xbf16, #tpu.memory_space<vmem>>, vector<1x128x512xbf16>
    %1052 = vector.shape_cast %1051 : vector<1x128x512xbf16> to vector<128x512xbf16>
    %cst_638 = arith.constant dense<0.000000e+00> : vector<8x512xf32>
    %1053 = tpu.matmul %1050, %1052, %cst_638 {dimension_numbers = #tpu.dot_dimension_numbers<[1], [0], [0], [1], [0, 0, 1, 1], [], []>} : vector<8x128xbf16>, vector<128x512xbf16>, vector<8x512xf32> -> vector<8x512xf32>
    %1054 = arith.truncf %1047 : vector<8x128xf32> to vector<8x128xbf16>
    %c0_639 = arith.constant 0 : index
    %c0_640 = arith.constant 0 : index
    %c0_641 = arith.constant 0 : index
    %1055 = vector.load %arg10[%c0_639, %c0_640, %c0_641] : memref<2x128x512xbf16, #tpu.memory_space<vmem>>, vector<1x128x512xbf16>
    %1056 = vector.shape_cast %1055 : vector<1x128x512xbf16> to vector<128x512xbf16>
    %cst_642 = arith.constant dense<0.000000e+00> : vector<8x512xf32>
    %1057 = tpu.matmul %1054, %1056, %cst_642 {dimension_numbers = #tpu.dot_dimension_numbers<[1], [0], [0], [1], [0, 0, 1, 1], [], []>} : vector<8x128xbf16>, vector<128x512xbf16>, vector<8x512xf32> -> vector<8x512xf32>
    %1058 = arith.addf %1053, %1057 : vector<8x512xf32>
    %c0_643 = arith.constant 0 : index
    %c0_644 = arith.constant 0 : index
    %c0_645 = arith.constant 0 : index
    %1059 = vector.load %arg11[%c0_643, %c0_644, %c0_645] : memref<2x1x512xf32, #tpu.memory_space<vmem>>, vector<1x1x512xf32>
    %1060 = vector.shape_cast %1059 : vector<1x1x512xf32> to vector<1x512xf32>
    %1061 = vector.broadcast %1060 : vector<1x512xf32> to vector<8x512xf32>
    %1062 = arith.addf %1058, %1061 : vector<8x512xf32>
    %1063 = vector.extract_strided_slice %1062 {offsets = [0, 0], sizes = [8, 128], strides = [1, 1]} : vector<8x512xf32> to vector<8x128xf32>
    %cst_646 = arith.constant 5.000000e-01 : f32
    %1064 = vector.broadcast %cst_646 : f32 to vector<8x128xf32>
    %1065 = arith.mulf %1064, %1063 : vector<8x128xf32>
    %1066 = math.tanh %1065 : vector<8x128xf32>
    %cst_647 = arith.constant 5.000000e-01 : f32
    %1067 = vector.broadcast %cst_647 : f32 to vector<8x128xf32>
    %1068 = arith.mulf %1067, %1066 : vector<8x128xf32>
    %cst_648 = arith.constant 5.000000e-01 : f32
    %1069 = vector.broadcast %cst_648 : f32 to vector<8x128xf32>
    %1070 = arith.addf %1068, %1069 : vector<8x128xf32>
    %1071 = vector.extract_strided_slice %1062 {offsets = [0, 128], sizes = [8, 128], strides = [1, 1]} : vector<8x512xf32> to vector<8x128xf32>
    %cst_649 = arith.constant 5.000000e-01 : f32
    %1072 = vector.broadcast %cst_649 : f32 to vector<8x128xf32>
    %1073 = arith.mulf %1072, %1071 : vector<8x128xf32>
    %1074 = math.tanh %1073 : vector<8x128xf32>
    %cst_650 = arith.constant 5.000000e-01 : f32
    %1075 = vector.broadcast %cst_650 : f32 to vector<8x128xf32>
    %1076 = arith.mulf %1075, %1074 : vector<8x128xf32>
    %cst_651 = arith.constant 5.000000e-01 : f32
    %1077 = vector.broadcast %cst_651 : f32 to vector<8x128xf32>
    %1078 = arith.addf %1076, %1077 : vector<8x128xf32>
    %1079 = vector.extract_strided_slice %1062 {offsets = [0, 256], sizes = [8, 128], strides = [1, 1]} : vector<8x512xf32> to vector<8x128xf32>
    %1080 = math.tanh %1079 : vector<8x128xf32>
    %1081 = vector.extract_strided_slice %1062 {offsets = [0, 384], sizes = [8, 128], strides = [1, 1]} : vector<8x512xf32> to vector<8x128xf32>
    %cst_652 = arith.constant 5.000000e-01 : f32
    %1082 = vector.broadcast %cst_652 : f32 to vector<8x128xf32>
    %1083 = arith.mulf %1082, %1081 : vector<8x128xf32>
    %1084 = math.tanh %1083 : vector<8x128xf32>
    %cst_653 = arith.constant 5.000000e-01 : f32
    %1085 = vector.broadcast %cst_653 : f32 to vector<8x128xf32>
    %1086 = arith.mulf %1085, %1084 : vector<8x128xf32>
    %cst_654 = arith.constant 5.000000e-01 : f32
    %1087 = vector.broadcast %cst_654 : f32 to vector<8x128xf32>
    %1088 = arith.addf %1086, %1087 : vector<8x128xf32>
    %1089 = arith.mulf %1078, %1049 : vector<8x128xf32>
    %1090 = arith.mulf %1070, %1080 : vector<8x128xf32>
    %1091 = arith.addf %1089, %1090 : vector<8x128xf32>
    %1092 = math.tanh %1091 : vector<8x128xf32>
    %1093 = arith.mulf %1088, %1092 : vector<8x128xf32>
    %c0_655 = arith.constant 0 : index
    %c0_656 = arith.constant 0 : index
    %c0_657 = arith.constant 0 : index
    %1094 = vector.load %arg15[%c0_655, %c0_656, %c0_657] : memref<2x8x128xf32, #tpu.memory_space<vmem>>, vector<1x8x128xf32>
    %1095 = vector.shape_cast %1094 : vector<1x8x128xf32> to vector<8x128xf32>
    %1096 = vector.shape_cast %1093 : vector<8x128xf32> to vector<1x8x128xf32>
    tpu.vector_store %arg15[%c0_655, %c0_656, %c0_657], %1096 {strides = array<i32>} : memref<2x8x128xf32, #tpu.memory_space<vmem>>, vector<1x8x128xf32>,
    %c0_658 = arith.constant 0 : index
    %c0_659 = arith.constant 0 : index
    %c0_660 = arith.constant 0 : index
    %1097 = vector.load %arg16[%c0_658, %c0_659, %c0_660] : memref<2x8x128xf32, #tpu.memory_space<vmem>>, vector<1x8x128xf32>
    %1098 = vector.shape_cast %1097 : vector<1x8x128xf32> to vector<8x128xf32>
    %1099 = vector.shape_cast %1091 : vector<8x128xf32> to vector<1x8x128xf32>
    tpu.vector_store %arg16[%c0_658, %c0_659, %c0_660], %1099 {strides = array<i32>} : memref<2x8x128xf32, #tpu.memory_space<vmem>>, vector<1x8x128xf32>,
    %c1_661 = arith.constant 1 : index
    %c0_662 = arith.constant 0 : index
    %c0_663 = arith.constant 0 : index
    %1100 = vector.load %arg15[%c1_661, %c0_662, %c0_663] : memref<2x8x128xf32, #tpu.memory_space<vmem>>, vector<1x8x128xf32>
    %1101 = vector.shape_cast %1100 : vector<1x8x128xf32> to vector<8x128xf32>
    %c1_664 = arith.constant 1 : index
    %c0_665 = arith.constant 0 : index
    %c0_666 = arith.constant 0 : index
    %1102 = vector.load %arg16[%c1_664, %c0_665, %c0_666] : memref<2x8x128xf32, #tpu.memory_space<vmem>>, vector<1x8x128xf32>
    %1103 = vector.shape_cast %1102 : vector<1x8x128xf32> to vector<8x128xf32>
    %1104 = arith.truncf %1093 : vector<8x128xf32> to vector<8x128xbf16>
    %c1_667 = arith.constant 1 : index
    %c0_668 = arith.constant 0 : index
    %c0_669 = arith.constant 0 : index
    %1105 = vector.load %arg9[%c1_667, %c0_668, %c0_669] : memref<2x128x512xbf16, #tpu.memory_space<vmem>>, vector<1x128x512xbf16>
    %1106 = vector.shape_cast %1105 : vector<1x128x512xbf16> to vector<128x512xbf16>
    %cst_670 = arith.constant dense<0.000000e+00> : vector<8x512xf32>
    %1107 = tpu.matmul %1104, %1106, %cst_670 {dimension_numbers = #tpu.dot_dimension_numbers<[1], [0], [0], [1], [0, 0, 1, 1], [], []>} : vector<8x128xbf16>, vector<128x512xbf16>, vector<8x512xf32> -> vector<8x512xf32>
    %1108 = arith.truncf %1101 : vector<8x128xf32> to vector<8x128xbf16>
    %c1_671 = arith.constant 1 : index
    %c0_672 = arith.constant 0 : index
    %c0_673 = arith.constant 0 : index
    %1109 = vector.load %arg10[%c1_671, %c0_672, %c0_673] : memref<2x128x512xbf16, #tpu.memory_space<vmem>>, vector<1x128x512xbf16>
    %1110 = vector.shape_cast %1109 : vector<1x128x512xbf16> to vector<128x512xbf16>
    %cst_674 = arith.constant dense<0.000000e+00> : vector<8x512xf32>
    %1111 = tpu.matmul %1108, %1110, %cst_674 {dimension_numbers = #tpu.dot_dimension_numbers<[1], [0], [0], [1], [0, 0, 1, 1], [], []>} : vector<8x128xbf16>, vector<128x512xbf16>, vector<8x512xf32> -> vector<8x512xf32>
    %1112 = arith.addf %1107, %1111 : vector<8x512xf32>
    %c1_675 = arith.constant 1 : index
    %c0_676 = arith.constant 0 : index
    %c0_677 = arith.constant 0 : index
    %1113 = vector.load %arg11[%c1_675, %c0_676, %c0_677] : memref<2x1x512xf32, #tpu.memory_space<vmem>>, vector<1x1x512xf32>
    %1114 = vector.shape_cast %1113 : vector<1x1x512xf32> to vector<1x512xf32>
    %1115 = vector.broadcast %1114 : vector<1x512xf32> to vector<8x512xf32>
    %1116 = arith.addf %1112, %1115 : vector<8x512xf32>
    %1117 = vector.extract_strided_slice %1116 {offsets = [0, 0], sizes = [8, 128], strides = [1, 1]} : vector<8x512xf32> to vector<8x128xf32>
    %cst_678 = arith.constant 5.000000e-01 : f32
    %1118 = vector.broadcast %cst_678 : f32 to vector<8x128xf32>
    %1119 = arith.mulf %1118, %1117 : vector<8x128xf32>
    %1120 = math.tanh %1119 : vector<8x128xf32>
    %cst_679 = arith.constant 5.000000e-01 : f32
    %1121 = vector.broadcast %cst_679 : f32 to vector<8x128xf32>
    %1122 = arith.mulf %1121, %1120 : vector<8x128xf32>
    %cst_680 = arith.constant 5.000000e-01 : f32
    %1123 = vector.broadcast %cst_680 : f32 to vector<8x128xf32>
    %1124 = arith.addf %1122, %1123 : vector<8x128xf32>
    %1125 = vector.extract_strided_slice %1116 {offsets = [0, 128], sizes = [8, 128], strides = [1, 1]} : vector<8x512xf32> to vector<8x128xf32>
    %cst_681 = arith.constant 5.000000e-01 : f32
    %1126 = vector.broadcast %cst_681 : f32 to vector<8x128xf32>
    %1127 = arith.mulf %1126, %1125 : vector<8x128xf32>
    %1128 = math.tanh %1127 : vector<8x128xf32>
    %cst_682 = arith.constant 5.000000e-01 : f32
    %1129 = vector.broadcast %cst_682 : f32 to vector<8x128xf32>
    %1130 = arith.mulf %1129, %1128 : vector<8x128xf32>
    %cst_683 = arith.constant 5.000000e-01 : f32
    %1131 = vector.broadcast %cst_683 : f32 to vector<8x128xf32>
    %1132 = arith.addf %1130, %1131 : vector<8x128xf32>
    %1133 = vector.extract_strided_slice %1116 {offsets = [0, 256], sizes = [8, 128], strides = [1, 1]} : vector<8x512xf32> to vector<8x128xf32>
    %1134 = math.tanh %1133 : vector<8x128xf32>
    %1135 = vector.extract_strided_slice %1116 {offsets = [0, 384], sizes = [8, 128], strides = [1, 1]} : vector<8x512xf32> to vector<8x128xf32>
    %cst_684 = arith.constant 5.000000e-01 : f32
    %1136 = vector.broadcast %cst_684 : f32 to vector<8x128xf32>
    %1137 = arith.mulf %1136, %1135 : vector<8x128xf32>
    %1138 = math.tanh %1137 : vector<8x128xf32>
    %cst_685 = arith.constant 5.000000e-01 : f32
    %1139 = vector.broadcast %cst_685 : f32 to vector<8x128xf32>
    %1140 = arith.mulf %1139, %1138 : vector<8x128xf32>
    %cst_686 = arith.constant 5.000000e-01 : f32
    %1141 = vector.broadcast %cst_686 : f32 to vector<8x128xf32>
    %1142 = arith.addf %1140, %1141 : vector<8x128xf32>
    %1143 = arith.mulf %1132, %1103 : vector<8x128xf32>
    %1144 = arith.mulf %1124, %1134 : vector<8x128xf32>
    %1145 = arith.addf %1143, %1144 : vector<8x128xf32>
    %1146 = math.tanh %1145 : vector<8x128xf32>
    %1147 = arith.mulf %1142, %1146 : vector<8x128xf32>
    %c1_687 = arith.constant 1 : index
    %c0_688 = arith.constant 0 : index
    %c0_689 = arith.constant 0 : index
    %1148 = vector.load %arg15[%c1_687, %c0_688, %c0_689] : memref<2x8x128xf32, #tpu.memory_space<vmem>>, vector<1x8x128xf32>
    %1149 = vector.shape_cast %1148 : vector<1x8x128xf32> to vector<8x128xf32>
    %1150 = vector.shape_cast %1147 : vector<8x128xf32> to vector<1x8x128xf32>
    tpu.vector_store %arg15[%c1_687, %c0_688, %c0_689], %1150 {strides = array<i32>} : memref<2x8x128xf32, #tpu.memory_space<vmem>>, vector<1x8x128xf32>,
    %c1_690 = arith.constant 1 : index
    %c0_691 = arith.constant 0 : index
    %c0_692 = arith.constant 0 : index
    %1151 = vector.load %arg16[%c1_690, %c0_691, %c0_692] : memref<2x8x128xf32, #tpu.memory_space<vmem>>, vector<1x8x128xf32>
    %1152 = vector.shape_cast %1151 : vector<1x8x128xf32> to vector<8x128xf32>
    %1153 = vector.shape_cast %1145 : vector<8x128xf32> to vector<1x8x128xf32>
    tpu.vector_store %arg16[%c1_690, %c0_691, %c0_692], %1153 {strides = array<i32>} : memref<2x8x128xf32, #tpu.memory_space<vmem>>, vector<1x8x128xf32>,
    %1154 = arith.truncf %1147 : vector<8x128xf32> to vector<8x128xbf16>
    %c0_693 = arith.constant 0 : index
    %c0_694 = arith.constant 0 : index
    %1155 = vector.load %arg12[%c0_693, %c0_694] : memref<128x128xbf16, #tpu.memory_space<vmem>>, vector<128x128xbf16>
    %cst_695 = arith.constant dense<0.000000e+00> : vector<8x128xf32>
    %1156 = tpu.matmul %1154, %1155, %cst_695 {dimension_numbers = #tpu.dot_dimension_numbers<[1], [0], [0], [1], [0, 0, 1, 1], [], []>} : vector<8x128xbf16>, vector<128x128xbf16>, vector<8x128xf32> -> vector<8x128xf32>
    %c0_696 = arith.constant 0 : index
    %c0_697 = arith.constant 0 : index
    %1157 = vector.load %arg13[%c0_696, %c0_697] : memref<1x128xf32, #tpu.memory_space<vmem>>, vector<1x128xf32>
    %1158 = vector.broadcast %1157 : vector<1x128xf32> to vector<8x128xf32>
    %1159 = arith.addf %1156, %1158 : vector<8x128xf32>
    %1160 = arith.index_cast %c4_i32_623 : i32 to index
    %c0_698 = arith.constant 0 : index
    %c0_699 = arith.constant 0 : index
    %1161 = vector.load %arg14[%1160, %c0_698, %c0_699] : memref<6x8x128xf32, #tpu.memory_space<vmem>>, vector<1x8x128xf32>
    %1162 = vector.shape_cast %1161 : vector<1x8x128xf32> to vector<8x128xf32>
    %1163 = vector.shape_cast %1159 : vector<8x128xf32> to vector<1x8x128xf32>
    tpu.vector_store %arg14[%1160, %c0_698, %c0_699], %1163 {strides = array<i32>} : memref<6x8x128xf32, #tpu.memory_space<vmem>>, vector<1x8x128xf32>,
    %cst_700 = arith.constant dense<0xFF800000> : vector<8xf32>
    %1164 = vector.multi_reduction <maximumf>, %1159, %cst_700 [1] : vector<8x128xf32> to vector<8xf32>
    %1165 = vector.shape_cast %1164 : vector<8xf32> to vector<8x1xf32>
    %1166 = vector.broadcast %1165 : vector<8x1xf32> to vector<8x128xf32>
    %1167 = arith.cmpf oeq, %1159, %1166 : vector<8x128xf32>
    %c128_i32_701 = arith.constant 128 : i32
    %1168 = vector.broadcast %c128_i32_701 : i32 to vector<8x128xi32>
    %1169 = arith.select %1167, %469, %1168 : vector<8x128xi1>, vector<8x128xi32>
    %cst_702 = arith.constant dense<2147483647> : vector<8xi32>
    %1170 = vector.multi_reduction <minsi>, %1169, %cst_702 [1] : vector<8x128xi32> to vector<8xi32>
    %1171 = vector.shape_cast %1170 : vector<8xi32> to vector<8x1xi32>
    %1172 = arith.index_cast %c4_i32_623 : i32 to index
    %1173 = memref.load %arg2[%1172] : memref<6xi32, #tpu.memory_space<smem>>
    %c0_i32_703 = arith.constant 0 : i32
    %1174 = arith.cmpi sgt, %1173, %c0_i32_703 : i32
    %1175 = arith.index_cast %c4_i32_623 : i32 to index
    %c0_704 = arith.constant 0 : index
    %c0_705 = arith.constant 0 : index
    %1176 = vector.load %arg1[%1175, %c0_704, %c0_705] : memref<6x8x1xi32, #tpu.memory_space<vmem>>, vector<1x8x1xi32>
    %1177 = vector.shape_cast %1176 : vector<1x8x1xi32> to vector<8x1xi32>
    %1178 = arith.select %1174, %1177, %1171 : vector<8x1xi32>
    %c0_706 = arith.constant 0 : index
    %c0_707 = arith.constant 0 : index
    %1179 = vector.load %arg17[%c0_706, %c0_707] : memref<8x1xi32, #tpu.memory_space<vmem>>, vector<8x1xi32>
    tpu.vector_store %arg17[%c0_706, %c0_707], %1178 {strides = array<i32>} : memref<8x1xi32, #tpu.memory_space<vmem>>, vector<8x1xi32>,
    %c5_i32 = arith.constant 5 : i32
    %c0_708 = arith.constant 0 : index
    %c0_709 = arith.constant 0 : index
    %1180 = vector.load %arg17[%c0_708, %c0_709] : memref<8x1xi32, #tpu.memory_space<vmem>>, vector<8x1xi32>
    %1181 = vector.broadcast %1180 : vector<8x1xi32> to vector<8x128xi32>
    %1182 = arith.cmpi eq, %469, %1181 : vector<8x128xi32>
    %1183 = arith.extui %1182 : vector<8x128xi1> to vector<8x128xi32>
    %1184 = arith.sitofp %1183 : vector<8x128xi32> to vector<8x128xf32>
    %1185 = arith.truncf %1184 : vector<8x128xf32> to vector<8x128xbf16>
    %c0_710 = arith.constant 0 : index
    %c0_711 = arith.constant 0 : index
    %1186 = vector.load %arg8[%c0_710, %c0_711] : memref<128x128xbf16, #tpu.memory_space<vmem>>, vector<128x128xbf16>
    %cst_712 = arith.constant dense<0.000000e+00> : vector<8x128xf32>
    %1187 = tpu.matmul %1185, %1186, %cst_712 {dimension_numbers = #tpu.dot_dimension_numbers<[1], [0], [0], [1], [0, 0, 1, 1], [], []>} : vector<8x128xbf16>, vector<128x128xbf16>, vector<8x128xf32> -> vector<8x128xf32>
    %c0_713 = arith.constant 0 : index
    %c0_714 = arith.constant 0 : index
    %c0_715 = arith.constant 0 : index
    %1188 = vector.load %arg15[%c0_713, %c0_714, %c0_715] : memref<2x8x128xf32, #tpu.memory_space<vmem>>, vector<1x8x128xf32>
    %1189 = vector.shape_cast %1188 : vector<1x8x128xf32> to vector<8x128xf32>
    %c0_716 = arith.constant 0 : index
    %c0_717 = arith.constant 0 : index
    %c0_718 = arith.constant 0 : index
    %1190 = vector.load %arg16[%c0_716, %c0_717, %c0_718] : memref<2x8x128xf32, #tpu.memory_space<vmem>>, vector<1x8x128xf32>
    %1191 = vector.shape_cast %1190 : vector<1x8x128xf32> to vector<8x128xf32>
    %1192 = arith.truncf %1187 : vector<8x128xf32> to vector<8x128xbf16>
    %c0_719 = arith.constant 0 : index
    %c0_720 = arith.constant 0 : index
    %c0_721 = arith.constant 0 : index
    %1193 = vector.load %arg9[%c0_719, %c0_720, %c0_721] : memref<2x128x512xbf16, #tpu.memory_space<vmem>>, vector<1x128x512xbf16>
    %1194 = vector.shape_cast %1193 : vector<1x128x512xbf16> to vector<128x512xbf16>
    %cst_722 = arith.constant dense<0.000000e+00> : vector<8x512xf32>
    %1195 = tpu.matmul %1192, %1194, %cst_722 {dimension_numbers = #tpu.dot_dimension_numbers<[1], [0], [0], [1], [0, 0, 1, 1], [], []>} : vector<8x128xbf16>, vector<128x512xbf16>, vector<8x512xf32> -> vector<8x512xf32>
    %1196 = arith.truncf %1189 : vector<8x128xf32> to vector<8x128xbf16>
    %c0_723 = arith.constant 0 : index
    %c0_724 = arith.constant 0 : index
    %c0_725 = arith.constant 0 : index
    %1197 = vector.load %arg10[%c0_723, %c0_724, %c0_725] : memref<2x128x512xbf16, #tpu.memory_space<vmem>>, vector<1x128x512xbf16>
    %1198 = vector.shape_cast %1197 : vector<1x128x512xbf16> to vector<128x512xbf16>
    %cst_726 = arith.constant dense<0.000000e+00> : vector<8x512xf32>
    %1199 = tpu.matmul %1196, %1198, %cst_726 {dimension_numbers = #tpu.dot_dimension_numbers<[1], [0], [0], [1], [0, 0, 1, 1], [], []>} : vector<8x128xbf16>, vector<128x512xbf16>, vector<8x512xf32> -> vector<8x512xf32>
    %1200 = arith.addf %1195, %1199 : vector<8x512xf32>
    %c0_727 = arith.constant 0 : index
    %c0_728 = arith.constant 0 : index
    %c0_729 = arith.constant 0 : index
    %1201 = vector.load %arg11[%c0_727, %c0_728, %c0_729] : memref<2x1x512xf32, #tpu.memory_space<vmem>>, vector<1x1x512xf32>
    %1202 = vector.shape_cast %1201 : vector<1x1x512xf32> to vector<1x512xf32>
    %1203 = vector.broadcast %1202 : vector<1x512xf32> to vector<8x512xf32>
    %1204 = arith.addf %1200, %1203 : vector<8x512xf32>
    %1205 = vector.extract_strided_slice %1204 {offsets = [0, 0], sizes = [8, 128], strides = [1, 1]} : vector<8x512xf32> to vector<8x128xf32>
    %cst_730 = arith.constant 5.000000e-01 : f32
    %1206 = vector.broadcast %cst_730 : f32 to vector<8x128xf32>
    %1207 = arith.mulf %1206, %1205 : vector<8x128xf32>
    %1208 = math.tanh %1207 : vector<8x128xf32>
    %cst_731 = arith.constant 5.000000e-01 : f32
    %1209 = vector.broadcast %cst_731 : f32 to vector<8x128xf32>
    %1210 = arith.mulf %1209, %1208 : vector<8x128xf32>
    %cst_732 = arith.constant 5.000000e-01 : f32
    %1211 = vector.broadcast %cst_732 : f32 to vector<8x128xf32>
    %1212 = arith.addf %1210, %1211 : vector<8x128xf32>
    %1213 = vector.extract_strided_slice %1204 {offsets = [0, 128], sizes = [8, 128], strides = [1, 1]} : vector<8x512xf32> to vector<8x128xf32>
    %cst_733 = arith.constant 5.000000e-01 : f32
    %1214 = vector.broadcast %cst_733 : f32 to vector<8x128xf32>
    %1215 = arith.mulf %1214, %1213 : vector<8x128xf32>
    %1216 = math.tanh %1215 : vector<8x128xf32>
    %cst_734 = arith.constant 5.000000e-01 : f32
    %1217 = vector.broadcast %cst_734 : f32 to vector<8x128xf32>
    %1218 = arith.mulf %1217, %1216 : vector<8x128xf32>
    %cst_735 = arith.constant 5.000000e-01 : f32
    %1219 = vector.broadcast %cst_735 : f32 to vector<8x128xf32>
    %1220 = arith.addf %1218, %1219 : vector<8x128xf32>
    %1221 = vector.extract_strided_slice %1204 {offsets = [0, 256], sizes = [8, 128], strides = [1, 1]} : vector<8x512xf32> to vector<8x128xf32>
    %1222 = math.tanh %1221 : vector<8x128xf32>
    %1223 = vector.extract_strided_slice %1204 {offsets = [0, 384], sizes = [8, 128], strides = [1, 1]} : vector<8x512xf32> to vector<8x128xf32>
    %cst_736 = arith.constant 5.000000e-01 : f32
    %1224 = vector.broadcast %cst_736 : f32 to vector<8x128xf32>
    %1225 = arith.mulf %1224, %1223 : vector<8x128xf32>
    %1226 = math.tanh %1225 : vector<8x128xf32>
    %cst_737 = arith.constant 5.000000e-01 : f32
    %1227 = vector.broadcast %cst_737 : f32 to vector<8x128xf32>
    %1228 = arith.mulf %1227, %1226 : vector<8x128xf32>
    %cst_738 = arith.constant 5.000000e-01 : f32
    %1229 = vector.broadcast %cst_738 : f32 to vector<8x128xf32>
    %1230 = arith.addf %1228, %1229 : vector<8x128xf32>
    %1231 = arith.mulf %1220, %1191 : vector<8x128xf32>
    %1232 = arith.mulf %1212, %1222 : vector<8x128xf32>
    %1233 = arith.addf %1231, %1232 : vector<8x128xf32>
    %1234 = math.tanh %1233 : vector<8x128xf32>
    %1235 = arith.mulf %1230, %1234 : vector<8x128xf32>
    %c0_739 = arith.constant 0 : index
    %c0_740 = arith.constant 0 : index
    %c0_741 = arith.constant 0 : index
    %1236 = vector.load %arg15[%c0_739, %c0_740, %c0_741] : memref<2x8x128xf32, #tpu.memory_space<vmem>>, vector<1x8x128xf32>
    %1237 = vector.shape_cast %1236 : vector<1x8x128xf32> to vector<8x128xf32>
    %1238 = vector.shape_cast %1235 : vector<8x128xf32> to vector<1x8x128xf32>
    tpu.vector_store %arg15[%c0_739, %c0_740, %c0_741], %1238 {strides = array<i32>} : memref<2x8x128xf32, #tpu.memory_space<vmem>>, vector<1x8x128xf32>,
    %c0_742 = arith.constant 0 : index
    %c0_743 = arith.constant 0 : index
    %c0_744 = arith.constant 0 : index
    %1239 = vector.load %arg16[%c0_742, %c0_743, %c0_744] : memref<2x8x128xf32, #tpu.memory_space<vmem>>, vector<1x8x128xf32>
    %1240 = vector.shape_cast %1239 : vector<1x8x128xf32> to vector<8x128xf32>
    %1241 = vector.shape_cast %1233 : vector<8x128xf32> to vector<1x8x128xf32>
    tpu.vector_store %arg16[%c0_742, %c0_743, %c0_744], %1241 {strides = array<i32>} : memref<2x8x128xf32, #tpu.memory_space<vmem>>, vector<1x8x128xf32>,
    %c1_745 = arith.constant 1 : index
    %c0_746 = arith.constant 0 : index
    %c0_747 = arith.constant 0 : index
    %1242 = vector.load %arg15[%c1_745, %c0_746, %c0_747] : memref<2x8x128xf32, #tpu.memory_space<vmem>>, vector<1x8x128xf32>
    %1243 = vector.shape_cast %1242 : vector<1x8x128xf32> to vector<8x128xf32>
    %c1_748 = arith.constant 1 : index
    %c0_749 = arith.constant 0 : index
    %c0_750 = arith.constant 0 : index
    %1244 = vector.load %arg16[%c1_748, %c0_749, %c0_750] : memref<2x8x128xf32, #tpu.memory_space<vmem>>, vector<1x8x128xf32>
    %1245 = vector.shape_cast %1244 : vector<1x8x128xf32> to vector<8x128xf32>
    %1246 = arith.truncf %1235 : vector<8x128xf32> to vector<8x128xbf16>
    %c1_751 = arith.constant 1 : index
    %c0_752 = arith.constant 0 : index
    %c0_753 = arith.constant 0 : index
    %1247 = vector.load %arg9[%c1_751, %c0_752, %c0_753] : memref<2x128x512xbf16, #tpu.memory_space<vmem>>, vector<1x128x512xbf16>
    %1248 = vector.shape_cast %1247 : vector<1x128x512xbf16> to vector<128x512xbf16>
    %cst_754 = arith.constant dense<0.000000e+00> : vector<8x512xf32>
    %1249 = tpu.matmul %1246, %1248, %cst_754 {dimension_numbers = #tpu.dot_dimension_numbers<[1], [0], [0], [1], [0, 0, 1, 1], [], []>} : vector<8x128xbf16>, vector<128x512xbf16>, vector<8x512xf32> -> vector<8x512xf32>
    %1250 = arith.truncf %1243 : vector<8x128xf32> to vector<8x128xbf16>
    %c1_755 = arith.constant 1 : index
    %c0_756 = arith.constant 0 : index
    %c0_757 = arith.constant 0 : index
    %1251 = vector.load %arg10[%c1_755, %c0_756, %c0_757] : memref<2x128x512xbf16, #tpu.memory_space<vmem>>, vector<1x128x512xbf16>
    %1252 = vector.shape_cast %1251 : vector<1x128x512xbf16> to vector<128x512xbf16>
    %cst_758 = arith.constant dense<0.000000e+00> : vector<8x512xf32>
    %1253 = tpu.matmul %1250, %1252, %cst_758 {dimension_numbers = #tpu.dot_dimension_numbers<[1], [0], [0], [1], [0, 0, 1, 1], [], []>} : vector<8x128xbf16>, vector<128x512xbf16>, vector<8x512xf32> -> vector<8x512xf32>
    %1254 = arith.addf %1249, %1253 : vector<8x512xf32>
    %c1_759 = arith.constant 1 : index
    %c0_760 = arith.constant 0 : index
    %c0_761 = arith.constant 0 : index
    %1255 = vector.load %arg11[%c1_759, %c0_760, %c0_761] : memref<2x1x512xf32, #tpu.memory_space<vmem>>, vector<1x1x512xf32>
    %1256 = vector.shape_cast %1255 : vector<1x1x512xf32> to vector<1x512xf32>
    %1257 = vector.broadcast %1256 : vector<1x512xf32> to vector<8x512xf32>
    %1258 = arith.addf %1254, %1257 : vector<8x512xf32>
    %1259 = vector.extract_strided_slice %1258 {offsets = [0, 0], sizes = [8, 128], strides = [1, 1]} : vector<8x512xf32> to vector<8x128xf32>
    %cst_762 = arith.constant 5.000000e-01 : f32
    %1260 = vector.broadcast %cst_762 : f32 to vector<8x128xf32>
    %1261 = arith.mulf %1260, %1259 : vector<8x128xf32>
    %1262 = math.tanh %1261 : vector<8x128xf32>
    %cst_763 = arith.constant 5.000000e-01 : f32
    %1263 = vector.broadcast %cst_763 : f32 to vector<8x128xf32>
    %1264 = arith.mulf %1263, %1262 : vector<8x128xf32>
    %cst_764 = arith.constant 5.000000e-01 : f32
    %1265 = vector.broadcast %cst_764 : f32 to vector<8x128xf32>
    %1266 = arith.addf %1264, %1265 : vector<8x128xf32>
    %1267 = vector.extract_strided_slice %1258 {offsets = [0, 128], sizes = [8, 128], strides = [1, 1]} : vector<8x512xf32> to vector<8x128xf32>
    %cst_765 = arith.constant 5.000000e-01 : f32
    %1268 = vector.broadcast %cst_765 : f32 to vector<8x128xf32>
    %1269 = arith.mulf %1268, %1267 : vector<8x128xf32>
    %1270 = math.tanh %1269 : vector<8x128xf32>
    %cst_766 = arith.constant 5.000000e-01 : f32
    %1271 = vector.broadcast %cst_766 : f32 to vector<8x128xf32>
    %1272 = arith.mulf %1271, %1270 : vector<8x128xf32>
    %cst_767 = arith.constant 5.000000e-01 : f32
    %1273 = vector.broadcast %cst_767 : f32 to vector<8x128xf32>
    %1274 = arith.addf %1272, %1273 : vector<8x128xf32>
    %1275 = vector.extract_strided_slice %1258 {offsets = [0, 256], sizes = [8, 128], strides = [1, 1]} : vector<8x512xf32> to vector<8x128xf32>
    %1276 = math.tanh %1275 : vector<8x128xf32>
    %1277 = vector.extract_strided_slice %1258 {offsets = [0, 384], sizes = [8, 128], strides = [1, 1]} : vector<8x512xf32> to vector<8x128xf32>
    %cst_768 = arith.constant 5.000000e-01 : f32
    %1278 = vector.broadcast %cst_768 : f32 to vector<8x128xf32>
    %1279 = arith.mulf %1278, %1277 : vector<8x128xf32>
    %1280 = math.tanh %1279 : vector<8x128xf32>
    %cst_769 = arith.constant 5.000000e-01 : f32
    %1281 = vector.broadcast %cst_769 : f32 to vector<8x128xf32>
    %1282 = arith.mulf %1281, %1280 : vector<8x128xf32>
    %cst_770 = arith.constant 5.000000e-01 : f32
    %1283 = vector.broadcast %cst_770 : f32 to vector<8x128xf32>
    %1284 = arith.addf %1282, %1283 : vector<8x128xf32>
    %1285 = arith.mulf %1274, %1245 : vector<8x128xf32>
    %1286 = arith.mulf %1266, %1276 : vector<8x128xf32>
    %1287 = arith.addf %1285, %1286 : vector<8x128xf32>
    %1288 = math.tanh %1287 : vector<8x128xf32>
    %1289 = arith.mulf %1284, %1288 : vector<8x128xf32>
    %c1_771 = arith.constant 1 : index
    %c0_772 = arith.constant 0 : index
    %c0_773 = arith.constant 0 : index
    %1290 = vector.load %arg15[%c1_771, %c0_772, %c0_773] : memref<2x8x128xf32, #tpu.memory_space<vmem>>, vector<1x8x128xf32>
    %1291 = vector.shape_cast %1290 : vector<1x8x128xf32> to vector<8x128xf32>
    %1292 = vector.shape_cast %1289 : vector<8x128xf32> to vector<1x8x128xf32>
    tpu.vector_store %arg15[%c1_771, %c0_772, %c0_773], %1292 {strides = array<i32>} : memref<2x8x128xf32, #tpu.memory_space<vmem>>, vector<1x8x128xf32>,
    %c1_774 = arith.constant 1 : index
    %c0_775 = arith.constant 0 : index
    %c0_776 = arith.constant 0 : index
    %1293 = vector.load %arg16[%c1_774, %c0_775, %c0_776] : memref<2x8x128xf32, #tpu.memory_space<vmem>>, vector<1x8x128xf32>
    %1294 = vector.shape_cast %1293 : vector<1x8x128xf32> to vector<8x128xf32>
    %1295 = vector.shape_cast %1287 : vector<8x128xf32> to vector<1x8x128xf32>
    tpu.vector_store %arg16[%c1_774, %c0_775, %c0_776], %1295 {strides = array<i32>} : memref<2x8x128xf32, #tpu.memory_space<vmem>>, vector<1x8x128xf32>,
    %1296 = arith.truncf %1289 : vector<8x128xf32> to vector<8x128xbf16>
    %c0_777 = arith.constant 0 : index
    %c0_778 = arith.constant 0 : index
    %1297 = vector.load %arg12[%c0_777, %c0_778] : memref<128x128xbf16, #tpu.memory_space<vmem>>, vector<128x128xbf16>
    %cst_779 = arith.constant dense<0.000000e+00> : vector<8x128xf32>
    %1298 = tpu.matmul %1296, %1297, %cst_779 {dimension_numbers = #tpu.dot_dimension_numbers<[1], [0], [0], [1], [0, 0, 1, 1], [], []>} : vector<8x128xbf16>, vector<128x128xbf16>, vector<8x128xf32> -> vector<8x128xf32>
    %c0_780 = arith.constant 0 : index
    %c0_781 = arith.constant 0 : index
    %1299 = vector.load %arg13[%c0_780, %c0_781] : memref<1x128xf32, #tpu.memory_space<vmem>>, vector<1x128xf32>
    %1300 = vector.broadcast %1299 : vector<1x128xf32> to vector<8x128xf32>
    %1301 = arith.addf %1298, %1300 : vector<8x128xf32>
    %1302 = arith.index_cast %c5_i32 : i32 to index
    %c0_782 = arith.constant 0 : index
    %c0_783 = arith.constant 0 : index
    %1303 = vector.load %arg14[%1302, %c0_782, %c0_783] : memref<6x8x128xf32, #tpu.memory_space<vmem>>, vector<1x8x128xf32>
    %1304 = vector.shape_cast %1303 : vector<1x8x128xf32> to vector<8x128xf32>
    %1305 = vector.shape_cast %1301 : vector<8x128xf32> to vector<1x8x128xf32>
    tpu.vector_store %arg14[%1302, %c0_782, %c0_783], %1305 {strides = array<i32>} : memref<6x8x128xf32, #tpu.memory_space<vmem>>, vector<1x8x128xf32>,
    %cst_784 = arith.constant dense<0xFF800000> : vector<8xf32>
    %1306 = vector.multi_reduction <maximumf>, %1301, %cst_784 [1] : vector<8x128xf32> to vector<8xf32>
    %1307 = vector.shape_cast %1306 : vector<8xf32> to vector<8x1xf32>
    %1308 = vector.broadcast %1307 : vector<8x1xf32> to vector<8x128xf32>
    %1309 = arith.cmpf oeq, %1301, %1308 : vector<8x128xf32>
    %c128_i32_785 = arith.constant 128 : i32
    %1310 = vector.broadcast %c128_i32_785 : i32 to vector<8x128xi32>
    %1311 = arith.select %1309, %469, %1310 : vector<8x128xi1>, vector<8x128xi32>
    %cst_786 = arith.constant dense<2147483647> : vector<8xi32>
    %1312 = vector.multi_reduction <minsi>, %1311, %cst_786 [1] : vector<8x128xi32> to vector<8xi32>
    %1313 = vector.shape_cast %1312 : vector<8xi32> to vector<8x1xi32>
    %1314 = arith.index_cast %c5_i32 : i32 to index
    %1315 = memref.load %arg2[%1314] : memref<6xi32, #tpu.memory_space<smem>>
    %c0_i32_787 = arith.constant 0 : i32
    %1316 = arith.cmpi sgt, %1315, %c0_i32_787 : i32
    %1317 = arith.index_cast %c5_i32 : i32 to index
    %c0_788 = arith.constant 0 : index
    %c0_789 = arith.constant 0 : index
    %1318 = vector.load %arg1[%1317, %c0_788, %c0_789] : memref<6x8x1xi32, #tpu.memory_space<vmem>>, vector<1x8x1xi32>
    %1319 = vector.shape_cast %1318 : vector<1x8x1xi32> to vector<8x1xi32>
    %1320 = arith.select %1316, %1319, %1313 : vector<8x1xi32>
    %c0_790 = arith.constant 0 : index
    %c0_791 = arith.constant 0 : index
    %1321 = vector.load %arg17[%c0_790, %c0_791] : memref<8x1xi32, #tpu.memory_space<vmem>>, vector<8x1xi32>
    tpu.vector_store %arg17[%c0_790, %c0_791], %1320 {strides = array<i32>} : memref<8x1xi32, #tpu.memory_space<vmem>>, vector<8x1xi32>,
    %c6_i32 = arith.constant 6 : i32
    return
  }
}

</mosaic_0001>

<bundles_post_ra>
// kernel: vid2seq_forward.1
= control target key start
LH: loop header
LB: loop body
LE: loop exit
PB: predicated region body
PF: predicated region fallthrough
CT: control target
= control target key end

     0   :  { %19 = vsyncpa [#allocation8], 0  ;;  %s23411_s0 = inlined_call_operand.vmem [shape: bf16[64,192], index: 0, kind: input, shape index: {}]   ;;  %s23412_s1 = inlined_call_operand.vmem [shape: s32[6,8,1], index: 1, kind: input, shape index: {}]   ;;  %s23413_s2 = inlined_call_operand.vmem [shape: s32[6], index: 2, kind: input, shape index: {}]   ;;  %s23414_s3 = inlined_call_operand.vmem [shape: bf16[192,128], index: 3, kind: input, shape index: {}]   ;;  %s23415_s4 = inlined_call_operand.vmem [shape: f32[1,128], index: 4, kind: input, shape index: {}]   ;;  %s23416_s5 = inlined_call_operand.vmem [shape: bf16[2,128,512], index: 5, kind: input, shape index: {}]   ;;  %s23417_s6 = inlined_call_operand.vmem [shape: bf16[2,128,512], index: 6, kind: input, shape index: {}]   ;;  %s23418_s7 = inlined_call_operand.vmem [shape: f32[2,1,512], index: 7, kind: input, shape index: {}]   ;;  %s23419_s8 = inlined_call_operand.vmem [shape: bf16[128,128], index: 8, kind: input, shape index: {}]   ;;  %s23420_s9 = inlined_call_operand.vmem [shape: bf16[2,128,512], index: 9, kind: input, shape index: {}]   ;;  %s23421_s10 = inlined_call_operand.vmem [shape: bf16[2,128,512], index: 10, kind: input, shape index: {}]   ;;  %s23422_s11 = inlined_call_operand.vmem [shape: f32[2,1,512], index: 11, kind: input, shape index: {}]   ;;  %s23423_s12 = inlined_call_operand.vmem [shape: bf16[128,128], index: 12, kind: input, shape index: {}]   ;;  %s23424_s13 = inlined_call_operand.vmem [shape: f32[1,128], index: 13, kind: input, shape index: {}]   ;;  %s23425_s14 = inlined_call_operand.hbm [shape: f32[6,8,128], index: 14, kind: output, shape index: {}]  }
   0x1   :  { %20 = vsyncpa [#allocation7], 0  ;;  %s31_s15 = sshll.u32 %s23413_s2, 4  ;;  %s32_s15 = int_to_ptr.vmem [resolvable:$true] %s31_s15 }
   0x2   :  { %s18229_s16 = scalar_lea.vmem %s32_s15, 16  ;;  %p18234_p1 = scmp.lt.s32.totalorder %s32_s15, %s32_s15 }
   0x3   :  { %p18230_p0 = scmp.ne.s32.totalorder %s32_s15, %s18229_s16  ;;  %p18235_p2 = scmp.lt.s32.totalorder %s18229_s16, %s18229_s16 }
   0x5   :  { %p18236_p3 = por %p18235_p2, %p18234_p1 }
   0x7   :  { %p18237_p4 = pnand %p18236_p3, %p18230_p0 }
   0x9   :  { %18240 = shalt.err (!%p18237_p4)
}
   0xa   :  { %s18267_s17 = smov [#allocation6]  }
   0xb   :  { %34 = dma.vmem_to_smem %s32_s15, 16, %s18267_s17, [#allocation8]  }
   0xc   :  { %18263 = dma.done.wait [#allocation8], 16  }
   0xd   :  { %18264 = vsyncadd [#allocation8], 4294967280 }
   0xe   :  { %60 = sfence }
   0xf   :  { %v16268_v0 = vld [vmem:[%s23414_s3] sm:$0xff]   ;;  %v23427_v1 = vmov 0   ;;  %v16269_v2 = vld [vmem:[%s23414_s3 + $0x8] sm:$0xff]   ;;  %v16270_v3 = vld [vmem:[%s23414_s3 + $0x10] sm:$0xff]   ;;  %vm209_vm0 = vcmask 523264   ;;  %v18269_v44 = vmov 0.0|0.0  }
  0x10   :  { %222 = vmatprep.subr.bf16.mxu0 %v23427_v1  ;;  %572 = vmatprep.mubr.bf16.mxu1 %v23427_v1  ;;  %v16271_v4 = vld [vmem:[%s23414_s3 + $0x18] sm:$0xff]   ;;  %v16282_v5 = vld [vmem:[%s23411_s0 + $0x4] ss:$8 sps:$4 sm:$0xff]   ;;  %v16294_v9 = vld [vmem:[%s23417_s6] ss:$16 sps:$4 sm:$0xff]   ;;  %vm5108_vm1 = vcmask 7168  }
  0x11   :  { %223 = vmatpush1.bf16.msra.mxu0 %v16268_v0  ;;  %16266 = vset.pattern.permute.xlu0 %v23427_v1  ;;  %v16272_v6 = vld [vmem:[%s23414_s3 + $0x20] sm:$0xff]   ;;  %v16273_v7 = vld [vmem:[%s23414_s3 + $0x28] sm:$0xff]   ;;  %v358_v12 = vld [vmem:[%s23417_s6 + $0x50] sm:$0xff]  ;;  %vm18271_vm2 = vmmov 0   ;;  %s15047_s25 = sld [smem:[#allocation6 + $0x1]]  ;;  %s15262_s24 = sld [smem:[#allocation6 + $0x2]] }
  0x12   :  { %224 = vmatprep.subr.bf16.mxu0 %v23427_v1  ;;  %16267 = vset.pattern.permute.xlu1 %v23427_v1  ;;  %v16292_v8 = vld [vmem:[%s23417_s6 + $0x4] ss:$16 sps:$4 sm:$0xff]   ;;  %v16297_v13 = vld [vmem:[%s23417_s6 + $0x20] ss:$16 sps:$4 sm:$0xff]   ;;  %v16275_v16 = vld [vmem:[%s23414_s3 + $0x38] sm:$0xff]   ;;  %s15477_s23 = sld [smem:[#allocation6 + $0x3]] }
  0x13   :  { %13845 = vmatprep.mubr.msk.bf16.mxu0 %vm209_vm0, %v16282_v5  ;;  %v16295_v10 = vld [vmem:[%s23417_s6 + $0x24] ss:$16 sps:$4 sm:$0xff]   ;;  %540 = vmatprep.subr.bf16.mxu1 %v16292_v8  ;;  %v16302_v20 = vld [vmem:[%s23417_s6 + $0x60] ss:$16 sps:$4 sm:$0xff]   ;;  %v16277_v22 = vld [vmem:[%s23414_s3 + $0x48] sm:$0xff]   ;;  %s15692_s22 = sld [smem:[#allocation6 + $0x4]] }
  0x14   :  { %v356_v11 = vld [vmem:[%s23417_s6 + $0x40] sm:$0xff]  ;;  %541 = vmatpush1.bf16.msra.mxu1 %v16294_v9  ;;  %v16274_v14 = vld [vmem:[%s23414_s3 + $0x30] sm:$0xff]   ;;  %v16279_v28 = vld [vmem:[%s23414_s3 + $0x58] sm:$0xff]  }
  0x15   :  { %225 = vmatpush1.bf16.msra.mxu0 %v16269_v2  ;;  %542 = vmatprep.subr.bf16.mxu1 %v16295_v10  ;;  %v13858_v15 = vcombine.high %v356_v11, %v358_v12  ;;  %v18410_v17 = vcombine.low %v356_v11, %v358_v12  ;;  %v16300_v18 = vld [vmem:[%s23417_s6 + $0x64] ss:$16 sps:$4 sm:$0xff]   ;;  %v16305_v23 = vld [vmem:[%s23417_s6 + $0x80] ss:$16 sps:$4 sm:$0xff]   ;;  %v16317_v35 = vld [vmem:[%s23417_s6 + $0xc] ss:$16 sps:$4 sm:$0xff]  }
  0x16   :  { %226 = vmatprep.subr.bf16.mxu0 %v23427_v1  ;;  %v16276_v19 = vld [vmem:[%s23414_s3 + $0x40] sm:$0xff]   ;;  %v16278_v25 = vld [vmem:[%s23414_s3 + $0x50] sm:$0xff]   ;;  %v16315_v38 = vld [vmem:[%s23417_s6 + $0x8] ss:$16 sps:$4 sm:$0xff]   ;;  %s6554_s3 = sld [smem:[#allocation6]] }
  0x17   :  { %v16303_v21 = vld [vmem:[%s23417_s6 + $0x84] ss:$16 sps:$4 sm:$0xff]   ;;  %v16308_v26 = vld [vmem:[%s23417_s6 + $0xa0] ss:$16 sps:$4 sm:$0xff]   ;;  %v16320_v39 = vld [vmem:[%s23417_s6 + $0x2c] ss:$16 sps:$4 sm:$0xff]  }
  0x18   :  { %543 = vmatpush1.bf16.msra.mxu1 %v16297_v13  ;;  %v16306_v24 = vld [vmem:[%s23417_s6 + $0xa4] ss:$16 sps:$4 sm:$0xff]   ;;  %v16311_v29 = vld [vmem:[%s23417_s6 + $0xc0] ss:$16 sps:$4 sm:$0xff]   ;;  %v16318_v42 = vld [vmem:[%s23417_s6 + $0x28] ss:$16 sps:$4 sm:$0xff]  }
  0x19   :  { %227 = vmatpush1.bf16.msra.mxu0 %v16270_v3  ;;  %544 = vmatprep.subr.bf16.mxu1 %v13858_v15  ;;  %v16309_v27 = vld [vmem:[%s23417_s6 + $0xc4] ss:$16 sps:$4 sm:$0xff]   ;;  %v16280_v31 = vld [vmem:[%s23411_s0] ss:$8 sps:$4 sm:$0xff]   ;;  %v16285_v41 = vld [vmem:[%s23411_s0 + $0x10] ss:$8 sps:$4 sm:$0xff]  }
  0x1a   :  { %228 = vmatprep.subr.bf16.mxu0 %v23427_v1  ;;  %v16312_v30 = vld [vmem:[%s23417_s6 + $0xe4] ss:$16 sps:$4 sm:$0xff]   ;;  %v16314_v32 = vld [vmem:[%s23417_s6 + $0xe0] ss:$16 sps:$4 sm:$0xff]   ;;  %v16323_v45 = vld [vmem:[%s23417_s6 + $0x4c] ss:$16 sps:$4 sm:$0xff]  }
  0x1b   :  { %v16341_v33 = vld [vmem:[%s23416_s5 + $0x4] ss:$16 sps:$4 sm:$0xff]   ;;  %v16339_v36 = vld [vmem:[%s23416_s5] ss:$16 sps:$4 sm:$0xff]   ;;  %v16321_v46 = vld [vmem:[%s23417_s6 + $0x48] ss:$16 sps:$4 sm:$0xff]  }
  0x1c   :  { %545 = vmatpush1.bf16.msra.mxu1 %v18410_v17  ;;  %v16283_v34 = vld [vmem:[%s23411_s0 + $0x14] ss:$8 sps:$4 sm:$0xff]   ;;  %v16345_v40 = vld [vmem:[%s23416_s5 + $0x20] ss:$16 sps:$4 sm:$0xff]   ;;  %v16286_v43 = vld [vmem:[%s23411_s0 + $0x24] ss:$8 sps:$4 sm:$0xff]  }
  0x1d   :  { %229 = vmatpush1.bf16.msra.mxu0 %v16271_v4  ;;  %546 = vmatprep.subr.bf16.mxu1 %v16300_v18  ;;  %v16347_v37 = vld [vmem:[%s23416_s5 + $0x24] ss:$16 sps:$4 sm:$0xff]   ;;  %v16326_v47 = vld [vmem:[%s23417_s6 + $0x6c] ss:$16 sps:$4 sm:$0xff]   ;;  %v16288_v48 = vld [vmem:[%s23411_s0 + $0x20] ss:$8 sps:$4 sm:$0xff]  }
  0x1e   :  { %230 = vmatprep.subr.bf16.mxu0 %v23427_v1  ;;  %v16324_v49 = vld [vmem:[%s23417_s6 + $0x68] ss:$16 sps:$4 sm:$0xff]   ;;  %v16289_v50 = vld [vmem:[%s23411_s0 + $0x34] ss:$8 sps:$4 sm:$0xff]   ;;  %v16351_v3 = vld [vmem:[%s23416_s5 + $0x40] ss:$16 sps:$4 sm:$0xff]  }
  0x1f   :  { %v16329_v51 = vld [vmem:[%s23417_s6 + $0x8c] ss:$16 sps:$4 sm:$0xff]   ;;  %v16327_v52 = vld [vmem:[%s23417_s6 + $0x88] ss:$16 sps:$4 sm:$0xff]   ;;  %v16353_v0 = vld [vmem:[%s23416_s5 + $0x44] ss:$16 sps:$4 sm:$0xff]  }
  0x20   :  { %547 = vmatpush1.bf16.msra.mxu1 %v16302_v20  ;;  %v16332_v53 = vld [vmem:[%s23417_s6 + $0xac] ss:$16 sps:$4 sm:$0xff]   ;;  %v16291_v54 = vld [vmem:[%s23411_s0 + $0x30] ss:$8 sps:$4 sm:$0xff]   ;;  %v16365_v9 = vld [vmem:[%s23416_s5 + $0x84] ss:$16 sps:$4 sm:$0xff]  }
  0x21   :  { %231 = vmatpush1.bf16.msra.mxu0 %v16272_v6  ;;  %548 = vmatprep.subr.bf16.mxu1 %v16303_v21  ;;  %v16330_v55 = vld [vmem:[%s23417_s6 + $0xa8] ss:$16 sps:$4 sm:$0xff]   ;;  %v16335_v56 = vld [vmem:[%s23417_s6 + $0xcc] ss:$16 sps:$4 sm:$0xff]   ;;  %v16357_v5 = vld [vmem:[%s23416_s5 + $0x60] ss:$16 sps:$4 sm:$0xff]  }
  0x22   :  { %232 = vmatprep.subr.bf16.mxu0 %v23427_v1  ;;  %v16333_v57 = vld [vmem:[%s23417_s6 + $0xc8] ss:$16 sps:$4 sm:$0xff]   ;;  %v16338_v58 = vld [vmem:[%s23417_s6 + $0xec] ss:$16 sps:$4 sm:$0xff]   ;;  %v16359_v6 = vld [vmem:[%s23416_s5 + $0x64] ss:$16 sps:$4 sm:$0xff]  }
  0x23   :  { %v16336_v59 = vld [vmem:[%s23417_s6 + $0xe8] ss:$16 sps:$4 sm:$0xff]   ;;  %v16344_v60 = vld [vmem:[%s23416_s5 + $0xc] ss:$16 sps:$4 sm:$0xff]   ;;  %v16363_v11 = vld [vmem:[%s23416_s5 + $0x80] ss:$16 sps:$4 sm:$0xff]  }
  0x24   :  { %549 = vmatpush1.bf16.msra.mxu1 %v16305_v23  ;;  %v16342_v61 = vld [vmem:[%s23416_s5 + $0x8] ss:$16 sps:$4 sm:$0xff]   ;;  %v16350_v62 = vld [vmem:[%s23416_s5 + $0x2c] ss:$16 sps:$4 sm:$0xff]   ;;  %v16369_v13 = vld [vmem:[%s23416_s5 + $0xa0] ss:$16 sps:$4 sm:$0xff]  }
  0x25   :  { %233 = vmatpush1.bf16.msra.mxu0 %v16273_v7  ;;  %550 = vmatprep.subr.bf16.mxu1 %v16306_v24  ;;  %v16348_v63 = vld [vmem:[%s23416_s5 + $0x28] ss:$16 sps:$4 sm:$0xff]   ;;  %v16356_v2 = vld [vmem:[%s23416_s5 + $0x4c] ss:$16 sps:$4 sm:$0xff]   ;;  %v16377_v18 = vld [vmem:[%s23416_s5 + $0xc4] ss:$16 sps:$4 sm:$0xff]  }
  0x26   :  { %234 = vmatprep.subr.bf16.mxu0 %v23427_v1  ;;  %v16354_v4 = vld [vmem:[%s23416_s5 + $0x48] ss:$16 sps:$4 sm:$0xff]   ;;  %v16362_v8 = vld [vmem:[%s23416_s5 + $0x6c] ss:$16 sps:$4 sm:$0xff]   ;;  %v16375_v20 = vld [vmem:[%s23416_s5 + $0xc0] ss:$16 sps:$4 sm:$0xff]  }
  0x27   :  { %v16360_v7 = vld [vmem:[%s23416_s5 + $0x68] ss:$16 sps:$4 sm:$0xff]   ;;  %v16368_v10 = vld [vmem:[%s23416_s5 + $0x8c] ss:$16 sps:$4 sm:$0xff]   ;;  %v16381_v24 = vld [vmem:[%s23416_s5 + $0xe0] ss:$16 sps:$4 sm:$0xff]  }
  0x28   :  { %551 = vmatpush1.bf16.msra.mxu1 %v16308_v26  ;;  %v16366_v12 = vld [vmem:[%s23416_s5 + $0x88] ss:$16 sps:$4 sm:$0xff]   ;;  %v16386_v23 = vld [vmem:[%s23416_s5 + $0xec] ss:$16 sps:$4 sm:$0xff]   ;;  %v16389_v26 = vld [vmem:[%s23417_s6 + $0x104] ss:$16 sps:$4 sm:$0xff]  }
  0x29   :  { %235 = vmatpush1.bf16.msra.mxu0 %v16274_v14  ;;  %552 = vmatprep.subr.bf16.mxu1 %v16309_v27  ;;  %v16371_v14 = vld [vmem:[%s23416_s5 + $0xa4] ss:$16 sps:$4 sm:$0xff]   ;;  %v16372_v15 = vld [vmem:[%s23416_s5 + $0xa8] ss:$16 sps:$4 sm:$0xff]   ;;  %v16392_v27 = vld [vmem:[%s23417_s6 + $0x10c] ss:$16 sps:$4 sm:$0xff]  }
  0x2a   :  { %236 = vmatprep.subr.bf16.mxu0 %v23427_v1  ;;  %v16378_v21 = vld [vmem:[%s23416_s5 + $0xc8] ss:$16 sps:$4 sm:$0xff]   ;;  %p6555_p5 = scmp.gt.s32.totalorder %s6554_s3, 0  ;;  %p8003_p6 = scmp.gt.s32.totalorder %s15047_s25, 0 }
  0x2b   :  { %p9452_p7 = scmp.gt.s32.totalorder %s15262_s24, 0  ;;  %p10901_p8 = scmp.gt.s32.totalorder %s15477_s23, 0 }
  0x2c   :  { %553 = vmatpush1.bf16.msra.mxu1 %v16311_v29  ;;  %s6557_s26 = scalar_select %p6555_p5, 1, 0 }
  0x2d   :  { %237 = vmatpush1.bf16.msra.mxu0 %v16275_v16  ;;  %554 = vmatprep.subr.bf16.mxu1 %v16312_v30  ;;  %v16374_v16 = vld [vmem:[%s23416_s5 + $0xac] ss:$16 sps:$4 sm:$0xff]   ;;  %s8006_s3 = scalar_select %p8003_p6, 1, 0 }
  0x2e   :  { %238 = vmatprep.subr.bf16.mxu0 %v23427_v1  ;;  %s9455_s25 = scalar_select %p9452_p7, 1, 0 }
  0x2f   :  { %s10904_s24 = scalar_select %p10901_p8, 1, 0 }
  0x30   :  { %555 = vmatpush1.bf16.msra.mxu1 %v16314_v32  ;;  %p12350_p9 = scmp.gt.s32.totalorder %s15692_s22, 0 }
  0x31   :  { %239 = vmatpush1.bf16.msra.mxu0 %v16276_v19  ;;  %581 = vmatprep.subr.bf16.mxu1 %v16317_v35  ;;  %v16380_v19 = vld [vmem:[%s23416_s5 + $0xcc] ss:$16 sps:$4 sm:$0xff]  }
  0x32   :  { %240 = vmatprep.subr.bf16.mxu0 %v23427_v1  ;;  %s12353_s23 = scalar_select %p12350_p9, 1, 0 }
  0x33   :  { %573 = vmatmul.mubr.bf16.vlgmr.msra.gmra.mrb[0].mxu1 %v18269_v44 }
  0x34   :  { %582 = vmatpush1.bf16.msra.mxu1 %v16315_v38  ;;  %613 = vmatprep.mubr.bf16.mxu1 %v23427_v1 }
  0x35   :  { %241 = vmatpush1.bf16.msra.mxu0 %v16277_v22  ;;  %583 = vmatprep.subr.bf16.mxu1 %v16320_v39  ;;  %v16383_v22 = vld [vmem:[%s23416_s5 + $0xe4] ss:$16 sps:$4 sm:$0xff]  }
  0x36   :  { %242 = vmatprep.subr.bf16.mxu0 %v23427_v1 }
  0x38   :  { %584 = vmatpush1.bf16.msra.mxu1 %v16318_v42 }
  0x39   :  { %243 = vmatpush1.bf16.msra.mxu0 %v16278_v25  ;;  %585 = vmatprep.subr.bf16.mxu1 %v16323_v45  ;;  %v16384_v25 = vld [vmem:[%s23416_s5 + $0xe8] ss:$16 sps:$4 sm:$0xff]  }
  0x3a   :  { %244 = vmatprep.subr.bf16.mxu0 %v23427_v1 }
  0x3c   :  { %586 = vmatpush1.bf16.msra.mxu1 %v16321_v46 }
  0x3d   :  { %245 = vmatpush1.bf16.msra.mxu0 %v16279_v28  ;;  %587 = vmatprep.subr.bf16.mxu1 %v16326_v47  ;;  %v13824_v28 = vld [vmem:[%s23415_s4] ss:$0 sm:$0xff] }
  0x3e   :  { %782 = vmatprep.subr.bf16.mxu0 %v16341_v33 }
  0x40   :  { %255 = vmatmul.mubr.bf16.vlgmr.msra.gmra.mrb[0].mxu0 %v16280_v31  ;;  %588 = vmatpush1.bf16.msra.mxu1 %v16324_v49 }
  0x41   :  { %13846 = vmatprep.mubr.msk.bf16.mxu0 %vm209_vm0, %v16283_v34  ;;  %783 = vmatpush1.bf16.msra.mxu0 %v16339_v36 }
  0x42   :  { %784 = vmatprep.subr.bf16.mxu0 %v16347_v37  ;;  %589 = vmatprep.subr.bf16.mxu1 %v16329_v51 }
  0x44   :  { %590 = vmatpush1.bf16.msra.mxu1 %v16327_v52 }
  0x45   :  { %785 = vmatpush1.bf16.msra.mxu0 %v16345_v40  ;;  %591 = vmatprep.subr.bf16.mxu1 %v16332_v53 }
  0x46   :  { %786 = vmatprep.subr.bf16.mxu0 %v16353_v0 }
  0x48   :  { %263 = vmatmul.mubr.bf16.gmra.mrb[4].mxu0 %v16285_v41  ;;  %592 = vmatpush1.bf16.msra.mxu1 %v16330_v55 }
  0x49   :  { %13847 = vmatprep.mubr.msk.bf16.mxu0 %vm209_vm0, %v16286_v43  ;;  %593 = vmatprep.subr.bf16.mxu1 %v16335_v56 }
  0x4a   :  { %787 = vmatpush1.bf16.msra.mxu0 %v16351_v3 }
  0x4b   :  { %788 = vmatprep.subr.bf16.mxu0 %v16359_v6  ;;  %v16396_v6 = vld [vmem:[%s23417_s6 + $0x128] ss:$16 sps:$4 sm:$0xff]  }
  0x4c   :  { %594 = vmatpush1.bf16.msra.mxu1 %v16333_v57  ;;  %v16387_v57 = vld [vmem:[%s23417_s6 + $0x100] ss:$16 sps:$4 sm:$0xff]  }
  0x4d   :  { %595 = vmatprep.subr.bf16.mxu1 %v16338_v58  ;;  %v16390_v58 = vld [vmem:[%s23417_s6 + $0x108] ss:$16 sps:$4 sm:$0xff]  }
  0x4e   :  { %789 = vmatpush1.bf16.msra.mxu0 %v16357_v5  ;;  %v16393_v5 = vld [vmem:[%s23417_s6 + $0x120] ss:$16 sps:$4 sm:$0xff]  }
  0x4f   :  { %790 = vmatprep.subr.bf16.mxu0 %v16365_v9 }
  0x50   :  { %271 = vmatmul.mubr.bf16.gmra.mrb[8].mxu0 %v16288_v48  ;;  %596 = vmatpush1.bf16.msra.mxu1 %v16336_v59 }
  0x51   :  { %13848 = vmatprep.mubr.msk.bf16.mxu0 %vm209_vm0, %v16289_v50  ;;  %823 = vmatprep.subr.bf16.mxu1 %v16344_v60 }
  0x52   :  { %791 = vmatpush1.bf16.msra.mxu0 %v16363_v11  ;;  %v16404_v11 = vld [vmem:[%s23417_s6 + $0x14c] ss:$16 sps:$4 sm:$0xff]  }
  0x53   :  { %614 = vmatmul.mubr.bf16.vlgmr.msra.gmra.mrb[4].mxu1 %v18269_v44  ;;  %792 = vmatprep.subr.bf16.mxu0 %v16371_v14 }
  0x54   :  { %824 = vmatpush1.bf16.msra.mxu1 %v16342_v61  ;;  %855 = vmatprep.mubr.bf16.mxu1 %v23427_v1  ;;  %v16395_v61 = vld [vmem:[%s23417_s6 + $0x124] ss:$16 sps:$4 sm:$0xff]  }
  0x55   :  { %825 = vmatprep.subr.bf16.mxu1 %v16350_v62  ;;  %v16398_v62 = vld [vmem:[%s23417_s6 + $0x12c] ss:$16 sps:$4 sm:$0xff]  }
  0x56   :  { %793 = vmatpush1.bf16.msra.mxu0 %v16369_v13 }
  0x57   :  { %794 = vmatprep.subr.bf16.mxu0 %v16377_v18  ;;  %v16402_v18 = vld [vmem:[%s23417_s6 + $0x148] ss:$16 sps:$4 sm:$0xff]  }
  0x58   :  { %279 = vmatmul.mubr.bf16.gmra.mrb[12].mxu0 %v16291_v54  ;;  %826 = vmatpush1.bf16.msra.mxu1 %v16348_v63 }
  0x59   :  { %814 = vmatprep.mubr.bf16.mxu0 %v23427_v1  ;;  %827 = vmatprep.subr.bf16.mxu1 %v16356_v2 }
  0x5a   :  { %795 = vmatpush1.bf16.msra.mxu0 %v16375_v20  ;;  %v16407_v20 = vld [vmem:[%s23417_s6 + $0x164] ss:$16 sps:$4 sm:$0xff]  }
  0x5b   :  { %796 = vmatprep.subr.bf16.mxu0 %v16383_v22  ;;  %v16405_v22 = vld [vmem:[%s23417_s6 + $0x160] ss:$16 sps:$4 sm:$0xff]  }
  0x5c   :  { %828 = vmatpush1.bf16.msra.mxu1 %v16354_v4 }
  0x5d   :  { %829 = vmatprep.subr.bf16.mxu1 %v16362_v8 }
  0x5e   :  { %797 = vmatpush1.bf16.msra.mxu0 %v16381_v24 }
  0x5f   :  { %1142 = vmatprep.subr.bf16.mxu0 %v16389_v26  ;;  %v16416_v26 = vld [vmem:[%s23417_s6 + $0x18c] ss:$16 sps:$4 sm:$0xff]  }
  0x60   :  { %830 = vmatpush1.bf16.msra.mxu1 %v16360_v7 }
  0x61   :  { %831 = vmatprep.subr.bf16.mxu1 %v16368_v10  ;;  %v16401_v10 = vld [vmem:[%s23417_s6 + $0x144] ss:$16 sps:$4 sm:$0xff]  }
  0x64   :  { %832 = vmatpush1.bf16.msra.mxu1 %v16366_v12 }
  0x65   :  { %833 = vmatprep.subr.bf16.mxu1 %v16374_v16  ;;  %v16399_v16 = vld [vmem:[%s23417_s6 + $0x140] ss:$16 sps:$4 sm:$0xff]  }
  0x68   :  { %834 = vmatpush1.bf16.msra.mxu1 %v16372_v15 }
  0x69   :  { %835 = vmatprep.subr.bf16.mxu1 %v16380_v19 }
  0x6c   :  { %836 = vmatpush1.bf16.msra.mxu1 %v16378_v21  ;;  %v16410_v21 = vld [vmem:[%s23417_s6 + $0x16c] ss:$16 sps:$4 sm:$0xff]  }
  0x6d   :  { %837 = vmatprep.subr.bf16.mxu1 %v16386_v23  ;;  %v16408_v23 = vld [vmem:[%s23417_s6 + $0x168] ss:$16 sps:$4 sm:$0xff]  }
  0x70   :  { %838 = vmatpush1.bf16.msra.mxu1 %v16384_v25  ;;  %v16413_v25 = vld [vmem:[%s23417_s6 + $0x184] ss:$16 sps:$4 sm:$0xff]  }
  0x71   :  { %1183 = vmatprep.subr.bf16.mxu1 %v16392_v27 }
 0x106   :  { %v18642_v34 = vpop.f32.mrb[0].mxu1 }
 0x107   :  { %v18644_v35 = vpop.f32.mrb[1].mxu1 }
 0x108   :  { %v578_v36 = vpop.f32.mrb[2].mxu1 }
 0x109   :  { %v579_v37 = vpop.f32.mrb[3].mxu1  ;;  %v16417_v36 = vld [vmem:[%s23417_s6 + $0x1a0] ss:$16 sps:$4 sm:$0xff]  }
 0x10a   :  { %v16420_v37 = vld [vmem:[%s23417_s6 + $0x1a8] ss:$16 sps:$4 sm:$0xff]  }
 0x113   :  { %v256_v29 = vpop.f32.mrb[0].mxu0 }
 0x114   :  { %v258_v30 = vpop.f32.mrb[1].mxu0  ;;  %v257_v45 = vadd.f32 %v13824_v28, %v256_v29 }
 0x115   :  { %v259_v31 = vpop.f32.mrb[2].mxu0  ;;  %v16411_v30 = vld [vmem:[%s23417_s6 + $0x180] ss:$16 sps:$4 sm:$0xff]  }
 0x116   :  { %v260_v32 = vadd.f32 %v13824_v28, %v259_v31  ;;  %v261_v33 = vpop.f32.mrb[3].mxu0  ;;  %v287_v50 = vmax.f32 %v257_v45, 0.0  ;;  %v16414_v31 = vld [vmem:[%s23417_s6 + $0x188] ss:$16 sps:$4 sm:$0xff]   ;;  %v18756_v45 = vld [vmem:[%s23417_s6 + $0x1ec] ss:$16 sps:$4 sm:$0xff]  }
 0x117   :  { %v16422_v33 = vld [vmem:[%s23417_s6 + $0x1ac] ss:$16 sps:$4 sm:$0xff]  }
 0x118   :  { %v288_v54 = vmax.f32 %v260_v32, 0.0  ;;  %v16419_v32 = vld [vmem:[%s23417_s6 + $0x1a4] ss:$16 sps:$4 sm:$0xff]  }
 0x11b   :  { %v264_v38 = vpop.f32.mrb[4].mxu0 }
 0x11c   :  { %v265_v39 = vadd.f32 %v13824_v28, %v264_v38  ;;  %v266_v40 = vpop.f32.mrb[5].mxu0  ;;  %v16425_v38 = vld [vmem:[%s23417_s6 + $0x1c4] ss:$16 sps:$4 sm:$0xff]  }
 0x11d   :  { %v267_v41 = vpop.f32.mrb[6].mxu0  ;;  %v18733_v40 = vld [vmem:[%s23417_s6 + $0x1cc] ss:$16 sps:$4 sm:$0xff]  }
 0x11e   :  { %v268_v42 = vadd.f32 %v13824_v28, %v267_v41  ;;  %v269_v43 = vpop.f32.mrb[7].mxu0  ;;  %v289_v7 = vmax.f32 %v265_v39, 0.0  ;;  %v16423_v39 = vld [vmem:[%s23417_s6 + $0x1c0] ss:$16 sps:$4 sm:$0xff]   ;;  %v18738_v41 = vld [vmem:[%s23417_s6 + $0x1c8] ss:$16 sps:$4 sm:$0xff]  }
 0x11f   :  { %v18750_v43 = vld [vmem:[%s23417_s6 + $0x1e0] ss:$16 sps:$4 sm:$0xff]  }
 0x120   :  { %v290_v13 = vmax.f32 %v268_v42, 0.0  ;;  %v18744_v42 = vld [vmem:[%s23417_s6 + $0x1e4] ss:$16 sps:$4 sm:$0xff]  }
 0x123   :  { %v272_v46 = vpop.f32.mrb[8].mxu0 }
 0x124   :  { %v273_v47 = vadd.f32 %v13824_v28, %v272_v46  ;;  %v274_v48 = vpop.f32.mrb[9].mxu0  ;;  %v18762_v46 = vld [vmem:[%s23417_s6 + $0x1e8] ss:$16 sps:$4 sm:$0xff]  }
 0x125   :  { %v275_v49 = vpop.f32.mrb[10].mxu0  ;;  %v18775_v48 = vld [vmem:[%s23416_s5 + $0x10c] ss:$16 sps:$4 sm:$0xff]  }
 0x126   :  { %v291_v51 = vmax.f32 %v273_v47, 0.0  ;;  %v276_v52 = vadd.f32 %v13824_v28, %v275_v49  ;;  %v277_v53 = vpop.f32.mrb[11].mxu0  ;;  %v18696_v24 = vpop.f32.mrb[4].mxu1  ;;  %v18770_v47 = vld [vmem:[%s23416_s5 + $0x104] ss:$16 sps:$4 sm:$0xff]  }
 0x127   :  { %v18704_v27 = vpop.f32.mrb[5].mxu1  ;;  %v16435_v49 = vld [vmem:[%s23416_s5 + $0x100] ss:$16 sps:$4 sm:$0xff]  }
 0x128   :  { %v295_v55 = vadd.f32 %v291_v51, %v287_v50  ;;  %v292_v56 = vmax.f32 %v276_v52, 0.0  ;;  %v16438_v50 = vld [vmem:[%s23416_s5 + $0x108] ss:$16 sps:$4 sm:$0xff]   ;;  %v16443_v51 = vld [vmem:[%s23416_s5 + $0x124] ss:$16 sps:$4 sm:$0xff]  }
 0x129   :  { %v16446_v52 = vld [vmem:[%s23416_s5 + $0x12c] ss:$16 sps:$4 sm:$0xff]   ;;  %v16441_v53 = vld [vmem:[%s23416_s5 + $0x120] ss:$16 sps:$4 sm:$0xff]  }
 0x12a   :  { %v299_v59 = vmul.f32 0.5, %v295_v55  ;;  %v18652_v60 = vadd.f32 %v292_v56, %v288_v54  ;;  %v16449_v54 = vld [vmem:[%s23416_s5 + $0x144] ss:$16 sps:$4 sm:$0xff]   ;;  %v16452_v55 = vld [vmem:[%s23416_s5 + $0x14c] ss:$16 sps:$4 sm:$0xff]  }
 0x12b   :  { %v280_v63 = vpop.f32.mrb[12].mxu0  ;;  %v16447_v56 = vld [vmem:[%s23416_s5 + $0x140] ss:$16 sps:$4 sm:$0xff]  }
 0x12c   :  { %v314_v0 = vpack.c.bf16 %v299_v59, %v299_v59  ;;  %v281_v2 = vadd.f32 %v13824_v28, %v280_v63  ;;  %v282_v3 = vpop.f32.mrb[13].mxu0  ;;  %v18820_v59 = vld [vmem:[%s23416_s5 + $0x16c] ss:$16 sps:$4 sm:$0xff]   ;;  %v18839_v63 = vld [vmem:[%s23416_s5 + $0x184] ss:$16 sps:$4 sm:$0xff]  }
 0x12d   :  { %v283_v4 = vpop.f32.mrb[14].mxu0  ;;  %v18854_v3 = vld [vmem:[%s23416_s5 + $0x188] ss:$16 sps:$4 sm:$0xff]  }
 0x12e   :  { %v293_v8 = vmax.f32 %v281_v2, 0.0  ;;  %v284_v9 = vadd.f32 %v13824_v28, %v283_v4  ;;  %815 = vmatmul.mubr.bf16.vlgmr.msra.gmra.mrb[16].mxu0 %v314_v0  ;;  %856 = vmatmul.mubr.bf16.vlgmr.msra.gmra.mrb[8].mxu1 %v314_v0  ;;  %v285_v12 = vpop.f32.mrb[15].mxu0  ;;  %v619_v28 = vpop.f32.mrb[6].mxu1  ;;  %v18844_v0 = vld [vmem:[%s23416_s5 + $0x18c] ss:$16 sps:$4 sm:$0xff]  }
 0x12f   :  { %1143 = vmatpush1.bf16.msra.mxu0 %v16387_v57  ;;  %1184 = vmatpush1.bf16.msra.mxu1 %v16390_v58  ;;  %v620_v29 = vpop.f32.mrb[7].mxu1  ;;  %v16450_v57 = vld [vmem:[%s23416_s5 + $0x148] ss:$16 sps:$4 sm:$0xff]   ;;  %v18815_v58 = vld [vmem:[%s23416_s5 + $0x164] ss:$16 sps:$4 sm:$0xff]  }
 0x130   :  { %v18672_v14 = vadd.f32 %v293_v8, %v289_v7  ;;  %v294_v15 = vmax.f32 %v284_v9, 0.0  ;;  %1144 = vmatprep.subr.bf16.mxu0 %v16395_v61  ;;  %1185 = vmatprep.subr.bf16.mxu1 %v16398_v62  ;;  %v18825_v61 = vld [vmem:[%s23416_s5 + $0x160] ss:$16 sps:$4 sm:$0xff]   ;;  %v18830_v62 = vld [vmem:[%s23416_s5 + $0x168] ss:$16 sps:$4 sm:$0xff]  }
 0x131   :  { %1174 = vmatprep.mubr.bf16.mxu0 %v23427_v1  ;;  %1215 = vmatprep.mubr.bf16.mxu1 %v23427_v1  ;;  %v18849_v2 = vld [vmem:[%s23416_s5 + $0x180] ss:$16 sps:$4 sm:$0xff]   ;;  %v18878_v7 = vld [vmem:[%s23416_s5 + $0x1ac] ss:$16 sps:$4 sm:$0xff]   ;;  %v18883_v8 = vld [vmem:[%s23416_s5 + $0x1c4] ss:$16 sps:$4 sm:$0xff]  }
 0x132   :  { %v18682_v19 = vadd.f32 %v294_v15, %v290_v13  ;;  %v18862_v4 = vld [vmem:[%s23416_s5 + $0x1a0] ss:$16 sps:$4 sm:$0xff]   ;;  %v18889_v9 = vld [vmem:[%s23416_s5 + $0x1cc] ss:$16 sps:$4 sm:$0xff]   ;;  %v18905_v12 = vld [vmem:[%s23416_s5 + $0x1e4] ss:$16 sps:$4 sm:$0xff]  }
 0x133   :  { %1145 = vmatpush1.bf16.msra.mxu0 %v16393_v5  ;;  %1186 = vmatpush1.bf16.msra.mxu1 %v16396_v6  ;;  %v18867_v5 = vld [vmem:[%s23416_s5 + $0x1a4] ss:$16 sps:$4 sm:$0xff]   ;;  %v18873_v6 = vld [vmem:[%s23416_s5 + $0x1a8] ss:$16 sps:$4 sm:$0xff]   ;;  %v18911_v13 = vld [vmem:[%s23416_s5 + $0x1ec] ss:$16 sps:$4 sm:$0xff]  }
 0x134   :  { %23509 = vst [vmem:[#allocation12_spill] sm:$0xff] %v18682_v19  ;;  %1146 = vmatprep.subr.bf16.mxu0 %v16401_v10  ;;  %1187 = vmatprep.subr.bf16.mxu1 %v16404_v11  ;;  %v18895_v10 = vld [vmem:[%s23416_s5 + $0x1c0] ss:$16 sps:$4 sm:$0xff]   ;;  %v18900_v11 = vld [vmem:[%s23416_s5 + $0x1c8] ss:$16 sps:$4 sm:$0xff]   ;;  %v23533_v19 = vmov 0  }
 0x135   :  { %v18919_v15 = vld [vmem:[%s23416_s5 + $0x1e0] ss:$16 sps:$4 sm:$0xff]  }
 0x137   :  { %1147 = vmatpush1.bf16.msra.mxu0 %v16399_v16  ;;  %1188 = vmatpush1.bf16.msra.mxu1 %v16402_v18  ;;  %v18924_v16 = vld [vmem:[%s23416_s5 + $0x1e8] ss:$16 sps:$4 sm:$0xff]   ;;  %v18139_v18 = vld [vmem:[%s23417_s6 + $0x4] ss:$16 sps:$4 sm:$0xff]  }
 0x138   :  { %1148 = vmatprep.subr.bf16.mxu0 %v16407_v20  ;;  %1189 = vmatprep.subr.bf16.mxu1 %v16410_v21  ;;  %v18140_v20 = vld [vmem:[%s23417_s6 + $0xc] ss:$16 sps:$4 sm:$0xff]   ;;  %v23426_v21 = vlaneseq }
 0x13b   :  { %1149 = vmatpush1.bf16.msra.mxu0 %v16405_v22  ;;  %1190 = vmatpush1.bf16.msra.mxu1 %v16408_v23  ;;  %v867_v22 = vshrl.u32 %v23426_v21, 7  ;;  %v301_v21 = vmul.f32 0.5, %v18672_v14  ;;  %v19711_v14 = vld [vmem:[%s23417_s6 + $0x10c] ss:$16 sps:$4 sm:$0xff]  }
 0x13c   :  { %1150 = vmatprep.subr.bf16.mxu0 %v16413_v25  ;;  %1191 = vmatprep.subr.bf16.mxu1 %v16416_v26  ;;  %v864_v25 = vld [vmem:[%s23418_s7] sm:$0xf]  ;;  %23535 = vst [vmem:[#allocation37_spill] sm:$0xff] %v19711_v14 }
 0x13d   :  { %v18939_v23 = vsub.s32 0, %v867_v22  ;;  %v18944_v26 = vsub.s32 1, %v867_v22  ;;  %v18947_v29 = vsub.s32 2, %v867_v22 }
 0x13f   :  { %1151 = vmatpush1.bf16.msra.mxu0 %v16411_v30  ;;  %1192 = vmatpush1.bf16.msra.mxu1 %v16414_v31  ;;  %v869_v28 = vrot.slane %v864_v25, %v18939_v23 }
 0x140   :  { %1152 = vmatprep.subr.bf16.mxu0 %v16419_v32  ;;  %1193 = vmatprep.subr.bf16.mxu1 %v16422_v33  ;;  %v873_v32 = vrot.slane %v864_v25, %v18944_v26 }
 0x143   :  { %1153 = vmatpush1.bf16.msra.mxu0 %v16417_v36  ;;  %1194 = vmatpush1.bf16.msra.mxu1 %v16420_v37 }
 0x144   :  { %1154 = vmatprep.subr.bf16.mxu0 %v16425_v38  ;;  %1195 = vmatprep.subr.bf16.mxu1 %v18733_v40 }
 0x147   :  { %1155 = vmatpush1.bf16.msra.mxu0 %v16423_v39  ;;  %1196 = vmatpush1.bf16.msra.mxu1 %v18738_v41 }
 0x148   :  { %1156 = vmatprep.subr.bf16.mxu0 %v18744_v42  ;;  %1197 = vmatprep.subr.bf16.mxu1 %v18756_v45 }
 0x14b   :  { %1157 = vmatpush1.bf16.msra.mxu0 %v18750_v43  ;;  %1198 = vmatpush1.bf16.msra.mxu1 %v18762_v46 }
 0x14c   :  { %1384 = vmatprep.subr.bf16.mxu0 %v18770_v47  ;;  %1425 = vmatprep.subr.bf16.mxu1 %v18775_v48 }
 0x14e   :  { %1175 = vmatmul.mubr.bf16.vlgmr.msra.gmra.mrb[20].mxu0 %v18269_v44  ;;  %1216 = vmatmul.mubr.bf16.vlgmr.msra.gmra.mrb[12].mxu1 %v18269_v44  ;;  %v16444_v44 = vld [vmem:[%s23416_s5 + $0x128] ss:$16 sps:$4 sm:$0xff]  }
 0x14f   :  { %1416 = vmatprep.mubr.bf16.mxu0 %v23427_v1  ;;  %1385 = vmatpush1.bf16.msra.mxu0 %v16435_v49 }
 0x150   :  { %1426 = vmatpush1.bf16.msra.mxu1 %v16438_v50  ;;  %1457 = vmatprep.mubr.bf16.mxu1 %v23427_v1 }
 0x151   :  { %1386 = vmatprep.subr.bf16.mxu0 %v16443_v51  ;;  %1427 = vmatprep.subr.bf16.mxu1 %v16446_v52 }
 0x153   :  { %1387 = vmatpush1.bf16.msra.mxu0 %v16441_v53  ;;  %v877_v53 = vrot.slane %v864_v25, %v18947_v29 }
 0x154   :  { %1428 = vmatpush1.bf16.msra.mxu1 %v16444_v44  ;;  %1388 = vmatprep.subr.bf16.mxu0 %v16449_v54  ;;  %v18955_v44 = vsub.s32 3, %v867_v22 }
 0x155   :  { %1429 = vmatprep.subr.bf16.mxu1 %v16452_v55 }
 0x157   :  { %1389 = vmatpush1.bf16.msra.mxu0 %v16447_v56 }
 0x158   :  { %1430 = vmatpush1.bf16.msra.mxu1 %v16450_v57  ;;  %1390 = vmatprep.subr.bf16.mxu0 %v18815_v58 }
 0x159   :  { %1431 = vmatprep.subr.bf16.mxu1 %v18820_v59 }
 0x15b   :  { %1391 = vmatpush1.bf16.msra.mxu0 %v18825_v61 }
 0x15c   :  { %1432 = vmatpush1.bf16.msra.mxu1 %v18830_v62  ;;  %1392 = vmatprep.subr.bf16.mxu0 %v18839_v63 }
 0x15d   :  { %1433 = vmatprep.subr.bf16.mxu1 %v18844_v0 }
 0x15f   :  { %1393 = vmatpush1.bf16.msra.mxu0 %v18849_v2 }
 0x160   :  { %1434 = vmatpush1.bf16.msra.mxu1 %v18854_v3  ;;  %1394 = vmatprep.subr.bf16.mxu0 %v18867_v5 }
 0x161   :  { %1435 = vmatprep.subr.bf16.mxu1 %v18878_v7 }
 0x163   :  { %1395 = vmatpush1.bf16.msra.mxu0 %v18862_v4 }
 0x164   :  { %1436 = vmatpush1.bf16.msra.mxu1 %v18873_v6  ;;  %1396 = vmatprep.subr.bf16.mxu0 %v18883_v8 }
 0x165   :  { %1437 = vmatprep.subr.bf16.mxu1 %v18889_v9 }
 0x167   :  { %1397 = vmatpush1.bf16.msra.mxu0 %v18895_v10 }
 0x168   :  { %1438 = vmatpush1.bf16.msra.mxu1 %v18900_v11  ;;  %1398 = vmatprep.subr.bf16.mxu0 %v18905_v12 }
 0x169   :  { %1439 = vmatprep.subr.bf16.mxu1 %v18911_v13 }
 0x16b   :  { %1399 = vmatpush1.bf16.msra.mxu0 %v18919_v15 }
 0x16c   :  { %1440 = vmatpush1.bf16.msra.mxu1 %v18924_v16  ;;  %1743 = vmatprep.subr.bf16.mxu0 %v18139_v18  ;;  %v881_v18 = vrot.slane %v864_v25, %v18955_v44 }
 0x16d   :  { %1784 = vmatprep.subr.bf16.mxu1 %v18140_v20 }
 0x201   :  { %v816_v30 = vpop.f32.mrb[16].mxu0  ;;  %v857_v31 = vpop.f32.mrb[8].mxu1 }
 0x202   :  { %v817_v33 = vadd.f32 %v816_v30, %v18642_v34  ;;  %v858_v36 = vadd.f32 %v857_v31, %v18696_v24  ;;  %v818_v37 = vpop.f32.mrb[17].mxu0  ;;  %v859_v38 = vpop.f32.mrb[9].mxu1 }
 0x203   :  { %v819_v39 = vadd.f32 %v818_v37, %v18644_v35  ;;  %v860_v49 = vadd.f32 %v859_v38, %v18704_v27  ;;  %v820_v50 = vpop.f32.mrb[18].mxu0  ;;  %v861_v51 = vpop.f32.mrb[10].mxu1 }
 0x204   :  { %v886_v52 = vadd.f32 %v869_v28, %v817_v33  ;;  %v821_v54 = vpop.f32.mrb[19].mxu0  ;;  %v862_v55 = vpop.f32.mrb[11].mxu1  ;;  %v888_v24 = vadd.f32 %v877_v53, %v858_v36  ;;  %v18141_v53 = vld [vmem:[%s23417_s6] ss:$16 sps:$4 sm:$0xff]  }
 0x205   :  { %v887_v56 = vadd.f32 %v873_v32, %v819_v39  ;;  %v889_v35 = vadd.f32 %v881_v18, %v860_v49  ;;  %v18142_v54 = vld [vmem:[%s23417_s6 + $0x8] ss:$16 sps:$4 sm:$0xff]   ;;  %v18143_v55 = vld [vmem:[%s23417_s6 + $0x24] ss:$16 sps:$4 sm:$0xff]   ;;  %v18147_v18 = vld [vmem:[%s23417_s6 + $0x20] ss:$16 sps:$4 sm:$0xff]  }
 0x206   :  { %v890_v57 = vmul.f32 0.5, %v886_v52 }
 0x207   :  { %v894_v34 = vmul.f32 0.5, %v887_v56  ;;  %v899_v27 = vmul.f32 0.5, %v889_v35  ;;  %v18144_v56 = vld [vmem:[%s23417_s6 + $0x2c] ss:$16 sps:$4 sm:$0xff]   ;;  %v18148_v35 = vld [vmem:[%s23417_s6 + $0x28] ss:$16 sps:$4 sm:$0xff]  }
 0x208   :  { %17939 = vtanh.f32 %v890_v57  ;;  %v18145_v57 = vld [vmem:[%s23417_s6 + $0x40] sm:$0xff] }
 0x209   :  { %17941 = vtanh.f32 %v894_v34  ;;  %v18146_v34 = vld [vmem:[%s23417_s6 + $0x50] sm:$0xff] }
 0x20a   :  { %17943 = vtanh.f32 %v888_v24  ;;  %v14051_v24 = vcombine.high %v18145_v57, %v18146_v34  ;;  %v18159_v57 = vld [vmem:[%s23417_s6 + $0xec] ss:$16 sps:$4 sm:$0xff]   ;;  %v18160_v34 = vld [vmem:[%s23417_s6 + $0xe8] ss:$16 sps:$4 sm:$0xff]  }
 0x20b   :  { %17945 = vtanh.f32 %v899_v27  ;;  %v18149_v27 = vld [vmem:[%s23417_s6 + $0x4c] ss:$16 sps:$4 sm:$0xff]  }
 0x212   :  { %v17940_v20 = vpop.eup %17939 }
 0x213   :  { %v17942_v30 = vpop.eup %17941  ;;  %v892_v28 = vmul.f32 0.5, %v17940_v20  ;;  %v18997_v20 = vld [vmem:[%s23417_s6 + $0x64] ss:$16 sps:$4 sm:$0xff]  }
 0x214   :  { %v896_v31 = vmul.f32 0.5, %v17942_v30  ;;  %v17944_v33 = vpop.eup %17943  ;;  %v18150_v30 = vld [vmem:[%s23417_s6 + $0x48] ss:$16 sps:$4 sm:$0xff]  }
 0x215   :  { %v893_v22 = vadd.f32 0.5, %v892_v28  ;;  %v17946_v36 = vpop.eup %17945  ;;  %v19006_v28 = vld [vmem:[%s23417_s6 + $0x60] ss:$16 sps:$4 sm:$0xff]  }
 0x216   :  { %v897_v37 = vadd.f32 0.5, %v896_v31  ;;  %v901_v25 = vmul.f32 0.5, %v17946_v36  ;;  %v18151_v31 = vld [vmem:[%s23417_s6 + $0x6c] ss:$16 sps:$4 sm:$0xff]   ;;  %v19042_v36 = vld [vmem:[%s23417_s6 + $0xa0] ss:$16 sps:$4 sm:$0xff]  }
 0x217   :  { %v904_v38 = vmul.f32 %v17944_v33, %v893_v22  ;;  %v18152_v22 = vld [vmem:[%s23417_s6 + $0x68] ss:$16 sps:$4 sm:$0xff]   ;;  %v19024_v33 = vld [vmem:[%s23417_s6 + $0x80] ss:$16 sps:$4 sm:$0xff]  }
 0x218   :  { %v903_v32 = vmul.f32 0.0, %v897_v37  ;;  %v902_v50 = vadd.f32 0.5, %v901_v25  ;;  %v18153_v37 = vld [vmem:[%s23417_s6 + $0x8c] ss:$16 sps:$4 sm:$0xff]  }
 0x219   :  { %v18155_v25 = vld [vmem:[%s23417_s6 + $0xac] ss:$16 sps:$4 sm:$0xff]  }
 0x21a   :  { %v18958_v39 = vadd.f32 %v904_v38, %v903_v32  ;;  %v19033_v38 = vld [vmem:[%s23417_s6 + $0xa4] ss:$16 sps:$4 sm:$0xff]   ;;  %v18154_v32 = vld [vmem:[%s23417_s6 + $0x88] ss:$16 sps:$4 sm:$0xff]  }
 0x21c   :  { %17947 = vtanh.f32 %v18958_v39 }
 0x226   :  { %v17948_v51 = vpop.eup %17947 }
 0x227   :  { %v907_v49 = vmul.f32 %v17948_v51, %v902_v50  ;;  %v19051_v50 = vld [vmem:[%s23417_s6 + $0xc4] ss:$16 sps:$4 sm:$0xff]   ;;  %v18156_v51 = vld [vmem:[%s23417_s6 + $0xa8] ss:$16 sps:$4 sm:$0xff]  }
 0x229   :  { %v18961_v52 = vpack.c.bf16 %v907_v49, %v907_v49  ;;  %v19060_v49 = vld [vmem:[%s23417_s6 + $0xc0] ss:$16 sps:$4 sm:$0xff]  }
 0x22b   :  { %1417 = vmatmul.mubr.bf16.vlgmr.msra.gmra.mrb[24].mxu0 %v18961_v52  ;;  %1458 = vmatmul.mubr.bf16.vlgmr.msra.gmra.mrb[16].mxu1 %v18961_v52 }
 0x22c   :  { %1744 = vmatpush1.bf16.msra.mxu0 %v18141_v53  ;;  %1785 = vmatpush1.bf16.msra.mxu1 %v18142_v54  ;;  %v18157_v53 = vld [vmem:[%s23417_s6 + $0xcc] ss:$16 sps:$4 sm:$0xff]   ;;  %v19069_v54 = vld [vmem:[%s23417_s6 + $0xe4] ss:$16 sps:$4 sm:$0xff]  }
 0x22d   :  { %1745 = vmatprep.subr.bf16.mxu0 %v18143_v55  ;;  %1786 = vmatprep.subr.bf16.mxu1 %v18144_v56  ;;  %v18158_v55 = vld [vmem:[%s23417_s6 + $0xc8] ss:$16 sps:$4 sm:$0xff]   ;;  %v19078_v56 = vld [vmem:[%s23417_s6 + $0xe0] ss:$16 sps:$4 sm:$0xff]  }
 0x22e   :  { %1775 = vmatprep.mubr.bf16.mxu0 %v23427_v1  ;;  %1816 = vmatprep.mubr.bf16.mxu1 %v23427_v1 }
 0x230   :  { %1746 = vmatpush1.bf16.msra.mxu0 %v18147_v18  ;;  %1787 = vmatpush1.bf16.msra.mxu1 %v18148_v35  ;;  %v18162_v18 = vld [vmem:[%s23416_s5 + $0xc] ss:$16 sps:$4 sm:$0xff]   ;;  %v18163_v35 = vld [vmem:[%s23416_s5] ss:$16 sps:$4 sm:$0xff]  }
 0x231   :  { %1747 = vmatprep.subr.bf16.mxu0 %v14051_v24  ;;  %1788 = vmatprep.subr.bf16.mxu1 %v18149_v27  ;;  %v18161_v24 = vld [vmem:[%s23416_s5 + $0x4] ss:$16 sps:$4 sm:$0xff]   ;;  %v18164_v27 = vld [vmem:[%s23416_s5 + $0x8] ss:$16 sps:$4 sm:$0xff]  }
 0x234   :  { %1748 = vmatpush1.bf16.msra.mxu0 %v18410_v17  ;;  %1789 = vmatpush1.bf16.msra.mxu1 %v18150_v30  ;;  %v19015_v17 = vld [vmem:[%s23417_s6 + $0x84] ss:$16 sps:$4 sm:$0xff]  }
 0x235   :  { %1749 = vmatprep.subr.bf16.mxu0 %v18997_v20  ;;  %1790 = vmatprep.subr.bf16.mxu1 %v18151_v31  ;;  %v18165_v30 = vld [vmem:[%s23416_s5 + $0x24] ss:$16 sps:$4 sm:$0xff]   ;;  %v18166_v31 = vld [vmem:[%s23416_s5 + $0x2c] ss:$16 sps:$4 sm:$0xff]  }
 0x238   :  { %1750 = vmatpush1.bf16.msra.mxu0 %v19006_v28  ;;  %1791 = vmatpush1.bf16.msra.mxu1 %v18152_v22  ;;  %v18168_v22 = vld [vmem:[%s23416_s5 + $0x28] ss:$16 sps:$4 sm:$0xff]  }
 0x239   :  { %1751 = vmatprep.subr.bf16.mxu0 %v19015_v17  ;;  %1792 = vmatprep.subr.bf16.mxu1 %v18153_v37  ;;  %v18169_v37 = vld [vmem:[%s23416_s5 + $0x44] ss:$16 sps:$4 sm:$0xff]  }
 0x23c   :  { %1752 = vmatpush1.bf16.msra.mxu0 %v19024_v33  ;;  %1793 = vmatpush1.bf16.msra.mxu1 %v18154_v32  ;;  %v18170_v32 = vld [vmem:[%s23416_s5 + $0x4c] ss:$16 sps:$4 sm:$0xff]  }
 0x23d   :  { %1753 = vmatprep.subr.bf16.mxu0 %v19033_v38  ;;  %1794 = vmatprep.subr.bf16.mxu1 %v18155_v25  ;;  %v18171_v25 = vld [vmem:[%s23416_s5 + $0x40] ss:$16 sps:$4 sm:$0xff]  }
 0x240   :  { %1754 = vmatpush1.bf16.msra.mxu0 %v19042_v36  ;;  %1795 = vmatpush1.bf16.msra.mxu1 %v18156_v51  ;;  %v18172_v51 = vld [vmem:[%s23416_s5 + $0x48] ss:$16 sps:$4 sm:$0xff]  }
 0x241   :  { %1755 = vmatprep.subr.bf16.mxu0 %v19051_v50  ;;  %1796 = vmatprep.subr.bf16.mxu1 %v18157_v53  ;;  %v18173_v53 = vld [vmem:[%s23416_s5 + $0x64] ss:$16 sps:$4 sm:$0xff]  }
 0x244   :  { %1756 = vmatpush1.bf16.msra.mxu0 %v19060_v49  ;;  %1797 = vmatpush1.bf16.msra.mxu1 %v18158_v55  ;;  %v18174_v55 = vld [vmem:[%s23416_s5 + $0x6c] ss:$16 sps:$4 sm:$0xff]  }
 0x245   :  { %1757 = vmatprep.subr.bf16.mxu0 %v19069_v54  ;;  %1798 = vmatprep.subr.bf16.mxu1 %v18159_v57  ;;  %v18175_v57 = vld [vmem:[%s23416_s5 + $0x60] ss:$16 sps:$4 sm:$0xff]  }
 0x248   :  { %1758 = vmatpush1.bf16.msra.mxu0 %v19078_v56  ;;  %1799 = vmatpush1.bf16.msra.mxu1 %v18160_v34  ;;  %v18176_v34 = vld [vmem:[%s23416_s5 + $0x68] ss:$16 sps:$4 sm:$0xff]  }
 0x249   :  { %1985 = vmatprep.subr.bf16.mxu0 %v18161_v24  ;;  %2026 = vmatprep.subr.bf16.mxu1 %v18162_v18  ;;  %v18177_v24 = vld [vmem:[%s23416_s5 + $0x84] ss:$16 sps:$4 sm:$0xff]   ;;  %v18178_v18 = vld [vmem:[%s23416_s5 + $0x8c] ss:$16 sps:$4 sm:$0xff]  }
 0x24b   :  { %1776 = vmatmul.mubr.bf16.vlgmr.msra.gmra.mrb[28].mxu0 %v18961_v52  ;;  %1817 = vmatmul.mubr.bf16.vlgmr.msra.gmra.mrb[20].mxu1 %v18961_v52  ;;  %v18167_v52 = vld [vmem:[%s23416_s5 + $0x20] ss:$16 sps:$4 sm:$0xff]  }
 0x24c   :  { %1986 = vmatpush1.bf16.msra.mxu0 %v18163_v35  ;;  %2027 = vmatpush1.bf16.msra.mxu1 %v18164_v27  ;;  %v18179_v35 = vld [vmem:[%s23416_s5 + $0x80] ss:$16 sps:$4 sm:$0xff]   ;;  %v18180_v27 = vld [vmem:[%s23416_s5 + $0x88] ss:$16 sps:$4 sm:$0xff]  }
 0x24d   :  { %1987 = vmatprep.subr.bf16.mxu0 %v18165_v30  ;;  %2028 = vmatprep.subr.bf16.mxu1 %v18166_v31  ;;  %v19152_v30 = vpop.f32.mrb[20].mxu0  ;;  %v18181_v31 = vld [vmem:[%s23416_s5 + $0xa4] ss:$16 sps:$4 sm:$0xff]  }
 0x24e   :  { %2017 = vmatprep.mubr.bf16.mxu0 %v23427_v1  ;;  %2058 = vmatprep.mubr.bf16.mxu1 %v23427_v1 }
 0x250   :  { %1988 = vmatpush1.bf16.msra.mxu0 %v18167_v52  ;;  %2029 = vmatpush1.bf16.msra.mxu1 %v18168_v22  ;;  %v18182_v52 = vld [vmem:[%s23416_s5 + $0xac] ss:$16 sps:$4 sm:$0xff]   ;;  %v19160_v22 = vpop.f32.mrb[21].mxu0 }
 0x251   :  { %1989 = vmatprep.subr.bf16.mxu0 %v18169_v37  ;;  %2030 = vmatprep.subr.bf16.mxu1 %v18170_v32  ;;  %v1180_v37 = vpop.f32.mrb[22].mxu0 }
 0x252   :  { %v1181_v32 = vpop.f32.mrb[23].mxu0  ;;  %v18190_v37 = vld [vmem:[%s23416_s5 + $0xec] ss:$16 sps:$4 sm:$0xff]  }
 0x253   :  { %v18191_v32 = vld [vmem:[%s23416_s5 + $0xe0] ss:$16 sps:$4 sm:$0xff]  }
 0x254   :  { %1990 = vmatpush1.bf16.msra.mxu0 %v18171_v25  ;;  %2031 = vmatpush1.bf16.msra.mxu1 %v18172_v51  ;;  %v19162_v25 = vpop.f32.mrb[12].mxu1  ;;  %v18183_v51 = vld [vmem:[%s23416_s5 + $0xa0] ss:$16 sps:$4 sm:$0xff]  }
 0x255   :  { %1991 = vmatprep.subr.bf16.mxu0 %v18173_v53  ;;  %2032 = vmatprep.subr.bf16.mxu1 %v18174_v55  ;;  %v18184_v53 = vld [vmem:[%s23416_s5 + $0xa8] ss:$16 sps:$4 sm:$0xff]   ;;  %v19170_v55 = vpop.f32.mrb[13].mxu1 }
 0x258   :  { %1992 = vmatpush1.bf16.msra.mxu0 %v18175_v57  ;;  %2033 = vmatpush1.bf16.msra.mxu1 %v18176_v34  ;;  %v18185_v57 = vld [vmem:[%s23416_s5 + $0xc4] ss:$16 sps:$4 sm:$0xff]   ;;  %v18186_v34 = vld [vmem:[%s23416_s5 + $0xcc] ss:$16 sps:$4 sm:$0xff]  }
 0x259   :  { %1993 = vmatprep.subr.bf16.mxu0 %v18177_v24  ;;  %2034 = vmatprep.subr.bf16.mxu1 %v18178_v18  ;;  %v1221_v24 = vpop.f32.mrb[14].mxu1 }
 0x25a   :  { %v1222_v18 = vpop.f32.mrb[15].mxu1  ;;  %v18196_v24 = vld [vmem:[%s23417_s6 + $0x108] ss:$16 sps:$4 sm:$0xff]  }
 0x25b   :  { %v18197_v18 = vld [vmem:[%s23417_s6 + $0x124] ss:$16 sps:$4 sm:$0xff]  }
 0x25c   :  { %1994 = vmatpush1.bf16.msra.mxu0 %v18179_v35  ;;  %2035 = vmatpush1.bf16.msra.mxu1 %v18180_v27  ;;  %v18187_v35 = vld [vmem:[%s23416_s5 + $0xc0] ss:$16 sps:$4 sm:$0xff]   ;;  %v18188_v27 = vld [vmem:[%s23416_s5 + $0xc8] ss:$16 sps:$4 sm:$0xff]  }
 0x25d   :  { %1995 = vmatprep.subr.bf16.mxu0 %v18181_v31  ;;  %2036 = vmatprep.subr.bf16.mxu1 %v18182_v52  ;;  %v300_v31 = vmul.f32 0.5, %v18652_v60  ;;  %v18189_v52 = vld [vmem:[%s23416_s5 + $0xe4] ss:$16 sps:$4 sm:$0xff]  }
 0x25f   :  { %v1517_v60 = vpack.c.bf16 %v300_v31, %v300_v31  ;;  %v18200_v31 = vld [vmem:[%s23417_s6 + $0x128] ss:$16 sps:$4 sm:$0xff]  }
 0x260   :  { %1996 = vmatpush1.bf16.msra.mxu0 %v18183_v51  ;;  %2037 = vmatpush1.bf16.msra.mxu1 %v18184_v53  ;;  %v18192_v51 = vld [vmem:[%s23416_s5 + $0xe8] ss:$16 sps:$4 sm:$0xff]   ;;  %v18193_v53 = vld [vmem:[%s23417_s6 + $0x104] ss:$16 sps:$4 sm:$0xff]  }
 0x261   :  { %1997 = vmatprep.subr.bf16.mxu0 %v18185_v57  ;;  %2038 = vmatprep.subr.bf16.mxu1 %v18186_v34  ;;  %v18194_v57 = vld [vmem:[%s23417_s6 + $0x10c] ss:$16 sps:$4 sm:$0xff]   ;;  %v18195_v34 = vld [vmem:[%s23417_s6 + $0x100] ss:$16 sps:$4 sm:$0xff]  }
 0x264   :  { %1998 = vmatpush1.bf16.msra.mxu0 %v18187_v35  ;;  %2039 = vmatpush1.bf16.msra.mxu1 %v18188_v27  ;;  %v18198_v35 = vld [vmem:[%s23417_s6 + $0x12c] ss:$16 sps:$4 sm:$0xff]   ;;  %v18199_v27 = vld [vmem:[%s23417_s6 + $0x120] ss:$16 sps:$4 sm:$0xff]  }
 0x265   :  { %1999 = vmatprep.subr.bf16.mxu0 %v18189_v52  ;;  %2040 = vmatprep.subr.bf16.mxu1 %v18190_v37  ;;  %v18201_v52 = vld [vmem:[%s23417_s6 + $0x144] ss:$16 sps:$4 sm:$0xff]   ;;  %v18202_v37 = vld [vmem:[%s23417_s6 + $0x14c] ss:$16 sps:$4 sm:$0xff]  }
 0x268   :  { %2000 = vmatpush1.bf16.msra.mxu0 %v18191_v32  ;;  %2041 = vmatpush1.bf16.msra.mxu1 %v18192_v51  ;;  %v18203_v32 = vld [vmem:[%s23417_s6 + $0x140] ss:$16 sps:$4 sm:$0xff]   ;;  %v18204_v51 = vld [vmem:[%s23417_s6 + $0x148] ss:$16 sps:$4 sm:$0xff]  }
 0x269   :  { %2341 = vmatprep.subr.bf16.mxu0 %v18193_v53  ;;  %2382 = vmatprep.subr.bf16.mxu1 %v18194_v57  ;;  %v18206_v53 = vld [vmem:[%s23417_s6 + $0x16c] ss:$16 sps:$4 sm:$0xff]   ;;  %v18207_v57 = vld [vmem:[%s23417_s6 + $0x160] ss:$16 sps:$4 sm:$0xff]  }
 0x26b   :  { %2018 = vmatmul.mubr.bf16.vlgmr.msra.gmra.mrb[32].mxu0 %v1517_v60  ;;  %2059 = vmatmul.mubr.bf16.vlgmr.msra.gmra.mrb[24].mxu1 %v1517_v60  ;;  %v18205_v60 = vld [vmem:[%s23417_s6 + $0x164] ss:$16 sps:$4 sm:$0xff]  }
 0x26c   :  { %2342 = vmatpush1.bf16.msra.mxu0 %v18195_v34  ;;  %2383 = vmatpush1.bf16.msra.mxu1 %v18196_v24  ;;  %v18208_v34 = vld [vmem:[%s23417_s6 + $0x168] ss:$16 sps:$4 sm:$0xff]   ;;  %v18209_v24 = vld [vmem:[%s23417_s6 + $0x184] ss:$16 sps:$4 sm:$0xff]  }
 0x26d   :  { %2343 = vmatprep.subr.bf16.mxu0 %v18197_v18  ;;  %2384 = vmatprep.subr.bf16.mxu1 %v18198_v35  ;;  %v18210_v18 = vld [vmem:[%s23417_s6 + $0x18c] ss:$16 sps:$4 sm:$0xff]   ;;  %v18211_v35 = vld [vmem:[%s23417_s6 + $0x180] ss:$16 sps:$4 sm:$0xff]  }
 0x26e   :  { %2373 = vmatprep.mubr.bf16.mxu0 %v23427_v1  ;;  %2414 = vmatprep.mubr.bf16.mxu1 %v23427_v1 }
 0x270   :  { %2344 = vmatpush1.bf16.msra.mxu0 %v18199_v27  ;;  %2385 = vmatpush1.bf16.msra.mxu1 %v18200_v31  ;;  %v18212_v27 = vld [vmem:[%s23417_s6 + $0x188] ss:$16 sps:$4 sm:$0xff]   ;;  %v18213_v31 = vld [vmem:[%s23417_s6 + $0x1a4] ss:$16 sps:$4 sm:$0xff]  }
 0x271   :  { %2345 = vmatprep.subr.bf16.mxu0 %v18201_v52  ;;  %2386 = vmatprep.subr.bf16.mxu1 %v18202_v37  ;;  %v18214_v52 = vld [vmem:[%s23417_s6 + $0x1ac] ss:$16 sps:$4 sm:$0xff]   ;;  %v18215_v37 = vld [vmem:[%s23417_s6 + $0x1a0] ss:$16 sps:$4 sm:$0xff]  }
 0x274   :  { %2346 = vmatpush1.bf16.msra.mxu0 %v18203_v32  ;;  %2387 = vmatpush1.bf16.msra.mxu1 %v18204_v51  ;;  %v18216_v32 = vld [vmem:[%s23417_s6 + $0x1a8] ss:$16 sps:$4 sm:$0xff]   ;;  %v18217_v51 = vld [vmem:[%s23417_s6 + $0x1c4] ss:$16 sps:$4 sm:$0xff]  }
 0x275   :  { %2347 = vmatprep.subr.bf16.mxu0 %v18205_v60  ;;  %2388 = vmatprep.subr.bf16.mxu1 %v18206_v53  ;;  %v18218_v60 = vld [vmem:[%s23417_s6 + $0x1c0] ss:$16 sps:$4 sm:$0xff]  }
 0x278   :  { %2348 = vmatpush1.bf16.msra.mxu0 %v18207_v57  ;;  %2389 = vmatpush1.bf16.msra.mxu1 %v18208_v34 }
 0x279   :  { %2349 = vmatprep.subr.bf16.mxu0 %v18209_v24  ;;  %2390 = vmatprep.subr.bf16.mxu1 %v18210_v18 }
 0x27c   :  { %2350 = vmatpush1.bf16.msra.mxu0 %v18211_v35  ;;  %2391 = vmatpush1.bf16.msra.mxu1 %v18212_v27 }
 0x27d   :  { %2351 = vmatprep.subr.bf16.mxu0 %v18213_v31  ;;  %2392 = vmatprep.subr.bf16.mxu1 %v18214_v52 }
 0x280   :  { %2352 = vmatpush1.bf16.msra.mxu0 %v18215_v37  ;;  %2393 = vmatpush1.bf16.msra.mxu1 %v18216_v32 }
 0x281   :  { %2353 = vmatprep.subr.bf16.mxu0 %v18217_v51  ;;  %2394 = vmatprep.subr.bf16.mxu1 %v18733_v40  ;;  %v14041_v40 = vld [vmem:[%s23418_s7 + $0x4] sm:$0xf] }
 0x282   :  { %v1472_v53 = vrot.slane %v14041_v40, %v18939_v23  ;;  %v1480_v27 = vrot.slane %v14041_v40, %v18947_v29 }
 0x284   :  { %2354 = vmatpush1.bf16.msra.mxu0 %v18218_v60  ;;  %2395 = vmatpush1.bf16.msra.mxu1 %v18738_v41 }
 0x285   :  { %2355 = vmatprep.subr.bf16.mxu0 %v18744_v42  ;;  %2396 = vmatprep.subr.bf16.mxu1 %v18756_v45  ;;  %v1476_v42 = vrot.slane %v14041_v40, %v18944_v26 }
 0x288   :  { %2356 = vmatpush1.bf16.msra.mxu0 %v18750_v43  ;;  %2397 = vmatpush1.bf16.msra.mxu1 %v18762_v46 }
 0x289   :  { %2583 = vmatprep.subr.bf16.mxu0 %v18770_v47  ;;  %2624 = vmatprep.subr.bf16.mxu1 %v18775_v48 }
 0x2fe   :  { %v1418_v57 = vpop.f32.mrb[24].mxu0  ;;  %v1459_v41 = vpop.f32.mrb[16].mxu1 }
 0x2ff   :  { %v1419_v45 = vadd.f32 %v1418_v57, %v19152_v30  ;;  %v1460_v43 = vadd.f32 %v1459_v41, %v19162_v25  ;;  %v1420_v34 = vpop.f32.mrb[25].mxu0  ;;  %v1461_v46 = vpop.f32.mrb[17].mxu1  ;;  %v1484_v25 = vrot.slane %v14041_v40, %v18955_v44 }
 0x300   :  { %v1421_v47 = vadd.f32 %v1420_v34, %v19160_v22  ;;  %v1462_v48 = vadd.f32 %v1461_v46, %v19170_v55  ;;  %v1422_v24 = vpop.f32.mrb[26].mxu0  ;;  %v1463_v18 = vpop.f32.mrb[18].mxu1 }
 0x301   :  { %v1489_v35 = vadd.f32 %v1472_v53, %v1419_v45  ;;  %v1423_v31 = vpop.f32.mrb[27].mxu0  ;;  %v1464_v52 = vpop.f32.mrb[19].mxu1  ;;  %v1491_v30 = vadd.f32 %v1480_v27, %v1460_v43 }
 0x302   :  { %v1490_v37 = vadd.f32 %v1476_v42, %v1421_v47  ;;  %v1492_v60 = vadd.f32 %v1484_v25, %v1462_v48 }
 0x303   :  { %v1493_v32 = vmul.f32 0.5, %v1489_v35 }
 0x304   :  { %v1497_v51 = vmul.f32 0.5, %v1490_v37  ;;  %v1502_v22 = vmul.f32 0.5, %v1492_v60 }
 0x305   :  { %17949 = vtanh.f32 %v1493_v32 }
 0x306   :  { %17951 = vtanh.f32 %v1497_v51 }
 0x307   :  { %17953 = vtanh.f32 %v1491_v30 }
 0x308   :  { %17955 = vtanh.f32 %v1502_v22  ;;  %v18219_v22 = vld [vmem:[%s23416_s5 + $0x100] ss:$16 sps:$4 sm:$0xff]  }
 0x30f   :  { %v17950_v57 = vpop.eup %17949 }
 0x310   :  { %v17952_v55 = vpop.eup %17951  ;;  %v1495_v41 = vmul.f32 0.5, %v17950_v57  ;;  %v18220_v57 = vld [vmem:[%s23416_s5 + $0x108] ss:$16 sps:$4 sm:$0xff]  }
 0x311   :  { %v1499_v34 = vmul.f32 0.5, %v17952_v55  ;;  %v17954_v45 = vpop.eup %17953  ;;  %v18221_v55 = vld [vmem:[%s23416_s5 + $0x124] ss:$16 sps:$4 sm:$0xff]  }
 0x312   :  { %v1496_v53 = vadd.f32 0.5, %v1495_v41  ;;  %v17956_v43 = vpop.eup %17955  ;;  %v18222_v41 = vld [vmem:[%s23416_s5 + $0x12c] ss:$16 sps:$4 sm:$0xff]  }
 0x313   :  { %v1500_v46 = vadd.f32 0.5, %v1499_v34  ;;  %v1504_v40 = vmul.f32 0.5, %v17956_v43  ;;  %v18223_v34 = vld [vmem:[%s23416_s5 + $0x120] ss:$16 sps:$4 sm:$0xff]  }
 0x314   :  { %v1507_v24 = vmul.f32 %v17954_v45, %v1496_v53  ;;  %v18224_v53 = vld [vmem:[%s23416_s5 + $0x128] ss:$16 sps:$4 sm:$0xff]   ;;  %v18225_v45 = vld [vmem:[%s23416_s5 + $0x144] ss:$16 sps:$4 sm:$0xff]   ;;  %v2067_v43 = vld [vmem:[%s23418_s7] sm:$0xf] }
 0x315   :  { %v1506_v42 = vmul.f32 0.0, %v1500_v46  ;;  %v1505_v51 = vadd.f32 0.5, %v1504_v40  ;;  %v18226_v46 = vld [vmem:[%s23416_s5 + $0x14c] ss:$16 sps:$4 sm:$0xff]  }
 0x317   :  { %v19296_v47 = vadd.f32 %v1507_v24, %v1506_v42  ;;  %v18227_v24 = vld [vmem:[%s23416_s5 + $0x140] ss:$16 sps:$4 sm:$0xff]   ;;  %v18228_v42 = vld [vmem:[%s23416_s5 + $0x148] ss:$16 sps:$4 sm:$0xff]  }
 0x319   :  { %17957 = vtanh.f32 %v19296_v47 }
 0x31e   :  { %v1777_v18 = vpop.f32.mrb[28].mxu0  ;;  %v1818_v35 = vpop.f32.mrb[20].mxu1 }
 0x31f   :  { %v1779_v48 = vpop.f32.mrb[29].mxu0  ;;  %v1820_v27 = vpop.f32.mrb[21].mxu1 }
 0x320   :  { %v1781_v31 = vpop.f32.mrb[30].mxu0  ;;  %v1822_v52 = vpop.f32.mrb[22].mxu1 }
 0x321   :  { %v1782_v37 = vpop.f32.mrb[31].mxu0  ;;  %v1823_v32 = vpop.f32.mrb[23].mxu1 }
 0x323   :  { %v17958_v30 = vpop.eup %17957 }
 0x324   :  { %v1510_v25 = vmul.f32 %v17958_v30, %v1505_v51 }
 0x326   :  { %v2148_v60 = vpack.c.bf16 %v1510_v25, %v1510_v25 }
 0x328   :  { %2374 = vmatmul.mubr.bf16.vlgmr.msra.gmra.mrb[36].mxu0 %v2148_v60  ;;  %2415 = vmatmul.mubr.bf16.vlgmr.msra.gmra.mrb[28].mxu1 %v2148_v60 }
 0x329   :  { %2584 = vmatpush1.bf16.msra.mxu0 %v18219_v22  ;;  %2625 = vmatpush1.bf16.msra.mxu1 %v18220_v57 }
 0x32a   :  { %2585 = vmatprep.subr.bf16.mxu0 %v18221_v55  ;;  %2626 = vmatprep.subr.bf16.mxu1 %v18222_v41 }
 0x32b   :  { %2615 = vmatprep.mubr.bf16.mxu0 %v23427_v1  ;;  %2656 = vmatprep.mubr.bf16.mxu1 %v23427_v1 }
 0x32d   :  { %2586 = vmatpush1.bf16.msra.mxu0 %v18223_v34  ;;  %2627 = vmatpush1.bf16.msra.mxu1 %v18224_v53 }
 0x32e   :  { %2587 = vmatprep.subr.bf16.mxu0 %v18225_v45  ;;  %2628 = vmatprep.subr.bf16.mxu1 %v18226_v46  ;;  %v19377_v46 = vld [vmem:[%s23417_s6] ss:$16 sps:$4 sm:$0xff]  }
 0x331   :  { %2588 = vmatpush1.bf16.msra.mxu0 %v18227_v24  ;;  %2629 = vmatpush1.bf16.msra.mxu1 %v18228_v42  ;;  %v19382_v24 = vld [vmem:[%s23417_s6 + $0x8] ss:$16 sps:$4 sm:$0xff]   ;;  %v19387_v42 = vld [vmem:[%s23417_s6 + $0x24] ss:$16 sps:$4 sm:$0xff]  }
 0x332   :  { %2589 = vmatprep.subr.bf16.mxu0 %v18815_v58  ;;  %2630 = vmatprep.subr.bf16.mxu1 %v18820_v59  ;;  %v2072_v58 = vrot.slane %v2067_v43, %v18939_v23 }
 0x335   :  { %2590 = vmatpush1.bf16.msra.mxu0 %v18825_v61  ;;  %2631 = vmatpush1.bf16.msra.mxu1 %v18830_v62  ;;  %v2076_v62 = vrot.slane %v2067_v43, %v18944_v26 }
 0x336   :  { %2591 = vmatprep.subr.bf16.mxu0 %v18839_v63  ;;  %2632 = vmatprep.subr.bf16.mxu1 %v18844_v0 }
 0x339   :  { %2592 = vmatpush1.bf16.msra.mxu0 %v18849_v2  ;;  %2633 = vmatpush1.bf16.msra.mxu1 %v18854_v3 }
 0x33a   :  { %2593 = vmatprep.subr.bf16.mxu0 %v18867_v5  ;;  %2634 = vmatprep.subr.bf16.mxu1 %v18878_v7 }
 0x33d   :  { %2594 = vmatpush1.bf16.msra.mxu0 %v18862_v4  ;;  %2635 = vmatpush1.bf16.msra.mxu1 %v18873_v6  ;;  %v2080_v4 = vrot.slane %v2067_v43, %v18947_v29 }
 0x33e   :  { %v2019_v59 = vpop.f32.mrb[32].mxu0  ;;  %v2060_v61 = vpop.f32.mrb[24].mxu1  ;;  %2595 = vmatprep.subr.bf16.mxu0 %v18883_v8  ;;  %2636 = vmatprep.subr.bf16.mxu1 %v18889_v9  ;;  %v19358_v9 = vld [vmem:[%s23417_s6 + $0x4] ss:$16 sps:$4 sm:$0xff]  }
 0x33f   :  { %v2020_v63 = vadd.f32 %v2019_v59, %v1777_v18  ;;  %v2061_v0 = vadd.f32 %v2060_v61, %v1818_v35  ;;  %v2021_v2 = vpop.f32.mrb[33].mxu0  ;;  %v2062_v3 = vpop.f32.mrb[25].mxu1  ;;  %v19363_v18 = vld [vmem:[%s23417_s6 + $0xc] ss:$16 sps:$4 sm:$0xff]   ;;  %v19404_v59 = vld [vmem:[%s23417_s6 + $0x28] ss:$16 sps:$4 sm:$0xff]  }
 0x340   :  { %v2022_v5 = vadd.f32 %v2021_v2, %v1779_v48  ;;  %v2063_v7 = vadd.f32 %v2062_v3, %v1820_v27  ;;  %v2023_v40 = vpop.f32.mrb[34].mxu0  ;;  %v2064_v31 = vpop.f32.mrb[26].mxu1  ;;  %v19411_v61 = vld [vmem:[%s23417_s6 + $0x44] ss:$16 sps:$4 sm:$0xff]   ;;  %v19437_v2 = vld [vmem:[%s23417_s6 + $0x6c] ss:$16 sps:$4 sm:$0xff]  }
 0x341   :  { %v2089_v52 = vadd.f32 %v2072_v58, %v2020_v63  ;;  %v2024_v6 = vpop.f32.mrb[35].mxu0  ;;  %v2065_v37 = vpop.f32.mrb[27].mxu1  ;;  %2596 = vmatpush1.bf16.msra.mxu0 %v18895_v10  ;;  %2637 = vmatpush1.bf16.msra.mxu1 %v18900_v11  ;;  %v2091_v10 = vadd.f32 %v2080_v4, %v2061_v0  ;;  %v2084_v11 = vrot.slane %v2067_v43, %v18955_v44  ;;  %v19392_v43 = vld [vmem:[%s23417_s6 + $0x2c] ss:$16 sps:$4 sm:$0xff]   ;;  %v19399_v58 = vld [vmem:[%s23417_s6 + $0x20] ss:$16 sps:$4 sm:$0xff]  }
 0x342   :  { %v2090_v8 = vadd.f32 %v2076_v62, %v2022_v5  ;;  %2597 = vmatprep.subr.bf16.mxu0 %v18905_v12  ;;  %2638 = vmatprep.subr.bf16.mxu1 %v18911_v13  ;;  %v19416_v62 = vld [vmem:[%s23417_s6 + $0x4c] ss:$16 sps:$4 sm:$0xff]   ;;  %v19425_v63 = vld [vmem:[%s23417_s6 + $0x40] ss:$16 sps:$4 sm:$0xff]   ;;  %v19430_v0 = vld [vmem:[%s23417_s6 + $0x48] ss:$16 sps:$4 sm:$0xff]  }
 0x343   :  { %v2093_v35 = vmul.f32 0.5, %v2089_v52  ;;  %v2092_v12 = vadd.f32 %v2084_v11, %v2063_v7  ;;  %v19444_v3 = vld [vmem:[%s23417_s6 + $0x68] ss:$16 sps:$4 sm:$0xff]   ;;  %v19451_v5 = vld [vmem:[%s23417_s6 + $0x8c] ss:$16 sps:$4 sm:$0xff]  }
 0x344   :  { %v2097_v48 = vmul.f32 0.5, %v2090_v8  ;;  %v19458_v7 = vld [vmem:[%s23417_s6 + $0x88] ss:$16 sps:$4 sm:$0xff]   ;;  %v19536_v31 = vld [vmem:[%s23416_s5 + $0x2c] ss:$16 sps:$4 sm:$0xff]  }
 0x345   :  { %17959 = vtanh.f32 %v2093_v35  ;;  %2598 = vmatpush1.bf16.msra.mxu0 %v18919_v15  ;;  %2639 = vmatpush1.bf16.msra.mxu1 %v18924_v16  ;;  %v2102_v13 = vmul.f32 0.5, %v2092_v12  ;;  %v19524_v40 = vld [vmem:[%s23416_s5 + $0x8] ss:$16 sps:$4 sm:$0xff]   ;;  %v19543_v52 = vld [vmem:[%s23416_s5 + $0x20] ss:$16 sps:$4 sm:$0xff]  }
 0x346   :  { %17961 = vtanh.f32 %v2097_v48  ;;  %2941 = vmatprep.subr.bf16.mxu0 %v19358_v9  ;;  %2982 = vmatprep.subr.bf16.mxu1 %v19363_v18  ;;  %v19548_v4 = vld [vmem:[%s23416_s5 + $0x28] ss:$16 sps:$4 sm:$0xff]   ;;  %v19555_v6 = vld [vmem:[%s23416_s5 + $0x44] ss:$16 sps:$4 sm:$0xff]   ;;  %v19560_v37 = vld [vmem:[%s23416_s5 + $0x4c] ss:$16 sps:$4 sm:$0xff]  }
 0x347   :  { %17963 = vtanh.f32 %v2091_v10  ;;  %23510 = vst [vmem:[#allocation13_spill] sm:$0xff] %v19560_v37  ;;  %v19569_v8 = vld [vmem:[%s23416_s5 + $0x40] ss:$16 sps:$4 sm:$0xff]   ;;  %v19574_v35 = vld [vmem:[%s23416_s5 + $0x48] ss:$16 sps:$4 sm:$0xff]  }
 0x348   :  { %17965 = vtanh.f32 %v2102_v13  ;;  %23511 = vst [vmem:[#allocation14_spill] sm:$0xff] %v19569_v8  ;;  %23512 = vst [vmem:[#allocation15_spill] sm:$0xff] %v19574_v35  ;;  %v19581_v48 = vld [vmem:[%s23416_s5 + $0x64] ss:$16 sps:$4 sm:$0xff]   ;;  %v19586_v10 = vld [vmem:[%s23416_s5 + $0x6c] ss:$16 sps:$4 sm:$0xff]  }
 0x349   :  { %23513 = vst [vmem:[#allocation16_spill] sm:$0xff] %v19581_v48  ;;  %23514 = vst [vmem:[#allocation17_spill] sm:$0xff] %v19586_v10  ;;  %v19593_v11 = vld [vmem:[%s23416_s5 + $0x60] ss:$16 sps:$4 sm:$0xff]   ;;  %v19598_v12 = vld [vmem:[%s23416_s5 + $0x68] ss:$16 sps:$4 sm:$0xff]  }
 0x34a   :  { %23515 = vst [vmem:[#allocation18_spill] sm:$0xff] %v19593_v11  ;;  %23516 = vst [vmem:[#allocation19_spill] sm:$0xff] %v19598_v12  ;;  %v19605_v13 = vld [vmem:[%s23416_s5 + $0x84] ss:$16 sps:$4 sm:$0xff]  }
 0x34b   :  { %23517 = vst [vmem:[#allocation20_spill] sm:$0xff] %v19605_v13 }
 0x34f   :  { %v17960_v27 = vpop.eup %17959 }
 0x350   :  { %v17962_v32 = vpop.eup %17961  ;;  %v2095_v51 = vmul.f32 0.5, %v17960_v27  ;;  %v19610_v27 = vld [vmem:[%s23416_s5 + $0x8c] ss:$16 sps:$4 sm:$0xff]  }
 0x351   :  { %v2099_v30 = vmul.f32 0.5, %v17962_v32  ;;  %v17964_v60 = vpop.eup %17963  ;;  %23518 = vst [vmem:[#allocation21_spill] sm:$0xff] %v19610_v27  ;;  %v19617_v32 = vld [vmem:[%s23416_s5 + $0x80] ss:$16 sps:$4 sm:$0xff]  }
 0x352   :  { %v2096_v25 = vadd.f32 0.5, %v2095_v51  ;;  %v17966_v55 = vpop.eup %17965  ;;  %23519 = vst [vmem:[#allocation22_spill] sm:$0xff] %v19617_v32  ;;  %v19622_v51 = vld [vmem:[%s23416_s5 + $0x88] ss:$16 sps:$4 sm:$0xff]  }
 0x353   :  { %v2100_v22 = vadd.f32 0.5, %v2099_v30  ;;  %v2104_v41 = vmul.f32 0.5, %v17966_v55  ;;  %23520 = vst [vmem:[#allocation23_spill] sm:$0xff] %v19622_v51  ;;  %v19629_v30 = vld [vmem:[%s23416_s5 + $0xa4] ss:$16 sps:$4 sm:$0xff]  }
 0x354   :  { %v2107_v57 = vmul.f32 %v17964_v60, %v2096_v25  ;;  %23521 = vst [vmem:[#allocation24_spill] sm:$0xff] %v19629_v30  ;;  %v19634_v25 = vld [vmem:[%s23416_s5 + $0xac] ss:$16 sps:$4 sm:$0xff]   ;;  %v19641_v60 = vld [vmem:[%s23416_s5 + $0xa0] ss:$16 sps:$4 sm:$0xff]  }
 0x355   :  { %v2106_v15 = vmul.f32 %v2100_v22, %v18958_v39  ;;  %v2105_v34 = vadd.f32 0.5, %v2104_v41  ;;  %23522 = vst [vmem:[#allocation25_spill] sm:$0xff] %v19634_v25  ;;  %23523 = vst [vmem:[#allocation26_spill] sm:$0xff] %v19641_v60  ;;  %v19646_v22 = vld [vmem:[%s23416_s5 + $0xa8] ss:$16 sps:$4 sm:$0xff]  }
 0x356   :  { %23524 = vst [vmem:[#allocation27_spill] sm:$0xff] %v19646_v22  ;;  %v19665_v55 = vld [vmem:[%s23416_s5 + $0xc0] ss:$16 sps:$4 sm:$0xff]   ;;  %v19670_v41 = vld [vmem:[%s23416_s5 + $0xc8] ss:$16 sps:$4 sm:$0xff]  }
 0x357   :  { %v19371_v16 = vadd.f32 %v2107_v57, %v2106_v15  ;;  %v19653_v57 = vld [vmem:[%s23416_s5 + $0xc4] ss:$16 sps:$4 sm:$0xff]   ;;  %v19658_v15 = vld [vmem:[%s23416_s5 + $0xcc] ss:$16 sps:$4 sm:$0xff]   ;;  %23527 = vst [vmem:[#allocation30_spill] sm:$0xff] %v19665_v55  ;;  %23528 = vst [vmem:[#allocation31_spill] sm:$0xff] %v19670_v41 }
 0x358   :  { %23525 = vst [vmem:[#allocation28_spill] sm:$0xff] %v19653_v57  ;;  %23526 = vst [vmem:[#allocation29_spill] sm:$0xff] %v19658_v15 }
 0x359   :  { %17967 = vtanh.f32 %v19371_v16 }
 0x363   :  { %v17968_v53 = vpop.eup %17967 }
 0x364   :  { %v2110_v45 = vmul.f32 %v17968_v53, %v2105_v34  ;;  %v19677_v34 = vld [vmem:[%s23416_s5 + $0xe4] ss:$16 sps:$4 sm:$0xff]   ;;  %v19682_v53 = vld [vmem:[%s23416_s5 + $0xec] ss:$16 sps:$4 sm:$0xff]  }
 0x365   :  { %23529 = vst [vmem:[#allocation32_spill] sm:$0xff] %v19677_v34  ;;  %23530 = vst [vmem:[#allocation33_spill] sm:$0xff] %v19682_v53 }
 0x366   :  { %v2115_v39 = vpack.c.bf16 %v2110_v45, %v2110_v45  ;;  %v19689_v45 = vld [vmem:[%s23416_s5 + $0xe0] ss:$16 sps:$4 sm:$0xff]  }
 0x367   :  { %23531 = vst [vmem:[#allocation34_spill] sm:$0xff] %v19689_v45 }
 0x368   :  { %2616 = vmatmul.mubr.bf16.vlgmr.msra.gmra.mrb[40].mxu0 %v2115_v39  ;;  %2657 = vmatmul.mubr.bf16.vlgmr.msra.gmra.mrb[32].mxu1 %v2115_v39 }
 0x369   :  { %2942 = vmatpush1.bf16.msra.mxu0 %v19377_v46  ;;  %2983 = vmatpush1.bf16.msra.mxu1 %v19382_v24 }
 0x36a   :  { %2943 = vmatprep.subr.bf16.mxu0 %v19387_v42  ;;  %2984 = vmatprep.subr.bf16.mxu1 %v19392_v43 }
 0x36b   :  { %2973 = vmatprep.mubr.bf16.mxu0 %v23427_v1  ;;  %3014 = vmatprep.mubr.bf16.mxu1 %v23427_v1 }
 0x36d   :  { %2944 = vmatpush1.bf16.msra.mxu0 %v19399_v58  ;;  %2985 = vmatpush1.bf16.msra.mxu1 %v19404_v59 }
 0x36e   :  { %2945 = vmatprep.subr.bf16.mxu0 %v19411_v61  ;;  %2986 = vmatprep.subr.bf16.mxu1 %v19416_v62 }
 0x371   :  { %2946 = vmatpush1.bf16.msra.mxu0 %v19425_v63  ;;  %2987 = vmatpush1.bf16.msra.mxu1 %v19430_v0 }
 0x372   :  { %2947 = vmatprep.subr.bf16.mxu0 %v18997_v20  ;;  %2988 = vmatprep.subr.bf16.mxu1 %v19437_v2  ;;  %v19465_v20 = vld [vmem:[%s23417_s6 + $0xac] ss:$16 sps:$4 sm:$0xff]  }
 0x375   :  { %2948 = vmatpush1.bf16.msra.mxu0 %v19006_v28  ;;  %2989 = vmatpush1.bf16.msra.mxu1 %v19444_v3  ;;  %v19472_v28 = vld [vmem:[%s23417_s6 + $0xa8] ss:$16 sps:$4 sm:$0xff]  }
 0x376   :  { %2949 = vmatprep.subr.bf16.mxu0 %v19015_v17  ;;  %2990 = vmatprep.subr.bf16.mxu1 %v19451_v5  ;;  %v19479_v17 = vld [vmem:[%s23417_s6 + $0xcc] ss:$16 sps:$4 sm:$0xff]  }
 0x379   :  { %2950 = vmatpush1.bf16.msra.mxu0 %v19024_v33  ;;  %2991 = vmatpush1.bf16.msra.mxu1 %v19458_v7  ;;  %v19486_v33 = vld [vmem:[%s23417_s6 + $0xc8] ss:$16 sps:$4 sm:$0xff]  }
 0x37a   :  { %2951 = vmatprep.subr.bf16.mxu0 %v19033_v38  ;;  %2992 = vmatprep.subr.bf16.mxu1 %v19465_v20  ;;  %v19493_v38 = vld [vmem:[%s23417_s6 + $0xec] ss:$16 sps:$4 sm:$0xff]  }
 0x37d   :  { %2952 = vmatpush1.bf16.msra.mxu0 %v19042_v36  ;;  %2993 = vmatpush1.bf16.msra.mxu1 %v19472_v28  ;;  %v19500_v36 = vld [vmem:[%s23417_s6 + $0xe8] ss:$16 sps:$4 sm:$0xff]  }
 0x37e   :  { %2953 = vmatprep.subr.bf16.mxu0 %v19051_v50  ;;  %2994 = vmatprep.subr.bf16.mxu1 %v19479_v17  ;;  %v19507_v50 = vld [vmem:[%s23416_s5 + $0x4] ss:$16 sps:$4 sm:$0xff]  }
 0x381   :  { %2954 = vmatpush1.bf16.msra.mxu0 %v19060_v49  ;;  %2995 = vmatpush1.bf16.msra.mxu1 %v19486_v33  ;;  %v19512_v49 = vld [vmem:[%s23416_s5 + $0xc] ss:$16 sps:$4 sm:$0xff]  }
 0x382   :  { %2955 = vmatprep.subr.bf16.mxu0 %v19069_v54  ;;  %2996 = vmatprep.subr.bf16.mxu1 %v19493_v38  ;;  %v19519_v54 = vld [vmem:[%s23416_s5] ss:$16 sps:$4 sm:$0xff]  }
 0x385   :  { %2956 = vmatpush1.bf16.msra.mxu0 %v19078_v56  ;;  %2997 = vmatpush1.bf16.msra.mxu1 %v19500_v36  ;;  %v19531_v56 = vld [vmem:[%s23416_s5 + $0x24] ss:$16 sps:$4 sm:$0xff]  }
 0x386   :  { %3183 = vmatprep.subr.bf16.mxu0 %v19507_v50  ;;  %3224 = vmatprep.subr.bf16.mxu1 %v19512_v49 }
 0x388   :  { %2974 = vmatmul.mubr.bf16.vlgmr.msra.gmra.mrb[44].mxu0 %v2115_v39  ;;  %3015 = vmatmul.mubr.bf16.vlgmr.msra.gmra.mrb[36].mxu1 %v2115_v39  ;;  %v19694_v39 = vld [vmem:[%s23416_s5 + $0xe8] ss:$16 sps:$4 sm:$0xff]  }
 0x389   :  { %3184 = vmatpush1.bf16.msra.mxu0 %v19519_v54  ;;  %3225 = vmatpush1.bf16.msra.mxu1 %v19524_v40  ;;  %23532 = vst [vmem:[#allocation35_spill] sm:$0xff] %v19694_v39 }
 0x38a   :  { %3185 = vmatprep.subr.bf16.mxu0 %v19531_v56  ;;  %3226 = vmatprep.subr.bf16.mxu1 %v19536_v31 }
 0x38b   :  { %3215 = vmatprep.mubr.bf16.mxu0 %v23427_v1  ;;  %3256 = vmatprep.mubr.bf16.mxu1 %v23427_v1  ;;  %v2715_v1 = vpack.c.bf16 %v301_v21, %v301_v21  ;;  %v19716_v21 = vld [vmem:[%s23417_s6 + $0x100] ss:$16 sps:$4 sm:$0xff]  }
 0x38c   :  { %23536 = vst [vmem:[#allocation38_spill] sm:$0xff] %v19716_v21 }
 0x38d   :  { %3186 = vmatpush1.bf16.msra.mxu0 %v19543_v52  ;;  %3227 = vmatpush1.bf16.msra.mxu1 %v19548_v4 }
 0x38e   :  { %3187 = vmatprep.subr.bf16.mxu0 %v19555_v6  ;;  %3228 = vmatprep.subr.bf16.mxu1 %v19560_v37 }
 0x391   :  { %3188 = vmatpush1.bf16.msra.mxu0 %v19569_v8  ;;  %3229 = vmatpush1.bf16.msra.mxu1 %v19574_v35 }
 0x392   :  { %3189 = vmatprep.subr.bf16.mxu0 %v19581_v48  ;;  %3230 = vmatprep.subr.bf16.mxu1 %v19586_v10 }
 0x395   :  { %3190 = vmatpush1.bf16.msra.mxu0 %v19593_v11  ;;  %3231 = vmatpush1.bf16.msra.mxu1 %v19598_v12 }
 0x396   :  { %3191 = vmatprep.subr.bf16.mxu0 %v19605_v13  ;;  %3232 = vmatprep.subr.bf16.mxu1 %v19610_v27 }
 0x399   :  { %3192 = vmatpush1.bf16.msra.mxu0 %v19617_v32  ;;  %3233 = vmatpush1.bf16.msra.mxu1 %v19622_v51 }
 0x39a   :  { %3193 = vmatprep.subr.bf16.mxu0 %v19629_v30  ;;  %3234 = vmatprep.subr.bf16.mxu1 %v19634_v25 }
 0x39d   :  { %3194 = vmatpush1.bf16.msra.mxu0 %v19641_v60  ;;  %3235 = vmatpush1.bf16.msra.mxu1 %v19646_v22  ;;  %v19898_v60 = vld [vmem:[%s23416_s5 + $0x104] ss:$16 sps:$4 sm:$0xff]  }
 0x39e   :  { %3195 = vmatprep.subr.bf16.mxu0 %v19653_v57  ;;  %3236 = vmatprep.subr.bf16.mxu1 %v19658_v15  ;;  %23566 = vst [vmem:[#allocation68_spill] sm:$0xff] %v19898_v60 }
 0x3a1   :  { %3196 = vmatpush1.bf16.msra.mxu0 %v19665_v55  ;;  %3237 = vmatpush1.bf16.msra.mxu1 %v19670_v41  ;;  %v19706_v41 = vld [vmem:[%s23417_s6 + $0x104] ss:$16 sps:$4 sm:$0xff]  }
 0x3a2   :  { %3197 = vmatprep.subr.bf16.mxu0 %v19677_v34  ;;  %3238 = vmatprep.subr.bf16.mxu1 %v19682_v53  ;;  %23534 = vst [vmem:[#allocation36_spill] sm:$0xff] %v19706_v41 }
 0x3a5   :  { %3198 = vmatpush1.bf16.msra.mxu0 %v19689_v45  ;;  %3239 = vmatpush1.bf16.msra.mxu1 %v19694_v39  ;;  %v19730_v39 = vld [vmem:[%s23417_s6 + $0x124] ss:$16 sps:$4 sm:$0xff]   ;;  %v19735_v45 = vld [vmem:[%s23417_s6 + $0x12c] ss:$16 sps:$4 sm:$0xff]  }
 0x3a6   :  { %3539 = vmatprep.subr.bf16.mxu0 %v19706_v41  ;;  %3580 = vmatprep.subr.bf16.mxu1 %v19711_v14  ;;  %23538 = vst [vmem:[#allocation40_spill] sm:$0xff] %v19730_v39  ;;  %23539 = vst [vmem:[#allocation41_spill] sm:$0xff] %v19735_v45  ;;  %v19740_v41 = vld [vmem:[%s23417_s6 + $0x120] ss:$16 sps:$4 sm:$0xff]   ;;  %v19759_v14 = vld [vmem:[%s23417_s6 + $0x14c] ss:$16 sps:$4 sm:$0xff]  }
 0x3a7   :  { %23540 = vst [vmem:[#allocation42_spill] sm:$0xff] %v19740_v41  ;;  %23543 = vst [vmem:[#allocation45_spill] sm:$0xff] %v19759_v14 }
 0x3a8   :  { %3216 = vmatmul.mubr.bf16.vlgmr.msra.gmra.mrb[48].mxu0 %v2715_v1  ;;  %3257 = vmatmul.mubr.bf16.vlgmr.msra.gmra.mrb[40].mxu1 %v2715_v1  ;;  %v19721_v1 = vld [vmem:[%s23417_s6 + $0x108] ss:$16 sps:$4 sm:$0xff]  }
 0x3a9   :  { %3571 = vmatprep.mubr.bf16.mxu0 %v23533_v19  ;;  %3612 = vmatprep.mubr.bf16.mxu1 %v23533_v19  ;;  %23537 = vst [vmem:[#allocation39_spill] sm:$0xff] %v19721_v1 }
 0x3aa   :  { %3540 = vmatpush1.bf16.msra.mxu0 %v19716_v21  ;;  %3581 = vmatpush1.bf16.msra.mxu1 %v19721_v1  ;;  %v19745_v21 = vld [vmem:[%s23417_s6 + $0x128] ss:$16 sps:$4 sm:$0xff]   ;;  %v19754_v1 = vld [vmem:[%s23417_s6 + $0x144] ss:$16 sps:$4 sm:$0xff]  }
 0x3ab   :  { %23541 = vst [vmem:[#allocation43_spill] sm:$0xff] %v19745_v21  ;;  %3541 = vmatprep.subr.bf16.mxu0 %v19730_v39  ;;  %3582 = vmatprep.subr.bf16.mxu1 %v19735_v45  ;;  %23542 = vst [vmem:[#allocation44_spill] sm:$0xff] %v19754_v1  ;;  %v19764_v39 = vld [vmem:[%s23417_s6 + $0x140] ss:$16 sps:$4 sm:$0xff]   ;;  %v19783_v45 = vld [vmem:[%s23417_s6 + $0x16c] ss:$16 sps:$4 sm:$0xff]  }
 0x3ac   :  { %23544 = vst [vmem:[#allocation46_spill] sm:$0xff] %v19764_v39  ;;  %23547 = vst [vmem:[#allocation49_spill] sm:$0xff] %v19783_v45 }
 0x3ae   :  { %3542 = vmatpush1.bf16.msra.mxu0 %v19740_v41  ;;  %3583 = vmatpush1.bf16.msra.mxu1 %v19745_v21  ;;  %v19769_v41 = vld [vmem:[%s23417_s6 + $0x148] ss:$16 sps:$4 sm:$0xff]   ;;  %v19778_v21 = vld [vmem:[%s23417_s6 + $0x164] ss:$16 sps:$4 sm:$0xff]  }
 0x3af   :  { %23545 = vst [vmem:[#allocation47_spill] sm:$0xff] %v19769_v41  ;;  %3543 = vmatprep.subr.bf16.mxu0 %v19754_v1  ;;  %3584 = vmatprep.subr.bf16.mxu1 %v19759_v14  ;;  %23546 = vst [vmem:[#allocation48_spill] sm:$0xff] %v19778_v21  ;;  %v19788_v1 = vld [vmem:[%s23417_s6 + $0x160] ss:$16 sps:$4 sm:$0xff]   ;;  %v19807_v14 = vld [vmem:[%s23417_s6 + $0x18c] ss:$16 sps:$4 sm:$0xff]  }
 0x3b0   :  { %23548 = vst [vmem:[#allocation50_spill] sm:$0xff] %v19788_v1  ;;  %23551 = vst [vmem:[#allocation53_spill] sm:$0xff] %v19807_v14 }
 0x3b2   :  { %3544 = vmatpush1.bf16.msra.mxu0 %v19764_v39  ;;  %3585 = vmatpush1.bf16.msra.mxu1 %v19769_v41  ;;  %v19793_v39 = vld [vmem:[%s23417_s6 + $0x168] ss:$16 sps:$4 sm:$0xff]   ;;  %v19802_v41 = vld [vmem:[%s23417_s6 + $0x184] ss:$16 sps:$4 sm:$0xff]  }
 0x3b3   :  { %23549 = vst [vmem:[#allocation51_spill] sm:$0xff] %v19793_v39  ;;  %3545 = vmatprep.subr.bf16.mxu0 %v19778_v21  ;;  %3586 = vmatprep.subr.bf16.mxu1 %v19783_v45  ;;  %23550 = vst [vmem:[#allocation52_spill] sm:$0xff] %v19802_v41  ;;  %v19812_v21 = vld [vmem:[%s23417_s6 + $0x180] ss:$16 sps:$4 sm:$0xff]  }
 0x3b4   :  { %23552 = vst [vmem:[#allocation54_spill] sm:$0xff] %v19812_v21  ;;  %v19831_v45 = vld [vmem:[%s23417_s6 + $0x1a0] ss:$16 sps:$4 sm:$0xff]  }
 0x3b5   :  { %23555 = vst [vmem:[#allocation57_spill] sm:$0xff] %v19831_v45 }
 0x3b6   :  { %3546 = vmatpush1.bf16.msra.mxu0 %v19788_v1  ;;  %3587 = vmatpush1.bf16.msra.mxu1 %v19793_v39  ;;  %v19817_v1 = vld [vmem:[%s23417_s6 + $0x188] ss:$16 sps:$4 sm:$0xff]   ;;  %v19824_v39 = vld [vmem:[%s23417_s6 + $0x1a4] ss:$16 sps:$4 sm:$0xff]  }
 0x3b7   :  { %23553 = vst [vmem:[#allocation55_spill] sm:$0xff] %v19817_v1  ;;  %3547 = vmatprep.subr.bf16.mxu0 %v19802_v41  ;;  %3588 = vmatprep.subr.bf16.mxu1 %v19807_v14  ;;  %23554 = vst [vmem:[#allocation56_spill] sm:$0xff] %v19824_v39  ;;  %v19836_v41 = vld [vmem:[%s23417_s6 + $0x1a8] ss:$16 sps:$4 sm:$0xff]   ;;  %v19841_v14 = vld [vmem:[%s23417_s6 + $0x1ac] ss:$16 sps:$4 sm:$0xff]  }
 0x3b8   :  { %23556 = vst [vmem:[#allocation58_spill] sm:$0xff] %v19836_v41  ;;  %23557 = vst [vmem:[#allocation59_spill] sm:$0xff] %v19841_v14 }
 0x3ba   :  { %3548 = vmatpush1.bf16.msra.mxu0 %v19812_v21  ;;  %3589 = vmatpush1.bf16.msra.mxu1 %v19817_v1  ;;  %v19850_v1 = vld [vmem:[%s23417_s6 + $0x1c4] ss:$16 sps:$4 sm:$0xff]   ;;  %v19855_v21 = vld [vmem:[%s23417_s6 + $0x1cc] ss:$16 sps:$4 sm:$0xff]  }
 0x3bb   :  { %3549 = vmatprep.subr.bf16.mxu0 %v19824_v39  ;;  %3590 = vmatprep.subr.bf16.mxu1 %v19841_v14  ;;  %23558 = vst [vmem:[#allocation60_spill] sm:$0xff] %v19850_v1  ;;  %23559 = vst [vmem:[#allocation61_spill] sm:$0xff] %v19855_v21  ;;  %v19860_v39 = vld [vmem:[%s23417_s6 + $0x1c0] ss:$16 sps:$4 sm:$0xff]  }
 0x3bc   :  { %23560 = vst [vmem:[#allocation62_spill] sm:$0xff] %v19860_v39  ;;  %v19879_v14 = vld [vmem:[%s23417_s6 + $0x1e0] ss:$16 sps:$4 sm:$0xff]  }
 0x3bd   :  { %23563 = vst [vmem:[#allocation65_spill] sm:$0xff] %v19879_v14 }
 0x3be   :  { %3550 = vmatpush1.bf16.msra.mxu0 %v19831_v45  ;;  %3591 = vmatpush1.bf16.msra.mxu1 %v19836_v41  ;;  %v19865_v45 = vld [vmem:[%s23417_s6 + $0x1c8] ss:$16 sps:$4 sm:$0xff]   ;;  %v19872_v41 = vld [vmem:[%s23417_s6 + $0x1e4] ss:$16 sps:$4 sm:$0xff]  }
 0x3bf   :  { %23561 = vst [vmem:[#allocation63_spill] sm:$0xff] %v19865_v45  ;;  %3551 = vmatprep.subr.bf16.mxu0 %v19850_v1  ;;  %3592 = vmatprep.subr.bf16.mxu1 %v19855_v21  ;;  %23562 = vst [vmem:[#allocation64_spill] sm:$0xff] %v19872_v41  ;;  %v19884_v1 = vld [vmem:[%s23417_s6 + $0x1e8] ss:$16 sps:$4 sm:$0xff]   ;;  %v19889_v21 = vld [vmem:[%s23417_s6 + $0x1ec] ss:$16 sps:$4 sm:$0xff]  }
 0x3c0   :  { %23564 = vst [vmem:[#allocation66_spill] sm:$0xff] %v19884_v1  ;;  %23565 = vst [vmem:[#allocation67_spill] sm:$0xff] %v19889_v21 }
 0x3c2   :  { %3552 = vmatpush1.bf16.msra.mxu0 %v19860_v39  ;;  %3593 = vmatpush1.bf16.msra.mxu1 %v19865_v45 }
 0x3c3   :  { %3553 = vmatprep.subr.bf16.mxu0 %v19872_v41  ;;  %3594 = vmatprep.subr.bf16.mxu1 %v19889_v21  ;;  %v19903_v21 = vld [vmem:[%s23416_s5 + $0x10c] ss:$16 sps:$4 sm:$0xff]  }
 0x3c4   :  { %23567 = vst [vmem:[#allocation69_spill] sm:$0xff] %v19903_v21 }
 0x3c6   :  { %3554 = vmatpush1.bf16.msra.mxu0 %v19879_v14  ;;  %3595 = vmatpush1.bf16.msra.mxu1 %v19884_v1 }
 0x3c7   :  { %3781 = vmatprep.subr.bf16.mxu0 %v19898_v60  ;;  %3822 = vmatprep.subr.bf16.mxu1 %v19903_v21 }
 0x3fb   :  { %v2375_v45 = vpop.f32.mrb[36].mxu0  ;;  %v2416_v39 = vpop.f32.mrb[28].mxu1 }
 0x3fc   :  { %v2377_v53 = vpop.f32.mrb[37].mxu0  ;;  %v2418_v34 = vpop.f32.mrb[29].mxu1 }
 0x3fd   :  { %v2379_v55 = vpop.f32.mrb[38].mxu0  ;;  %v2420_v15 = vpop.f32.mrb[30].mxu1 }
 0x3fe   :  { %v2380_v57 = vpop.f32.mrb[39].mxu0  ;;  %v2421_v22 = vpop.f32.mrb[31].mxu1  ;;  %v14234_v15 = vld [vmem:[%s23418_s7 + $0x4] sm:$0xf] }
 0x3ff   :  { %v2670_v22 = vrot.slane %v14234_v15, %v18939_v23  ;;  %v2674_v1 = vrot.slane %v14234_v15, %v18944_v26  ;;  %v2678_v21 = vrot.slane %v14234_v15, %v18947_v29  ;;  %v2682_v37 = vrot.slane %v14234_v15, %v18955_v44 }
 0x43b   :  { %v2617_v57 = vpop.f32.mrb[40].mxu0  ;;  %v2658_v55 = vpop.f32.mrb[32].mxu1 }
 0x43c   :  { %v2618_v14 = vadd.f32 %v2617_v57, %v2375_v45  ;;  %v2659_v41 = vadd.f32 %v2658_v55, %v2416_v39  ;;  %v2619_v25 = vpop.f32.mrb[41].mxu0  ;;  %v2660_v30 = vpop.f32.mrb[33].mxu1  ;;  %v19929_v57 = vld [vmem:[%s23416_s5 + $0x100] ss:$16 sps:$4 sm:$0xff]   ;;  %v19934_v55 = vld [vmem:[%s23416_s5 + $0x108] ss:$16 sps:$4 sm:$0xff]  }
 0x43d   :  { %v2620_v51 = vadd.f32 %v2619_v25, %v2377_v53  ;;  %v2661_v32 = vadd.f32 %v2660_v30, %v2418_v34  ;;  %v2621_v27 = vpop.f32.mrb[42].mxu0  ;;  %v2662_v60 = vpop.f32.mrb[34].mxu1  ;;  %23568 = vst [vmem:[#allocation70_spill] sm:$0xff] %v19934_v55 }
 0x43e   :  { %v2687_v13 = vadd.f32 %v2670_v22, %v2618_v14  ;;  %v2622_v12 = vpop.f32.mrb[43].mxu0  ;;  %v2663_v11 = vpop.f32.mrb[35].mxu1  ;;  %v2689_v8 = vadd.f32 %v2678_v21, %v2659_v41 }
 0x43f   :  { %v2688_v10 = vadd.f32 %v2674_v1, %v2620_v51  ;;  %v2690_v45 = vadd.f32 %v2682_v37, %v2661_v32 }
 0x440   :  { %v2691_v48 = vmul.f32 0.5, %v2687_v13 }
 0x441   :  { %v2695_v35 = vmul.f32 0.5, %v2688_v10  ;;  %v2700_v39 = vmul.f32 0.5, %v2690_v45 }
 0x442   :  { %17969 = vtanh.f32 %v2691_v48 }
 0x443   :  { %17971 = vtanh.f32 %v2695_v35 }
 0x444   :  { %17973 = vtanh.f32 %v2689_v8 }
 0x445   :  { %17975 = vtanh.f32 %v2700_v39  ;;  %v19939_v39 = vld [vmem:[%s23416_s5 + $0x124] ss:$16 sps:$4 sm:$0xff]  }
 0x446   :  { %23569 = vst [vmem:[#allocation71_spill] sm:$0xff] %v19939_v39 }
 0x44c   :  { %v17970_v25 = vpop.eup %17969 }
 0x44d   :  { %v17972_v30 = vpop.eup %17971  ;;  %v2693_v27 = vmul.f32 0.5, %v17970_v25  ;;  %v19944_v25 = vld [vmem:[%s23416_s5 + $0x12c] ss:$16 sps:$4 sm:$0xff]  }
 0x44e   :  { %v2697_v60 = vmul.f32 0.5, %v17972_v30  ;;  %v17974_v53 = vpop.eup %17973  ;;  %23570 = vst [vmem:[#allocation72_spill] sm:$0xff] %v19944_v25  ;;  %v19951_v30 = vld [vmem:[%s23416_s5 + $0x120] ss:$16 sps:$4 sm:$0xff]  }
 0x44f   :  { %v2694_v34 = vadd.f32 0.5, %v2693_v27  ;;  %v17976_v48 = vpop.eup %17975  ;;  %23571 = vst [vmem:[#allocation73_spill] sm:$0xff] %v19951_v30  ;;  %v19956_v27 = vld [vmem:[%s23416_s5 + $0x128] ss:$16 sps:$4 sm:$0xff]  }
 0x450   :  { %v2698_v12 = vadd.f32 0.5, %v2697_v60  ;;  %v2702_v35 = vmul.f32 0.5, %v17976_v48  ;;  %23572 = vst [vmem:[#allocation74_spill] sm:$0xff] %v19956_v27  ;;  %v19963_v60 = vld [vmem:[%s23416_s5 + $0x144] ss:$16 sps:$4 sm:$0xff]  }
 0x451   :  { %v2705_v11 = vmul.f32 %v17974_v53, %v2694_v34  ;;  %23573 = vst [vmem:[#allocation75_spill] sm:$0xff] %v19963_v60  ;;  %v19968_v34 = vld [vmem:[%s23416_s5 + $0x14c] ss:$16 sps:$4 sm:$0xff]   ;;  %v19977_v53 = vld [vmem:[%s23416_s5 + $0x140] ss:$16 sps:$4 sm:$0xff]  }
 0x452   :  { %v2704_v13 = vmul.f32 %v2698_v12, %v19296_v47  ;;  %v2703_v15 = vadd.f32 0.5, %v2702_v35  ;;  %23574 = vst [vmem:[#allocation76_spill] sm:$0xff] %v19968_v34  ;;  %23575 = vst [vmem:[#allocation77_spill] sm:$0xff] %v19977_v53  ;;  %v19982_v12 = vld [vmem:[%s23416_s5 + $0x148] ss:$16 sps:$4 sm:$0xff]  }
 0x453   :  { %23576 = vst [vmem:[#allocation78_spill] sm:$0xff] %v19982_v12  ;;  %v20001_v48 = vld [vmem:[%s23416_s5 + $0x160] ss:$16 sps:$4 sm:$0xff]   ;;  %v20006_v35 = vld [vmem:[%s23416_s5 + $0x168] ss:$16 sps:$4 sm:$0xff]  }
 0x454   :  { %v19915_v10 = vadd.f32 %v2705_v11, %v2704_v13  ;;  %v19989_v11 = vld [vmem:[%s23416_s5 + $0x164] ss:$16 sps:$4 sm:$0xff]   ;;  %v19994_v13 = vld [vmem:[%s23416_s5 + $0x16c] ss:$16 sps:$4 sm:$0xff]   ;;  %23579 = vst [vmem:[#allocation81_spill] sm:$0xff] %v20001_v48  ;;  %23580 = vst [vmem:[#allocation82_spill] sm:$0xff] %v20006_v35 }
 0x455   :  { %23577 = vst [vmem:[#allocation79_spill] sm:$0xff] %v19989_v11  ;;  %23578 = vst [vmem:[#allocation80_spill] sm:$0xff] %v19994_v13 }
 0x456   :  { %17977 = vtanh.f32 %v19915_v10 }
 0x45b   :  { %v19918_v8 = vpop.f32.mrb[44].mxu0  ;;  %v19920_v37 = vpop.f32.mrb[36].mxu1 }
 0x45c   :  { %v19922_v32 = vpop.f32.mrb[45].mxu0  ;;  %v19924_v51 = vpop.f32.mrb[37].mxu1 }
 0x45d   :  { %v2979_v41 = vpop.f32.mrb[46].mxu0  ;;  %v3020_v14 = vpop.f32.mrb[38].mxu1 }
 0x45e   :  { %v2980_v21 = vpop.f32.mrb[47].mxu0  ;;  %v3021_v1 = vpop.f32.mrb[39].mxu1  ;;  %v20013_v41 = vld [vmem:[%s23416_s5 + $0x184] ss:$16 sps:$4 sm:$0xff]   ;;  %v20018_v14 = vld [vmem:[%s23416_s5 + $0x18c] ss:$16 sps:$4 sm:$0xff]  }
 0x45f   :  { %23581 = vst [vmem:[#allocation83_spill] sm:$0xff] %v20013_v41  ;;  %23582 = vst [vmem:[#allocation84_spill] sm:$0xff] %v20018_v14  ;;  %v20025_v21 = vld [vmem:[%s23416_s5 + $0x180] ss:$16 sps:$4 sm:$0xff]   ;;  %v20030_v1 = vld [vmem:[%s23416_s5 + $0x188] ss:$16 sps:$4 sm:$0xff]  }
 0x460   :  { %v17978_v47 = vpop.eup %17977  ;;  %23583 = vst [vmem:[#allocation85_spill] sm:$0xff] %v20025_v21  ;;  %23584 = vst [vmem:[#allocation86_spill] sm:$0xff] %v20030_v1 }
 0x461   :  { %v2708_v22 = vmul.f32 %v17978_v47, %v2703_v15  ;;  %v20037_v15 = vld [vmem:[%s23416_s5 + $0x1a4] ss:$16 sps:$4 sm:$0xff]   ;;  %v20042_v47 = vld [vmem:[%s23416_s5 + $0x1ac] ss:$16 sps:$4 sm:$0xff]  }
 0x462   :  { %23585 = vst [vmem:[#allocation87_spill] sm:$0xff] %v20037_v15  ;;  %23586 = vst [vmem:[#allocation88_spill] sm:$0xff] %v20042_v47 }
 0x463   :  { %v3346_v45 = vpack.c.bf16 %v2708_v22, %v2708_v22  ;;  %v20049_v22 = vld [vmem:[%s23416_s5 + $0x1a0] ss:$16 sps:$4 sm:$0xff]  }
 0x464   :  { %23587 = vst [vmem:[#allocation89_spill] sm:$0xff] %v20049_v22 }
 0x465   :  { %3572 = vmatmul.mubr.bf16.vlgmr.msra.gmra.mrb[52].mxu0 %v3346_v45  ;;  %3613 = vmatmul.mubr.bf16.vlgmr.msra.gmra.mrb[44].mxu1 %v3346_v45  ;;  %v20054_v45 = vld [vmem:[%s23416_s5 + $0x1a8] ss:$16 sps:$4 sm:$0xff]  }
 0x466   :  { %3782 = vmatpush1.bf16.msra.mxu0 %v19929_v57  ;;  %3823 = vmatpush1.bf16.msra.mxu1 %v19934_v55  ;;  %23588 = vst [vmem:[#allocation90_spill] sm:$0xff] %v20054_v45 }
 0x467   :  { %3783 = vmatprep.subr.bf16.mxu0 %v19939_v39  ;;  %3824 = vmatprep.subr.bf16.mxu1 %v19944_v25 }
 0x468   :  { %3813 = vmatprep.mubr.bf16.mxu0 %v23533_v19  ;;  %3854 = vmatprep.mubr.bf16.mxu1 %v23533_v19 }
 0x46a   :  { %3784 = vmatpush1.bf16.msra.mxu0 %v19951_v30  ;;  %3825 = vmatpush1.bf16.msra.mxu1 %v19956_v27 }
 0x46b   :  { %3785 = vmatprep.subr.bf16.mxu0 %v19963_v60  ;;  %3826 = vmatprep.subr.bf16.mxu1 %v19968_v34 }
 0x46e   :  { %3786 = vmatpush1.bf16.msra.mxu0 %v19977_v53  ;;  %3827 = vmatpush1.bf16.msra.mxu1 %v19982_v12 }
 0x46f   :  { %3787 = vmatprep.subr.bf16.mxu0 %v19989_v11  ;;  %3828 = vmatprep.subr.bf16.mxu1 %v19994_v13 }
 0x472   :  { %3788 = vmatpush1.bf16.msra.mxu0 %v20001_v48  ;;  %3829 = vmatpush1.bf16.msra.mxu1 %v20006_v35 }
 0x473   :  { %3789 = vmatprep.subr.bf16.mxu0 %v20013_v41  ;;  %3830 = vmatprep.subr.bf16.mxu1 %v20018_v14  ;;  %v3265_v14 = vld [vmem:[%s23418_s7] sm:$0xf] }
 0x474   :  { %v3270_v41 = vrot.slane %v3265_v14, %v18939_v23  ;;  %v3274_v13 = vrot.slane %v3265_v14, %v18944_v26  ;;  %v3278_v25 = vrot.slane %v3265_v14, %v18947_v29 }
 0x476   :  { %3790 = vmatpush1.bf16.msra.mxu0 %v20025_v21  ;;  %3831 = vmatpush1.bf16.msra.mxu1 %v20030_v1  ;;  %v20064_v1 = vld [vmem:[%s23416_s5 + $0x1c4] ss:$16 sps:$4 sm:$0xff]   ;;  %v20069_v21 = vld [vmem:[%s23416_s5 + $0x1cc] ss:$16 sps:$4 sm:$0xff]  }
 0x477   :  { %3791 = vmatprep.subr.bf16.mxu0 %v20037_v15  ;;  %3832 = vmatprep.subr.bf16.mxu1 %v20042_v47  ;;  %23589 = vst [vmem:[#allocation91_spill] sm:$0xff] %v20064_v1  ;;  %23590 = vst [vmem:[#allocation92_spill] sm:$0xff] %v20069_v21  ;;  %v20077_v47 = vld [vmem:[%s23416_s5 + $0x1c0] ss:$16 sps:$4 sm:$0xff]   ;;  %v20082_v15 = vld [vmem:[%s23416_s5 + $0x1c8] ss:$16 sps:$4 sm:$0xff]  }
 0x47a   :  { %3792 = vmatpush1.bf16.msra.mxu0 %v20049_v22  ;;  %3833 = vmatpush1.bf16.msra.mxu1 %v20054_v45  ;;  %v20090_v45 = vld [vmem:[%s23416_s5 + $0x1e4] ss:$16 sps:$4 sm:$0xff]   ;;  %v20095_v22 = vld [vmem:[%s23416_s5 + $0x1ec] ss:$16 sps:$4 sm:$0xff]  }
 0x47b   :  { %v3217_v35 = vpop.f32.mrb[48].mxu0  ;;  %v3258_v48 = vpop.f32.mrb[40].mxu1  ;;  %3793 = vmatprep.subr.bf16.mxu0 %v20064_v1  ;;  %3834 = vmatprep.subr.bf16.mxu1 %v20069_v21 }
 0x47c   :  { %v3218_v11 = vadd.f32 %v3217_v35, %v19918_v8  ;;  %v3259_v12 = vadd.f32 %v3258_v48, %v19920_v37  ;;  %v3219_v53 = vpop.f32.mrb[49].mxu0  ;;  %v3260_v34 = vpop.f32.mrb[41].mxu1  ;;  %v20107_v8 = vld [vmem:[%s23416_s5 + $0x1e0] ss:$16 sps:$4 sm:$0xff]   ;;  %v20112_v37 = vld [vmem:[%s23416_s5 + $0x1e8] ss:$16 sps:$4 sm:$0xff]  }
 0x47d   :  { %v3220_v1 = vadd.f32 %v3219_v53, %v19922_v32  ;;  %v3261_v21 = vadd.f32 %v3260_v34, %v19924_v51  ;;  %v3221_v60 = vpop.f32.mrb[50].mxu0  ;;  %v3262_v27 = vpop.f32.mrb[42].mxu1 }
 0x47e   :  { %v3287_v30 = vadd.f32 %v3270_v41, %v3218_v11  ;;  %v3222_v39 = vpop.f32.mrb[51].mxu0  ;;  %v3263_v55 = vpop.f32.mrb[43].mxu1  ;;  %3794 = vmatpush1.bf16.msra.mxu0 %v20077_v47  ;;  %3835 = vmatpush1.bf16.msra.mxu1 %v20082_v15  ;;  %v3282_v27 = vrot.slane %v3265_v14, %v18955_v44 }
 0x47f   :  { %v3288_v32 = vadd.f32 %v3274_v13, %v3220_v1  ;;  %3795 = vmatprep.subr.bf16.mxu0 %v20090_v45  ;;  %3836 = vmatprep.subr.bf16.mxu1 %v20095_v22  ;;  %v3289_v39 = vadd.f32 %v3278_v25, %v3259_v12 }
 0x480   :  { %v3291_v51 = vmul.f32 0.5, %v3287_v30  ;;  %v3290_v60 = vadd.f32 %v3282_v27, %v3261_v21  ;;  %v23612_v27 = vld [vmem:[#allocation33_spill] sm:$0xff] }
 0x481   :  { %v3295_v55 = vmul.f32 0.5, %v3288_v32 }
 0x482   :  { %17979 = vtanh.f32 %v3291_v51  ;;  %3796 = vmatpush1.bf16.msra.mxu0 %v20107_v8  ;;  %3837 = vmatpush1.bf16.msra.mxu1 %v20112_v37  ;;  %v3300_v34 = vmul.f32 0.5, %v3290_v60  ;;  %v23613_v60 = vld [vmem:[#allocation34_spill] sm:$0xff] }
 0x483   :  { %17981 = vtanh.f32 %v3295_v55  ;;  %4139 = vmatprep.subr.bf16.mxu0 %v19358_v9  ;;  %4180 = vmatprep.subr.bf16.mxu1 %v19363_v18 }
 0x484   :  { %17983 = vtanh.f32 %v3289_v39  ;;  %v23611_v39 = vld [vmem:[#allocation32_spill] sm:$0xff] }
 0x485   :  { %17985 = vtanh.f32 %v3300_v34  ;;  %v23614_v34 = vld [vmem:[#allocation35_spill] sm:$0xff] }
 0x48c   :  { %v17980_v53 = vpop.eup %17979 }
 0x48d   :  { %v17982_v11 = vpop.eup %17981  ;;  %v3293_v30 = vmul.f32 0.5, %v17980_v53 }
 0x48e   :  { %v3297_v13 = vmul.f32 0.5, %v17982_v11  ;;  %v17984_v12 = vpop.eup %17983  ;;  %v23615_v11 = vld [vmem:[#allocation36_spill] sm:$0xff] }
 0x48f   :  { %v3294_v25 = vadd.f32 0.5, %v3293_v30  ;;  %v17986_v9 = vpop.eup %17985  ;;  %v23616_v30 = vld [vmem:[#allocation37_spill] sm:$0xff] }
 0x490   :  { %v3298_v48 = vadd.f32 0.5, %v3297_v13  ;;  %v3302_v18 = vmul.f32 0.5, %v17986_v9  ;;  %v23617_v13 = vld [vmem:[#allocation38_spill] sm:$0xff]  ;;  %v23623_v9 = vld [vmem:[#allocation44_spill] sm:$0xff] }
 0x491   :  { %v3305_v35 = vmul.f32 %v17984_v12, %v3294_v25  ;;  %v23618_v25 = vld [vmem:[#allocation39_spill] sm:$0xff]  ;;  %v23619_v12 = vld [vmem:[#allocation40_spill] sm:$0xff] }
 0x492   :  { %v3304_v41 = vmul.f32 %v3298_v48, %v19371_v16  ;;  %v3303_v1 = vadd.f32 0.5, %v3302_v18  ;;  %v16678_v16 = vld [vmem:[%s23417_s6 + $0x64] ss:$16 sps:$4 sm:$0xff]  }
 0x493   :  { %v23620_v48 = vld [vmem:[#allocation41_spill] sm:$0xff] }
 0x494   :  { %v20122_v14 = vadd.f32 %v3305_v35, %v3304_v41  ;;  %v23621_v35 = vld [vmem:[#allocation42_spill] sm:$0xff]  ;;  %v23622_v41 = vld [vmem:[#allocation43_spill] sm:$0xff]  ;;  %v23624_v18 = vld [vmem:[#allocation45_spill] sm:$0xff] }
 0x496   :  { %17987 = vtanh.f32 %v20122_v14 }
 0x4a0   :  { %v17988_v21 = vpop.eup %17987 }
 0x4a1   :  { %v3308_v32 = vmul.f32 %v17988_v21, %v3303_v1  ;;  %v23625_v1 = vld [vmem:[#allocation46_spill] sm:$0xff]  ;;  %v23626_v21 = vld [vmem:[#allocation47_spill] sm:$0xff] }
 0x4a3   :  { %v3313_v51 = vpack.c.bf16 %v3308_v32, %v3308_v32  ;;  %v23627_v32 = vld [vmem:[#allocation48_spill] sm:$0xff] }
 0x4a5   :  { %3814 = vmatmul.mubr.bf16.vlgmr.msra.gmra.mrb[56].mxu0 %v3313_v51  ;;  %3855 = vmatmul.mubr.bf16.vlgmr.msra.gmra.mrb[48].mxu1 %v3313_v51 }
 0x4a6   :  { %4140 = vmatpush1.bf16.msra.mxu0 %v19377_v46  ;;  %4181 = vmatpush1.bf16.msra.mxu1 %v19382_v24  ;;  %v16676_v46 = vld [vmem:[%s23417_s6 + $0x60] ss:$16 sps:$4 sm:$0xff]   ;;  %v16681_v24 = vld [vmem:[%s23417_s6 + $0x84] ss:$16 sps:$4 sm:$0xff]  }
 0x4a7   :  { %4141 = vmatprep.subr.bf16.mxu0 %v19387_v42  ;;  %4182 = vmatprep.subr.bf16.mxu1 %v19392_v43  ;;  %v16679_v42 = vld [vmem:[%s23417_s6 + $0x80] ss:$16 sps:$4 sm:$0xff]   ;;  %v16684_v43 = vld [vmem:[%s23417_s6 + $0xa4] ss:$16 sps:$4 sm:$0xff]  }
 0x4a8   :  { %4171 = vmatprep.mubr.bf16.mxu0 %v23533_v19  ;;  %4212 = vmatprep.mubr.bf16.mxu1 %v23533_v19 }
 0x4aa   :  { %4142 = vmatpush1.bf16.msra.mxu0 %v19399_v58  ;;  %4183 = vmatpush1.bf16.msra.mxu1 %v19404_v59  ;;  %v16682_v58 = vld [vmem:[%s23417_s6 + $0xa0] ss:$16 sps:$4 sm:$0xff]   ;;  %v16687_v59 = vld [vmem:[%s23417_s6 + $0xc4] ss:$16 sps:$4 sm:$0xff]  }
 0x4ab   :  { %4143 = vmatprep.subr.bf16.mxu0 %v19411_v61  ;;  %4184 = vmatprep.subr.bf16.mxu1 %v19416_v62  ;;  %v16685_v61 = vld [vmem:[%s23417_s6 + $0xc0] ss:$16 sps:$4 sm:$0xff]   ;;  %v16690_v62 = vld [vmem:[%s23417_s6 + $0xe4] ss:$16 sps:$4 sm:$0xff]  }
 0x4ae   :  { %4144 = vmatpush1.bf16.msra.mxu0 %v19425_v63  ;;  %4185 = vmatpush1.bf16.msra.mxu1 %v19430_v0  ;;  %v16688_v63 = vld [vmem:[%s23417_s6 + $0xe0] ss:$16 sps:$4 sm:$0xff]  }
 0x4af   :  { %4145 = vmatprep.subr.bf16.mxu0 %v16678_v16  ;;  %4186 = vmatprep.subr.bf16.mxu1 %v19437_v2  ;;  %v23591_v0 = vld [vmem:[#allocation13_spill] sm:$0xff]  ;;  %v23592_v2 = vld [vmem:[#allocation14_spill] sm:$0xff] }
 0x4b0   :  { %v23629_v16 = vld [vmem:[#allocation50_spill] sm:$0xff] }
 0x4b2   :  { %4146 = vmatpush1.bf16.msra.mxu0 %v16676_v46  ;;  %4187 = vmatpush1.bf16.msra.mxu1 %v19444_v3  ;;  %v23593_v3 = vld [vmem:[#allocation15_spill] sm:$0xff] }
 0x4b3   :  { %4147 = vmatprep.subr.bf16.mxu0 %v16681_v24  ;;  %4188 = vmatprep.subr.bf16.mxu1 %v19451_v5  ;;  %v23594_v5 = vld [vmem:[#allocation16_spill] sm:$0xff]  ;;  %v23630_v46 = vld [vmem:[#allocation51_spill] sm:$0xff] }
 0x4b4   :  { %v23631_v24 = vld [vmem:[#allocation52_spill] sm:$0xff] }
 0x4b6   :  { %4148 = vmatpush1.bf16.msra.mxu0 %v16679_v42  ;;  %4189 = vmatpush1.bf16.msra.mxu1 %v19458_v7  ;;  %v23595_v7 = vld [vmem:[#allocation17_spill] sm:$0xff] }
 0x4b7   :  { %4149 = vmatprep.subr.bf16.mxu0 %v16684_v43  ;;  %4190 = vmatprep.subr.bf16.mxu1 %v19465_v20  ;;  %v23596_v20 = vld [vmem:[#allocation18_spill] sm:$0xff]  ;;  %v23632_v42 = vld [vmem:[#allocation53_spill] sm:$0xff] }
 0x4b8   :  { %v5107_v43 = vld [vmem:[%s23412_s1] sm:$0xff] }
 0x4b9   :  { %5109 = vst.msk [vmem:[#allocation4] sm:$0xff] %vm5108_vm1, %v5107_v43 }
 0x4ba   :  { %4150 = vmatpush1.bf16.msra.mxu0 %v16682_v58  ;;  %4191 = vmatpush1.bf16.msra.mxu1 %v19472_v28  ;;  %v23597_v28 = vld [vmem:[#allocation19_spill] sm:$0xff]  ;;  %v23633_v58 = vld [vmem:[#allocation54_spill] sm:$0xff] }
 0x4bb   :  { %4151 = vmatprep.subr.bf16.mxu0 %v16687_v59  ;;  %4192 = vmatprep.subr.bf16.mxu1 %v19479_v17  ;;  %v23598_v17 = vld [vmem:[#allocation20_spill] sm:$0xff]  ;;  %v23634_v59 = vld [vmem:[#allocation55_spill] sm:$0xff] }
 0x4be   :  { %4152 = vmatpush1.bf16.msra.mxu0 %v16685_v61  ;;  %4193 = vmatpush1.bf16.msra.mxu1 %v19486_v33  ;;  %v23599_v33 = vld [vmem:[#allocation21_spill] sm:$0xff]  ;;  %v23635_v61 = vld [vmem:[#allocation56_spill] sm:$0xff] }
 0x4bf   :  { %4153 = vmatprep.subr.bf16.mxu0 %v16690_v62  ;;  %4194 = vmatprep.subr.bf16.mxu1 %v19493_v38  ;;  %v23600_v38 = vld [vmem:[#allocation22_spill] sm:$0xff]  ;;  %v23636_v62 = vld [vmem:[#allocation59_spill] sm:$0xff] }
 0x4c2   :  { %4154 = vmatpush1.bf16.msra.mxu0 %v16688_v63  ;;  %4195 = vmatpush1.bf16.msra.mxu1 %v19500_v36  ;;  %v23601_v36 = vld [vmem:[#allocation23_spill] sm:$0xff]  ;;  %v23637_v63 = vld [vmem:[#allocation57_spill] sm:$0xff] }
 0x4c3   :  { %4381 = vmatprep.subr.bf16.mxu0 %v19507_v50  ;;  %4422 = vmatprep.subr.bf16.mxu1 %v19512_v49  ;;  %v23602_v50 = vld [vmem:[#allocation24_spill] sm:$0xff]  ;;  %v23603_v49 = vld [vmem:[#allocation25_spill] sm:$0xff] }
 0x4c5   :  { %4172 = vmatmul.mubr.bf16.vlgmr.msra.gmra.mrb[60].mxu0 %v3313_v51  ;;  %4213 = vmatmul.mubr.bf16.vlgmr.msra.gmra.mrb[52].mxu1 %v3313_v51  ;;  %v23628_v51 = vld [vmem:[#allocation49_spill] sm:$0xff] }
 0x4c6   :  { %4382 = vmatpush1.bf16.msra.mxu0 %v19519_v54  ;;  %4423 = vmatpush1.bf16.msra.mxu1 %v19524_v40  ;;  %v23604_v54 = vld [vmem:[#allocation26_spill] sm:$0xff]  ;;  %v23605_v40 = vld [vmem:[#allocation27_spill] sm:$0xff] }
 0x4c7   :  { %4383 = vmatprep.subr.bf16.mxu0 %v19531_v56  ;;  %4424 = vmatprep.subr.bf16.mxu1 %v19536_v31  ;;  %v23606_v56 = vld [vmem:[#allocation28_spill] sm:$0xff]  ;;  %v23607_v31 = vld [vmem:[#allocation29_spill] sm:$0xff] }
 0x4c8   :  { %4413 = vmatprep.mubr.bf16.mxu0 %v23533_v19  ;;  %4454 = vmatprep.mubr.bf16.mxu1 %v23533_v19 }
 0x4ca   :  { %4384 = vmatpush1.bf16.msra.mxu0 %v19543_v52  ;;  %4425 = vmatpush1.bf16.msra.mxu1 %v19548_v4  ;;  %v23608_v52 = vld [vmem:[#allocation30_spill] sm:$0xff]  ;;  %v23609_v4 = vld [vmem:[#allocation31_spill] sm:$0xff] }
 0x4cb   :  { %4385 = vmatprep.subr.bf16.mxu0 %v19555_v6  ;;  %4426 = vmatprep.subr.bf16.mxu1 %v23591_v0  ;;  %v23610_v6 = vld [vmem:[#allocation12_spill] sm:$0xff]  ;;  %v23638_v0 = vld [vmem:[#allocation58_spill] sm:$0xff] }
 0x4cc   :  { %v302_v55 = vmul.f32 0.5, %v23610_v6 }
 0x4ce   :  { %4386 = vmatpush1.bf16.msra.mxu0 %v23592_v2  ;;  %4427 = vmatpush1.bf16.msra.mxu1 %v23593_v3  ;;  %v3913_v53 = vpack.c.bf16 %v302_v55, %v302_v55  ;;  %v23639_v2 = vld [vmem:[#allocation60_spill] sm:$0xff]  ;;  %v23640_v3 = vld [vmem:[#allocation61_spill] sm:$0xff] }
 0x4cf   :  { %4387 = vmatprep.subr.bf16.mxu0 %v23594_v5  ;;  %4428 = vmatprep.subr.bf16.mxu1 %v23595_v7  ;;  %v5112_v5 = vld [vmem:[#allocation4] sm:$0xff]  ;;  %v23641_v7 = vld [vmem:[#allocation62_spill] sm:$0xff] }
 0x4d0   :  { %5114 = vperm.xlu0 %16266, %v5112_v5   ;;  %v14427_v55 = vld [vmem:[%s23418_s7 + $0x4] sm:$0xf] }
 0x4d2   :  { %4388 = vmatpush1.bf16.msra.mxu0 %v23596_v20  ;;  %4429 = vmatpush1.bf16.msra.mxu1 %v23597_v28  ;;  %v23642_v20 = vld [vmem:[#allocation63_spill] sm:$0xff]  ;;  %v23643_v28 = vld [vmem:[#allocation64_spill] sm:$0xff] }
 0x4d3   :  { %4389 = vmatprep.subr.bf16.mxu0 %v23598_v17  ;;  %4430 = vmatprep.subr.bf16.mxu1 %v23599_v33  ;;  %v23644_v17 = vld [vmem:[#allocation67_spill] sm:$0xff]  ;;  %v23645_v33 = vld [vmem:[#allocation65_spill] sm:$0xff] }
 0x4d6   :  { %4390 = vmatpush1.bf16.msra.mxu0 %v23600_v38  ;;  %4431 = vmatpush1.bf16.msra.mxu1 %v23601_v36  ;;  %v23646_v38 = vld [vmem:[#allocation66_spill] sm:$0xff]  ;;  %v23647_v36 = vld [vmem:[#allocation68_spill] sm:$0xff] }
 0x4d7   :  { %4391 = vmatprep.subr.bf16.mxu0 %v23602_v50  ;;  %4432 = vmatprep.subr.bf16.mxu1 %v23603_v49  ;;  %v23648_v50 = vld [vmem:[#allocation69_spill] sm:$0xff] }
 0x4da   :  { %4392 = vmatpush1.bf16.msra.mxu0 %v23604_v54  ;;  %4433 = vmatpush1.bf16.msra.mxu1 %v23605_v40 }
 0x4db   :  { %4393 = vmatprep.subr.bf16.mxu0 %v23606_v56  ;;  %4434 = vmatprep.subr.bf16.mxu1 %v23607_v31 }
 0x4de   :  { %4394 = vmatpush1.bf16.msra.mxu0 %v23608_v52  ;;  %4435 = vmatpush1.bf16.msra.mxu1 %v23609_v4 }
 0x4df   :  { %4395 = vmatprep.subr.bf16.mxu0 %v23611_v39  ;;  %4436 = vmatprep.subr.bf16.mxu1 %v23612_v27  ;;  %v3868_v39 = vrot.slane %v14427_v55, %v18939_v23 }
 0x4e2   :  { %4396 = vmatpush1.bf16.msra.mxu0 %v23613_v60  ;;  %4437 = vmatpush1.bf16.msra.mxu1 %v23614_v34  ;;  %v3872_v34 = vrot.slane %v14427_v55, %v18944_v26 }
 0x4e3   :  { %4737 = vmatprep.subr.bf16.mxu0 %v23615_v11  ;;  %4778 = vmatprep.subr.bf16.mxu1 %v23616_v30 }
 0x4e5   :  { %4414 = vmatmul.mubr.bf16.vlgmr.msra.gmra.mrb[64].mxu0 %v3913_v53  ;;  %4455 = vmatmul.mubr.bf16.vlgmr.msra.gmra.mrb[56].mxu1 %v3913_v53 }
 0x4e6   :  { %4738 = vmatpush1.bf16.msra.mxu0 %v23617_v13  ;;  %4779 = vmatpush1.bf16.msra.mxu1 %v23618_v25 }
 0x4e7   :  { %4739 = vmatprep.subr.bf16.mxu0 %v23619_v12  ;;  %4780 = vmatprep.subr.bf16.mxu1 %v23620_v48 }
 0x4e8   :  { %4769 = vmatprep.mubr.bf16.mxu0 %v23533_v19  ;;  %4810 = vmatprep.mubr.bf16.mxu1 %v23533_v19 }
 0x4ea   :  { %4740 = vmatpush1.bf16.msra.mxu0 %v23621_v35  ;;  %4781 = vmatpush1.bf16.msra.mxu1 %v23622_v41 }
 0x4eb   :  { %4741 = vmatprep.subr.bf16.mxu0 %v23623_v9  ;;  %4782 = vmatprep.subr.bf16.mxu1 %v23624_v18  ;;  %v3876_v9 = vrot.slane %v14427_v55, %v18947_v29 }
 0x4ee   :  { %4742 = vmatpush1.bf16.msra.mxu0 %v23625_v1  ;;  %4783 = vmatpush1.bf16.msra.mxu1 %v23626_v21 }
 0x4ef   :  { %4743 = vmatprep.subr.bf16.mxu0 %v23627_v32  ;;  %4784 = vmatprep.subr.bf16.mxu1 %v23628_v51 }
 0x4f2   :  { %4744 = vmatpush1.bf16.msra.mxu0 %v23629_v16  ;;  %4785 = vmatpush1.bf16.msra.mxu1 %v23630_v46  ;;  %v3880_v46 = vrot.slane %v14427_v55, %v18955_v44  ;;  %v23652_v55 = vld [vmem:[#allocation73_spill] sm:$0xff] }
 0x4f3   :  { %4745 = vmatprep.subr.bf16.mxu0 %v23631_v24  ;;  %4786 = vmatprep.subr.bf16.mxu1 %v23632_v42 }
 0x4f6   :  { %4746 = vmatpush1.bf16.msra.mxu0 %v23633_v58  ;;  %4787 = vmatpush1.bf16.msra.mxu1 %v23634_v59 }
 0x4f7   :  { %4747 = vmatprep.subr.bf16.mxu0 %v23635_v61  ;;  %4788 = vmatprep.subr.bf16.mxu1 %v23636_v62 }
 0x4fa   :  { %4748 = vmatpush1.bf16.msra.mxu0 %v23637_v63  ;;  %4789 = vmatpush1.bf16.msra.mxu1 %v23638_v0 }
 0x4fb   :  { %4749 = vmatprep.subr.bf16.mxu0 %v23639_v2  ;;  %4790 = vmatprep.subr.bf16.mxu1 %v23640_v3 }
 0x4fe   :  { %4750 = vmatpush1.bf16.msra.mxu0 %v23641_v7  ;;  %4791 = vmatpush1.bf16.msra.mxu1 %v23642_v20 }
 0x4ff   :  { %4751 = vmatprep.subr.bf16.mxu0 %v23643_v28  ;;  %4792 = vmatprep.subr.bf16.mxu1 %v23644_v17 }
 0x502   :  { %4752 = vmatpush1.bf16.msra.mxu0 %v23645_v33  ;;  %4793 = vmatpush1.bf16.msra.mxu1 %v23646_v38 }
 0x503   :  { %4979 = vmatprep.subr.bf16.mxu0 %v23647_v36  ;;  %5020 = vmatprep.subr.bf16.mxu1 %v23648_v50 }
 0x538   :  { %v3573_v49 = vpop.f32.mrb[52].mxu0  ;;  %v3614_v54 = vpop.f32.mrb[44].mxu1 }
 0x539   :  { %v3575_v40 = vpop.f32.mrb[53].mxu0  ;;  %v3616_v56 = vpop.f32.mrb[45].mxu1 }
 0x53a   :  { %v3577_v31 = vpop.f32.mrb[54].mxu0  ;;  %v3618_v52 = vpop.f32.mrb[46].mxu1 }
 0x53b   :  { %v3578_v4 = vpop.f32.mrb[55].mxu0  ;;  %v3619_v6 = vpop.f32.mrb[47].mxu1 }
 0x53c   :  { %v23650_v4 = vld [vmem:[#allocation71_spill] sm:$0xff]  ;;  %v23651_v6 = vld [vmem:[#allocation72_spill] sm:$0xff] }
 0x578   :  { %v3815_v27 = vpop.f32.mrb[56].mxu0  ;;  %v3856_v60 = vpop.f32.mrb[48].mxu1 }
 0x579   :  { %v3816_v53 = vadd.f32 %v3815_v27, %v3573_v49  ;;  %v3857_v11 = vadd.f32 %v3856_v60, %v3614_v54  ;;  %v3817_v30 = vpop.f32.mrb[57].mxu0  ;;  %v3858_v13 = vpop.f32.mrb[49].mxu1  ;;  %v23654_v27 = vld [vmem:[#allocation75_spill] sm:$0xff]  ;;  %v23655_v60 = vld [vmem:[#allocation76_spill] sm:$0xff] }
 0x57a   :  { %v3818_v25 = vadd.f32 %v3817_v30, %v3575_v40  ;;  %v3859_v12 = vadd.f32 %v3858_v13, %v3616_v56  ;;  %v3819_v48 = vpop.f32.mrb[58].mxu0  ;;  %v3860_v35 = vpop.f32.mrb[50].mxu1  ;;  %v23660_v30 = vld [vmem:[#allocation81_spill] sm:$0xff]  ;;  %v23661_v13 = vld [vmem:[#allocation82_spill] sm:$0xff] }
 0x57b   :  { %v3885_v41 = vadd.f32 %v3868_v39, %v3816_v53  ;;  %v3820_v18 = vpop.f32.mrb[59].mxu0  ;;  %v3861_v1 = vpop.f32.mrb[51].mxu1  ;;  %v3887_v16 = vadd.f32 %v3876_v9, %v3857_v11  ;;  %v23653_v39 = vld [vmem:[#allocation74_spill] sm:$0xff]  ;;  %v23658_v53 = vld [vmem:[#allocation79_spill] sm:$0xff]  ;;  %v23659_v11 = vld [vmem:[#allocation80_spill] sm:$0xff] }
 0x57c   :  { %v3886_v21 = vadd.f32 %v3872_v34, %v3818_v25  ;;  %v3888_v24 = vadd.f32 %v3880_v46, %v3859_v12  ;;  %v23656_v34 = vld [vmem:[#allocation77_spill] sm:$0xff]  ;;  %v23662_v25 = vld [vmem:[#allocation83_spill] sm:$0xff]  ;;  %v23663_v12 = vld [vmem:[#allocation84_spill] sm:$0xff] }
 0x57d   :  { %v3889_v32 = vmul.f32 0.5, %v3885_v41  ;;  %v23664_v48 = vld [vmem:[#allocation85_spill] sm:$0xff]  ;;  %v23665_v35 = vld [vmem:[#allocation86_spill] sm:$0xff]  ;;  %v23666_v9 = vld [vmem:[#allocation87_spill] sm:$0xff] }
 0x57e   :  { %v3893_v51 = vmul.f32 0.5, %v3886_v21  ;;  %v3898_v42 = vmul.f32 0.5, %v3888_v24  ;;  %v4463_v41 = vld [vmem:[%s23418_s7] sm:$0xf]  ;;  %v23667_v18 = vld [vmem:[#allocation88_spill] sm:$0xff]  ;;  %v23670_v24 = vld [vmem:[#allocation91_spill] sm:$0xff] }
 0x57f   :  { %17989 = vtanh.f32 %v3889_v32  ;;  %v4468_v1 = vrot.slane %v4463_v41, %v18939_v23  ;;  %v23668_v21 = vld [vmem:[#allocation89_spill] sm:$0xff]  ;;  %v23669_v32 = vld [vmem:[#allocation90_spill] sm:$0xff]  ;;  %v4472_v46 = vrot.slane %v4463_v41, %v18944_v26 }
 0x580   :  { %17991 = vtanh.f32 %v3893_v51 }
 0x581   :  { %17993 = vtanh.f32 %v3887_v16 }
 0x582   :  { %17995 = vtanh.f32 %v3898_v42  ;;  %v23671_v42 = vld [vmem:[#allocation92_spill] sm:$0xff] }
 0x589   :  { %v17990_v43 = vpop.eup %17989 }
 0x58a   :  { %v17992_v58 = vpop.eup %17991  ;;  %v3891_v59 = vmul.f32 0.5, %v17990_v43 }
 0x58b   :  { %v3895_v61 = vmul.f32 0.5, %v17992_v58  ;;  %v17994_v63 = vpop.eup %17993 }
 0x58c   :  { %v3892_v62 = vadd.f32 0.5, %v3891_v59  ;;  %v17996_v7 = vpop.eup %17995 }
 0x58d   :  { %v3896_v0 = vadd.f32 0.5, %v3895_v61  ;;  %v3900_v20 = vmul.f32 0.5, %v17996_v7  ;;  %v4476_v7 = vrot.slane %v4463_v41, %v18947_v29 }
 0x58e   :  { %v3903_v2 = vmul.f32 %v17994_v63, %v3892_v62 }
 0x58f   :  { %v3902_v3 = vmul.f32 %v3896_v0, %v19915_v10  ;;  %v3901_v40 = vadd.f32 0.5, %v3900_v20  ;;  %v23649_v10 = vld [vmem:[#allocation70_spill] sm:$0xff] }
 0x591   :  { %v20260_v5 = vadd.f32 %v3903_v2, %v3902_v3 }
 0x593   :  { %17997 = vtanh.f32 %v20260_v5 }
 0x598   :  { %v4173_v28 = vpop.f32.mrb[60].mxu0  ;;  %v4214_v17 = vpop.f32.mrb[52].mxu1 }
 0x599   :  { %v4175_v33 = vpop.f32.mrb[61].mxu0  ;;  %v4216_v38 = vpop.f32.mrb[53].mxu1 }
 0x59a   :  { %v4177_v36 = vpop.f32.mrb[62].mxu0  ;;  %v4218_v50 = vpop.f32.mrb[54].mxu1 }
 0x59b   :  { %v4178_v49 = vpop.f32.mrb[63].mxu0  ;;  %v4219_v54 = vpop.f32.mrb[55].mxu1 }
 0x59c   :  { %v4480_v49 = vrot.slane %v4463_v41, %v18955_v44  ;;  %v16706_v41 = vld [vmem:[%s23419_s8 + $0x18] sm:$0xff]  }
 0x59d   :  { %v17998_v56 = vpop.eup %17997 }
 0x59e   :  { %v3906_v31 = vmul.f32 %v17998_v56, %v3901_v40 }
 0x5a0   :  { %v4544_v52 = vpack.c.bf16 %v3906_v31, %v3906_v31 }
 0x5a2   :  { %4770 = vmatmul.mubr.bf16.vlgmr.msra.gmra.mrb[68].mxu0 %v4544_v52  ;;  %4811 = vmatmul.mubr.bf16.vlgmr.msra.gmra.mrb[60].mxu1 %v4544_v52 }
 0x5a3   :  { %4980 = vmatpush1.bf16.msra.mxu0 %v19929_v57  ;;  %5021 = vmatpush1.bf16.msra.mxu1 %v23649_v10  ;;  %v23657_v57 = vld [vmem:[#allocation78_spill] sm:$0xff] }
 0x5a4   :  { %4981 = vmatprep.subr.bf16.mxu0 %v23650_v4  ;;  %5022 = vmatprep.subr.bf16.mxu1 %v23651_v6 }
 0x5a5   :  { %5011 = vmatprep.mubr.bf16.mxu0 %v23533_v19  ;;  %5052 = vmatprep.mubr.bf16.mxu1 %v23533_v19 }
 0x5a7   :  { %4982 = vmatpush1.bf16.msra.mxu0 %v23652_v55  ;;  %5023 = vmatpush1.bf16.msra.mxu1 %v23653_v39 }
 0x5a8   :  { %4983 = vmatprep.subr.bf16.mxu0 %v23654_v27  ;;  %5024 = vmatprep.subr.bf16.mxu1 %v23655_v60 }
 0x5ab   :  { %4984 = vmatpush1.bf16.msra.mxu0 %v23656_v34  ;;  %5025 = vmatpush1.bf16.msra.mxu1 %v23657_v57  ;;  %v16691_v34 = vld [vmem:[%s23421_s10] ss:$16 sps:$4 sm:$0xff]  }
 0x5ac   :  { %4985 = vmatprep.subr.bf16.mxu0 %v23658_v53  ;;  %5026 = vmatprep.subr.bf16.mxu1 %v23659_v11  ;;  %v16694_v57 = vld [vmem:[%s23419_s8] sm:$0xff]  }
 0x5ad   :  { %v16695_v11 = vld [vmem:[%s23421_s10 + $0x20] ss:$16 sps:$4 sm:$0xff]  }
 0x5af   :  { %4986 = vmatpush1.bf16.msra.mxu0 %v23660_v30  ;;  %5027 = vmatpush1.bf16.msra.mxu1 %v23661_v13  ;;  %v16698_v30 = vld [vmem:[%s23419_s8 + $0x8] sm:$0xff]   ;;  %v16701_v13 = vld [vmem:[%s23421_s10 + $0x44] ss:$16 sps:$4 sm:$0xff]  }
 0x5b0   :  { %4987 = vmatprep.subr.bf16.mxu0 %v23662_v25  ;;  %5028 = vmatprep.subr.bf16.mxu1 %v23663_v12  ;;  %v16699_v25 = vld [vmem:[%s23421_s10 + $0x40] ss:$16 sps:$4 sm:$0xff]  }
 0x5b1   :  { %v16702_v12 = vld [vmem:[%s23419_s8 + $0x10] sm:$0xff]  }
 0x5b3   :  { %4988 = vmatpush1.bf16.msra.mxu0 %v23664_v48  ;;  %5029 = vmatpush1.bf16.msra.mxu1 %v23665_v35  ;;  %v16705_v48 = vld [vmem:[%s23421_s10 + $0x64] ss:$16 sps:$4 sm:$0xff]   ;;  %v16703_v35 = vld [vmem:[%s23421_s10 + $0x60] ss:$16 sps:$4 sm:$0xff]  }
 0x5b4   :  { %4989 = vmatprep.subr.bf16.mxu0 %v23666_v9  ;;  %5030 = vmatprep.subr.bf16.mxu1 %v23667_v18  ;;  %v16709_v9 = vld [vmem:[%s23421_s10 + $0x84] ss:$16 sps:$4 sm:$0xff]   ;;  %v16707_v18 = vld [vmem:[%s23421_s10 + $0x80] ss:$16 sps:$4 sm:$0xff]  }
 0x5b7   :  { %4990 = vmatpush1.bf16.msra.mxu0 %v23668_v21  ;;  %5031 = vmatpush1.bf16.msra.mxu1 %v23669_v32  ;;  %v16713_v21 = vld [vmem:[%s23421_s10 + $0xa4] ss:$16 sps:$4 sm:$0xff]   ;;  %v16711_v32 = vld [vmem:[%s23421_s10 + $0xa0] ss:$16 sps:$4 sm:$0xff]  }
 0x5b8   :  { %v4415_v51 = vpop.f32.mrb[64].mxu0  ;;  %v4456_v16 = vpop.f32.mrb[56].mxu1  ;;  %4991 = vmatprep.subr.bf16.mxu0 %v23670_v24  ;;  %5032 = vmatprep.subr.bf16.mxu1 %v23671_v42  ;;  %v16718_v24 = vld [vmem:[%s23419_s8 + $0x30] sm:$0xff]  }
 0x5b9   :  { %v4416_v43 = vadd.f32 %v4415_v51, %v4173_v28  ;;  %v4457_v58 = vadd.f32 %v4456_v16, %v4214_v17  ;;  %v4417_v59 = vpop.f32.mrb[65].mxu0  ;;  %v4458_v61 = vpop.f32.mrb[57].mxu1  ;;  %v16693_v28 = vld [vmem:[%s23421_s10 + $0x4] ss:$16 sps:$4 sm:$0xff]   ;;  %v16714_v51 = vld [vmem:[%s23419_s8 + $0x28] sm:$0xff]  }
 0x5ba   :  { %v4418_v62 = vadd.f32 %v4417_v59, %v4175_v33  ;;  %v4459_v63 = vadd.f32 %v4458_v61, %v4216_v38  ;;  %v4419_v0 = vpop.f32.mrb[66].mxu0  ;;  %v4460_v2 = vpop.f32.mrb[58].mxu1  ;;  %v16717_v16 = vld [vmem:[%s23421_s10 + $0xc4] ss:$16 sps:$4 sm:$0xff]   ;;  %v16719_v61 = vld [vmem:[%s23421_s10 + $0xe0] ss:$16 sps:$4 sm:$0xff]  }
 0x5bb   :  { %v4485_v3 = vadd.f32 %v4468_v1, %v4416_v43  ;;  %v4420_v20 = vpop.f32.mrb[67].mxu0  ;;  %v4461_v36 = vpop.f32.mrb[59].mxu1  ;;  %4992 = vmatpush1.bf16.msra.mxu0 %v20077_v47  ;;  %5033 = vmatpush1.bf16.msra.mxu1 %v20082_v15  ;;  %v4487_v38 = vadd.f32 %v4476_v7, %v4457_v58  ;;  %v18270_v15 = vmov 0.0   ;;  %v16710_v1 = vld [vmem:[%s23419_s8 + $0x20] sm:$0xff]   ;;  %v23672_v43 = vlaneseq  ;;  %v16723_v0 = vld [vmem:[%s23421_s10 + $0x8] ss:$16 sps:$4 sm:$0xff]  }
 0x5bc   :  { %v4486_v50 = vadd.f32 %v4472_v46, %v4418_v62  ;;  %4993 = vmatprep.subr.bf16.mxu0 %v20090_v45  ;;  %5034 = vmatprep.subr.bf16.mxu1 %v20095_v22  ;;  %v4488_v47 = vadd.f32 %v4480_v49, %v4459_v63  ;;  %v16715_v46 = vld [vmem:[%s23421_s10 + $0xc0] ss:$16 sps:$4 sm:$0xff]   ;;  %v16721_v42 = vld [vmem:[%s23421_s10 + $0xe4] ss:$16 sps:$4 sm:$0xff]   ;;  %v5115_v59 = vpop.permute.xlu0 %5114  ;;  %v16722_v62 = vld [vmem:[%s23419_s8 + $0x38] sm:$0xff]  }
 0x5bd   :  { %v4489_v17 = vmul.f32 0.5, %v4485_v3  ;;  %v20387_v58 = vand.u32 127, %v23672_v43  ;;  %v16725_v63 = vld [vmem:[%s23421_s10 + $0xc] ss:$16 sps:$4 sm:$0xff]   ;;  %v18272_v3 = vmov 1.0|1.0  }
 0x5be   :  { %v4493_v33 = vmul.f32 0.5, %v4486_v50  ;;  %v4498_v22 = vmul.f32 0.5, %v4488_v47  ;;  %v16728_v2 = vld [vmem:[%s23421_s10 + $0x2c] ss:$16 sps:$4 sm:$0xff]   ;;  %v16726_v7 = vld [vmem:[%s23421_s10 + $0x28] ss:$16 sps:$4 sm:$0xff]  }
 0x5bf   :  { %17999 = vtanh.f32 %v4489_v17  ;;  %4994 = vmatpush1.bf16.msra.mxu0 %v20107_v8  ;;  %5035 = vmatpush1.bf16.msra.mxu1 %v20112_v37  ;;  %vm5116_vm3 = vcmp.eq.s32.totalorder %v20387_v58, %v5115_v59  ;;  %v16731_v20 = vld [vmem:[%s23421_s10 + $0x4c] ss:$16 sps:$4 sm:$0xff]   ;;  %v16729_v36 = vld [vmem:[%s23421_s10 + $0x48] ss:$16 sps:$4 sm:$0xff]  }
 0x5c0   :  { %18001 = vtanh.f32 %v4493_v33  ;;  %16017 = vmatprep.subr.bf16.mxu0 %v18270_v15  ;;  %5452 = vmatprep.subr.bf16.mxu1 %v16693_v28  ;;  %vm14630_vm4 = vmpackc.low %vm5116_vm3, %vm5116_vm3  ;;  %v16734_v50 = vld [vmem:[%s23421_s10 + $0x6c] ss:$16 sps:$4 sm:$0xff]   ;;  %v16732_v28 = vld [vmem:[%s23421_s10 + $0x68] ss:$16 sps:$4 sm:$0xff]  }
 0x5c1   :  { %18003 = vtanh.f32 %v4487_v38  ;;  %v16737_v17 = vld [vmem:[%s23421_s10 + $0x8c] ss:$16 sps:$4 sm:$0xff]   ;;  %v16735_v33 = vld [vmem:[%s23421_s10 + $0x88] ss:$16 sps:$4 sm:$0xff]  }
 0x5c2   :  { %18005 = vtanh.f32 %v4498_v22  ;;  %v16740_v38 = vld [vmem:[%s23421_s10 + $0xac] ss:$16 sps:$4 sm:$0xff]   ;;  %v16738_v49 = vld [vmem:[%s23421_s10 + $0xa8] ss:$16 sps:$4 sm:$0xff]  }
 0x5c3   :  { %v16743_v47 = vld [vmem:[%s23421_s10 + $0xcc] ss:$16 sps:$4 sm:$0xff]   ;;  %v16741_v22 = vld [vmem:[%s23421_s10 + $0xc8] ss:$16 sps:$4 sm:$0xff]  }
 0x5c9   :  { %v18000_v45 = vpop.eup %17999 }
 0x5ca   :  { %v18002_v54 = vpop.eup %18001  ;;  %v4491_v40 = vmul.f32 0.5, %v18000_v45  ;;  %v16746_v45 = vld [vmem:[%s23421_s10 + $0xec] ss:$16 sps:$4 sm:$0xff]  }
 0x5cb   :  { %v4495_v56 = vmul.f32 0.5, %v18002_v54  ;;  %v18004_v52 = vpop.eup %18003  ;;  %v16744_v54 = vld [vmem:[%s23421_s10 + $0xe8] ss:$16 sps:$4 sm:$0xff]  }
 0x5cc   :  { %v4492_v31 = vadd.f32 0.5, %v4491_v40  ;;  %v18006_v6 = vpop.eup %18005  ;;  %v16749_v40 = vld [vmem:[%s23420_s9 + $0x4] ss:$16 sps:$4 sm:$0xff]  }
 0x5cd   :  { %v4496_v10 = vadd.f32 0.5, %v4495_v56  ;;  %v4500_v55 = vmul.f32 0.5, %v18006_v6  ;;  %v16752_v56 = vld [vmem:[%s23420_s9 + $0xc] ss:$16 sps:$4 sm:$0xff]   ;;  %v16756_v6 = vld [vmem:[%s23420_s9 + $0x28] ss:$16 sps:$4 sm:$0xff]  }
 0x5ce   :  { %v4503_v4 = vmul.f32 %v18004_v52, %v4492_v31  ;;  %v16747_v31 = vld [vmem:[%s23420_s9] ss:$16 sps:$4 sm:$0xff]   ;;  %v16750_v52 = vld [vmem:[%s23420_s9 + $0x8] ss:$16 sps:$4 sm:$0xff]  }
 0x5cf   :  { %v4502_v8 = vmul.f32 %v4496_v10, %v20122_v14  ;;  %v4501_v39 = vadd.f32 0.5, %v4500_v55  ;;  %v16697_v14 = vld [vmem:[%s23421_s10 + $0x24] ss:$16 sps:$4 sm:$0xff]  }
 0x5d0   :  { %v16755_v10 = vld [vmem:[%s23420_s9 + $0x24] ss:$16 sps:$4 sm:$0xff]  }
 0x5d1   :  { %v20307_v37 = vadd.f32 %v4503_v4, %v4502_v8  ;;  %v16758_v4 = vld [vmem:[%s23420_s9 + $0x2c] ss:$16 sps:$4 sm:$0xff]   ;;  %v16753_v8 = vld [vmem:[%s23420_s9 + $0x20] ss:$16 sps:$4 sm:$0xff]   ;;  %v16761_v55 = vld [vmem:[%s23420_s9 + $0x44] ss:$16 sps:$4 sm:$0xff]  }
 0x5d3   :  { %18007 = vtanh.f32 %v20307_v37 }
 0x5dd   :  { %v18008_v27 = vpop.eup %18007 }
 0x5de   :  { %v4506_v60 = vmul.f32 %v18008_v27, %v4501_v39  ;;  %v16764_v39 = vld [vmem:[%s23420_s9 + $0x4c] ss:$16 sps:$4 sm:$0xff]   ;;  %v16759_v27 = vld [vmem:[%s23420_s9 + $0x40] ss:$16 sps:$4 sm:$0xff]  }
 0x5e0   :  { %v20316_v53 = vpack.c.bf16 %v4506_v60, %v4506_v60  ;;  %v16762_v60 = vld [vmem:[%s23420_s9 + $0x48] ss:$16 sps:$4 sm:$0xff]  }
 0x5e2   :  { %5012 = vmatmul.mubr.bf16.vlgmr.msra.gmra.mrb[72].mxu0 %v20316_v53  ;;  %5053 = vmatmul.mubr.bf16.vlgmr.msra.gmra.mrb[64].mxu1 %v20316_v53 }
 0x5e3   :  { %16018 = vmatpush3.bf16.msra.mxu0 %v16694_v57  ;;  %5453 = vmatpush1.bf16.msra.mxu1 %v16691_v34  ;;  %v16767_v34 = vld [vmem:[%s23420_s9 + $0x64] ss:$16 sps:$4 sm:$0xff]   ;;  %v16770_v57 = vld [vmem:[%s23420_s9 + $0x6c] ss:$16 sps:$4 sm:$0xff]  }
 0x5e4   :  { %16019 = vmatprep.subr.bf16.mxu0 %v18270_v15  ;;  %5454 = vmatprep.subr.bf16.mxu1 %v16697_v14  ;;  %v16768_v14 = vld [vmem:[%s23420_s9 + $0x68] ss:$16 sps:$4 sm:$0xff]  }
 0x5e5   :  { %16033 = vmatprep.mubr.msk.bf16.mxu0 %vm18271_vm2, %v18270_v15  ;;  %5484 = vmatprep.mubr.bf16.mxu1 %v23533_v19 }
 0x5e7   :  { %16020 = vmatpush3.bf16.msra.mxu0 %v16698_v30  ;;  %5455 = vmatpush1.bf16.msra.mxu1 %v16695_v11  ;;  %v16773_v11 = vld [vmem:[%s23420_s9 + $0x84] ss:$16 sps:$4 sm:$0xff]   ;;  %v16776_v30 = vld [vmem:[%s23420_s9 + $0x8c] ss:$16 sps:$4 sm:$0xff]  }
 0x5e8   :  { %16021 = vmatprep.subr.bf16.mxu0 %v18270_v15  ;;  %5456 = vmatprep.subr.bf16.mxu1 %v16701_v13  ;;  %v16771_v13 = vld [vmem:[%s23420_s9 + $0x80] ss:$16 sps:$4 sm:$0xff]  }
 0x5eb   :  { %16022 = vmatpush3.bf16.msra.mxu0 %v16702_v12  ;;  %5457 = vmatpush1.bf16.msra.mxu1 %v16699_v25  ;;  %v16774_v25 = vld [vmem:[%s23420_s9 + $0x88] ss:$16 sps:$4 sm:$0xff]   ;;  %v16779_v12 = vld [vmem:[%s23420_s9 + $0xa4] ss:$16 sps:$4 sm:$0xff]  }
 0x5ec   :  { %16023 = vmatprep.subr.bf16.mxu0 %v18270_v15  ;;  %5458 = vmatprep.subr.bf16.mxu1 %v16705_v48  ;;  %v16782_v48 = vld [vmem:[%s23420_s9 + $0xac] ss:$16 sps:$4 sm:$0xff]  }
 0x5ef   :  { %16024 = vmatpush3.bf16.msra.mxu0 %v16706_v41  ;;  %5459 = vmatpush1.bf16.msra.mxu1 %v16703_v35  ;;  %v16777_v35 = vld [vmem:[%s23420_s9 + $0xa0] ss:$16 sps:$4 sm:$0xff]   ;;  %v16780_v41 = vld [vmem:[%s23420_s9 + $0xa8] ss:$16 sps:$4 sm:$0xff]  }
 0x5f0   :  { %16025 = vmatprep.subr.bf16.mxu0 %v18270_v15  ;;  %5460 = vmatprep.subr.bf16.mxu1 %v16709_v9  ;;  %v16785_v9 = vld [vmem:[%s23420_s9 + $0xc4] ss:$16 sps:$4 sm:$0xff]  }
 0x5f3   :  { %16026 = vmatpush3.bf16.msra.mxu0 %v16710_v1  ;;  %5461 = vmatpush1.bf16.msra.mxu1 %v16707_v18  ;;  %v16788_v18 = vld [vmem:[%s23420_s9 + $0xcc] ss:$16 sps:$4 sm:$0xff]   ;;  %v16783_v1 = vld [vmem:[%s23420_s9 + $0xc0] ss:$16 sps:$4 sm:$0xff]  }
 0x5f4   :  { %16027 = vmatprep.subr.bf16.mxu0 %v18270_v15  ;;  %5462 = vmatprep.subr.bf16.mxu1 %v16713_v21  ;;  %v16786_v21 = vld [vmem:[%s23420_s9 + $0xc8] ss:$16 sps:$4 sm:$0xff]  }
 0x5f7   :  { %16028 = vmatpush3.bf16.msra.mxu0 %v16714_v51  ;;  %5463 = vmatpush1.bf16.msra.mxu1 %v16711_v32  ;;  %v16789_v32 = vld [vmem:[%s23420_s9 + $0xe0] ss:$16 sps:$4 sm:$0xff]   ;;  %v16791_v51 = vld [vmem:[%s23420_s9 + $0xe4] ss:$16 sps:$4 sm:$0xff]  }
 0x5f8   :  { %16029 = vmatprep.subr.bf16.mxu0 %v18270_v15  ;;  %5464 = vmatprep.subr.bf16.mxu1 %v16717_v16  ;;  %v16792_v16 = vld [vmem:[%s23420_s9 + $0xe8] ss:$16 sps:$4 sm:$0xff]  }
 0x5fb   :  { %16030 = vmatpush3.bf16.msra.mxu0 %v16718_v24  ;;  %5465 = vmatpush1.bf16.msra.mxu1 %v16715_v46  ;;  %v16794_v46 = vld [vmem:[%s23420_s9 + $0xec] ss:$16 sps:$4 sm:$0xff]   ;;  %v16797_v24 = vld [vmem:[%s23421_s10 + $0x104] ss:$16 sps:$4 sm:$0xff]  }
 0x5fc   :  { %16031 = vmatprep.subr.bf16.mxu0 %v18270_v15  ;;  %5466 = vmatprep.subr.bf16.mxu1 %v16721_v42  ;;  %v16800_v42 = vld [vmem:[%s23421_s10 + $0x10c] ss:$16 sps:$4 sm:$0xff]  }
 0x5ff   :  { %16032 = vmatpush3.bf16.msra.mxu0 %v16722_v62  ;;  %5467 = vmatpush1.bf16.msra.mxu1 %v16719_v61 }
 0x600   :  { %5493 = vmatprep.subr.bf16.mxu0 %v16725_v63  ;;  %5694 = vmatprep.subr.bf16.mxu1 %v16749_v40 }
 0x602   :  { %16034 = vmatmul.mubr.msk.bf16.vlgmr.msra.gmra.mrb[76].mxu0 %vm14630_vm4, %v18272_v3  ;;  %5485 = vmatmul.mubr.bf16.vlgmr.msra.gmra.mrb[68].mxu1 %v20316_v53 }
 0x603   :  { %5494 = vmatpush1.bf16.msra.mxu0 %v16723_v0  ;;  %5525 = vmatprep.mubr.bf16.mxu0 %v23533_v19 }
 0x604   :  { %5495 = vmatprep.subr.bf16.mxu0 %v16728_v2  ;;  %5726 = vmatprep.mubr.bf16.mxu1 %v23533_v19 }
 0x605   :  { %5695 = vmatpush1.bf16.msra.mxu1 %v16747_v31 }
 0x606   :  { %5696 = vmatprep.subr.bf16.mxu1 %v16755_v10 }
 0x607   :  { %5496 = vmatpush1.bf16.msra.mxu0 %v16726_v7 }
 0x608   :  { %5497 = vmatprep.subr.bf16.mxu0 %v16731_v20  ;;  %v14620_v20 = vld [vmem:[%s23418_s7 + $0x4] sm:$0xf] }
 0x609   :  { %5697 = vmatpush1.bf16.msra.mxu1 %v16753_v8  ;;  %v5074_v31 = vrot.slane %v14620_v20, %v18947_v29 }
 0x60a   :  { %5698 = vmatprep.subr.bf16.mxu1 %v16761_v55 }
 0x60b   :  { %5498 = vmatpush1.bf16.msra.mxu0 %v16729_v36  ;;  %v5066_v36 = vrot.slane %v14620_v20, %v18939_v23 }
 0x60c   :  { %5499 = vmatprep.subr.bf16.mxu0 %v16734_v50 }
 0x60d   :  { %5699 = vmatpush1.bf16.msra.mxu1 %v16759_v27 }
 0x60e   :  { %5700 = vmatprep.subr.bf16.mxu1 %v16767_v34 }
 0x60f   :  { %5500 = vmatpush1.bf16.msra.mxu0 %v16732_v28 }
 0x610   :  { %5501 = vmatprep.subr.bf16.mxu0 %v16737_v17  ;;  %v5070_v17 = vrot.slane %v14620_v20, %v18944_v26 }
 0x613   :  { %5502 = vmatpush1.bf16.msra.mxu0 %v16735_v33 }
 0x614   :  { %5503 = vmatprep.subr.bf16.mxu0 %v16740_v38 }
 0x617   :  { %5504 = vmatpush1.bf16.msra.mxu0 %v16738_v49 }
 0x618   :  { %5505 = vmatprep.subr.bf16.mxu0 %v16743_v47 }
 0x61b   :  { %5506 = vmatpush1.bf16.msra.mxu0 %v16741_v22 }
 0x61c   :  { %5507 = vmatprep.subr.bf16.mxu0 %v16746_v45 }
 0x61f   :  { %5508 = vmatpush1.bf16.msra.mxu0 %v16744_v54 }
 0x620   :  { %5735 = vmatprep.subr.bf16.mxu0 %v16752_v56 }
 0x622   :  { %5526 = vmatmul.mubr.bf16.vlgmr.msra.gmra.mrb[80].mxu0 %v20316_v53  ;;  %v16765_v53 = vld [vmem:[%s23420_s9 + $0x60] ss:$16 sps:$4 sm:$0xff]  }
 0x623   :  { %5767 = vmatprep.mubr.bf16.mxu0 %v23533_v19  ;;  %5736 = vmatpush1.bf16.msra.mxu0 %v16750_v52 }
 0x624   :  { %5737 = vmatprep.subr.bf16.mxu0 %v16758_v4  ;;  %5701 = vmatpush1.bf16.msra.mxu1 %v16765_v53 }
 0x625   :  { %5702 = vmatprep.subr.bf16.mxu1 %v16773_v11 }
 0x627   :  { %5738 = vmatpush1.bf16.msra.mxu0 %v16756_v6 }
 0x628   :  { %5739 = vmatprep.subr.bf16.mxu0 %v16764_v39  ;;  %5703 = vmatpush1.bf16.msra.mxu1 %v16771_v13 }
 0x629   :  { %5704 = vmatprep.subr.bf16.mxu1 %v16779_v12 }
 0x62b   :  { %5740 = vmatpush1.bf16.msra.mxu0 %v16762_v60 }
 0x62c   :  { %5741 = vmatprep.subr.bf16.mxu0 %v16770_v57  ;;  %5705 = vmatpush1.bf16.msra.mxu1 %v16777_v35  ;;  %v16795_v35 = vld [vmem:[%s23421_s10 + $0x100] ss:$16 sps:$4 sm:$0xff]  }
 0x62d   :  { %5706 = vmatprep.subr.bf16.mxu1 %v16785_v9 }
 0x62f   :  { %5742 = vmatpush1.bf16.msra.mxu0 %v16768_v14 }
 0x630   :  { %5743 = vmatprep.subr.bf16.mxu0 %v16776_v30  ;;  %5707 = vmatpush1.bf16.msra.mxu1 %v16783_v1 }
 0x631   :  { %5708 = vmatprep.subr.bf16.mxu1 %v16791_v51 }
 0x633   :  { %5744 = vmatpush1.bf16.msra.mxu0 %v16774_v25  ;;  %v5078_v25 = vrot.slane %v14620_v20, %v18955_v44  ;;  %v16813_v20 = vld [vmem:[%s23421_s10 + $0x160] ss:$16 sps:$4 sm:$0xff]  }
 0x634   :  { %5745 = vmatprep.subr.bf16.mxu0 %v16782_v48  ;;  %5709 = vmatpush1.bf16.msra.mxu1 %v16789_v32 }
 0x635   :  { %6052 = vmatprep.subr.bf16.mxu1 %v16797_v24 }
 0x637   :  { %5746 = vmatpush1.bf16.msra.mxu0 %v16780_v41  ;;  %v16798_v41 = vld [vmem:[%s23421_s10 + $0x108] ss:$16 sps:$4 sm:$0xff]  }
 0x638   :  { %5747 = vmatprep.subr.bf16.mxu0 %v16788_v18 }
 0x63b   :  { %5748 = vmatpush1.bf16.msra.mxu0 %v16786_v21  ;;  %v16806_v21 = vld [vmem:[%s23421_s10 + $0x12c] ss:$16 sps:$4 sm:$0xff]  }
 0x63c   :  { %5749 = vmatprep.subr.bf16.mxu0 %v16794_v46 }
 0x63f   :  { %5750 = vmatpush1.bf16.msra.mxu0 %v16792_v16 }
 0x640   :  { %6093 = vmatprep.subr.bf16.mxu0 %v16800_v42  ;;  %v16801_v42 = vld [vmem:[%s23421_s10 + $0x120] ss:$16 sps:$4 sm:$0xff]  }
 0x675   :  { %v4771_v43 = vpop.f32.mrb[68].mxu0  ;;  %v4812_v59 = vpop.f32.mrb[60].mxu1 }
 0x676   :  { %v4773_v61 = vpop.f32.mrb[69].mxu0  ;;  %v4814_v62 = vpop.f32.mrb[61].mxu1 }
 0x677   :  { %v4775_v63 = vpop.f32.mrb[70].mxu0  ;;  %v4816_v0 = vpop.f32.mrb[62].mxu1 }
 0x678   :  { %v4776_v2 = vpop.f32.mrb[71].mxu0  ;;  %v4817_v7 = vpop.f32.mrb[63].mxu1  ;;  %v16807_v63 = vld [vmem:[%s23421_s10 + $0x140] ss:$16 sps:$4 sm:$0xff]   ;;  %v16810_v0 = vld [vmem:[%s23421_s10 + $0x148] ss:$16 sps:$4 sm:$0xff]  }
 0x679   :  { %v16815_v2 = vld [vmem:[%s23421_s10 + $0x164] ss:$16 sps:$4 sm:$0xff]   ;;  %v16818_v7 = vld [vmem:[%s23421_s10 + $0x16c] ss:$16 sps:$4 sm:$0xff]  }
 0x6b5   :  { %v5013_v50 = vpop.f32.mrb[72].mxu0  ;;  %v5054_v28 = vpop.f32.mrb[64].mxu1 }
 0x6b6   :  { %v5014_v33 = vadd.f32 %v5013_v50, %v4771_v43  ;;  %v5055_v38 = vadd.f32 %v5054_v28, %v4812_v59  ;;  %v5015_v49 = vpop.f32.mrb[73].mxu0  ;;  %v5056_v47 = vpop.f32.mrb[65].mxu1  ;;  %v16804_v43 = vld [vmem:[%s23421_s10 + $0x128] ss:$16 sps:$4 sm:$0xff]   ;;  %v16809_v59 = vld [vmem:[%s23421_s10 + $0x144] ss:$16 sps:$4 sm:$0xff]  }
 0x6b7   :  { %v5016_v22 = vadd.f32 %v5015_v49, %v4773_v61  ;;  %v5057_v45 = vadd.f32 %v5056_v47, %v4814_v62  ;;  %v5017_v54 = vpop.f32.mrb[74].mxu0  ;;  %v5058_v40 = vpop.f32.mrb[66].mxu1  ;;  %v16812_v61 = vld [vmem:[%s23421_s10 + $0x14c] ss:$16 sps:$4 sm:$0xff]   ;;  %v16821_v50 = vld [vmem:[%s23421_s10 + $0x184] ss:$16 sps:$4 sm:$0xff]  }
 0x6b8   :  { %v5083_v56 = vadd.f32 %v5066_v36, %v5014_v33  ;;  %v5018_v52 = vpop.f32.mrb[75].mxu0  ;;  %v5059_v10 = vpop.f32.mrb[67].mxu1  ;;  %v5085_v55 = vadd.f32 %v5074_v31, %v5055_v38  ;;  %v16816_v36 = vld [vmem:[%s23421_s10 + $0x168] ss:$16 sps:$4 sm:$0xff]   ;;  %v16824_v28 = vld [vmem:[%s23421_s10 + $0x18c] ss:$16 sps:$4 sm:$0xff]  }
 0x6b9   :  { %v5084_v4 = vadd.f32 %v5070_v17, %v5016_v22  ;;  %v5086_v32 = vadd.f32 %v5078_v25, %v5057_v45  ;;  %v16819_v17 = vld [vmem:[%s23421_s10 + $0x180] ss:$16 sps:$4 sm:$0xff]   ;;  %v16822_v33 = vld [vmem:[%s23421_s10 + $0x188] ss:$16 sps:$4 sm:$0xff]   ;;  %v16827_v38 = vld [vmem:[%s23421_s10 + $0x1a4] ss:$16 sps:$4 sm:$0xff]  }
 0x6ba   :  { %v5087_v8 = vmul.f32 0.5, %v5083_v56  ;;  %v16830_v49 = vld [vmem:[%s23421_s10 + $0x1ac] ss:$16 sps:$4 sm:$0xff]   ;;  %v16825_v22 = vld [vmem:[%s23421_s10 + $0x1a0] ss:$16 sps:$4 sm:$0xff]  }
 0x6bb   :  { %v5091_v6 = vmul.f32 0.5, %v5084_v4  ;;  %v5096_v62 = vmul.f32 0.5, %v5086_v32  ;;  %v16828_v45 = vld [vmem:[%s23421_s10 + $0x1a8] ss:$16 sps:$4 sm:$0xff]   ;;  %v16833_v54 = vld [vmem:[%s23421_s10 + $0x1c4] ss:$16 sps:$4 sm:$0xff]  }
 0x6bc   :  { %18009 = vtanh.f32 %v5087_v8  ;;  %v16836_v40 = vld [vmem:[%s23421_s10 + $0x1cc] ss:$16 sps:$4 sm:$0xff]   ;;  %v16831_v31 = vld [vmem:[%s23421_s10 + $0x1c0] ss:$16 sps:$4 sm:$0xff]   ;;  %v16834_v52 = vld [vmem:[%s23421_s10 + $0x1c8] ss:$16 sps:$4 sm:$0xff]  }
 0x6bd   :  { %18011 = vtanh.f32 %v5091_v6  ;;  %v16839_v10 = vld [vmem:[%s23421_s10 + $0x1e4] ss:$16 sps:$4 sm:$0xff]   ;;  %v16842_v4 = vld [vmem:[%s23421_s10 + $0x1ec] ss:$16 sps:$4 sm:$0xff]   ;;  %v16843_v25 = vld [vmem:[%s23420_s9 + $0x100] ss:$16 sps:$4 sm:$0xff]  }
 0x6be   :  { %18013 = vtanh.f32 %v5085_v55  ;;  %v16837_v55 = vld [vmem:[%s23421_s10 + $0x1e0] ss:$16 sps:$4 sm:$0xff]  }
 0x6bf   :  { %18015 = vtanh.f32 %v5096_v62  ;;  %v16855_v32 = vld [vmem:[%s23420_s9 + $0x140] ss:$16 sps:$4 sm:$0xff]   ;;  %v16870_v62 = vld [vmem:[%s23420_s9 + $0x188] ss:$16 sps:$4 sm:$0xff]  }
 0x6c6   :  { %v18010_v39 = vpop.eup %18009 }
 0x6c7   :  { %v18012_v27 = vpop.eup %18011  ;;  %v5089_v60 = vmul.f32 0.5, %v18010_v39  ;;  %v16840_v39 = vld [vmem:[%s23421_s10 + $0x1e8] ss:$16 sps:$4 sm:$0xff]  }
 0x6c8   :  { %v5093_v34 = vmul.f32 0.5, %v18012_v27  ;;  %v18014_v53 = vpop.eup %18013 }
 0x6c9   :  { %v5090_v57 = vadd.f32 0.5, %v5089_v60  ;;  %v18016_v47 = vpop.eup %18015 }
 0x6ca   :  { %v5094_v14 = vadd.f32 0.5, %v5093_v34  ;;  %v5098_v56 = vmul.f32 0.5, %v18016_v47  ;;  %v5776_v47 = vld [vmem:[%s23422_s11] sm:$0xf] }
 0x6cb   :  { %v5101_v11 = vmul.f32 %v18014_v53, %v5090_v57 }
 0x6cc   :  { %v5100_v30 = vmul.f32 %v5094_v14, %v20260_v5  ;;  %v16803_v5 = vld [vmem:[%s23421_s10 + $0x124] ss:$16 sps:$4 sm:$0xff]   ;;  %v5099_v6 = vadd.f32 0.5, %v5098_v56 }
 0x6ce   :  { %v20560_v13 = vadd.f32 %v5101_v11, %v5100_v30  ;;  %v16845_v11 = vld [vmem:[%s23420_s9 + $0x104] ss:$16 sps:$4 sm:$0xff]   ;;  %v16848_v30 = vld [vmem:[%s23420_s9 + $0x10c] ss:$16 sps:$4 sm:$0xff]  }
 0x6d0   :  { %18017 = vtanh.f32 %v20560_v13 }
 0x6d5   :  { %v5218_v12 = vpop.f32.mrb[76].mxu0  ;;  %v20563_v48 = vpop.f32.mrb[68].mxu1 }
 0x6d6   :  { %v5226_v9 = vpack.c.bf16 %v5218_v12, %v5218_v12  ;;  %v16035_v18 = vpop.f32.mrb[77].mxu0  ;;  %v20571_v1 = vpop.f32.mrb[69].mxu1  ;;  %v16846_v12 = vld [vmem:[%s23420_s9 + $0x108] ss:$16 sps:$4 sm:$0xff]  }
 0x6d7   :  { %v5221_v51 = vpop.f32.mrb[78].mxu0  ;;  %v5490_v16 = vpop.f32.mrb[70].mxu1  ;;  %v16852_v18 = vld [vmem:[%s23420_s9 + $0x128] ss:$16 sps:$4 sm:$0xff]  }
 0x6d8   :  { %v16036_v46 = vpop.f32.mrb[79].mxu0  ;;  %v5491_v24 = vpop.f32.mrb[71].mxu1  ;;  %5727 = vmatmul.mubr.bf16.vlgmr.msra.gmra.mrb[72].mxu1 %v5226_v9  ;;  %5768 = vmatmul.mubr.bf16.vlgmr.msra.gmra.mrb[84].mxu0 %v5226_v9  ;;  %v16849_v9 = vld [vmem:[%s23420_s9 + $0x120] ss:$16 sps:$4 sm:$0xff]   ;;  %v16858_v51 = vld [vmem:[%s23420_s9 + $0x148] ss:$16 sps:$4 sm:$0xff]  }
 0x6d9   :  { %6053 = vmatpush1.bf16.msra.mxu1 %v16795_v35  ;;  %6094 = vmatpush1.bf16.msra.mxu0 %v16798_v41  ;;  %v16851_v35 = vld [vmem:[%s23420_s9 + $0x124] ss:$16 sps:$4 sm:$0xff]   ;;  %v16854_v41 = vld [vmem:[%s23420_s9 + $0x12c] ss:$16 sps:$4 sm:$0xff]   ;;  %v16861_v24 = vld [vmem:[%s23420_s9 + $0x160] ss:$16 sps:$4 sm:$0xff]  }
 0x6da   :  { %6054 = vmatprep.subr.bf16.mxu1 %v16803_v5  ;;  %6095 = vmatprep.subr.bf16.mxu0 %v16806_v21  ;;  %v18018_v8 = vpop.eup %18017  ;;  %v16857_v5 = vld [vmem:[%s23420_s9 + $0x144] ss:$16 sps:$4 sm:$0xff]   ;;  %v16860_v21 = vld [vmem:[%s23420_s9 + $0x14c] ss:$16 sps:$4 sm:$0xff]  }
 0x6db   :  { %6084 = vmatprep.mubr.bf16.mxu1 %v23533_v19  ;;  %6125 = vmatprep.mubr.bf16.mxu0 %v23533_v19  ;;  %v5104_v27 = vmul.f32 %v18018_v8, %v5099_v6  ;;  %v16863_v16 = vld [vmem:[%s23420_s9 + $0x164] ss:$16 sps:$4 sm:$0xff]   ;;  %v16866_v46 = vld [vmem:[%s23420_s9 + $0x16c] ss:$16 sps:$4 sm:$0xff]  }
 0x6dd   :  { %6055 = vmatpush1.bf16.msra.mxu1 %v16801_v42  ;;  %6096 = vmatpush1.bf16.msra.mxu0 %v16804_v43  ;;  %v5858_v57 = vpack.c.bf16 %v5104_v27, %v5104_v27  ;;  %v16864_v42 = vld [vmem:[%s23420_s9 + $0x168] ss:$16 sps:$4 sm:$0xff]   ;;  %v16869_v43 = vld [vmem:[%s23420_s9 + $0x184] ss:$16 sps:$4 sm:$0xff]   ;;  %v5789_v27 = vrot.slane %v5776_v47, %v18947_v29 }
 0x6de   :  { %6056 = vmatprep.subr.bf16.mxu1 %v16809_v59  ;;  %6097 = vmatprep.subr.bf16.mxu0 %v16812_v61  ;;  %v16872_v59 = vld [vmem:[%s23420_s9 + $0x18c] ss:$16 sps:$4 sm:$0xff]   ;;  %v16867_v61 = vld [vmem:[%s23420_s9 + $0x180] ss:$16 sps:$4 sm:$0xff]  }
 0x6e1   :  { %6057 = vmatpush1.bf16.msra.mxu1 %v16807_v63  ;;  %6098 = vmatpush1.bf16.msra.mxu0 %v16810_v0  ;;  %v16875_v63 = vld [vmem:[%s23420_s9 + $0x1a4] ss:$16 sps:$4 sm:$0xff]   ;;  %v16873_v0 = vld [vmem:[%s23420_s9 + $0x1a0] ss:$16 sps:$4 sm:$0xff]  }
 0x6e2   :  { %6058 = vmatprep.subr.bf16.mxu1 %v16815_v2  ;;  %6099 = vmatprep.subr.bf16.mxu0 %v16818_v7  ;;  %v16876_v2 = vld [vmem:[%s23420_s9 + $0x1a8] ss:$16 sps:$4 sm:$0xff]   ;;  %v16878_v7 = vld [vmem:[%s23420_s9 + $0x1ac] ss:$16 sps:$4 sm:$0xff]  }
 0x6e5   :  { %6059 = vmatpush1.bf16.msra.mxu1 %v16813_v20  ;;  %6100 = vmatpush1.bf16.msra.mxu0 %v16816_v36  ;;  %v16881_v20 = vld [vmem:[%s23420_s9 + $0x1c4] ss:$16 sps:$4 sm:$0xff]   ;;  %v16884_v36 = vld [vmem:[%s23420_s9 + $0x1cc] ss:$16 sps:$4 sm:$0xff]  }
 0x6e6   :  { %6060 = vmatprep.subr.bf16.mxu1 %v16821_v50  ;;  %6101 = vmatprep.subr.bf16.mxu0 %v16824_v28  ;;  %v16879_v50 = vld [vmem:[%s23420_s9 + $0x1c0] ss:$16 sps:$4 sm:$0xff]   ;;  %v16882_v28 = vld [vmem:[%s23420_s9 + $0x1c8] ss:$16 sps:$4 sm:$0xff]  }
 0x6e9   :  { %6061 = vmatpush1.bf16.msra.mxu1 %v16819_v17  ;;  %6102 = vmatpush1.bf16.msra.mxu0 %v16822_v33  ;;  %v16887_v17 = vld [vmem:[%s23420_s9 + $0x1e4] ss:$16 sps:$4 sm:$0xff]   ;;  %v16885_v33 = vld [vmem:[%s23420_s9 + $0x1e0] ss:$16 sps:$4 sm:$0xff]  }
 0x6ea   :  { %6062 = vmatprep.subr.bf16.mxu1 %v16827_v38  ;;  %6103 = vmatprep.subr.bf16.mxu0 %v16830_v49  ;;  %v16888_v38 = vld [vmem:[%s23420_s9 + $0x1e8] ss:$16 sps:$4 sm:$0xff]   ;;  %v16890_v49 = vld [vmem:[%s23420_s9 + $0x1ec] ss:$16 sps:$4 sm:$0xff]  }
 0x6ed   :  { %6063 = vmatpush1.bf16.msra.mxu1 %v16825_v22  ;;  %6104 = vmatpush1.bf16.msra.mxu0 %v16828_v45  ;;  %v5781_v22 = vrot.slane %v5776_v47, %v18939_v23 }
 0x6ee   :  { %6064 = vmatprep.subr.bf16.mxu1 %v16833_v54  ;;  %6105 = vmatprep.subr.bf16.mxu0 %v16836_v40  ;;  %v5785_v40 = vrot.slane %v5776_v47, %v18944_v26 }
 0x6f1   :  { %6065 = vmatpush1.bf16.msra.mxu1 %v16831_v31  ;;  %6106 = vmatpush1.bf16.msra.mxu0 %v16834_v52 }
 0x6f2   :  { %6066 = vmatprep.subr.bf16.mxu1 %v16839_v10  ;;  %6107 = vmatprep.subr.bf16.mxu0 %v16842_v4 }
 0x6f5   :  { %6067 = vmatpush1.bf16.msra.mxu1 %v16837_v55  ;;  %6108 = vmatpush1.bf16.msra.mxu0 %v16840_v39  ;;  %v20660_v60 = vpop.f32.mrb[80].mxu0 }
 0x6f6   :  { %v20662_v34 = vpop.f32.mrb[81].mxu0  ;;  %6294 = vmatprep.subr.bf16.mxu1 %v16845_v11  ;;  %6335 = vmatprep.subr.bf16.mxu0 %v16848_v30 }
 0x6f7   :  { %v5531_v53 = vpop.f32.mrb[82].mxu0 }
 0x6f8   :  { %6085 = vmatmul.mubr.bf16.vlgmr.msra.gmra.mrb[76].mxu1 %v5858_v57  ;;  %6126 = vmatmul.mubr.bf16.vlgmr.msra.gmra.mrb[88].mxu0 %v5858_v57  ;;  %v5532_v14 = vpop.f32.mrb[83].mxu0 }
 0x6f9   :  { %6326 = vmatprep.mubr.bf16.mxu1 %v23533_v19  ;;  %6367 = vmatprep.mubr.bf16.mxu0 %v23533_v19 }
 0x6fa   :  { %6295 = vmatpush1.bf16.msra.mxu1 %v16843_v25  ;;  %6336 = vmatpush1.bf16.msra.mxu0 %v16846_v12 }
 0x6fb   :  { %6296 = vmatprep.subr.bf16.mxu1 %v16851_v35  ;;  %6337 = vmatprep.subr.bf16.mxu0 %v16854_v41 }
 0x6fe   :  { %6297 = vmatpush1.bf16.msra.mxu1 %v16849_v9  ;;  %6338 = vmatpush1.bf16.msra.mxu0 %v16852_v18 }
 0x6ff   :  { %6298 = vmatprep.subr.bf16.mxu1 %v16857_v5  ;;  %6339 = vmatprep.subr.bf16.mxu0 %v16860_v21 }
 0x702   :  { %6299 = vmatpush1.bf16.msra.mxu1 %v16855_v32  ;;  %6340 = vmatpush1.bf16.msra.mxu0 %v16858_v51 }
 0x703   :  { %6300 = vmatprep.subr.bf16.mxu1 %v16863_v16  ;;  %6341 = vmatprep.subr.bf16.mxu0 %v16866_v46 }
 0x706   :  { %6301 = vmatpush1.bf16.msra.mxu1 %v16861_v24  ;;  %6342 = vmatpush1.bf16.msra.mxu0 %v16864_v42 }
 0x707   :  { %6302 = vmatprep.subr.bf16.mxu1 %v16869_v43  ;;  %6343 = vmatprep.subr.bf16.mxu0 %v16872_v59 }
 0x70a   :  { %6303 = vmatpush1.bf16.msra.mxu1 %v16867_v61  ;;  %6344 = vmatpush1.bf16.msra.mxu0 %v16870_v62 }
 0x70b   :  { %6304 = vmatprep.subr.bf16.mxu1 %v16875_v63  ;;  %6345 = vmatprep.subr.bf16.mxu0 %v16878_v7 }
 0x70e   :  { %6305 = vmatpush1.bf16.msra.mxu1 %v16873_v0  ;;  %6346 = vmatpush1.bf16.msra.mxu0 %v16876_v2 }
 0x70f   :  { %6306 = vmatprep.subr.bf16.mxu1 %v16881_v20  ;;  %6347 = vmatprep.subr.bf16.mxu0 %v16884_v36 }
 0x712   :  { %6307 = vmatpush1.bf16.msra.mxu1 %v16879_v50  ;;  %6348 = vmatpush1.bf16.msra.mxu0 %v16882_v28  ;;  %v16892_v50 = vld [vmem:[%s23423_s12 + $0x8] sm:$0xff]   ;;  %v16893_v28 = vld [vmem:[%s23423_s12 + $0x10] sm:$0xff]  }
 0x713   :  { %6308 = vmatprep.subr.bf16.mxu1 %v16887_v17  ;;  %6349 = vmatprep.subr.bf16.mxu0 %v16890_v49  ;;  %v16894_v17 = vld [vmem:[%s23423_s12 + $0x18] sm:$0xff]   ;;  %v16897_v49 = vld [vmem:[%s23423_s12 + $0x30] sm:$0xff]  }
 0x716   :  { %6309 = vmatpush1.bf16.msra.mxu1 %v16885_v33  ;;  %6350 = vmatpush1.bf16.msra.mxu0 %v16888_v38  ;;  %v16895_v33 = vld [vmem:[%s23423_s12 + $0x20] sm:$0xff]   ;;  %v16896_v38 = vld [vmem:[%s23423_s12 + $0x28] sm:$0xff]  }
 0x717   :  { %16037 = vmatprep.subr.bf16.mxu1 %v18270_v15  ;;  %16057 = vmatprep.subr.bf16.mxu0 %v18270_v15 }
 0x7ab   :  { %v5728_v45 = vpop.f32.mrb[72].mxu1  ;;  %v5769_v54 = vpop.f32.mrb[84].mxu0 }
 0x7ac   :  { %v5729_v56 = vadd.f32 %v5728_v45, %v20563_v48  ;;  %v5770_v31 = vadd.f32 %v5769_v54, %v20660_v60  ;;  %v5730_v52 = vpop.f32.mrb[73].mxu1  ;;  %v5771_v10 = vpop.f32.mrb[85].mxu0  ;;  %v5793_v60 = vrot.slane %v5776_v47, %v18955_v44  ;;  %v16898_v47 = vld [vmem:[%s23423_s12 + $0x38] sm:$0xff]   ;;  %v14824_v45 = vld [vmem:[%s23422_s11 + $0x4] sm:$0xf] }
 0x7ad   :  { %v5731_v4 = vadd.f32 %v5730_v52, %v20571_v1  ;;  %v5772_v8 = vadd.f32 %v5771_v10, %v20662_v34  ;;  %v5732_v6 = vpop.f32.mrb[74].mxu1  ;;  %v5773_v55 = vpop.f32.mrb[86].mxu0  ;;  %v6382_v54 = vrot.slane %v14824_v45, %v18939_v23 }
 0x7ae   :  { %v5798_v39 = vadd.f32 %v5781_v22, %v5729_v56  ;;  %v5733_v57 = vpop.f32.mrb[75].mxu1  ;;  %v5774_v53 = vpop.f32.mrb[87].mxu0  ;;  %v5800_v48 = vadd.f32 %v5789_v27, %v5770_v31  ;;  %v16901_v22 = vld [vmem:[%s23421_s10 + $0x4] ss:$16 sps:$4 sm:$0xff]   ;;  %v6386_v31 = vrot.slane %v14824_v45, %v18944_v26 }
 0x7af   :  { %v5799_v14 = vadd.f32 %v5785_v40, %v5731_v4  ;;  %v5801_v25 = vadd.f32 %v5793_v60, %v5772_v8  ;;  %v6390_v53 = vrot.slane %v14824_v45, %v18947_v29 }
 0x7b0   :  { %v5802_v11 = vmul.f32 0.5, %v5798_v39 }
 0x7b1   :  { %v5806_v30 = vmul.f32 0.5, %v5799_v14  ;;  %v5811_v1 = vmul.f32 0.5, %v5801_v25 }
 0x7b2   :  { %18019 = vtanh.f32 %v5802_v11 }
 0x7b3   :  { %18021 = vtanh.f32 %v5806_v30 }
 0x7b4   :  { %18023 = vtanh.f32 %v5800_v48 }
 0x7b5   :  { %18025 = vtanh.f32 %v5811_v1  ;;  %v6394_v1 = vrot.slane %v14824_v45, %v18955_v44  ;;  %v16920_v45 = vld [vmem:[%s23421_s10 + $0xe0] ss:$16 sps:$4 sm:$0xff]  }
 0x7bc   :  { %v18020_v12 = vpop.eup %18019 }
 0x7bd   :  { %v18022_v34 = vpop.eup %18021  ;;  %v5804_v35 = vmul.f32 0.5, %v18020_v12 }
 0x7be   :  { %v5808_v41 = vmul.f32 0.5, %v18022_v34  ;;  %v18024_v18 = vpop.eup %18023 }
 0x7bf   :  { %v5805_v9 = vadd.f32 0.5, %v5804_v35  ;;  %v18026_v16 = vpop.eup %18025 }
 0x7c0   :  { %v5809_v5 = vadd.f32 0.5, %v5808_v41  ;;  %v5813_v46 = vmul.f32 0.5, %v18026_v16 }
 0x7c1   :  { %v5816_v21 = vmul.f32 %v18024_v18, %v5805_v9 }
 0x7c2   :  { %v5815_v32 = vmul.f32 %v5809_v5, %v20307_v37  ;;  %v5814_v2 = vadd.f32 0.5, %v5813_v46  ;;  %v16891_v37 = vld [vmem:[%s23423_s12] sm:$0xff]  }
 0x7c4   :  { %v20776_v51 = vadd.f32 %v5816_v21, %v5815_v32 }
 0x7c6   :  { %18027 = vtanh.f32 %v20776_v51 }
 0x7cb   :  { %v6086_v24 = vpop.f32.mrb[76].mxu1  ;;  %v6127_v42 = vpop.f32.mrb[88].mxu0 }
 0x7cc   :  { %v6088_v43 = vpop.f32.mrb[77].mxu1  ;;  %v6129_v59 = vpop.f32.mrb[89].mxu0 }
 0x7cd   :  { %v6090_v61 = vpop.f32.mrb[78].mxu1  ;;  %v6131_v62 = vpop.f32.mrb[90].mxu0 }
 0x7ce   :  { %v6091_v63 = vpop.f32.mrb[79].mxu1  ;;  %v6132_v0 = vpop.f32.mrb[91].mxu0 }
 0x7cf   :  { %v16899_v63 = vld [vmem:[%s23421_s10] ss:$16 sps:$4 sm:$0xff]  }
 0x7d0   :  { %v18028_v7 = vpop.eup %18027 }
 0x7d1   :  { %v5819_v20 = vmul.f32 %v18028_v7, %v5814_v2  ;;  %v16904_v2 = vld [vmem:[%s23421_s10 + $0x24] ss:$16 sps:$4 sm:$0xff]  }
 0x7d2   :  { %v16907_v7 = vld [vmem:[%s23421_s10 + $0x44] ss:$16 sps:$4 sm:$0xff]  }
 0x7d3   :  { %v20779_v36 = vpack.c.bf16 %v5819_v20, %v5819_v20  ;;  %v16905_v20 = vld [vmem:[%s23421_s10 + $0x40] ss:$16 sps:$4 sm:$0xff]  }
 0x7d5   :  { %6327 = vmatmul.mubr.bf16.vlgmr.msra.gmra.mrb[80].mxu1 %v20779_v36  ;;  %6368 = vmatmul.mubr.bf16.vlgmr.msra.gmra.mrb[92].mxu0 %v20779_v36 }
 0x7d6   :  { %16053 = vmatprep.mubr.msk.bf16.mxu1 %vm18271_vm2, %v18270_v15  ;;  %16073 = vmatprep.mubr.msk.bf16.mxu0 %vm18271_vm2, %v18270_v15 }
 0x7d7   :  { %16038 = vmatpush3.bf16.msra.mxu1 %v16891_v37  ;;  %v16910_v37 = vld [vmem:[%s23421_s10 + $0x64] ss:$16 sps:$4 sm:$0xff]  }
 0x7d8   :  { %16039 = vmatprep.subr.bf16.mxu1 %v18270_v15 }
 0x7db   :  { %16040 = vmatpush3.bf16.msra.mxu1 %v16892_v50  ;;  %v16908_v50 = vld [vmem:[%s23421_s10 + $0x60] ss:$16 sps:$4 sm:$0xff]  }
 0x7dc   :  { %16041 = vmatprep.subr.bf16.mxu1 %v18270_v15 }
 0x7df   :  { %16042 = vmatpush3.bf16.msra.mxu1 %v16893_v28  ;;  %v16913_v28 = vld [vmem:[%s23421_s10 + $0x84] ss:$16 sps:$4 sm:$0xff]  }
 0x7e0   :  { %16043 = vmatprep.subr.bf16.mxu1 %v18270_v15 }
 0x7e3   :  { %16044 = vmatpush3.bf16.msra.mxu1 %v16894_v17  ;;  %v16911_v17 = vld [vmem:[%s23421_s10 + $0x80] ss:$16 sps:$4 sm:$0xff]  }
 0x7e4   :  { %16045 = vmatprep.subr.bf16.mxu1 %v18270_v15 }
 0x7e7   :  { %16046 = vmatpush3.bf16.msra.mxu1 %v16895_v33  ;;  %v16916_v33 = vld [vmem:[%s23421_s10 + $0xa4] ss:$16 sps:$4 sm:$0xff]  }
 0x7e8   :  { %16047 = vmatprep.subr.bf16.mxu1 %v18270_v15 }
 0x7eb   :  { %16048 = vmatpush3.bf16.msra.mxu1 %v16896_v38  ;;  %v16914_v38 = vld [vmem:[%s23421_s10 + $0xa0] ss:$16 sps:$4 sm:$0xff]  }
 0x7ec   :  { %16049 = vmatprep.subr.bf16.mxu1 %v18270_v15 }
 0x7ef   :  { %16050 = vmatpush3.bf16.msra.mxu1 %v16897_v49  ;;  %v16919_v49 = vld [vmem:[%s23421_s10 + $0xc4] ss:$16 sps:$4 sm:$0xff]  }
 0x7f0   :  { %16051 = vmatprep.subr.bf16.mxu1 %v18270_v15 }
 0x7f3   :  { %16052 = vmatpush3.bf16.msra.mxu1 %v16898_v47  ;;  %v16917_v47 = vld [vmem:[%s23421_s10 + $0xc0] ss:$16 sps:$4 sm:$0xff]  }
 0x7f4   :  { %6902 = vmatprep.subr.bf16.mxu1 %v16901_v22  ;;  %v16922_v22 = vld [vmem:[%s23421_s10 + $0xe4] ss:$16 sps:$4 sm:$0xff]  }
 0x8a8   :  { %v6328_v40 = vpop.f32.mrb[80].mxu1  ;;  %v6369_v56 = vpop.f32.mrb[92].mxu0 }
 0x8a9   :  { %v6329_v52 = vadd.f32 %v6328_v40, %v6086_v24  ;;  %v6370_v10 = vadd.f32 %v6369_v56, %v6127_v42  ;;  %v6330_v4 = vpop.f32.mrb[81].mxu1  ;;  %v6371_v8 = vpop.f32.mrb[93].mxu0 }
 0x8aa   :  { %v6331_v6 = vadd.f32 %v6330_v4, %v6088_v43  ;;  %v6372_v55 = vadd.f32 %v6371_v8, %v6129_v59  ;;  %v6332_v39 = vpop.f32.mrb[82].mxu1  ;;  %v6373_v27 = vpop.f32.mrb[94].mxu0 }
 0x8ab   :  { %v6399_v57 = vadd.f32 %v6382_v54, %v6329_v52  ;;  %v6333_v14 = vpop.f32.mrb[83].mxu1  ;;  %v6374_v11 = vpop.f32.mrb[95].mxu0  ;;  %v6401_v25 = vadd.f32 %v6390_v53, %v6370_v10  ;;  %v14825_v54 = vld [vmem:[%s23424_s13] ss:$0 sm:$0xff] }
 0x8ac   :  { %v6400_v30 = vadd.f32 %v6386_v31, %v6331_v6  ;;  %v6402_v12 = vadd.f32 %v6394_v1, %v6372_v55  ;;  %v16925_v1 = vld [vmem:[%s23419_s8 + $0x10] sm:$0xff]  }
 0x8ad   :  { %v6403_v48 = vmul.f32 0.5, %v6399_v57 }
 0x8ae   :  { %v6407_v60 = vmul.f32 0.5, %v6400_v30  ;;  %v6412_v34 = vmul.f32 0.5, %v6402_v12  ;;  %v16926_v12 = vld [vmem:[%s23419_s8 + $0x18] sm:$0xff]  }
 0x8af   :  { %18029 = vtanh.f32 %v6403_v48 }
 0x8b0   :  { %18031 = vtanh.f32 %v6407_v60  ;;  %v16923_v60 = vld [vmem:[%s23419_s8] sm:$0xff]  }
 0x8b1   :  { %18033 = vtanh.f32 %v6401_v25  ;;  %16058 = vmatpush3.bf16.msra.mxu0 %v16923_v60  ;;  %v16924_v25 = vld [vmem:[%s23419_s8 + $0x8] sm:$0xff]  }
 0x8b2   :  { %18035 = vtanh.f32 %v6412_v34  ;;  %16059 = vmatprep.subr.bf16.mxu0 %v18270_v15  ;;  %v16927_v34 = vld [vmem:[%s23419_s8 + $0x20] sm:$0xff]   ;;  %v16960_v60 = vld [vmem:[%s23420_s9 + $0xc] ss:$16 sps:$4 sm:$0xff]  }
 0x8b5   :  { %16060 = vmatpush3.bf16.msra.mxu0 %v16924_v25  ;;  %v16958_v25 = vld [vmem:[%s23420_s9 + $0x8] ss:$16 sps:$4 sm:$0xff]  }
 0x8b6   :  { %16061 = vmatprep.subr.bf16.mxu0 %v18270_v15 }
 0x8b9   :  { %v18030_v35 = vpop.eup %18029  ;;  %16062 = vmatpush3.bf16.msra.mxu0 %v16925_v1  ;;  %v16966_v1 = vld [vmem:[%s23420_s9 + $0x2c] ss:$16 sps:$4 sm:$0xff]  }
 0x8ba   :  { %v18032_v41 = vpop.eup %18031  ;;  %v6405_v9 = vmul.f32 0.5, %v18030_v35  ;;  %16063 = vmatprep.subr.bf16.mxu0 %v18270_v15  ;;  %v16928_v35 = vld [vmem:[%s23419_s8 + $0x28] sm:$0xff]  }
 0x8bb   :  { %v6409_v18 = vmul.f32 0.5, %v18032_v41  ;;  %v18034_v21 = vpop.eup %18033  ;;  %v16929_v41 = vld [vmem:[%s23419_s8 + $0x30] sm:$0xff]  }
 0x8bc   :  { %v6406_v5 = vadd.f32 0.5, %v6405_v9  ;;  %v18036_v42 = vpop.eup %18035  ;;  %v16930_v9 = vld [vmem:[%s23419_s8 + $0x38] sm:$0xff]  }
 0x8bd   :  { %v6410_v32 = vadd.f32 0.5, %v6409_v18  ;;  %v6414_v43 = vmul.f32 0.5, %v18036_v42  ;;  %16064 = vmatpush3.bf16.msra.mxu0 %v16926_v12  ;;  %v16964_v12 = vld [vmem:[%s23420_s9 + $0x28] ss:$16 sps:$4 sm:$0xff]  }
 0x8be   :  { %v6417_v16 = vmul.f32 %v18034_v21, %v6406_v5  ;;  %16065 = vmatprep.subr.bf16.mxu0 %v18270_v15  ;;  %v6558_v5 = vstv %s6557_s26 }
 0x8bf   :  { %v6416_v46 = vmul.f32 %v6410_v32, %v20560_v13  ;;  %v6415_v59 = vadd.f32 0.5, %v6414_v43  ;;  %v16902_v13 = vld [vmem:[%s23421_s10 + $0x20] ss:$16 sps:$4 sm:$0xff]   ;;  %vm6559_vm7 = vcmp.eq.s32.totalorder %v6558_v5, 1  ;;  %v16990_v5 = vld [vmem:[%s23420_s9 + $0xac] ss:$16 sps:$4 sm:$0xff]  }
 0x8c1   :  { %v20829_v24 = vadd.f32 %v6417_v16, %v6416_v46  ;;  %16066 = vmatpush3.bf16.msra.mxu0 %v16927_v34  ;;  %v6556_v46 = vld [vmem:[%s23412_s1] sm:$0xff]  ;;  %v16972_v34 = vld [vmem:[%s23420_s9 + $0x4c] ss:$16 sps:$4 sm:$0xff]  }
 0x8c2   :  { %16067 = vmatprep.subr.bf16.mxu0 %v18270_v15 }
 0x8c3   :  { %18037 = vtanh.f32 %v20829_v24 }
 0x8c5   :  { %16068 = vmatpush3.bf16.msra.mxu0 %v16928_v35  ;;  %v16970_v35 = vld [vmem:[%s23420_s9 + $0x48] ss:$16 sps:$4 sm:$0xff]  }
 0x8c6   :  { %16069 = vmatprep.subr.bf16.mxu0 %v18270_v15 }
 0x8c9   :  { %16070 = vmatpush3.bf16.msra.mxu0 %v16929_v41  ;;  %v16976_v41 = vld [vmem:[%s23420_s9 + $0x68] ss:$16 sps:$4 sm:$0xff]  }
 0x8ca   :  { %16071 = vmatprep.subr.bf16.mxu0 %v18270_v15 }
 0x8cd   :  { %v18038_v61 = vpop.eup %18037  ;;  %16072 = vmatpush3.bf16.msra.mxu0 %v16930_v9  ;;  %v16984_v9 = vld [vmem:[%s23420_s9 + $0x8c] ss:$16 sps:$4 sm:$0xff]  }
 0x8ce   :  { %v6420_v62 = vmul.f32 %v18038_v61, %v6415_v59  ;;  %v16933_v61 = vld [vmem:[%s23421_s10 + $0xc] ss:$16 sps:$4 sm:$0xff]  }
 0x8cf   :  { %6943 = vmatprep.subr.bf16.mxu0 %v16933_v61 }
 0x8d0   :  { %v20835_v0 = vpack.c.bf16 %v6420_v62, %v6420_v62  ;;  %v16955_v62 = vld [vmem:[%s23420_s9] ss:$16 sps:$4 sm:$0xff]  }
 0x8d2   :  { %16054 = vmatmul.mubr.bf16.vlgmr.msra.gmra.mrb[84].mxu1 %v20835_v0 }
 0x8d3   :  { %6903 = vmatpush1.bf16.msra.mxu1 %v16899_v63  ;;  %6934 = vmatprep.mubr.bf16.mxu1 %v23533_v19  ;;  %v16957_v63 = vld [vmem:[%s23420_s9 + $0x4] ss:$16 sps:$4 sm:$0xff]  }
 0x8d4   :  { %6904 = vmatprep.subr.bf16.mxu1 %v16904_v2  ;;  %v16963_v2 = vld [vmem:[%s23420_s9 + $0x24] ss:$16 sps:$4 sm:$0xff]  }
 0x8d7   :  { %6905 = vmatpush1.bf16.msra.mxu1 %v16902_v13  ;;  %v16961_v13 = vld [vmem:[%s23420_s9 + $0x20] ss:$16 sps:$4 sm:$0xff]  }
 0x8d8   :  { %6906 = vmatprep.subr.bf16.mxu1 %v16907_v7  ;;  %v16969_v7 = vld [vmem:[%s23420_s9 + $0x44] ss:$16 sps:$4 sm:$0xff]  }
 0x8db   :  { %6907 = vmatpush1.bf16.msra.mxu1 %v16905_v20  ;;  %v16967_v20 = vld [vmem:[%s23420_s9 + $0x40] ss:$16 sps:$4 sm:$0xff]  }
 0x8dc   :  { %6908 = vmatprep.subr.bf16.mxu1 %v16910_v37  ;;  %v16975_v37 = vld [vmem:[%s23420_s9 + $0x64] ss:$16 sps:$4 sm:$0xff]  }
 0x8df   :  { %6909 = vmatpush1.bf16.msra.mxu1 %v16908_v50  ;;  %v16973_v50 = vld [vmem:[%s23420_s9 + $0x60] ss:$16 sps:$4 sm:$0xff]  }
 0x8e0   :  { %6910 = vmatprep.subr.bf16.mxu1 %v16913_v28  ;;  %v16981_v28 = vld [vmem:[%s23420_s9 + $0x84] ss:$16 sps:$4 sm:$0xff]  }
 0x8e3   :  { %6911 = vmatpush1.bf16.msra.mxu1 %v16911_v17  ;;  %v16979_v17 = vld [vmem:[%s23420_s9 + $0x80] ss:$16 sps:$4 sm:$0xff]  }
 0x8e4   :  { %6912 = vmatprep.subr.bf16.mxu1 %v16916_v33  ;;  %v16987_v33 = vld [vmem:[%s23420_s9 + $0xa4] ss:$16 sps:$4 sm:$0xff]  }
 0x8e7   :  { %6913 = vmatpush1.bf16.msra.mxu1 %v16914_v38  ;;  %v16985_v38 = vld [vmem:[%s23420_s9 + $0xa0] ss:$16 sps:$4 sm:$0xff]  }
 0x8e8   :  { %6914 = vmatprep.subr.bf16.mxu1 %v16919_v49  ;;  %v16993_v49 = vld [vmem:[%s23420_s9 + $0xc4] ss:$16 sps:$4 sm:$0xff]  }
 0x8eb   :  { %6915 = vmatpush1.bf16.msra.mxu1 %v16917_v47  ;;  %v16991_v47 = vld [vmem:[%s23420_s9 + $0xc0] ss:$16 sps:$4 sm:$0xff]  }
 0x8ec   :  { %6916 = vmatprep.subr.bf16.mxu1 %v16922_v22  ;;  %v16999_v22 = vld [vmem:[%s23420_s9 + $0xe4] ss:$16 sps:$4 sm:$0xff]  }
 0x8ef   :  { %6917 = vmatpush1.bf16.msra.mxu1 %v16920_v45  ;;  %v16997_v45 = vld [vmem:[%s23420_s9 + $0xe0] ss:$16 sps:$4 sm:$0xff]  }
 0x8f0   :  { %7144 = vmatprep.subr.bf16.mxu1 %v16957_v63  ;;  %v17006_v63 = vld [vmem:[%s23421_s10 + $0x108] ss:$16 sps:$4 sm:$0xff]  }
 0x8f2   :  { %6935 = vmatmul.mubr.bf16.vlgmr.msra.gmra.mrb[88].mxu1 %v20779_v36 }
 0x8f3   :  { %7176 = vmatprep.mubr.bf16.mxu1 %v23533_v19  ;;  %7145 = vmatpush1.bf16.msra.mxu1 %v16955_v62  ;;  %v17003_v62 = vld [vmem:[%s23421_s10 + $0x100] ss:$16 sps:$4 sm:$0xff]  }
 0x8f4   :  { %7146 = vmatprep.subr.bf16.mxu1 %v16963_v2 }
 0x8f7   :  { %7147 = vmatpush1.bf16.msra.mxu1 %v16961_v13 }
 0x8f8   :  { %7148 = vmatprep.subr.bf16.mxu1 %v16969_v7  ;;  %v17011_v7 = vld [vmem:[%s23421_s10 + $0x124] ss:$16 sps:$4 sm:$0xff]  }
 0x8fb   :  { %7149 = vmatpush1.bf16.msra.mxu1 %v16967_v20  ;;  %v17014_v20 = vld [vmem:[%s23421_s10 + $0x12c] ss:$16 sps:$4 sm:$0xff]  }
 0x8fc   :  { %7150 = vmatprep.subr.bf16.mxu1 %v16975_v37 }
 0x8ff   :  { %7151 = vmatpush1.bf16.msra.mxu1 %v16973_v50 }
 0x900   :  { %7152 = vmatprep.subr.bf16.mxu1 %v16981_v28  ;;  %v17009_v28 = vld [vmem:[%s23421_s10 + $0x120] ss:$16 sps:$4 sm:$0xff]  }
 0x903   :  { %7153 = vmatpush1.bf16.msra.mxu1 %v16979_v17  ;;  %v17012_v17 = vld [vmem:[%s23421_s10 + $0x128] ss:$16 sps:$4 sm:$0xff]  }
 0x904   :  { %7154 = vmatprep.subr.bf16.mxu1 %v16987_v33  ;;  %v17017_v33 = vld [vmem:[%s23421_s10 + $0x144] ss:$16 sps:$4 sm:$0xff]  }
 0x907   :  { %7155 = vmatpush1.bf16.msra.mxu1 %v16985_v38  ;;  %v17020_v38 = vld [vmem:[%s23421_s10 + $0x14c] ss:$16 sps:$4 sm:$0xff]  }
 0x908   :  { %7156 = vmatprep.subr.bf16.mxu1 %v16993_v49  ;;  %v17015_v49 = vld [vmem:[%s23421_s10 + $0x140] ss:$16 sps:$4 sm:$0xff]  }
 0x90b   :  { %7157 = vmatpush1.bf16.msra.mxu1 %v16991_v47  ;;  %v17018_v47 = vld [vmem:[%s23421_s10 + $0x148] ss:$16 sps:$4 sm:$0xff]  }
 0x90c   :  { %7158 = vmatprep.subr.bf16.mxu1 %v16999_v22  ;;  %v17023_v22 = vld [vmem:[%s23421_s10 + $0x164] ss:$16 sps:$4 sm:$0xff]  }
 0x90f   :  { %7159 = vmatpush1.bf16.msra.mxu1 %v16997_v45  ;;  %v17026_v45 = vld [vmem:[%s23421_s10 + $0x16c] ss:$16 sps:$4 sm:$0xff]  }
 0x9a5   :  { %v6529_v40 = vpop.f32.mrb[84].mxu1 }
 0x9a6   :  { %v6530_v56 = vadd.f32 %v14825_v54, %v6529_v40  ;;  %v16055_v31 = vpop.f32.mrb[85].mxu1  ;;  %v16931_v40 = vld [vmem:[%s23421_s10 + $0x8] ss:$16 sps:$4 sm:$0xff]  }
 0x9a7   :  { %v6532_v52 = vpop.f32.mrb[86].mxu1  ;;  %v16934_v31 = vld [vmem:[%s23421_s10 + $0x28] ss:$16 sps:$4 sm:$0xff]  }
 0x9a8   :  { %6535 = vst [vmem:[#allocation9] sm:$0xff] %v6530_v56  ;;  %6536 = vmax.xlane.f32.xlu0 %v6530_v56  ;;  %v16056_v10 = vpop.f32.mrb[87].mxu1  ;;  %v16939_v52 = vld [vmem:[%s23421_s10 + $0x4c] ss:$16 sps:$4 sm:$0xff]  }
 0x9a9   :  { %v16937_v10 = vld [vmem:[%s23421_s10 + $0x48] ss:$16 sps:$4 sm:$0xff]  }
 0x9c5   :  { %v20886_v4 = vpop.f32.mrb[88].mxu1 }
 0x9c6   :  { %v20888_v8 = vpop.f32.mrb[89].mxu1 }
 0x9c7   :  { %v6940_v6 = vpop.f32.mrb[90].mxu1 }
 0x9c8   :  { %v6941_v55 = vpop.f32.mrb[91].mxu1  ;;  %v16942_v6 = vld [vmem:[%s23421_s10 + $0x6c] ss:$16 sps:$4 sm:$0xff]  }
 0x9c9   :  { %v16940_v55 = vld [vmem:[%s23421_s10 + $0x68] ss:$16 sps:$4 sm:$0xff]  }
 0xa35   :  { %v6537_v39 = vpop.xlane.xlu0 %6536 }
 0xa36   :  { %vm6538_vm5 = vcmp.eq.f32.partialorder %v6530_v56, %v6537_v39  ;;  %v16936_v56 = vld [vmem:[%s23421_s10 + $0x2c] ss:$16 sps:$4 sm:$0xff]  }
 0xa37   :  { %v6539_v27 = vsel %vm6538_vm5, %v20387_v58, 128  ;;  %v16945_v39 = vld [vmem:[%s23421_s10 + $0x8c] ss:$16 sps:$4 sm:$0xff]  }
 0xa38   :  { %v6541_v57 = vshra.s32 %v6539_v27, 16  ;;  %v6540_v14 = vand.u32 65535, %v6539_v27  ;;  %v16943_v27 = vld [vmem:[%s23421_s10 + $0x88] ss:$16 sps:$4 sm:$0xff]  }
 0xa3a   :  { %v6543_v53 = vcvt.s32.f32 %v6541_v57  ;;  %v6542_v30 = vcvt.s32.f32 %v6540_v14  ;;  %v16948_v57 = vld [vmem:[%s23421_s10 + $0xac] ss:$16 sps:$4 sm:$0xff]  }
 0xa3b   :  { %v16951_v14 = vld [vmem:[%s23421_s10 + $0xcc] ss:$16 sps:$4 sm:$0xff]  }
 0xa3c   :  { %6544 = vmin.xlane.f32.xlu1 %v6543_v53 }
 0xac9   :  { %v6545_v11 = vpop.xlane.xlu1 %6544 }
 0xaca   :  { %vm6546_vm6 = vcmp.eq.f32.partialorder %v6543_v53, %v6545_v11  ;;  %v6551_v18 = vcvt.f32.s32 %v6545_v11  ;;  %v16946_v53 = vld [vmem:[%s23421_s10 + $0xa8] ss:$16 sps:$4 sm:$0xff]  }
 0xacb   :  { %v6547_v48 = vsel %vm6546_vm6, %v6542_v30, inf  ;;  %v16949_v11 = vld [vmem:[%s23421_s10 + $0xc8] ss:$16 sps:$4 sm:$0xff]   ;;  %v16954_v30 = vld [vmem:[%s23421_s10 + $0xec] ss:$16 sps:$4 sm:$0xff]  }
 0xacc   :  { %6548 = vmin.xlane.f32.xlu1 %v6547_v48  ;;  %v6552_v32 = vshll.u32 %v6551_v18, 16  ;;  %v16952_v48 = vld [vmem:[%s23421_s10 + $0xe8] ss:$16 sps:$4 sm:$0xff]  }
 0xacd   :  { %v16982_v18 = vld [vmem:[%s23420_s9 + $0x88] ss:$16 sps:$4 sm:$0xff]  }
 0xb59   :  { %v6549_v21 = vpop.xlane.xlu1 %6548 }
 0xb5a   :  { %v6550_v16 = vcvt.f32.s32 %v6549_v21  ;;  %v16988_v21 = vld [vmem:[%s23420_s9 + $0xa8] ss:$16 sps:$4 sm:$0xff]  }
 0xb5c   :  { %v6553_v42 = vadd.s32 %v6552_v32, %v6550_v16  ;;  %v16996_v32 = vld [vmem:[%s23420_s9 + $0xcc] ss:$16 sps:$4 sm:$0xff]   ;;  %v16994_v16 = vld [vmem:[%s23420_s9 + $0xc8] ss:$16 sps:$4 sm:$0xff]  }
 0xb5e   :  { %v6560_v43 = vsel %vm6559_vm7, %v6556_v46, %v6553_v42  ;;  %v17002_v46 = vld [vmem:[%s23420_s9 + $0xec] ss:$16 sps:$4 sm:$0xff]   ;;  %v17000_v42 = vld [vmem:[%s23420_s9 + $0xe8] ss:$16 sps:$4 sm:$0xff]  }
 0xb5f   :  { %6561 = vst.msk [vmem:[#allocation4] sm:$0xff] %vm5108_vm1, %v6560_v43  ;;  %v17005_v43 = vld [vmem:[%s23421_s10 + $0x104] ss:$16 sps:$4 sm:$0xff]  }
 0xb60   :  { %7500 = vmatprep.subr.bf16.mxu1 %v17005_v43  ;;  %v17066_v43 = vld [vmem:[%s23420_s9 + $0x148] ss:$16 sps:$4 sm:$0xff]  }
 0xb66   :  { %v6562_v59 = vld [vmem:[#allocation4] sm:$0xff] }
 0xb67   :  { %6564 = vperm.xlu1 %16267, %v6562_v59   ;;  %v17008_v59 = vld [vmem:[%s23421_s10 + $0x10c] ss:$16 sps:$4 sm:$0xff]  }
 0xbe6   :  { %v6565_v54 = vpop.permute.xlu1 %6564 }
 0xbe7   :  { %vm6566_vm8 = vcmp.eq.s32.totalorder %v20387_v58, %v6565_v54  ;;  %v17021_v54 = vld [vmem:[%s23421_s10 + $0x160] ss:$16 sps:$4 sm:$0xff]  }
 0xbe8   :  { %vm14843_vm9 = vmpackc.low %vm6566_vm8, %vm6566_vm8 }
 0xbe9   :  { %16074 = vmatmul.mubr.msk.bf16.vlgmr.msra.gmra.mrb[96].mxu0 %vm14843_vm9, %v18272_v3 }
 0xbea   :  { %6944 = vmatpush1.bf16.msra.mxu0 %v16931_v40  ;;  %6975 = vmatprep.mubr.bf16.mxu0 %v23533_v19  ;;  %v17024_v40 = vld [vmem:[%s23421_s10 + $0x168] ss:$16 sps:$4 sm:$0xff]  }
 0xbeb   :  { %6945 = vmatprep.subr.bf16.mxu0 %v16936_v56  ;;  %v17029_v56 = vld [vmem:[%s23421_s10 + $0x184] ss:$16 sps:$4 sm:$0xff]  }
 0xbee   :  { %6946 = vmatpush1.bf16.msra.mxu0 %v16934_v31  ;;  %v17032_v31 = vld [vmem:[%s23421_s10 + $0x18c] ss:$16 sps:$4 sm:$0xff]  }
 0xbef   :  { %6947 = vmatprep.subr.bf16.mxu0 %v16939_v52  ;;  %v17027_v52 = vld [vmem:[%s23421_s10 + $0x180] ss:$16 sps:$4 sm:$0xff]  }
 0xbf2   :  { %6948 = vmatpush1.bf16.msra.mxu0 %v16937_v10  ;;  %v17030_v10 = vld [vmem:[%s23421_s10 + $0x188] ss:$16 sps:$4 sm:$0xff]  }
 0xbf3   :  { %6949 = vmatprep.subr.bf16.mxu0 %v16942_v6  ;;  %v17035_v6 = vld [vmem:[%s23421_s10 + $0x1a4] ss:$16 sps:$4 sm:$0xff]  }
 0xbf6   :  { %6950 = vmatpush1.bf16.msra.mxu0 %v16940_v55  ;;  %v17038_v55 = vld [vmem:[%s23421_s10 + $0x1ac] ss:$16 sps:$4 sm:$0xff]  }
 0xbf7   :  { %6951 = vmatprep.subr.bf16.mxu0 %v16945_v39  ;;  %v17033_v39 = vld [vmem:[%s23421_s10 + $0x1a0] ss:$16 sps:$4 sm:$0xff]  }
 0xbfa   :  { %6952 = vmatpush1.bf16.msra.mxu0 %v16943_v27  ;;  %v17036_v27 = vld [vmem:[%s23421_s10 + $0x1a8] ss:$16 sps:$4 sm:$0xff]  }
 0xbfb   :  { %6953 = vmatprep.subr.bf16.mxu0 %v16948_v57  ;;  %v17041_v57 = vld [vmem:[%s23421_s10 + $0x1c4] ss:$16 sps:$4 sm:$0xff]  }
 0xbfe   :  { %6954 = vmatpush1.bf16.msra.mxu0 %v16946_v53  ;;  %v17044_v53 = vld [vmem:[%s23421_s10 + $0x1cc] ss:$16 sps:$4 sm:$0xff]  }
 0xbff   :  { %6955 = vmatprep.subr.bf16.mxu0 %v16951_v14  ;;  %v17039_v14 = vld [vmem:[%s23421_s10 + $0x1c0] ss:$16 sps:$4 sm:$0xff]  }
 0xc02   :  { %6956 = vmatpush1.bf16.msra.mxu0 %v16949_v11  ;;  %v17042_v11 = vld [vmem:[%s23421_s10 + $0x1c8] ss:$16 sps:$4 sm:$0xff]  }
 0xc03   :  { %6957 = vmatprep.subr.bf16.mxu0 %v16954_v30  ;;  %v17047_v30 = vld [vmem:[%s23421_s10 + $0x1e4] ss:$16 sps:$4 sm:$0xff]  }
 0xc06   :  { %6958 = vmatpush1.bf16.msra.mxu0 %v16952_v48  ;;  %v17050_v48 = vld [vmem:[%s23421_s10 + $0x1ec] ss:$16 sps:$4 sm:$0xff]  }
 0xc07   :  { %7185 = vmatprep.subr.bf16.mxu0 %v16960_v60  ;;  %v17045_v60 = vld [vmem:[%s23421_s10 + $0x1e0] ss:$16 sps:$4 sm:$0xff]  }
 0xc09   :  { %6976 = vmatmul.mubr.bf16.vlgmr.msra.gmra.mrb[100].mxu0 %v20779_v36  ;;  %v16978_v36 = vld [vmem:[%s23420_s9 + $0x6c] ss:$16 sps:$4 sm:$0xff]  }
 0xc0a   :  { %7186 = vmatpush1.bf16.msra.mxu0 %v16958_v25  ;;  %7217 = vmatprep.mubr.bf16.mxu0 %v23533_v19  ;;  %v17048_v25 = vld [vmem:[%s23421_s10 + $0x1e8] ss:$16 sps:$4 sm:$0xff]  }
 0xc0b   :  { %7187 = vmatprep.subr.bf16.mxu0 %v16966_v1 }
 0xc0e   :  { %7188 = vmatpush1.bf16.msra.mxu0 %v16964_v12 }
 0xc0f   :  { %7189 = vmatprep.subr.bf16.mxu0 %v16972_v34 }
 0xc12   :  { %7190 = vmatpush1.bf16.msra.mxu0 %v16970_v35 }
 0xc13   :  { %7191 = vmatprep.subr.bf16.mxu0 %v16978_v36  ;;  %v17053_v36 = vld [vmem:[%s23420_s9 + $0x104] ss:$16 sps:$4 sm:$0xff]  }
 0xc16   :  { %7192 = vmatpush1.bf16.msra.mxu0 %v16976_v41  ;;  %v17056_v41 = vld [vmem:[%s23420_s9 + $0x10c] ss:$16 sps:$4 sm:$0xff]  }
 0xc17   :  { %7193 = vmatprep.subr.bf16.mxu0 %v16984_v9  ;;  %v17051_v9 = vld [vmem:[%s23420_s9 + $0x100] ss:$16 sps:$4 sm:$0xff]  }
 0xc1a   :  { %7194 = vmatpush1.bf16.msra.mxu0 %v16982_v18  ;;  %v17059_v18 = vld [vmem:[%s23420_s9 + $0x124] ss:$16 sps:$4 sm:$0xff]  }
 0xc1b   :  { %7195 = vmatprep.subr.bf16.mxu0 %v16990_v5  ;;  %v17062_v5 = vld [vmem:[%s23420_s9 + $0x12c] ss:$16 sps:$4 sm:$0xff]  }
 0xc1e   :  { %7196 = vmatpush1.bf16.msra.mxu0 %v16988_v21  ;;  %v17057_v21 = vld [vmem:[%s23420_s9 + $0x120] ss:$16 sps:$4 sm:$0xff]  }
 0xc1f   :  { %7197 = vmatprep.subr.bf16.mxu0 %v16996_v32  ;;  %v17060_v32 = vld [vmem:[%s23420_s9 + $0x128] ss:$16 sps:$4 sm:$0xff]  }
 0xc22   :  { %7198 = vmatpush1.bf16.msra.mxu0 %v16994_v16  ;;  %v17065_v16 = vld [vmem:[%s23420_s9 + $0x144] ss:$16 sps:$4 sm:$0xff]  }
 0xc23   :  { %7199 = vmatprep.subr.bf16.mxu0 %v17002_v46  ;;  %v17068_v46 = vld [vmem:[%s23420_s9 + $0x14c] ss:$16 sps:$4 sm:$0xff]  }
 0xc26   :  { %7200 = vmatpush1.bf16.msra.mxu0 %v17000_v42  ;;  %v17063_v42 = vld [vmem:[%s23420_s9 + $0x140] ss:$16 sps:$4 sm:$0xff]  }
 0xc27   :  { %7541 = vmatprep.subr.bf16.mxu0 %v17008_v59  ;;  %v17071_v59 = vld [vmem:[%s23420_s9 + $0x164] ss:$16 sps:$4 sm:$0xff]  }
 0xcbc   :  { %v6668_v61 = vpop.f32.mrb[96].mxu0 }
 0xcbd   :  { %v6676_v2 = vpack.c.bf16 %v6668_v61, %v6668_v61  ;;  %v16075_v13 = vpop.f32.mrb[97].mxu0  ;;  %v17074_v61 = vld [vmem:[%s23420_s9 + $0x16c] ss:$16 sps:$4 sm:$0xff]  }
 0xcbe   :  { %v6671_v37 = vpop.f32.mrb[98].mxu0  ;;  %v17080_v13 = vld [vmem:[%s23420_s9 + $0x18c] ss:$16 sps:$4 sm:$0xff]  }
 0xcbf   :  { %v16076_v50 = vpop.f32.mrb[99].mxu0  ;;  %7177 = vmatmul.mubr.bf16.vlgmr.msra.gmra.mrb[92].mxu1 %v6676_v2  ;;  %7218 = vmatmul.mubr.bf16.vlgmr.msra.gmra.mrb[104].mxu0 %v6676_v2  ;;  %v17077_v2 = vld [vmem:[%s23420_s9 + $0x184] ss:$16 sps:$4 sm:$0xff]  }
 0xcc0   :  { %7501 = vmatpush1.bf16.msra.mxu1 %v17003_v62  ;;  %7542 = vmatpush1.bf16.msra.mxu0 %v17006_v63  ;;  %v17069_v62 = vld [vmem:[%s23420_s9 + $0x160] ss:$16 sps:$4 sm:$0xff]   ;;  %v17072_v63 = vld [vmem:[%s23420_s9 + $0x168] ss:$16 sps:$4 sm:$0xff]   ;;  %v17083_v37 = vld [vmem:[%s23420_s9 + $0x1a4] ss:$16 sps:$4 sm:$0xff]  }
 0xcc1   :  { %7502 = vmatprep.subr.bf16.mxu1 %v17011_v7  ;;  %7543 = vmatprep.subr.bf16.mxu0 %v17014_v20  ;;  %v17075_v7 = vld [vmem:[%s23420_s9 + $0x180] ss:$16 sps:$4 sm:$0xff]   ;;  %v17078_v20 = vld [vmem:[%s23420_s9 + $0x188] ss:$16 sps:$4 sm:$0xff]  }
 0xcc2   :  { %7532 = vmatprep.mubr.bf16.mxu1 %v23533_v19  ;;  %7573 = vmatprep.mubr.bf16.mxu0 %v23533_v19  ;;  %v17081_v50 = vld [vmem:[%s23420_s9 + $0x1a0] ss:$16 sps:$4 sm:$0xff]  }
 0xcc4   :  { %7503 = vmatpush1.bf16.msra.mxu1 %v17009_v28  ;;  %7544 = vmatpush1.bf16.msra.mxu0 %v17012_v17  ;;  %v17084_v28 = vld [vmem:[%s23420_s9 + $0x1a8] ss:$16 sps:$4 sm:$0xff]   ;;  %v17086_v17 = vld [vmem:[%s23420_s9 + $0x1ac] ss:$16 sps:$4 sm:$0xff]  }
 0xcc5   :  { %7504 = vmatprep.subr.bf16.mxu1 %v17017_v33  ;;  %7545 = vmatprep.subr.bf16.mxu0 %v17020_v38  ;;  %v17089_v33 = vld [vmem:[%s23420_s9 + $0x1c4] ss:$16 sps:$4 sm:$0xff]   ;;  %v17092_v38 = vld [vmem:[%s23420_s9 + $0x1cc] ss:$16 sps:$4 sm:$0xff]  }
 0xcc8   :  { %7505 = vmatpush1.bf16.msra.mxu1 %v17015_v49  ;;  %7546 = vmatpush1.bf16.msra.mxu0 %v17018_v47  ;;  %v17087_v49 = vld [vmem:[%s23420_s9 + $0x1c0] ss:$16 sps:$4 sm:$0xff]   ;;  %v17090_v47 = vld [vmem:[%s23420_s9 + $0x1c8] ss:$16 sps:$4 sm:$0xff]  }
 0xcc9   :  { %7506 = vmatprep.subr.bf16.mxu1 %v17023_v22  ;;  %7547 = vmatprep.subr.bf16.mxu0 %v17026_v45  ;;  %v17095_v22 = vld [vmem:[%s23420_s9 + $0x1e4] ss:$16 sps:$4 sm:$0xff]   ;;  %v17093_v45 = vld [vmem:[%s23420_s9 + $0x1e0] ss:$16 sps:$4 sm:$0xff]  }
 0xccc   :  { %7507 = vmatpush1.bf16.msra.mxu1 %v17021_v54  ;;  %7548 = vmatpush1.bf16.msra.mxu0 %v17024_v40  ;;  %v17096_v54 = vld [vmem:[%s23420_s9 + $0x1e8] ss:$16 sps:$4 sm:$0xff]   ;;  %v17098_v40 = vld [vmem:[%s23420_s9 + $0x1ec] ss:$16 sps:$4 sm:$0xff]  }
 0xccd   :  { %7508 = vmatprep.subr.bf16.mxu1 %v17029_v56  ;;  %7549 = vmatprep.subr.bf16.mxu0 %v17032_v31  ;;  %v7226_v56 = vld [vmem:[%s23422_s11] sm:$0xf] }
 0xcce   :  { %v7231_v31 = vrot.slane %v7226_v56, %v18939_v23 }
 0xcd0   :  { %7509 = vmatpush1.bf16.msra.mxu1 %v17027_v52  ;;  %7550 = vmatpush1.bf16.msra.mxu0 %v17030_v10 }
 0xcd1   :  { %7510 = vmatprep.subr.bf16.mxu1 %v17035_v6  ;;  %7551 = vmatprep.subr.bf16.mxu0 %v17038_v55  ;;  %v7235_v6 = vrot.slane %v7226_v56, %v18944_v26 }
 0xcd4   :  { %7511 = vmatpush1.bf16.msra.mxu1 %v17033_v39  ;;  %7552 = vmatpush1.bf16.msra.mxu0 %v17036_v27 }
 0xcd5   :  { %7512 = vmatprep.subr.bf16.mxu1 %v17041_v57  ;;  %7553 = vmatprep.subr.bf16.mxu0 %v17044_v53 }
 0xcd8   :  { %7513 = vmatpush1.bf16.msra.mxu1 %v17039_v14  ;;  %7554 = vmatpush1.bf16.msra.mxu0 %v17042_v11 }
 0xcd9   :  { %7514 = vmatprep.subr.bf16.mxu1 %v17047_v30  ;;  %7555 = vmatprep.subr.bf16.mxu0 %v17050_v48 }
 0xcdc   :  { %v21173_v1 = vpop.f32.mrb[100].mxu0  ;;  %7515 = vmatpush1.bf16.msra.mxu1 %v17045_v60  ;;  %7556 = vmatpush1.bf16.msra.mxu0 %v17048_v25  ;;  %v7239_v60 = vrot.slane %v7226_v56, %v18947_v29 }
 0xcdd   :  { %v21175_v12 = vpop.f32.mrb[101].mxu0  ;;  %7742 = vmatprep.subr.bf16.mxu1 %v17053_v36  ;;  %7783 = vmatprep.subr.bf16.mxu0 %v17056_v41 }
 0xcde   :  { %v6981_v34 = vpop.f32.mrb[102].mxu0 }
 0xcdf   :  { %v6982_v35 = vpop.f32.mrb[103].mxu0  ;;  %7533 = vmatmul.mubr.bf16.vlgmr.msra.gmra.mrb[96].mxu1 %v20835_v0  ;;  %7574 = vmatmul.mubr.bf16.vlgmr.msra.gmra.mrb[108].mxu0 %v20835_v0  ;;  %v17054_v0 = vld [vmem:[%s23420_s9 + $0x108] ss:$16 sps:$4 sm:$0xff]  }
 0xce0   :  { %7774 = vmatprep.mubr.bf16.mxu1 %v23533_v19  ;;  %7815 = vmatprep.mubr.bf16.mxu0 %v23533_v19 }
 0xce1   :  { %7743 = vmatpush1.bf16.msra.mxu1 %v17051_v9  ;;  %7784 = vmatpush1.bf16.msra.mxu0 %v17054_v0 }
 0xce2   :  { %7744 = vmatprep.subr.bf16.mxu1 %v17059_v18  ;;  %7785 = vmatprep.subr.bf16.mxu0 %v17062_v5 }
 0xce5   :  { %7745 = vmatpush1.bf16.msra.mxu1 %v17057_v21  ;;  %7786 = vmatpush1.bf16.msra.mxu0 %v17060_v32 }
 0xce6   :  { %7746 = vmatprep.subr.bf16.mxu1 %v17065_v16  ;;  %7787 = vmatprep.subr.bf16.mxu0 %v17068_v46 }
 0xce9   :  { %7747 = vmatpush1.bf16.msra.mxu1 %v17063_v42  ;;  %7788 = vmatpush1.bf16.msra.mxu0 %v17066_v43 }
 0xcea   :  { %7748 = vmatprep.subr.bf16.mxu1 %v17071_v59  ;;  %7789 = vmatprep.subr.bf16.mxu0 %v17074_v61 }
 0xced   :  { %7749 = vmatpush1.bf16.msra.mxu1 %v17069_v62  ;;  %7790 = vmatpush1.bf16.msra.mxu0 %v17072_v63 }
 0xcee   :  { %7750 = vmatprep.subr.bf16.mxu1 %v17077_v2  ;;  %7791 = vmatprep.subr.bf16.mxu0 %v17080_v13 }
 0xcf1   :  { %7751 = vmatpush1.bf16.msra.mxu1 %v17075_v7  ;;  %7792 = vmatpush1.bf16.msra.mxu0 %v17078_v20 }
 0xcf2   :  { %7752 = vmatprep.subr.bf16.mxu1 %v17083_v37  ;;  %7793 = vmatprep.subr.bf16.mxu0 %v17086_v17 }
 0xcf5   :  { %7753 = vmatpush1.bf16.msra.mxu1 %v17081_v50  ;;  %7794 = vmatpush1.bf16.msra.mxu0 %v17084_v28 }
 0xcf6   :  { %7754 = vmatprep.subr.bf16.mxu1 %v17089_v33  ;;  %7795 = vmatprep.subr.bf16.mxu0 %v17092_v38 }
 0xcf9   :  { %7755 = vmatpush1.bf16.msra.mxu1 %v17087_v49  ;;  %7796 = vmatpush1.bf16.msra.mxu0 %v17090_v47  ;;  %v17100_v49 = vld [vmem:[%s23423_s12 + $0x8] sm:$0xff]   ;;  %v17101_v47 = vld [vmem:[%s23423_s12 + $0x10] sm:$0xff]  }
 0xcfa   :  { %7756 = vmatprep.subr.bf16.mxu1 %v17095_v22  ;;  %7797 = vmatprep.subr.bf16.mxu0 %v17098_v40  ;;  %v17102_v22 = vld [vmem:[%s23423_s12 + $0x18] sm:$0xff]   ;;  %v17105_v40 = vld [vmem:[%s23423_s12 + $0x30] sm:$0xff]  }
 0xcfd   :  { %7757 = vmatpush1.bf16.msra.mxu1 %v17093_v45  ;;  %7798 = vmatpush1.bf16.msra.mxu0 %v17096_v54  ;;  %v17103_v45 = vld [vmem:[%s23423_s12 + $0x20] sm:$0xff]   ;;  %v17104_v54 = vld [vmem:[%s23423_s12 + $0x28] sm:$0xff]  }
 0xcfe   :  { %16077 = vmatprep.subr.bf16.mxu1 %v18270_v15  ;;  %16097 = vmatprep.subr.bf16.mxu0 %v18270_v15 }
 0xd92   :  { %v7178_v52 = vpop.f32.mrb[92].mxu1  ;;  %v7219_v10 = vpop.f32.mrb[104].mxu0 }
 0xd93   :  { %v7179_v55 = vadd.f32 %v7178_v52, %v20886_v4  ;;  %v7220_v39 = vadd.f32 %v7219_v10, %v21173_v1  ;;  %v7180_v27 = vpop.f32.mrb[93].mxu1  ;;  %v7221_v57 = vpop.f32.mrb[105].mxu0  ;;  %v7243_v1 = vrot.slane %v7226_v56, %v18955_v44  ;;  %v17106_v56 = vld [vmem:[%s23423_s12 + $0x38] sm:$0xff]   ;;  %v15037_v52 = vld [vmem:[%s23422_s11 + $0x4] sm:$0xf] }
 0xd94   :  { %v7181_v53 = vadd.f32 %v7180_v27, %v20888_v8  ;;  %v7222_v14 = vadd.f32 %v7221_v57, %v21175_v12  ;;  %v7182_v11 = vpop.f32.mrb[94].mxu1  ;;  %v7223_v30 = vpop.f32.mrb[106].mxu0  ;;  %v7829_v10 = vrot.slane %v15037_v52, %v18939_v23 }
 0xd95   :  { %v7248_v48 = vadd.f32 %v7231_v31, %v7179_v55  ;;  %v7183_v25 = vpop.f32.mrb[95].mxu1  ;;  %v7224_v34 = vpop.f32.mrb[107].mxu0  ;;  %v7250_v4 = vadd.f32 %v7239_v60, %v7220_v39  ;;  %v17109_v31 = vld [vmem:[%s23421_s10 + $0x4] ss:$16 sps:$4 sm:$0xff]   ;;  %v7833_v39 = vrot.slane %v15037_v52, %v18944_v26 }
 0xd96   :  { %v7249_v35 = vadd.f32 %v7235_v6, %v7181_v53  ;;  %v7251_v9 = vadd.f32 %v7243_v1, %v7222_v14  ;;  %v7837_v34 = vrot.slane %v15037_v52, %v18947_v29 }
 0xd97   :  { %v7252_v36 = vmul.f32 0.5, %v7248_v48 }
 0xd98   :  { %v7256_v41 = vmul.f32 0.5, %v7249_v35  ;;  %v7261_v8 = vmul.f32 0.5, %v7251_v9 }
 0xd99   :  { %18039 = vtanh.f32 %v7252_v36 }
 0xd9a   :  { %18041 = vtanh.f32 %v7256_v41 }
 0xd9b   :  { %18043 = vtanh.f32 %v7250_v4 }
 0xd9c   :  { %18045 = vtanh.f32 %v7261_v8  ;;  %v7841_v8 = vrot.slane %v15037_v52, %v18955_v44  ;;  %v17128_v52 = vld [vmem:[%s23421_s10 + $0xe0] ss:$16 sps:$4 sm:$0xff]  }
 0xda3   :  { %v18040_v0 = vpop.eup %18039 }
 0xda4   :  { %v18042_v12 = vpop.eup %18041  ;;  %v7254_v18 = vmul.f32 0.5, %v18040_v0 }
 0xda5   :  { %v7258_v5 = vmul.f32 0.5, %v18042_v12  ;;  %v18044_v32 = vpop.eup %18043 }
 0xda6   :  { %v7255_v21 = vadd.f32 0.5, %v7254_v18  ;;  %v18046_v59 = vpop.eup %18045 }
 0xda7   :  { %v7259_v16 = vadd.f32 0.5, %v7258_v5  ;;  %v7263_v61 = vmul.f32 0.5, %v18046_v59 }
 0xda8   :  { %v7266_v46 = vmul.f32 %v18044_v32, %v7255_v21 }
 0xda9   :  { %v7265_v42 = vmul.f32 %v7259_v16, %v20776_v51  ;;  %v7264_v28 = vadd.f32 0.5, %v7263_v61  ;;  %v17099_v51 = vld [vmem:[%s23423_s12] sm:$0xff]  }
 0xdab   :  { %v21291_v43 = vadd.f32 %v7266_v46, %v7265_v42 }
 0xdad   :  { %18047 = vtanh.f32 %v21291_v43 }
 0xdb2   :  { %v7534_v62 = vpop.f32.mrb[96].mxu1  ;;  %v7575_v63 = vpop.f32.mrb[108].mxu0 }
 0xdb3   :  { %v7536_v2 = vpop.f32.mrb[97].mxu1  ;;  %v7577_v13 = vpop.f32.mrb[109].mxu0 }
 0xdb4   :  { %v7538_v7 = vpop.f32.mrb[98].mxu1  ;;  %v7579_v20 = vpop.f32.mrb[110].mxu0 }
 0xdb5   :  { %v7539_v37 = vpop.f32.mrb[99].mxu1  ;;  %v7580_v50 = vpop.f32.mrb[111].mxu0 }
 0xdb6   :  { %v17107_v37 = vld [vmem:[%s23421_s10] ss:$16 sps:$4 sm:$0xff]  }
 0xdb7   :  { %v18048_v17 = vpop.eup %18047 }
 0xdb8   :  { %v7269_v33 = vmul.f32 %v18048_v17, %v7264_v28  ;;  %v17112_v28 = vld [vmem:[%s23421_s10 + $0x24] ss:$16 sps:$4 sm:$0xff]  }
 0xdb9   :  { %v17115_v17 = vld [vmem:[%s23421_s10 + $0x44] ss:$16 sps:$4 sm:$0xff]  }
 0xdba   :  { %v21294_v38 = vpack.c.bf16 %v7269_v33, %v7269_v33  ;;  %v17113_v33 = vld [vmem:[%s23421_s10 + $0x40] ss:$16 sps:$4 sm:$0xff]  }
 0xdbc   :  { %7775 = vmatmul.mubr.bf16.vlgmr.msra.gmra.mrb[100].mxu1 %v21294_v38  ;;  %7816 = vmatmul.mubr.bf16.vlgmr.msra.gmra.mrb[112].mxu0 %v21294_v38 }
 0xdbd   :  { %16093 = vmatprep.mubr.msk.bf16.mxu1 %vm18271_vm2, %v18270_v15  ;;  %16113 = vmatprep.mubr.msk.bf16.mxu0 %vm18271_vm2, %v18270_v15 }
 0xdbe   :  { %16078 = vmatpush3.bf16.msra.mxu1 %v17099_v51  ;;  %v17118_v51 = vld [vmem:[%s23421_s10 + $0x64] ss:$16 sps:$4 sm:$0xff]  }
 0xdbf   :  { %16079 = vmatprep.subr.bf16.mxu1 %v18270_v15 }
 0xdc2   :  { %16080 = vmatpush3.bf16.msra.mxu1 %v17100_v49  ;;  %v17116_v49 = vld [vmem:[%s23421_s10 + $0x60] ss:$16 sps:$4 sm:$0xff]  }
 0xdc3   :  { %16081 = vmatprep.subr.bf16.mxu1 %v18270_v15 }
 0xdc6   :  { %16082 = vmatpush3.bf16.msra.mxu1 %v17101_v47  ;;  %v17121_v47 = vld [vmem:[%s23421_s10 + $0x84] ss:$16 sps:$4 sm:$0xff]  }
 0xdc7   :  { %16083 = vmatprep.subr.bf16.mxu1 %v18270_v15 }
 0xdca   :  { %16084 = vmatpush3.bf16.msra.mxu1 %v17102_v22  ;;  %v17119_v22 = vld [vmem:[%s23421_s10 + $0x80] ss:$16 sps:$4 sm:$0xff]  }
 0xdcb   :  { %16085 = vmatprep.subr.bf16.mxu1 %v18270_v15 }
 0xdce   :  { %16086 = vmatpush3.bf16.msra.mxu1 %v17103_v45  ;;  %v17124_v45 = vld [vmem:[%s23421_s10 + $0xa4] ss:$16 sps:$4 sm:$0xff]  }
 0xdcf   :  { %16087 = vmatprep.subr.bf16.mxu1 %v18270_v15 }
 0xdd2   :  { %16088 = vmatpush3.bf16.msra.mxu1 %v17104_v54  ;;  %v17122_v54 = vld [vmem:[%s23421_s10 + $0xa0] ss:$16 sps:$4 sm:$0xff]  }
 0xdd3   :  { %16089 = vmatprep.subr.bf16.mxu1 %v18270_v15 }
 0xdd6   :  { %16090 = vmatpush3.bf16.msra.mxu1 %v17105_v40  ;;  %v17127_v40 = vld [vmem:[%s23421_s10 + $0xc4] ss:$16 sps:$4 sm:$0xff]  }
 0xdd7   :  { %16091 = vmatprep.subr.bf16.mxu1 %v18270_v15 }
 0xdda   :  { %16092 = vmatpush3.bf16.msra.mxu1 %v17106_v56  ;;  %v17125_v56 = vld [vmem:[%s23421_s10 + $0xc0] ss:$16 sps:$4 sm:$0xff]  }
 0xddb   :  { %8351 = vmatprep.subr.bf16.mxu1 %v17109_v31  ;;  %v17130_v31 = vld [vmem:[%s23421_s10 + $0xe4] ss:$16 sps:$4 sm:$0xff]  }
 0xe8f   :  { %v7776_v6 = vpop.f32.mrb[100].mxu1  ;;  %v7817_v55 = vpop.f32.mrb[112].mxu0 }
 0xe90   :  { %v7777_v27 = vadd.f32 %v7776_v6, %v7534_v62  ;;  %v7818_v57 = vadd.f32 %v7817_v55, %v7575_v63  ;;  %v7778_v53 = vpop.f32.mrb[101].mxu1  ;;  %v7819_v14 = vpop.f32.mrb[113].mxu0 }
 0xe91   :  { %v7779_v11 = vadd.f32 %v7778_v53, %v7536_v2  ;;  %v7820_v30 = vadd.f32 %v7819_v14, %v7577_v13  ;;  %v7780_v48 = vpop.f32.mrb[102].mxu1  ;;  %v7821_v60 = vpop.f32.mrb[114].mxu0 }
 0xe92   :  { %v7846_v25 = vadd.f32 %v7829_v10, %v7777_v27  ;;  %v7781_v35 = vpop.f32.mrb[103].mxu1  ;;  %v7822_v36 = vpop.f32.mrb[115].mxu0  ;;  %v7848_v9 = vadd.f32 %v7837_v34, %v7818_v57  ;;  %v15038_v10 = vld [vmem:[%s23424_s13] ss:$0 sm:$0xff] }
 0xe93   :  { %v7847_v41 = vadd.f32 %v7833_v39, %v7779_v11  ;;  %v7849_v0 = vadd.f32 %v7841_v8, %v7820_v30  ;;  %v17133_v8 = vld [vmem:[%s23419_s8 + $0x10] sm:$0xff]  }
 0xe94   :  { %v7850_v4 = vmul.f32 0.5, %v7846_v25 }
 0xe95   :  { %v7854_v1 = vmul.f32 0.5, %v7847_v41  ;;  %v7859_v12 = vmul.f32 0.5, %v7849_v0  ;;  %v17134_v0 = vld [vmem:[%s23419_s8 + $0x18] sm:$0xff]  }
 0xe96   :  { %18049 = vtanh.f32 %v7850_v4 }
 0xe97   :  { %18051 = vtanh.f32 %v7854_v1  ;;  %v17131_v1 = vld [vmem:[%s23419_s8] sm:$0xff]  }
 0xe98   :  { %18053 = vtanh.f32 %v7848_v9  ;;  %16098 = vmatpush3.bf16.msra.mxu0 %v17131_v1  ;;  %v17132_v9 = vld [vmem:[%s23419_s8 + $0x8] sm:$0xff]  }
 0xe99   :  { %18055 = vtanh.f32 %v7859_v12  ;;  %16099 = vmatprep.subr.bf16.mxu0 %v18270_v15  ;;  %v17135_v12 = vld [vmem:[%s23419_s8 + $0x20] sm:$0xff]   ;;  %v17168_v1 = vld [vmem:[%s23420_s9 + $0xc] ss:$16 sps:$4 sm:$0xff]  }
 0xe9c   :  { %16100 = vmatpush3.bf16.msra.mxu0 %v17132_v9  ;;  %v17166_v9 = vld [vmem:[%s23420_s9 + $0x8] ss:$16 sps:$4 sm:$0xff]  }
 0xe9d   :  { %16101 = vmatprep.subr.bf16.mxu0 %v18270_v15 }
 0xea0   :  { %v18050_v18 = vpop.eup %18049  ;;  %16102 = vmatpush3.bf16.msra.mxu0 %v17133_v8  ;;  %v17174_v8 = vld [vmem:[%s23420_s9 + $0x2c] ss:$16 sps:$4 sm:$0xff]  }
 0xea1   :  { %v18052_v5 = vpop.eup %18051  ;;  %v7852_v21 = vmul.f32 0.5, %v18050_v18  ;;  %16103 = vmatprep.subr.bf16.mxu0 %v18270_v15  ;;  %v17136_v18 = vld [vmem:[%s23419_s8 + $0x28] sm:$0xff]  }
 0xea2   :  { %v7856_v32 = vmul.f32 0.5, %v18052_v5  ;;  %v18054_v46 = vpop.eup %18053  ;;  %v17137_v5 = vld [vmem:[%s23419_s8 + $0x30] sm:$0xff]  }
 0xea3   :  { %v7853_v16 = vadd.f32 0.5, %v7852_v21  ;;  %v18056_v63 = vpop.eup %18055  ;;  %v17138_v21 = vld [vmem:[%s23419_s8 + $0x38] sm:$0xff]  }
 0xea4   :  { %v7857_v42 = vadd.f32 0.5, %v7856_v32  ;;  %v7861_v2 = vmul.f32 0.5, %v18056_v63  ;;  %16104 = vmatpush3.bf16.msra.mxu0 %v17134_v0  ;;  %v17172_v0 = vld [vmem:[%s23420_s9 + $0x28] ss:$16 sps:$4 sm:$0xff]  }
 0xea5   :  { %v7864_v59 = vmul.f32 %v18054_v46, %v7853_v16  ;;  %16105 = vmatprep.subr.bf16.mxu0 %v18270_v15  ;;  %v8007_v16 = vstv %s8006_s3 }
 0xea6   :  { %v7863_v61 = vmul.f32 %v7857_v42, %v20829_v24  ;;  %v7862_v13 = vadd.f32 0.5, %v7861_v2  ;;  %v17110_v24 = vld [vmem:[%s23421_s10 + $0x20] ss:$16 sps:$4 sm:$0xff]   ;;  %vm8008_vm12 = vcmp.eq.s32.totalorder %v8007_v16, 1  ;;  %v17198_v16 = vld [vmem:[%s23420_s9 + $0xac] ss:$16 sps:$4 sm:$0xff]  }
 0xea8   :  { %v21344_v62 = vadd.f32 %v7864_v59, %v7863_v61  ;;  %16106 = vmatpush3.bf16.msra.mxu0 %v17135_v12  ;;  %v15048_v61 = vld [vmem:[%s23412_s1 + $0x8] sm:$0xff] }
 0xea9   :  { %16107 = vmatprep.subr.bf16.mxu0 %v18270_v15  ;;  %v17180_v12 = vld [vmem:[%s23420_s9 + $0x4c] ss:$16 sps:$4 sm:$0xff]  }
 0xeaa   :  { %18057 = vtanh.f32 %v21344_v62 }
 0xeac   :  { %16108 = vmatpush3.bf16.msra.mxu0 %v17136_v18  ;;  %v17178_v18 = vld [vmem:[%s23420_s9 + $0x48] ss:$16 sps:$4 sm:$0xff]  }
 0xead   :  { %16109 = vmatprep.subr.bf16.mxu0 %v18270_v15 }
 0xeb0   :  { %16110 = vmatpush3.bf16.msra.mxu0 %v17137_v5  ;;  %v17184_v5 = vld [vmem:[%s23420_s9 + $0x68] ss:$16 sps:$4 sm:$0xff]  }
 0xeb1   :  { %16111 = vmatprep.subr.bf16.mxu0 %v18270_v15 }
 0xeb4   :  { %v18058_v7 = vpop.eup %18057  ;;  %16112 = vmatpush3.bf16.msra.mxu0 %v17138_v21  ;;  %v17192_v21 = vld [vmem:[%s23420_s9 + $0x8c] ss:$16 sps:$4 sm:$0xff]  }
 0xeb5   :  { %v7867_v20 = vmul.f32 %v18058_v7, %v7862_v13  ;;  %v17141_v7 = vld [vmem:[%s23421_s10 + $0xc] ss:$16 sps:$4 sm:$0xff]  }
 0xeb6   :  { %8392 = vmatprep.subr.bf16.mxu0 %v17141_v7 }
 0xeb7   :  { %v21350_v50 = vpack.c.bf16 %v7867_v20, %v7867_v20  ;;  %v17163_v20 = vld [vmem:[%s23420_s9] ss:$16 sps:$4 sm:$0xff]  }
 0xeb9   :  { %16094 = vmatmul.mubr.bf16.vlgmr.msra.gmra.mrb[104].mxu1 %v21350_v50 }
 0xeba   :  { %8352 = vmatpush1.bf16.msra.mxu1 %v17107_v37  ;;  %8383 = vmatprep.mubr.bf16.mxu1 %v23533_v19  ;;  %v17165_v37 = vld [vmem:[%s23420_s9 + $0x4] ss:$16 sps:$4 sm:$0xff]  }
 0xebb   :  { %8353 = vmatprep.subr.bf16.mxu1 %v17112_v28  ;;  %v17171_v28 = vld [vmem:[%s23420_s9 + $0x24] ss:$16 sps:$4 sm:$0xff]  }
 0xebe   :  { %8354 = vmatpush1.bf16.msra.mxu1 %v17110_v24  ;;  %v17169_v24 = vld [vmem:[%s23420_s9 + $0x20] ss:$16 sps:$4 sm:$0xff]  }
 0xebf   :  { %8355 = vmatprep.subr.bf16.mxu1 %v17115_v17  ;;  %v17177_v17 = vld [vmem:[%s23420_s9 + $0x44] ss:$16 sps:$4 sm:$0xff]  }
 0xec2   :  { %8356 = vmatpush1.bf16.msra.mxu1 %v17113_v33  ;;  %v17175_v33 = vld [vmem:[%s23420_s9 + $0x40] ss:$16 sps:$4 sm:$0xff]  }
 0xec3   :  { %8357 = vmatprep.subr.bf16.mxu1 %v17118_v51  ;;  %v17183_v51 = vld [vmem:[%s23420_s9 + $0x64] ss:$16 sps:$4 sm:$0xff]  }
 0xec6   :  { %8358 = vmatpush1.bf16.msra.mxu1 %v17116_v49  ;;  %v17181_v49 = vld [vmem:[%s23420_s9 + $0x60] ss:$16 sps:$4 sm:$0xff]  }
 0xec7   :  { %8359 = vmatprep.subr.bf16.mxu1 %v17121_v47  ;;  %v17189_v47 = vld [vmem:[%s23420_s9 + $0x84] ss:$16 sps:$4 sm:$0xff]  }
 0xeca   :  { %8360 = vmatpush1.bf16.msra.mxu1 %v17119_v22  ;;  %v17187_v22 = vld [vmem:[%s23420_s9 + $0x80] ss:$16 sps:$4 sm:$0xff]  }
 0xecb   :  { %8361 = vmatprep.subr.bf16.mxu1 %v17124_v45  ;;  %v17195_v45 = vld [vmem:[%s23420_s9 + $0xa4] ss:$16 sps:$4 sm:$0xff]  }
 0xece   :  { %8362 = vmatpush1.bf16.msra.mxu1 %v17122_v54  ;;  %v17193_v54 = vld [vmem:[%s23420_s9 + $0xa0] ss:$16 sps:$4 sm:$0xff]  }
 0xecf   :  { %8363 = vmatprep.subr.bf16.mxu1 %v17127_v40  ;;  %v17201_v40 = vld [vmem:[%s23420_s9 + $0xc4] ss:$16 sps:$4 sm:$0xff]  }
 0xed2   :  { %8364 = vmatpush1.bf16.msra.mxu1 %v17125_v56  ;;  %v17199_v56 = vld [vmem:[%s23420_s9 + $0xc0] ss:$16 sps:$4 sm:$0xff]  }
 0xed3   :  { %8365 = vmatprep.subr.bf16.mxu1 %v17130_v31  ;;  %v17207_v31 = vld [vmem:[%s23420_s9 + $0xe4] ss:$16 sps:$4 sm:$0xff]  }
 0xed6   :  { %8366 = vmatpush1.bf16.msra.mxu1 %v17128_v52  ;;  %v17205_v52 = vld [vmem:[%s23420_s9 + $0xe0] ss:$16 sps:$4 sm:$0xff]  }
 0xed7   :  { %8593 = vmatprep.subr.bf16.mxu1 %v17165_v37  ;;  %v17214_v37 = vld [vmem:[%s23421_s10 + $0x108] ss:$16 sps:$4 sm:$0xff]  }
 0xed9   :  { %8384 = vmatmul.mubr.bf16.vlgmr.msra.gmra.mrb[108].mxu1 %v21294_v38 }
 0xeda   :  { %8625 = vmatprep.mubr.bf16.mxu1 %v23533_v19  ;;  %8594 = vmatpush1.bf16.msra.mxu1 %v17163_v20  ;;  %v17211_v20 = vld [vmem:[%s23421_s10 + $0x100] ss:$16 sps:$4 sm:$0xff]  }
 0xedb   :  { %8595 = vmatprep.subr.bf16.mxu1 %v17171_v28 }
 0xede   :  { %8596 = vmatpush1.bf16.msra.mxu1 %v17169_v24 }
 0xedf   :  { %8597 = vmatprep.subr.bf16.mxu1 %v17177_v17  ;;  %v17219_v17 = vld [vmem:[%s23421_s10 + $0x124] ss:$16 sps:$4 sm:$0xff]  }
 0xee2   :  { %8598 = vmatpush1.bf16.msra.mxu1 %v17175_v33  ;;  %v17222_v33 = vld [vmem:[%s23421_s10 + $0x12c] ss:$16 sps:$4 sm:$0xff]  }
 0xee3   :  { %8599 = vmatprep.subr.bf16.mxu1 %v17183_v51 }
 0xee6   :  { %8600 = vmatpush1.bf16.msra.mxu1 %v17181_v49 }
 0xee7   :  { %8601 = vmatprep.subr.bf16.mxu1 %v17189_v47  ;;  %v17217_v47 = vld [vmem:[%s23421_s10 + $0x120] ss:$16 sps:$4 sm:$0xff]  }
 0xeea   :  { %8602 = vmatpush1.bf16.msra.mxu1 %v17187_v22  ;;  %v17220_v22 = vld [vmem:[%s23421_s10 + $0x128] ss:$16 sps:$4 sm:$0xff]  }
 0xeeb   :  { %8603 = vmatprep.subr.bf16.mxu1 %v17195_v45  ;;  %v17225_v45 = vld [vmem:[%s23421_s10 + $0x144] ss:$16 sps:$4 sm:$0xff]  }
 0xeee   :  { %8604 = vmatpush1.bf16.msra.mxu1 %v17193_v54  ;;  %v17228_v54 = vld [vmem:[%s23421_s10 + $0x14c] ss:$16 sps:$4 sm:$0xff]  }
 0xeef   :  { %8605 = vmatprep.subr.bf16.mxu1 %v17201_v40  ;;  %v17223_v40 = vld [vmem:[%s23421_s10 + $0x140] ss:$16 sps:$4 sm:$0xff]  }
 0xef2   :  { %8606 = vmatpush1.bf16.msra.mxu1 %v17199_v56  ;;  %v17226_v56 = vld [vmem:[%s23421_s10 + $0x148] ss:$16 sps:$4 sm:$0xff]  }
 0xef3   :  { %8607 = vmatprep.subr.bf16.mxu1 %v17207_v31  ;;  %v17231_v31 = vld [vmem:[%s23421_s10 + $0x164] ss:$16 sps:$4 sm:$0xff]  }
 0xef6   :  { %8608 = vmatpush1.bf16.msra.mxu1 %v17205_v52  ;;  %v17234_v52 = vld [vmem:[%s23421_s10 + $0x16c] ss:$16 sps:$4 sm:$0xff]  }
 0xf8c   :  { %v7976_v6 = vpop.f32.mrb[104].mxu1 }
 0xf8d   :  { %v7977_v55 = vadd.f32 %v15038_v10, %v7976_v6  ;;  %v16095_v39 = vpop.f32.mrb[105].mxu1  ;;  %v17139_v6 = vld [vmem:[%s23421_s10 + $0x8] ss:$16 sps:$4 sm:$0xff]  }
 0xf8e   :  { %v7979_v27 = vpop.f32.mrb[106].mxu1  ;;  %v17142_v39 = vld [vmem:[%s23421_s10 + $0x28] ss:$16 sps:$4 sm:$0xff]  }
 0xf8f   :  { %7983 = vst [vmem:[#allocation9 + $0x8] sm:$0xff] %v7977_v55  ;;  %7984 = vmax.xlane.f32.xlu1 %v7977_v55  ;;  %v16096_v57 = vpop.f32.mrb[107].mxu1  ;;  %v17147_v27 = vld [vmem:[%s23421_s10 + $0x4c] ss:$16 sps:$4 sm:$0xff]  }
 0xf90   :  { %v17145_v57 = vld [vmem:[%s23421_s10 + $0x48] ss:$16 sps:$4 sm:$0xff]  }
 0xfac   :  { %v21401_v53 = vpop.f32.mrb[108].mxu1 }
 0xfad   :  { %v21403_v14 = vpop.f32.mrb[109].mxu1 }
 0xfae   :  { %v8389_v11 = vpop.f32.mrb[110].mxu1 }
 0xfaf   :  { %v8390_v30 = vpop.f32.mrb[111].mxu1  ;;  %v17150_v11 = vld [vmem:[%s23421_s10 + $0x6c] ss:$16 sps:$4 sm:$0xff]  }
 0xfb0   :  { %v17148_v30 = vld [vmem:[%s23421_s10 + $0x68] ss:$16 sps:$4 sm:$0xff]  }
0x101c   :  { %v7985_v48 = vpop.xlane.xlu1 %7984 }
0x101d   :  { %vm7986_vm10 = vcmp.eq.f32.partialorder %v7977_v55, %v7985_v48  ;;  %v17144_v55 = vld [vmem:[%s23421_s10 + $0x2c] ss:$16 sps:$4 sm:$0xff]  }
0x101e   :  { %v7987_v60 = vsel %vm7986_vm10, %v20387_v58, 128  ;;  %v17153_v48 = vld [vmem:[%s23421_s10 + $0x8c] ss:$16 sps:$4 sm:$0xff]  }
0x101f   :  { %v7989_v25 = vshra.s32 %v7987_v60, 16  ;;  %v7988_v35 = vand.u32 65535, %v7987_v60  ;;  %v17151_v60 = vld [vmem:[%s23421_s10 + $0x88] ss:$16 sps:$4 sm:$0xff]  }
0x1021   :  { %v7991_v34 = vcvt.s32.f32 %v7989_v25  ;;  %v7990_v41 = vcvt.s32.f32 %v7988_v35  ;;  %v17156_v25 = vld [vmem:[%s23421_s10 + $0xac] ss:$16 sps:$4 sm:$0xff]  }
0x1022   :  { %v17159_v35 = vld [vmem:[%s23421_s10 + $0xcc] ss:$16 sps:$4 sm:$0xff]  }
0x1023   :  { %7992 = vmin.xlane.f32.xlu0 %v7991_v34 }
0x10b0   :  { %v7993_v36 = vpop.xlane.xlu0 %7992 }
0x10b1   :  { %vm7994_vm11 = vcmp.eq.f32.partialorder %v7991_v34, %v7993_v36  ;;  %v7999_v32 = vcvt.f32.s32 %v7993_v36  ;;  %v17154_v34 = vld [vmem:[%s23421_s10 + $0xa8] ss:$16 sps:$4 sm:$0xff]  }
0x10b2   :  { %v7995_v4 = vsel %vm7994_vm11, %v7990_v41, inf  ;;  %v17157_v36 = vld [vmem:[%s23421_s10 + $0xc8] ss:$16 sps:$4 sm:$0xff]   ;;  %v17162_v41 = vld [vmem:[%s23421_s10 + $0xec] ss:$16 sps:$4 sm:$0xff]  }
0x10b3   :  { %7996 = vmin.xlane.f32.xlu0 %v7995_v4  ;;  %v8000_v42 = vshll.u32 %v7999_v32, 16  ;;  %v17160_v4 = vld [vmem:[%s23421_s10 + $0xe8] ss:$16 sps:$4 sm:$0xff]  }
0x10b4   :  { %v17190_v32 = vld [vmem:[%s23420_s9 + $0x88] ss:$16 sps:$4 sm:$0xff]  }
0x1140   :  { %v7997_v46 = vpop.xlane.xlu0 %7996 }
0x1141   :  { %v7998_v59 = vcvt.f32.s32 %v7997_v46  ;;  %v17196_v46 = vld [vmem:[%s23420_s9 + $0xa8] ss:$16 sps:$4 sm:$0xff]  }
0x1143   :  { %v8001_v63 = vadd.s32 %v8000_v42, %v7998_v59  ;;  %v17204_v42 = vld [vmem:[%s23420_s9 + $0xcc] ss:$16 sps:$4 sm:$0xff]   ;;  %v17202_v59 = vld [vmem:[%s23420_s9 + $0xc8] ss:$16 sps:$4 sm:$0xff]  }
0x1145   :  { %v8009_v2 = vsel %vm8008_vm12, %v15048_v61, %v8001_v63  ;;  %v17210_v61 = vld [vmem:[%s23420_s9 + $0xec] ss:$16 sps:$4 sm:$0xff]   ;;  %v17208_v63 = vld [vmem:[%s23420_s9 + $0xe8] ss:$16 sps:$4 sm:$0xff]  }
0x1146   :  { %8010 = vst.msk [vmem:[#allocation4] sm:$0xff] %vm5108_vm1, %v8009_v2  ;;  %v17213_v2 = vld [vmem:[%s23421_s10 + $0x104] ss:$16 sps:$4 sm:$0xff]  }
0x1147   :  { %8949 = vmatprep.subr.bf16.mxu1 %v17213_v2  ;;  %v17274_v2 = vld [vmem:[%s23420_s9 + $0x148] ss:$16 sps:$4 sm:$0xff]  }
0x114d   :  { %v8011_v13 = vld [vmem:[#allocation4] sm:$0xff] }
0x114e   :  { %8013 = vperm.xlu0 %16266, %v8011_v13   ;;  %v17216_v13 = vld [vmem:[%s23421_s10 + $0x10c] ss:$16 sps:$4 sm:$0xff]  }
0x11cd   :  { %v8014_v10 = vpop.permute.xlu0 %8013 }
0x11ce   :  { %vm8015_vm13 = vcmp.eq.s32.totalorder %v20387_v58, %v8014_v10  ;;  %v17229_v10 = vld [vmem:[%s23421_s10 + $0x160] ss:$16 sps:$4 sm:$0xff]  }
0x11cf   :  { %vm15058_vm14 = vmpackc.low %vm8015_vm13, %vm8015_vm13 }
0x11d0   :  { %16114 = vmatmul.mubr.msk.bf16.vlgmr.msra.gmra.mrb[116].mxu0 %vm15058_vm14, %v18272_v3 }
0x11d1   :  { %8393 = vmatpush1.bf16.msra.mxu0 %v17139_v6  ;;  %8424 = vmatprep.mubr.bf16.mxu0 %v23533_v19  ;;  %v17232_v6 = vld [vmem:[%s23421_s10 + $0x168] ss:$16 sps:$4 sm:$0xff]  }
0x11d2   :  { %8394 = vmatprep.subr.bf16.mxu0 %v17144_v55  ;;  %v17237_v55 = vld [vmem:[%s23421_s10 + $0x184] ss:$16 sps:$4 sm:$0xff]  }
0x11d5   :  { %8395 = vmatpush1.bf16.msra.mxu0 %v17142_v39  ;;  %v17240_v39 = vld [vmem:[%s23421_s10 + $0x18c] ss:$16 sps:$4 sm:$0xff]  }
0x11d6   :  { %8396 = vmatprep.subr.bf16.mxu0 %v17147_v27  ;;  %v17235_v27 = vld [vmem:[%s23421_s10 + $0x180] ss:$16 sps:$4 sm:$0xff]  }
0x11d9   :  { %8397 = vmatpush1.bf16.msra.mxu0 %v17145_v57  ;;  %v17238_v57 = vld [vmem:[%s23421_s10 + $0x188] ss:$16 sps:$4 sm:$0xff]  }
0x11da   :  { %8398 = vmatprep.subr.bf16.mxu0 %v17150_v11  ;;  %v17243_v11 = vld [vmem:[%s23421_s10 + $0x1a4] ss:$16 sps:$4 sm:$0xff]  }
0x11dd   :  { %8399 = vmatpush1.bf16.msra.mxu0 %v17148_v30  ;;  %v17246_v30 = vld [vmem:[%s23421_s10 + $0x1ac] ss:$16 sps:$4 sm:$0xff]  }
0x11de   :  { %8400 = vmatprep.subr.bf16.mxu0 %v17153_v48  ;;  %v17241_v48 = vld [vmem:[%s23421_s10 + $0x1a0] ss:$16 sps:$4 sm:$0xff]  }
0x11e1   :  { %8401 = vmatpush1.bf16.msra.mxu0 %v17151_v60  ;;  %v17244_v60 = vld [vmem:[%s23421_s10 + $0x1a8] ss:$16 sps:$4 sm:$0xff]  }
0x11e2   :  { %8402 = vmatprep.subr.bf16.mxu0 %v17156_v25  ;;  %v17249_v25 = vld [vmem:[%s23421_s10 + $0x1c4] ss:$16 sps:$4 sm:$0xff]  }
0x11e5   :  { %8403 = vmatpush1.bf16.msra.mxu0 %v17154_v34  ;;  %v17252_v34 = vld [vmem:[%s23421_s10 + $0x1cc] ss:$16 sps:$4 sm:$0xff]  }
0x11e6   :  { %8404 = vmatprep.subr.bf16.mxu0 %v17159_v35  ;;  %v17247_v35 = vld [vmem:[%s23421_s10 + $0x1c0] ss:$16 sps:$4 sm:$0xff]  }
0x11e9   :  { %8405 = vmatpush1.bf16.msra.mxu0 %v17157_v36  ;;  %v17250_v36 = vld [vmem:[%s23421_s10 + $0x1c8] ss:$16 sps:$4 sm:$0xff]  }
0x11ea   :  { %8406 = vmatprep.subr.bf16.mxu0 %v17162_v41  ;;  %v17255_v41 = vld [vmem:[%s23421_s10 + $0x1e4] ss:$16 sps:$4 sm:$0xff]  }
0x11ed   :  { %8407 = vmatpush1.bf16.msra.mxu0 %v17160_v4  ;;  %v17258_v4 = vld [vmem:[%s23421_s10 + $0x1ec] ss:$16 sps:$4 sm:$0xff]  }
0x11ee   :  { %8634 = vmatprep.subr.bf16.mxu0 %v17168_v1  ;;  %v17253_v1 = vld [vmem:[%s23421_s10 + $0x1e0] ss:$16 sps:$4 sm:$0xff]  }
0x11f0   :  { %8425 = vmatmul.mubr.bf16.vlgmr.msra.gmra.mrb[120].mxu0 %v21294_v38  ;;  %v17186_v38 = vld [vmem:[%s23420_s9 + $0x6c] ss:$16 sps:$4 sm:$0xff]  }
0x11f1   :  { %8635 = vmatpush1.bf16.msra.mxu0 %v17166_v9  ;;  %8666 = vmatprep.mubr.bf16.mxu0 %v23533_v19  ;;  %v17256_v9 = vld [vmem:[%s23421_s10 + $0x1e8] ss:$16 sps:$4 sm:$0xff]  }
0x11f2   :  { %8636 = vmatprep.subr.bf16.mxu0 %v17174_v8 }
0x11f5   :  { %8637 = vmatpush1.bf16.msra.mxu0 %v17172_v0 }
0x11f6   :  { %8638 = vmatprep.subr.bf16.mxu0 %v17180_v12 }
0x11f9   :  { %8639 = vmatpush1.bf16.msra.mxu0 %v17178_v18 }
0x11fa   :  { %8640 = vmatprep.subr.bf16.mxu0 %v17186_v38  ;;  %v17261_v38 = vld [vmem:[%s23420_s9 + $0x104] ss:$16 sps:$4 sm:$0xff]  }
0x11fd   :  { %8641 = vmatpush1.bf16.msra.mxu0 %v17184_v5  ;;  %v17264_v5 = vld [vmem:[%s23420_s9 + $0x10c] ss:$16 sps:$4 sm:$0xff]  }
0x11fe   :  { %8642 = vmatprep.subr.bf16.mxu0 %v17192_v21  ;;  %v17259_v21 = vld [vmem:[%s23420_s9 + $0x100] ss:$16 sps:$4 sm:$0xff]  }
0x1201   :  { %8643 = vmatpush1.bf16.msra.mxu0 %v17190_v32  ;;  %v17267_v32 = vld [vmem:[%s23420_s9 + $0x124] ss:$16 sps:$4 sm:$0xff]  }
0x1202   :  { %8644 = vmatprep.subr.bf16.mxu0 %v17198_v16  ;;  %v17270_v16 = vld [vmem:[%s23420_s9 + $0x12c] ss:$16 sps:$4 sm:$0xff]  }
0x1205   :  { %8645 = vmatpush1.bf16.msra.mxu0 %v17196_v46  ;;  %v17265_v46 = vld [vmem:[%s23420_s9 + $0x120] ss:$16 sps:$4 sm:$0xff]  }
0x1206   :  { %8646 = vmatprep.subr.bf16.mxu0 %v17204_v42  ;;  %v17268_v42 = vld [vmem:[%s23420_s9 + $0x128] ss:$16 sps:$4 sm:$0xff]  }
0x1209   :  { %8647 = vmatpush1.bf16.msra.mxu0 %v17202_v59  ;;  %v17273_v59 = vld [vmem:[%s23420_s9 + $0x144] ss:$16 sps:$4 sm:$0xff]  }
0x120a   :  { %8648 = vmatprep.subr.bf16.mxu0 %v17210_v61  ;;  %v17276_v61 = vld [vmem:[%s23420_s9 + $0x14c] ss:$16 sps:$4 sm:$0xff]  }
0x120d   :  { %8649 = vmatpush1.bf16.msra.mxu0 %v17208_v63  ;;  %v17271_v63 = vld [vmem:[%s23420_s9 + $0x140] ss:$16 sps:$4 sm:$0xff]  }
0x120e   :  { %8990 = vmatprep.subr.bf16.mxu0 %v17216_v13  ;;  %v17279_v13 = vld [vmem:[%s23420_s9 + $0x164] ss:$16 sps:$4 sm:$0xff]  }
0x12a3   :  { %v8117_v7 = vpop.f32.mrb[116].mxu0 }
0x12a4   :  { %v8125_v28 = vpack.c.bf16 %v8117_v7, %v8117_v7  ;;  %v16115_v24 = vpop.f32.mrb[117].mxu0  ;;  %v17282_v7 = vld [vmem:[%s23420_s9 + $0x16c] ss:$16 sps:$4 sm:$0xff]  }
0x12a5   :  { %v8120_v51 = vpop.f32.mrb[118].mxu0  ;;  %v17288_v24 = vld [vmem:[%s23420_s9 + $0x18c] ss:$16 sps:$4 sm:$0xff]  }
0x12a6   :  { %v16116_v49 = vpop.f32.mrb[119].mxu0  ;;  %8626 = vmatmul.mubr.bf16.vlgmr.msra.gmra.mrb[112].mxu1 %v8125_v28  ;;  %8667 = vmatmul.mubr.bf16.vlgmr.msra.gmra.mrb[124].mxu0 %v8125_v28  ;;  %v17285_v28 = vld [vmem:[%s23420_s9 + $0x184] ss:$16 sps:$4 sm:$0xff]  }
0x12a7   :  { %8950 = vmatpush1.bf16.msra.mxu1 %v17211_v20  ;;  %8991 = vmatpush1.bf16.msra.mxu0 %v17214_v37  ;;  %v17277_v20 = vld [vmem:[%s23420_s9 + $0x160] ss:$16 sps:$4 sm:$0xff]   ;;  %v17280_v37 = vld [vmem:[%s23420_s9 + $0x168] ss:$16 sps:$4 sm:$0xff]   ;;  %v17291_v51 = vld [vmem:[%s23420_s9 + $0x1a4] ss:$16 sps:$4 sm:$0xff]  }
0x12a8   :  { %8951 = vmatprep.subr.bf16.mxu1 %v17219_v17  ;;  %8992 = vmatprep.subr.bf16.mxu0 %v17222_v33  ;;  %v17283_v17 = vld [vmem:[%s23420_s9 + $0x180] ss:$16 sps:$4 sm:$0xff]   ;;  %v17286_v33 = vld [vmem:[%s23420_s9 + $0x188] ss:$16 sps:$4 sm:$0xff]  }
0x12a9   :  { %8981 = vmatprep.mubr.bf16.mxu1 %v23533_v19  ;;  %9022 = vmatprep.mubr.bf16.mxu0 %v23533_v19  ;;  %v17289_v49 = vld [vmem:[%s23420_s9 + $0x1a0] ss:$16 sps:$4 sm:$0xff]  }
0x12ab   :  { %8952 = vmatpush1.bf16.msra.mxu1 %v17217_v47  ;;  %8993 = vmatpush1.bf16.msra.mxu0 %v17220_v22  ;;  %v17292_v47 = vld [vmem:[%s23420_s9 + $0x1a8] ss:$16 sps:$4 sm:$0xff]   ;;  %v17294_v22 = vld [vmem:[%s23420_s9 + $0x1ac] ss:$16 sps:$4 sm:$0xff]  }
0x12ac   :  { %8953 = vmatprep.subr.bf16.mxu1 %v17225_v45  ;;  %8994 = vmatprep.subr.bf16.mxu0 %v17228_v54  ;;  %v17297_v45 = vld [vmem:[%s23420_s9 + $0x1c4] ss:$16 sps:$4 sm:$0xff]   ;;  %v17300_v54 = vld [vmem:[%s23420_s9 + $0x1cc] ss:$16 sps:$4 sm:$0xff]  }
0x12af   :  { %8954 = vmatpush1.bf16.msra.mxu1 %v17223_v40  ;;  %8995 = vmatpush1.bf16.msra.mxu0 %v17226_v56  ;;  %v17295_v40 = vld [vmem:[%s23420_s9 + $0x1c0] ss:$16 sps:$4 sm:$0xff]   ;;  %v17298_v56 = vld [vmem:[%s23420_s9 + $0x1c8] ss:$16 sps:$4 sm:$0xff]  }
0x12b0   :  { %8955 = vmatprep.subr.bf16.mxu1 %v17231_v31  ;;  %8996 = vmatprep.subr.bf16.mxu0 %v17234_v52  ;;  %v17303_v31 = vld [vmem:[%s23420_s9 + $0x1e4] ss:$16 sps:$4 sm:$0xff]   ;;  %v17301_v52 = vld [vmem:[%s23420_s9 + $0x1e0] ss:$16 sps:$4 sm:$0xff]  }
0x12b3   :  { %8956 = vmatpush1.bf16.msra.mxu1 %v17229_v10  ;;  %8997 = vmatpush1.bf16.msra.mxu0 %v17232_v6  ;;  %v17304_v10 = vld [vmem:[%s23420_s9 + $0x1e8] ss:$16 sps:$4 sm:$0xff]   ;;  %v17306_v6 = vld [vmem:[%s23420_s9 + $0x1ec] ss:$16 sps:$4 sm:$0xff]  }
0x12b4   :  { %8957 = vmatprep.subr.bf16.mxu1 %v17237_v55  ;;  %8998 = vmatprep.subr.bf16.mxu0 %v17240_v39  ;;  %v8675_v55 = vld [vmem:[%s23422_s11] sm:$0xf] }
0x12b5   :  { %v8680_v39 = vrot.slane %v8675_v55, %v18939_v23 }
0x12b7   :  { %8958 = vmatpush1.bf16.msra.mxu1 %v17235_v27  ;;  %8999 = vmatpush1.bf16.msra.mxu0 %v17238_v57 }
0x12b8   :  { %8959 = vmatprep.subr.bf16.mxu1 %v17243_v11  ;;  %9000 = vmatprep.subr.bf16.mxu0 %v17246_v30  ;;  %v8684_v11 = vrot.slane %v8675_v55, %v18944_v26 }
0x12bb   :  { %8960 = vmatpush1.bf16.msra.mxu1 %v17241_v48  ;;  %9001 = vmatpush1.bf16.msra.mxu0 %v17244_v60 }
0x12bc   :  { %8961 = vmatprep.subr.bf16.mxu1 %v17249_v25  ;;  %9002 = vmatprep.subr.bf16.mxu0 %v17252_v34 }
0x12bf   :  { %8962 = vmatpush1.bf16.msra.mxu1 %v17247_v35  ;;  %9003 = vmatpush1.bf16.msra.mxu0 %v17250_v36 }
0x12c0   :  { %8963 = vmatprep.subr.bf16.mxu1 %v17255_v41  ;;  %9004 = vmatprep.subr.bf16.mxu0 %v17258_v4 }
0x12c3   :  { %v21688_v8 = vpop.f32.mrb[120].mxu0  ;;  %8964 = vmatpush1.bf16.msra.mxu1 %v17253_v1  ;;  %9005 = vmatpush1.bf16.msra.mxu0 %v17256_v9  ;;  %v8688_v1 = vrot.slane %v8675_v55, %v18947_v29 }
0x12c4   :  { %v21690_v0 = vpop.f32.mrb[121].mxu0  ;;  %9191 = vmatprep.subr.bf16.mxu1 %v17261_v38  ;;  %9232 = vmatprep.subr.bf16.mxu0 %v17264_v5 }
0x12c5   :  { %v8430_v12 = vpop.f32.mrb[122].mxu0 }
0x12c6   :  { %v8431_v18 = vpop.f32.mrb[123].mxu0  ;;  %8982 = vmatmul.mubr.bf16.vlgmr.msra.gmra.mrb[116].mxu1 %v21350_v50  ;;  %9023 = vmatmul.mubr.bf16.vlgmr.msra.gmra.mrb[128].mxu0 %v21350_v50  ;;  %v17262_v50 = vld [vmem:[%s23420_s9 + $0x108] ss:$16 sps:$4 sm:$0xff]  }
0x12c7   :  { %9223 = vmatprep.mubr.bf16.mxu1 %v23533_v19  ;;  %9264 = vmatprep.mubr.bf16.mxu0 %v23533_v19 }
0x12c8   :  { %9192 = vmatpush1.bf16.msra.mxu1 %v17259_v21  ;;  %9233 = vmatpush1.bf16.msra.mxu0 %v17262_v50 }
0x12c9   :  { %9193 = vmatprep.subr.bf16.mxu1 %v17267_v32  ;;  %9234 = vmatprep.subr.bf16.mxu0 %v17270_v16 }
0x12cc   :  { %9194 = vmatpush1.bf16.msra.mxu1 %v17265_v46  ;;  %9235 = vmatpush1.bf16.msra.mxu0 %v17268_v42 }
0x12cd   :  { %9195 = vmatprep.subr.bf16.mxu1 %v17273_v59  ;;  %9236 = vmatprep.subr.bf16.mxu0 %v17276_v61 }
0x12d0   :  { %9196 = vmatpush1.bf16.msra.mxu1 %v17271_v63  ;;  %9237 = vmatpush1.bf16.msra.mxu0 %v17274_v2 }
0x12d1   :  { %9197 = vmatprep.subr.bf16.mxu1 %v17279_v13  ;;  %9238 = vmatprep.subr.bf16.mxu0 %v17282_v7 }
0x12d4   :  { %9198 = vmatpush1.bf16.msra.mxu1 %v17277_v20  ;;  %9239 = vmatpush1.bf16.msra.mxu0 %v17280_v37 }
0x12d5   :  { %9199 = vmatprep.subr.bf16.mxu1 %v17285_v28  ;;  %9240 = vmatprep.subr.bf16.mxu0 %v17288_v24 }
0x12d8   :  { %9200 = vmatpush1.bf16.msra.mxu1 %v17283_v17  ;;  %9241 = vmatpush1.bf16.msra.mxu0 %v17286_v33 }
0x12d9   :  { %9201 = vmatprep.subr.bf16.mxu1 %v17291_v51  ;;  %9242 = vmatprep.subr.bf16.mxu0 %v17294_v22 }
0x12dc   :  { %9202 = vmatpush1.bf16.msra.mxu1 %v17289_v49  ;;  %9243 = vmatpush1.bf16.msra.mxu0 %v17292_v47 }
0x12dd   :  { %9203 = vmatprep.subr.bf16.mxu1 %v17297_v45  ;;  %9244 = vmatprep.subr.bf16.mxu0 %v17300_v54 }
0x12e0   :  { %9204 = vmatpush1.bf16.msra.mxu1 %v17295_v40  ;;  %9245 = vmatpush1.bf16.msra.mxu0 %v17298_v56  ;;  %v17308_v40 = vld [vmem:[%s23423_s12 + $0x8] sm:$0xff]   ;;  %v17309_v56 = vld [vmem:[%s23423_s12 + $0x10] sm:$0xff]  }
0x12e1   :  { %9205 = vmatprep.subr.bf16.mxu1 %v17303_v31  ;;  %9246 = vmatprep.subr.bf16.mxu0 %v17306_v6  ;;  %v17310_v31 = vld [vmem:[%s23423_s12 + $0x18] sm:$0xff]   ;;  %v17313_v6 = vld [vmem:[%s23423_s12 + $0x30] sm:$0xff]  }
0x12e4   :  { %9206 = vmatpush1.bf16.msra.mxu1 %v17301_v52  ;;  %9247 = vmatpush1.bf16.msra.mxu0 %v17304_v10  ;;  %v17311_v52 = vld [vmem:[%s23423_s12 + $0x20] sm:$0xff]   ;;  %v17312_v10 = vld [vmem:[%s23423_s12 + $0x28] sm:$0xff]  }
0x12e5   :  { %16117 = vmatprep.subr.bf16.mxu1 %v18270_v15  ;;  %16137 = vmatprep.subr.bf16.mxu0 %v18270_v15 }
0x1379   :  { %v8627_v27 = vpop.f32.mrb[112].mxu1  ;;  %v8668_v57 = vpop.f32.mrb[124].mxu0 }
0x137a   :  { %v8628_v30 = vadd.f32 %v8627_v27, %v21401_v53  ;;  %v8669_v48 = vadd.f32 %v8668_v57, %v21688_v8  ;;  %v8629_v60 = vpop.f32.mrb[113].mxu1  ;;  %v8670_v25 = vpop.f32.mrb[125].mxu0  ;;  %v8692_v8 = vrot.slane %v8675_v55, %v18955_v44  ;;  %v17314_v55 = vld [vmem:[%s23423_s12 + $0x38] sm:$0xff]   ;;  %v15252_v27 = vld [vmem:[%s23422_s11 + $0x4] sm:$0xf] }
0x137b   :  { %v8630_v34 = vadd.f32 %v8629_v60, %v21403_v14  ;;  %v8671_v35 = vadd.f32 %v8670_v25, %v21690_v0  ;;  %v8631_v36 = vpop.f32.mrb[114].mxu1  ;;  %v8672_v41 = vpop.f32.mrb[126].mxu0  ;;  %v9278_v57 = vrot.slane %v15252_v27, %v18939_v23 }
0x137c   :  { %v8697_v4 = vadd.f32 %v8680_v39, %v8628_v30  ;;  %v8632_v9 = vpop.f32.mrb[115].mxu1  ;;  %v8673_v12 = vpop.f32.mrb[127].mxu0  ;;  %v8699_v53 = vadd.f32 %v8688_v1, %v8669_v48  ;;  %v17317_v39 = vld [vmem:[%s23421_s10 + $0x4] ss:$16 sps:$4 sm:$0xff]   ;;  %v9282_v48 = vrot.slane %v15252_v27, %v18944_v26 }
0x137d   :  { %v8698_v18 = vadd.f32 %v8684_v11, %v8630_v34  ;;  %v8700_v21 = vadd.f32 %v8692_v8, %v8671_v35  ;;  %v9286_v12 = vrot.slane %v15252_v27, %v18947_v29 }
0x137e   :  { %v8701_v38 = vmul.f32 0.5, %v8697_v4 }
0x137f   :  { %v8705_v5 = vmul.f32 0.5, %v8698_v18  ;;  %v8710_v14 = vmul.f32 0.5, %v8700_v21 }
0x1380   :  { %18059 = vtanh.f32 %v8701_v38 }
0x1381   :  { %18061 = vtanh.f32 %v8705_v5 }
0x1382   :  { %18063 = vtanh.f32 %v8699_v53 }
0x1383   :  { %18065 = vtanh.f32 %v8710_v14  ;;  %v9290_v14 = vrot.slane %v15252_v27, %v18955_v44  ;;  %v17336_v27 = vld [vmem:[%s23421_s10 + $0xe0] ss:$16 sps:$4 sm:$0xff]  }
0x138a   :  { %v18060_v50 = vpop.eup %18059 }
0x138b   :  { %v18062_v0 = vpop.eup %18061  ;;  %v8703_v32 = vmul.f32 0.5, %v18060_v50 }
0x138c   :  { %v8707_v16 = vmul.f32 0.5, %v18062_v0  ;;  %v18064_v42 = vpop.eup %18063 }
0x138d   :  { %v8704_v46 = vadd.f32 0.5, %v8703_v32  ;;  %v18066_v13 = vpop.eup %18065 }
0x138e   :  { %v8708_v59 = vadd.f32 0.5, %v8707_v16  ;;  %v8712_v7 = vmul.f32 0.5, %v18066_v13 }
0x138f   :  { %v8715_v61 = vmul.f32 %v18064_v42, %v8704_v46 }
0x1390   :  { %v8714_v63 = vmul.f32 %v8708_v59, %v21291_v43  ;;  %v8713_v47 = vadd.f32 0.5, %v8712_v7  ;;  %v17307_v43 = vld [vmem:[%s23423_s12] sm:$0xff]  }
0x1392   :  { %v21806_v2 = vadd.f32 %v8715_v61, %v8714_v63 }
0x1394   :  { %18067 = vtanh.f32 %v21806_v2 }
0x1399   :  { %v8983_v20 = vpop.f32.mrb[116].mxu1  ;;  %v9024_v37 = vpop.f32.mrb[128].mxu0 }
0x139a   :  { %v8985_v28 = vpop.f32.mrb[117].mxu1  ;;  %v9026_v24 = vpop.f32.mrb[129].mxu0 }
0x139b   :  { %v8987_v17 = vpop.f32.mrb[118].mxu1  ;;  %v9028_v33 = vpop.f32.mrb[130].mxu0 }
0x139c   :  { %v8988_v51 = vpop.f32.mrb[119].mxu1  ;;  %v9029_v49 = vpop.f32.mrb[131].mxu0 }
0x139d   :  { %v17315_v51 = vld [vmem:[%s23421_s10] ss:$16 sps:$4 sm:$0xff]  }
0x139e   :  { %v18068_v22 = vpop.eup %18067 }
0x139f   :  { %v8718_v45 = vmul.f32 %v18068_v22, %v8713_v47  ;;  %v17320_v47 = vld [vmem:[%s23421_s10 + $0x24] ss:$16 sps:$4 sm:$0xff]  }
0x13a0   :  { %v17323_v22 = vld [vmem:[%s23421_s10 + $0x44] ss:$16 sps:$4 sm:$0xff]  }
0x13a1   :  { %v21809_v54 = vpack.c.bf16 %v8718_v45, %v8718_v45  ;;  %v17321_v45 = vld [vmem:[%s23421_s10 + $0x40] ss:$16 sps:$4 sm:$0xff]  }
0x13a3   :  { %9224 = vmatmul.mubr.bf16.vlgmr.msra.gmra.mrb[120].mxu1 %v21809_v54  ;;  %9265 = vmatmul.mubr.bf16.vlgmr.msra.gmra.mrb[132].mxu0 %v21809_v54 }
0x13a4   :  { %16133 = vmatprep.mubr.msk.bf16.mxu1 %vm18271_vm2, %v18270_v15  ;;  %16153 = vmatprep.mubr.msk.bf16.mxu0 %vm18271_vm2, %v18270_v15 }
0x13a5   :  { %16118 = vmatpush3.bf16.msra.mxu1 %v17307_v43  ;;  %v17326_v43 = vld [vmem:[%s23421_s10 + $0x64] ss:$16 sps:$4 sm:$0xff]  }
0x13a6   :  { %16119 = vmatprep.subr.bf16.mxu1 %v18270_v15 }
0x13a9   :  { %16120 = vmatpush3.bf16.msra.mxu1 %v17308_v40  ;;  %v17324_v40 = vld [vmem:[%s23421_s10 + $0x60] ss:$16 sps:$4 sm:$0xff]  }
0x13aa   :  { %16121 = vmatprep.subr.bf16.mxu1 %v18270_v15 }
0x13ad   :  { %16122 = vmatpush3.bf16.msra.mxu1 %v17309_v56  ;;  %v17329_v56 = vld [vmem:[%s23421_s10 + $0x84] ss:$16 sps:$4 sm:$0xff]  }
0x13ae   :  { %16123 = vmatprep.subr.bf16.mxu1 %v18270_v15 }
0x13b1   :  { %16124 = vmatpush3.bf16.msra.mxu1 %v17310_v31  ;;  %v17327_v31 = vld [vmem:[%s23421_s10 + $0x80] ss:$16 sps:$4 sm:$0xff]  }
0x13b2   :  { %16125 = vmatprep.subr.bf16.mxu1 %v18270_v15 }
0x13b5   :  { %16126 = vmatpush3.bf16.msra.mxu1 %v17311_v52  ;;  %v17332_v52 = vld [vmem:[%s23421_s10 + $0xa4] ss:$16 sps:$4 sm:$0xff]  }
0x13b6   :  { %16127 = vmatprep.subr.bf16.mxu1 %v18270_v15 }
0x13b9   :  { %16128 = vmatpush3.bf16.msra.mxu1 %v17312_v10  ;;  %v17330_v10 = vld [vmem:[%s23421_s10 + $0xa0] ss:$16 sps:$4 sm:$0xff]  }
0x13ba   :  { %16129 = vmatprep.subr.bf16.mxu1 %v18270_v15 }
0x13bd   :  { %16130 = vmatpush3.bf16.msra.mxu1 %v17313_v6  ;;  %v17335_v6 = vld [vmem:[%s23421_s10 + $0xc4] ss:$16 sps:$4 sm:$0xff]  }
0x13be   :  { %16131 = vmatprep.subr.bf16.mxu1 %v18270_v15 }
0x13c1   :  { %16132 = vmatpush3.bf16.msra.mxu1 %v17314_v55  ;;  %v17333_v55 = vld [vmem:[%s23421_s10 + $0xc0] ss:$16 sps:$4 sm:$0xff]  }
0x13c2   :  { %9800 = vmatprep.subr.bf16.mxu1 %v17317_v39  ;;  %v17338_v39 = vld [vmem:[%s23421_s10 + $0xe4] ss:$16 sps:$4 sm:$0xff]  }
0x1476   :  { %v9225_v11 = vpop.f32.mrb[120].mxu1  ;;  %v9266_v30 = vpop.f32.mrb[132].mxu0 }
0x1477   :  { %v9226_v60 = vadd.f32 %v9225_v11, %v8983_v20  ;;  %v9267_v25 = vadd.f32 %v9266_v30, %v9024_v37  ;;  %v9227_v34 = vpop.f32.mrb[121].mxu1  ;;  %v9268_v35 = vpop.f32.mrb[133].mxu0 }
0x1478   :  { %v9228_v36 = vadd.f32 %v9227_v34, %v8985_v28  ;;  %v9269_v41 = vadd.f32 %v9268_v35, %v9026_v24  ;;  %v9229_v4 = vpop.f32.mrb[122].mxu1  ;;  %v9270_v1 = vpop.f32.mrb[134].mxu0 }
0x1479   :  { %v9295_v9 = vadd.f32 %v9278_v57, %v9226_v60  ;;  %v9230_v18 = vpop.f32.mrb[123].mxu1  ;;  %v9271_v38 = vpop.f32.mrb[135].mxu0  ;;  %v9297_v21 = vadd.f32 %v9286_v12, %v9267_v25  ;;  %v15253_v57 = vld [vmem:[%s23424_s13] ss:$0 sm:$0xff] }
0x147a   :  { %v9296_v5 = vadd.f32 %v9282_v48, %v9228_v36  ;;  %v9298_v50 = vadd.f32 %v9290_v14, %v9269_v41  ;;  %v17341_v14 = vld [vmem:[%s23419_s8 + $0x10] sm:$0xff]  }
0x147b   :  { %v9299_v53 = vmul.f32 0.5, %v9295_v9 }
0x147c   :  { %v9303_v8 = vmul.f32 0.5, %v9296_v5  ;;  %v9308_v0 = vmul.f32 0.5, %v9298_v50  ;;  %v17342_v50 = vld [vmem:[%s23419_s8 + $0x18] sm:$0xff]  }
0x147d   :  { %18069 = vtanh.f32 %v9299_v53 }
0x147e   :  { %18071 = vtanh.f32 %v9303_v8  ;;  %v17339_v8 = vld [vmem:[%s23419_s8] sm:$0xff]  }
0x147f   :  { %18073 = vtanh.f32 %v9297_v21  ;;  %16138 = vmatpush3.bf16.msra.mxu0 %v17339_v8  ;;  %v17340_v21 = vld [vmem:[%s23419_s8 + $0x8] sm:$0xff]  }
0x1480   :  { %18075 = vtanh.f32 %v9308_v0  ;;  %16139 = vmatprep.subr.bf16.mxu0 %v18270_v15  ;;  %v17343_v0 = vld [vmem:[%s23419_s8 + $0x20] sm:$0xff]   ;;  %v17376_v8 = vld [vmem:[%s23420_s9 + $0xc] ss:$16 sps:$4 sm:$0xff]  }
0x1483   :  { %16140 = vmatpush3.bf16.msra.mxu0 %v17340_v21  ;;  %v17374_v21 = vld [vmem:[%s23420_s9 + $0x8] ss:$16 sps:$4 sm:$0xff]  }
0x1484   :  { %16141 = vmatprep.subr.bf16.mxu0 %v18270_v15 }
0x1487   :  { %v18070_v32 = vpop.eup %18069  ;;  %16142 = vmatpush3.bf16.msra.mxu0 %v17341_v14  ;;  %v17382_v14 = vld [vmem:[%s23420_s9 + $0x2c] ss:$16 sps:$4 sm:$0xff]  }
0x1488   :  { %v18072_v16 = vpop.eup %18071  ;;  %v9301_v46 = vmul.f32 0.5, %v18070_v32  ;;  %16143 = vmatprep.subr.bf16.mxu0 %v18270_v15  ;;  %v17344_v32 = vld [vmem:[%s23419_s8 + $0x28] sm:$0xff]  }
0x1489   :  { %v9305_v42 = vmul.f32 0.5, %v18072_v16  ;;  %v18074_v61 = vpop.eup %18073  ;;  %v17345_v16 = vld [vmem:[%s23419_s8 + $0x30] sm:$0xff]  }
0x148a   :  { %v9302_v59 = vadd.f32 0.5, %v9301_v46  ;;  %v18076_v37 = vpop.eup %18075  ;;  %v17346_v46 = vld [vmem:[%s23419_s8 + $0x38] sm:$0xff]  }
0x148b   :  { %v9306_v63 = vadd.f32 0.5, %v9305_v42  ;;  %v9310_v28 = vmul.f32 0.5, %v18076_v37  ;;  %16144 = vmatpush3.bf16.msra.mxu0 %v17342_v50  ;;  %v17380_v50 = vld [vmem:[%s23420_s9 + $0x28] ss:$16 sps:$4 sm:$0xff]  }
0x148c   :  { %v9313_v13 = vmul.f32 %v18074_v61, %v9302_v59  ;;  %16145 = vmatprep.subr.bf16.mxu0 %v18270_v15  ;;  %v9456_v59 = vstv %s9455_s25 }
0x148d   :  { %v9312_v7 = vmul.f32 %v9306_v63, %v21344_v62  ;;  %v9311_v24 = vadd.f32 0.5, %v9310_v28  ;;  %v17318_v62 = vld [vmem:[%s23421_s10 + $0x20] ss:$16 sps:$4 sm:$0xff]   ;;  %vm9457_vm3 = vcmp.eq.s32.totalorder %v9456_v59, 1  ;;  %v17406_v59 = vld [vmem:[%s23420_s9 + $0xac] ss:$16 sps:$4 sm:$0xff]  }
0x148f   :  { %v21859_v20 = vadd.f32 %v9313_v13, %v9312_v7  ;;  %16146 = vmatpush3.bf16.msra.mxu0 %v17343_v0  ;;  %v15263_v7 = vld [vmem:[%s23412_s1 + $0x10] sm:$0xff]  ;;  %v17388_v0 = vld [vmem:[%s23420_s9 + $0x4c] ss:$16 sps:$4 sm:$0xff]  }
0x1490   :  { %16147 = vmatprep.subr.bf16.mxu0 %v18270_v15 }
0x1491   :  { %18077 = vtanh.f32 %v21859_v20 }
0x1493   :  { %16148 = vmatpush3.bf16.msra.mxu0 %v17344_v32  ;;  %v17386_v32 = vld [vmem:[%s23420_s9 + $0x48] ss:$16 sps:$4 sm:$0xff]  }
0x1494   :  { %16149 = vmatprep.subr.bf16.mxu0 %v18270_v15 }
0x1497   :  { %16150 = vmatpush3.bf16.msra.mxu0 %v17345_v16  ;;  %v17392_v16 = vld [vmem:[%s23420_s9 + $0x68] ss:$16 sps:$4 sm:$0xff]  }
0x1498   :  { %16151 = vmatprep.subr.bf16.mxu0 %v18270_v15 }
0x149b   :  { %v18078_v17 = vpop.eup %18077  ;;  %16152 = vmatpush3.bf16.msra.mxu0 %v17346_v46  ;;  %v17400_v46 = vld [vmem:[%s23420_s9 + $0x8c] ss:$16 sps:$4 sm:$0xff]  }
0x149c   :  { %v9316_v33 = vmul.f32 %v18078_v17, %v9311_v24  ;;  %v17349_v17 = vld [vmem:[%s23421_s10 + $0xc] ss:$16 sps:$4 sm:$0xff]  }
0x149d   :  { %9841 = vmatprep.subr.bf16.mxu0 %v17349_v17 }
0x149e   :  { %v21865_v49 = vpack.c.bf16 %v9316_v33, %v9316_v33  ;;  %v17371_v33 = vld [vmem:[%s23420_s9] ss:$16 sps:$4 sm:$0xff]  }
0x14a0   :  { %16134 = vmatmul.mubr.bf16.vlgmr.msra.gmra.mrb[124].mxu1 %v21865_v49 }
0x14a1   :  { %9801 = vmatpush1.bf16.msra.mxu1 %v17315_v51  ;;  %9832 = vmatprep.mubr.bf16.mxu1 %v23533_v19  ;;  %v17373_v51 = vld [vmem:[%s23420_s9 + $0x4] ss:$16 sps:$4 sm:$0xff]  }
0x14a2   :  { %9802 = vmatprep.subr.bf16.mxu1 %v17320_v47  ;;  %v17379_v47 = vld [vmem:[%s23420_s9 + $0x24] ss:$16 sps:$4 sm:$0xff]  }
0x14a5   :  { %9803 = vmatpush1.bf16.msra.mxu1 %v17318_v62  ;;  %v17377_v62 = vld [vmem:[%s23420_s9 + $0x20] ss:$16 sps:$4 sm:$0xff]  }
0x14a6   :  { %9804 = vmatprep.subr.bf16.mxu1 %v17323_v22  ;;  %v17385_v22 = vld [vmem:[%s23420_s9 + $0x44] ss:$16 sps:$4 sm:$0xff]  }
0x14a9   :  { %9805 = vmatpush1.bf16.msra.mxu1 %v17321_v45  ;;  %v17383_v45 = vld [vmem:[%s23420_s9 + $0x40] ss:$16 sps:$4 sm:$0xff]  }
0x14aa   :  { %9806 = vmatprep.subr.bf16.mxu1 %v17326_v43  ;;  %v17391_v43 = vld [vmem:[%s23420_s9 + $0x64] ss:$16 sps:$4 sm:$0xff]  }
0x14ad   :  { %9807 = vmatpush1.bf16.msra.mxu1 %v17324_v40  ;;  %v17389_v40 = vld [vmem:[%s23420_s9 + $0x60] ss:$16 sps:$4 sm:$0xff]  }
0x14ae   :  { %9808 = vmatprep.subr.bf16.mxu1 %v17329_v56  ;;  %v17397_v56 = vld [vmem:[%s23420_s9 + $0x84] ss:$16 sps:$4 sm:$0xff]  }
0x14b1   :  { %9809 = vmatpush1.bf16.msra.mxu1 %v17327_v31  ;;  %v17395_v31 = vld [vmem:[%s23420_s9 + $0x80] ss:$16 sps:$4 sm:$0xff]  }
0x14b2   :  { %9810 = vmatprep.subr.bf16.mxu1 %v17332_v52  ;;  %v17403_v52 = vld [vmem:[%s23420_s9 + $0xa4] ss:$16 sps:$4 sm:$0xff]  }
0x14b5   :  { %9811 = vmatpush1.bf16.msra.mxu1 %v17330_v10  ;;  %v17401_v10 = vld [vmem:[%s23420_s9 + $0xa0] ss:$16 sps:$4 sm:$0xff]  }
0x14b6   :  { %9812 = vmatprep.subr.bf16.mxu1 %v17335_v6  ;;  %v17409_v6 = vld [vmem:[%s23420_s9 + $0xc4] ss:$16 sps:$4 sm:$0xff]  }
0x14b9   :  { %9813 = vmatpush1.bf16.msra.mxu1 %v17333_v55  ;;  %v17407_v55 = vld [vmem:[%s23420_s9 + $0xc0] ss:$16 sps:$4 sm:$0xff]  }
0x14ba   :  { %9814 = vmatprep.subr.bf16.mxu1 %v17338_v39  ;;  %v17415_v39 = vld [vmem:[%s23420_s9 + $0xe4] ss:$16 sps:$4 sm:$0xff]  }
0x14bd   :  { %9815 = vmatpush1.bf16.msra.mxu1 %v17336_v27  ;;  %v17413_v27 = vld [vmem:[%s23420_s9 + $0xe0] ss:$16 sps:$4 sm:$0xff]  }
0x14be   :  { %10042 = vmatprep.subr.bf16.mxu1 %v17373_v51  ;;  %v17422_v51 = vld [vmem:[%s23421_s10 + $0x108] ss:$16 sps:$4 sm:$0xff]  }
0x14c0   :  { %9833 = vmatmul.mubr.bf16.vlgmr.msra.gmra.mrb[128].mxu1 %v21809_v54 }
0x14c1   :  { %10074 = vmatprep.mubr.bf16.mxu1 %v23533_v19  ;;  %10043 = vmatpush1.bf16.msra.mxu1 %v17371_v33  ;;  %v17419_v33 = vld [vmem:[%s23421_s10 + $0x100] ss:$16 sps:$4 sm:$0xff]  }
0x14c2   :  { %10044 = vmatprep.subr.bf16.mxu1 %v17379_v47 }
0x14c5   :  { %10045 = vmatpush1.bf16.msra.mxu1 %v17377_v62 }
0x14c6   :  { %10046 = vmatprep.subr.bf16.mxu1 %v17385_v22  ;;  %v17427_v22 = vld [vmem:[%s23421_s10 + $0x124] ss:$16 sps:$4 sm:$0xff]  }
0x14c9   :  { %10047 = vmatpush1.bf16.msra.mxu1 %v17383_v45  ;;  %v17430_v45 = vld [vmem:[%s23421_s10 + $0x12c] ss:$16 sps:$4 sm:$0xff]  }
0x14ca   :  { %10048 = vmatprep.subr.bf16.mxu1 %v17391_v43 }
0x14cd   :  { %10049 = vmatpush1.bf16.msra.mxu1 %v17389_v40 }
0x14ce   :  { %10050 = vmatprep.subr.bf16.mxu1 %v17397_v56  ;;  %v17425_v56 = vld [vmem:[%s23421_s10 + $0x120] ss:$16 sps:$4 sm:$0xff]  }
0x14d1   :  { %10051 = vmatpush1.bf16.msra.mxu1 %v17395_v31  ;;  %v17428_v31 = vld [vmem:[%s23421_s10 + $0x128] ss:$16 sps:$4 sm:$0xff]  }
0x14d2   :  { %10052 = vmatprep.subr.bf16.mxu1 %v17403_v52  ;;  %v17433_v52 = vld [vmem:[%s23421_s10 + $0x144] ss:$16 sps:$4 sm:$0xff]  }
0x14d5   :  { %10053 = vmatpush1.bf16.msra.mxu1 %v17401_v10  ;;  %v17436_v10 = vld [vmem:[%s23421_s10 + $0x14c] ss:$16 sps:$4 sm:$0xff]  }
0x14d6   :  { %10054 = vmatprep.subr.bf16.mxu1 %v17409_v6  ;;  %v17431_v6 = vld [vmem:[%s23421_s10 + $0x140] ss:$16 sps:$4 sm:$0xff]  }
0x14d9   :  { %10055 = vmatpush1.bf16.msra.mxu1 %v17407_v55  ;;  %v17434_v55 = vld [vmem:[%s23421_s10 + $0x148] ss:$16 sps:$4 sm:$0xff]  }
0x14da   :  { %10056 = vmatprep.subr.bf16.mxu1 %v17415_v39  ;;  %v17439_v39 = vld [vmem:[%s23421_s10 + $0x164] ss:$16 sps:$4 sm:$0xff]  }
0x14dd   :  { %10057 = vmatpush1.bf16.msra.mxu1 %v17413_v27  ;;  %v17442_v27 = vld [vmem:[%s23421_s10 + $0x16c] ss:$16 sps:$4 sm:$0xff]  }
0x1573   :  { %v9425_v11 = vpop.f32.mrb[124].mxu1 }
0x1574   :  { %v9426_v30 = vadd.f32 %v15253_v57, %v9425_v11  ;;  %v16135_v48 = vpop.f32.mrb[125].mxu1  ;;  %v17347_v11 = vld [vmem:[%s23421_s10 + $0x8] ss:$16 sps:$4 sm:$0xff]  }
0x1575   :  { %v9428_v60 = vpop.f32.mrb[126].mxu1  ;;  %v17350_v48 = vld [vmem:[%s23421_s10 + $0x28] ss:$16 sps:$4 sm:$0xff]  }
0x1576   :  { %9432 = vst [vmem:[#allocation9 + $0x10] sm:$0xff] %v9426_v30  ;;  %9433 = vmax.xlane.f32.xlu1 %v9426_v30  ;;  %v16136_v25 = vpop.f32.mrb[127].mxu1  ;;  %v17355_v60 = vld [vmem:[%s23421_s10 + $0x4c] ss:$16 sps:$4 sm:$0xff]  }
0x1577   :  { %v17353_v25 = vld [vmem:[%s23421_s10 + $0x48] ss:$16 sps:$4 sm:$0xff]  }
0x1593   :  { %v21916_v34 = vpop.f32.mrb[128].mxu1 }
0x1594   :  { %v21918_v35 = vpop.f32.mrb[129].mxu1 }
0x1595   :  { %v9838_v36 = vpop.f32.mrb[130].mxu1 }
0x1596   :  { %v9839_v41 = vpop.f32.mrb[131].mxu1  ;;  %v17358_v36 = vld [vmem:[%s23421_s10 + $0x6c] ss:$16 sps:$4 sm:$0xff]  }
0x1597   :  { %v17356_v41 = vld [vmem:[%s23421_s10 + $0x68] ss:$16 sps:$4 sm:$0xff]  }
0x1603   :  { %v9434_v4 = vpop.xlane.xlu1 %9433 }
0x1604   :  { %vm9435_vm15 = vcmp.eq.f32.partialorder %v9426_v30, %v9434_v4  ;;  %v17352_v30 = vld [vmem:[%s23421_s10 + $0x2c] ss:$16 sps:$4 sm:$0xff]  }
0x1605   :  { %v9436_v1 = vsel %vm9435_vm15, %v20387_v58, 128  ;;  %v17361_v4 = vld [vmem:[%s23421_s10 + $0x8c] ss:$16 sps:$4 sm:$0xff]  }
0x1606   :  { %v9438_v9 = vshra.s32 %v9436_v1, 16  ;;  %v9437_v18 = vand.u32 65535, %v9436_v1  ;;  %v17359_v1 = vld [vmem:[%s23421_s10 + $0x88] ss:$16 sps:$4 sm:$0xff]  }
0x1608   :  { %v9440_v12 = vcvt.s32.f32 %v9438_v9  ;;  %v9439_v5 = vcvt.s32.f32 %v9437_v18  ;;  %v17364_v9 = vld [vmem:[%s23421_s10 + $0xac] ss:$16 sps:$4 sm:$0xff]  }
0x1609   :  { %v17367_v18 = vld [vmem:[%s23421_s10 + $0xcc] ss:$16 sps:$4 sm:$0xff]  }
0x160a   :  { %9441 = vmin.xlane.f32.xlu0 %v9440_v12 }
0x1697   :  { %v9442_v38 = vpop.xlane.xlu0 %9441 }
0x1698   :  { %vm9443_vm0 = vcmp.eq.f32.partialorder %v9440_v12, %v9442_v38  ;;  %v9448_v42 = vcvt.f32.s32 %v9442_v38  ;;  %v17362_v12 = vld [vmem:[%s23421_s10 + $0xa8] ss:$16 sps:$4 sm:$0xff]  }
0x1699   :  { %v9444_v53 = vsel %vm9443_vm0, %v9439_v5, inf  ;;  %v17365_v38 = vld [vmem:[%s23421_s10 + $0xc8] ss:$16 sps:$4 sm:$0xff]   ;;  %v17370_v5 = vld [vmem:[%s23421_s10 + $0xec] ss:$16 sps:$4 sm:$0xff]  }
0x169a   :  { %9445 = vmin.xlane.f32.xlu1 %v9444_v53  ;;  %v9449_v63 = vshll.u32 %v9448_v42, 16  ;;  %v17368_v53 = vld [vmem:[%s23421_s10 + $0xe8] ss:$16 sps:$4 sm:$0xff]  }
0x169b   :  { %v17398_v42 = vld [vmem:[%s23420_s9 + $0x88] ss:$16 sps:$4 sm:$0xff]  }
0x1727   :  { %v9446_v61 = vpop.xlane.xlu1 %9445 }
0x1728   :  { %v9447_v13 = vcvt.f32.s32 %v9446_v61  ;;  %v17404_v61 = vld [vmem:[%s23420_s9 + $0xa8] ss:$16 sps:$4 sm:$0xff]  }
0x172a   :  { %v9450_v37 = vadd.s32 %v9449_v63, %v9447_v13  ;;  %v17412_v63 = vld [vmem:[%s23420_s9 + $0xcc] ss:$16 sps:$4 sm:$0xff]   ;;  %v17410_v13 = vld [vmem:[%s23420_s9 + $0xc8] ss:$16 sps:$4 sm:$0xff]  }
0x172c   :  { %v9458_v28 = vsel %vm9457_vm3, %v15263_v7, %v9450_v37  ;;  %v17418_v7 = vld [vmem:[%s23420_s9 + $0xec] ss:$16 sps:$4 sm:$0xff]   ;;  %v17416_v37 = vld [vmem:[%s23420_s9 + $0xe8] ss:$16 sps:$4 sm:$0xff]  }
0x172d   :  { %9459 = vst.msk [vmem:[#allocation4] sm:$0xff] %vm5108_vm1, %v9458_v28  ;;  %v17421_v28 = vld [vmem:[%s23421_s10 + $0x104] ss:$16 sps:$4 sm:$0xff]  }
0x172e   :  { %10398 = vmatprep.subr.bf16.mxu1 %v17421_v28  ;;  %v17482_v28 = vld [vmem:[%s23420_s9 + $0x148] ss:$16 sps:$4 sm:$0xff]  }
0x1734   :  { %v9460_v24 = vld [vmem:[#allocation4] sm:$0xff] }
0x1735   :  { %9462 = vperm.xlu1 %16267, %v9460_v24   ;;  %v17424_v24 = vld [vmem:[%s23421_s10 + $0x10c] ss:$16 sps:$4 sm:$0xff]  }
0x17b4   :  { %v9463_v57 = vpop.permute.xlu1 %9462 }
0x17b5   :  { %vm9464_vm4 = vcmp.eq.s32.totalorder %v20387_v58, %v9463_v57  ;;  %v17437_v57 = vld [vmem:[%s23421_s10 + $0x160] ss:$16 sps:$4 sm:$0xff]  }
0x17b6   :  { %vm15273_vm5 = vmpackc.low %vm9464_vm4, %vm9464_vm4 }
0x17b7   :  { %16154 = vmatmul.mubr.msk.bf16.vlgmr.msra.gmra.mrb[136].mxu0 %vm15273_vm5, %v18272_v3 }
0x17b8   :  { %9842 = vmatpush1.bf16.msra.mxu0 %v17347_v11  ;;  %9873 = vmatprep.mubr.bf16.mxu0 %v23533_v19  ;;  %v17440_v11 = vld [vmem:[%s23421_s10 + $0x168] ss:$16 sps:$4 sm:$0xff]  }
0x17b9   :  { %9843 = vmatprep.subr.bf16.mxu0 %v17352_v30  ;;  %v17445_v30 = vld [vmem:[%s23421_s10 + $0x184] ss:$16 sps:$4 sm:$0xff]  }
0x17bc   :  { %9844 = vmatpush1.bf16.msra.mxu0 %v17350_v48  ;;  %v17448_v48 = vld [vmem:[%s23421_s10 + $0x18c] ss:$16 sps:$4 sm:$0xff]  }
0x17bd   :  { %9845 = vmatprep.subr.bf16.mxu0 %v17355_v60  ;;  %v17443_v60 = vld [vmem:[%s23421_s10 + $0x180] ss:$16 sps:$4 sm:$0xff]  }
0x17c0   :  { %9846 = vmatpush1.bf16.msra.mxu0 %v17353_v25  ;;  %v17446_v25 = vld [vmem:[%s23421_s10 + $0x188] ss:$16 sps:$4 sm:$0xff]  }
0x17c1   :  { %9847 = vmatprep.subr.bf16.mxu0 %v17358_v36  ;;  %v17451_v36 = vld [vmem:[%s23421_s10 + $0x1a4] ss:$16 sps:$4 sm:$0xff]  }
0x17c4   :  { %9848 = vmatpush1.bf16.msra.mxu0 %v17356_v41  ;;  %v17454_v41 = vld [vmem:[%s23421_s10 + $0x1ac] ss:$16 sps:$4 sm:$0xff]  }
0x17c5   :  { %9849 = vmatprep.subr.bf16.mxu0 %v17361_v4  ;;  %v17449_v4 = vld [vmem:[%s23421_s10 + $0x1a0] ss:$16 sps:$4 sm:$0xff]  }
0x17c8   :  { %9850 = vmatpush1.bf16.msra.mxu0 %v17359_v1  ;;  %v17452_v1 = vld [vmem:[%s23421_s10 + $0x1a8] ss:$16 sps:$4 sm:$0xff]  }
0x17c9   :  { %9851 = vmatprep.subr.bf16.mxu0 %v17364_v9  ;;  %v17457_v9 = vld [vmem:[%s23421_s10 + $0x1c4] ss:$16 sps:$4 sm:$0xff]  }
0x17cc   :  { %9852 = vmatpush1.bf16.msra.mxu0 %v17362_v12  ;;  %v17460_v12 = vld [vmem:[%s23421_s10 + $0x1cc] ss:$16 sps:$4 sm:$0xff]  }
0x17cd   :  { %9853 = vmatprep.subr.bf16.mxu0 %v17367_v18  ;;  %v17455_v18 = vld [vmem:[%s23421_s10 + $0x1c0] ss:$16 sps:$4 sm:$0xff]  }
0x17d0   :  { %9854 = vmatpush1.bf16.msra.mxu0 %v17365_v38  ;;  %v17458_v38 = vld [vmem:[%s23421_s10 + $0x1c8] ss:$16 sps:$4 sm:$0xff]  }
0x17d1   :  { %9855 = vmatprep.subr.bf16.mxu0 %v17370_v5  ;;  %v17463_v5 = vld [vmem:[%s23421_s10 + $0x1e4] ss:$16 sps:$4 sm:$0xff]  }
0x17d4   :  { %9856 = vmatpush1.bf16.msra.mxu0 %v17368_v53  ;;  %v17466_v53 = vld [vmem:[%s23421_s10 + $0x1ec] ss:$16 sps:$4 sm:$0xff]  }
0x17d5   :  { %10083 = vmatprep.subr.bf16.mxu0 %v17376_v8  ;;  %v17461_v8 = vld [vmem:[%s23421_s10 + $0x1e0] ss:$16 sps:$4 sm:$0xff]  }
0x17d7   :  { %9874 = vmatmul.mubr.bf16.vlgmr.msra.gmra.mrb[140].mxu0 %v21809_v54  ;;  %v17394_v54 = vld [vmem:[%s23420_s9 + $0x6c] ss:$16 sps:$4 sm:$0xff]  }
0x17d8   :  { %10084 = vmatpush1.bf16.msra.mxu0 %v17374_v21  ;;  %10115 = vmatprep.mubr.bf16.mxu0 %v23533_v19  ;;  %v17464_v21 = vld [vmem:[%s23421_s10 + $0x1e8] ss:$16 sps:$4 sm:$0xff]  }
0x17d9   :  { %10085 = vmatprep.subr.bf16.mxu0 %v17382_v14 }
0x17dc   :  { %10086 = vmatpush1.bf16.msra.mxu0 %v17380_v50 }
0x17dd   :  { %10087 = vmatprep.subr.bf16.mxu0 %v17388_v0 }
0x17e0   :  { %10088 = vmatpush1.bf16.msra.mxu0 %v17386_v32 }
0x17e1   :  { %10089 = vmatprep.subr.bf16.mxu0 %v17394_v54  ;;  %v17469_v54 = vld [vmem:[%s23420_s9 + $0x104] ss:$16 sps:$4 sm:$0xff]  }
0x17e4   :  { %10090 = vmatpush1.bf16.msra.mxu0 %v17392_v16  ;;  %v17472_v16 = vld [vmem:[%s23420_s9 + $0x10c] ss:$16 sps:$4 sm:$0xff]  }
0x17e5   :  { %10091 = vmatprep.subr.bf16.mxu0 %v17400_v46  ;;  %v17467_v46 = vld [vmem:[%s23420_s9 + $0x100] ss:$16 sps:$4 sm:$0xff]  }
0x17e8   :  { %10092 = vmatpush1.bf16.msra.mxu0 %v17398_v42  ;;  %v17475_v42 = vld [vmem:[%s23420_s9 + $0x124] ss:$16 sps:$4 sm:$0xff]  }
0x17e9   :  { %10093 = vmatprep.subr.bf16.mxu0 %v17406_v59  ;;  %v17478_v59 = vld [vmem:[%s23420_s9 + $0x12c] ss:$16 sps:$4 sm:$0xff]  }
0x17ec   :  { %10094 = vmatpush1.bf16.msra.mxu0 %v17404_v61  ;;  %v17473_v61 = vld [vmem:[%s23420_s9 + $0x120] ss:$16 sps:$4 sm:$0xff]  }
0x17ed   :  { %10095 = vmatprep.subr.bf16.mxu0 %v17412_v63  ;;  %v17476_v63 = vld [vmem:[%s23420_s9 + $0x128] ss:$16 sps:$4 sm:$0xff]  }
0x17f0   :  { %10096 = vmatpush1.bf16.msra.mxu0 %v17410_v13  ;;  %v17481_v13 = vld [vmem:[%s23420_s9 + $0x144] ss:$16 sps:$4 sm:$0xff]  }
0x17f1   :  { %10097 = vmatprep.subr.bf16.mxu0 %v17418_v7  ;;  %v17484_v7 = vld [vmem:[%s23420_s9 + $0x14c] ss:$16 sps:$4 sm:$0xff]  }
0x17f4   :  { %10098 = vmatpush1.bf16.msra.mxu0 %v17416_v37  ;;  %v17479_v37 = vld [vmem:[%s23420_s9 + $0x140] ss:$16 sps:$4 sm:$0xff]  }
0x17f5   :  { %10439 = vmatprep.subr.bf16.mxu0 %v17424_v24  ;;  %v17487_v24 = vld [vmem:[%s23420_s9 + $0x164] ss:$16 sps:$4 sm:$0xff]  }
0x188a   :  { %v9566_v17 = vpop.f32.mrb[136].mxu0 }
0x188b   :  { %v9574_v47 = vpack.c.bf16 %v9566_v17, %v9566_v17  ;;  %v16155_v62 = vpop.f32.mrb[137].mxu0  ;;  %v17490_v17 = vld [vmem:[%s23420_s9 + $0x16c] ss:$16 sps:$4 sm:$0xff]  }
0x188c   :  { %v9569_v43 = vpop.f32.mrb[138].mxu0  ;;  %v17496_v62 = vld [vmem:[%s23420_s9 + $0x18c] ss:$16 sps:$4 sm:$0xff]  }
0x188d   :  { %v16156_v40 = vpop.f32.mrb[139].mxu0  ;;  %10075 = vmatmul.mubr.bf16.vlgmr.msra.gmra.mrb[132].mxu1 %v9574_v47  ;;  %10116 = vmatmul.mubr.bf16.vlgmr.msra.gmra.mrb[144].mxu0 %v9574_v47  ;;  %v17493_v47 = vld [vmem:[%s23420_s9 + $0x184] ss:$16 sps:$4 sm:$0xff]  }
0x188e   :  { %10399 = vmatpush1.bf16.msra.mxu1 %v17419_v33  ;;  %10440 = vmatpush1.bf16.msra.mxu0 %v17422_v51  ;;  %v17485_v33 = vld [vmem:[%s23420_s9 + $0x160] ss:$16 sps:$4 sm:$0xff]   ;;  %v17488_v51 = vld [vmem:[%s23420_s9 + $0x168] ss:$16 sps:$4 sm:$0xff]   ;;  %v17499_v43 = vld [vmem:[%s23420_s9 + $0x1a4] ss:$16 sps:$4 sm:$0xff]  }
0x188f   :  { %10400 = vmatprep.subr.bf16.mxu1 %v17427_v22  ;;  %10441 = vmatprep.subr.bf16.mxu0 %v17430_v45  ;;  %v17491_v22 = vld [vmem:[%s23420_s9 + $0x180] ss:$16 sps:$4 sm:$0xff]   ;;  %v17494_v45 = vld [vmem:[%s23420_s9 + $0x188] ss:$16 sps:$4 sm:$0xff]  }
0x1890   :  { %10430 = vmatprep.mubr.bf16.mxu1 %v23533_v19  ;;  %10471 = vmatprep.mubr.bf16.mxu0 %v23533_v19  ;;  %v17497_v40 = vld [vmem:[%s23420_s9 + $0x1a0] ss:$16 sps:$4 sm:$0xff]  }
0x1892   :  { %10401 = vmatpush1.bf16.msra.mxu1 %v17425_v56  ;;  %10442 = vmatpush1.bf16.msra.mxu0 %v17428_v31  ;;  %v17500_v56 = vld [vmem:[%s23420_s9 + $0x1a8] ss:$16 sps:$4 sm:$0xff]   ;;  %v17502_v31 = vld [vmem:[%s23420_s9 + $0x1ac] ss:$16 sps:$4 sm:$0xff]  }
0x1893   :  { %10402 = vmatprep.subr.bf16.mxu1 %v17433_v52  ;;  %10443 = vmatprep.subr.bf16.mxu0 %v17436_v10  ;;  %v17505_v52 = vld [vmem:[%s23420_s9 + $0x1c4] ss:$16 sps:$4 sm:$0xff]   ;;  %v17508_v10 = vld [vmem:[%s23420_s9 + $0x1cc] ss:$16 sps:$4 sm:$0xff]  }
0x1896   :  { %10403 = vmatpush1.bf16.msra.mxu1 %v17431_v6  ;;  %10444 = vmatpush1.bf16.msra.mxu0 %v17434_v55  ;;  %v17503_v6 = vld [vmem:[%s23420_s9 + $0x1c0] ss:$16 sps:$4 sm:$0xff]   ;;  %v17506_v55 = vld [vmem:[%s23420_s9 + $0x1c8] ss:$16 sps:$4 sm:$0xff]  }
0x1897   :  { %10404 = vmatprep.subr.bf16.mxu1 %v17439_v39  ;;  %10445 = vmatprep.subr.bf16.mxu0 %v17442_v27  ;;  %v17511_v39 = vld [vmem:[%s23420_s9 + $0x1e4] ss:$16 sps:$4 sm:$0xff]   ;;  %v17509_v27 = vld [vmem:[%s23420_s9 + $0x1e0] ss:$16 sps:$4 sm:$0xff]  }
0x189a   :  { %10405 = vmatpush1.bf16.msra.mxu1 %v17437_v57  ;;  %10446 = vmatpush1.bf16.msra.mxu0 %v17440_v11  ;;  %v17512_v57 = vld [vmem:[%s23420_s9 + $0x1e8] ss:$16 sps:$4 sm:$0xff]   ;;  %v17514_v11 = vld [vmem:[%s23420_s9 + $0x1ec] ss:$16 sps:$4 sm:$0xff]  }
0x189b   :  { %10406 = vmatprep.subr.bf16.mxu1 %v17445_v30  ;;  %10447 = vmatprep.subr.bf16.mxu0 %v17448_v48  ;;  %v10124_v30 = vld [vmem:[%s23422_s11] sm:$0xf] }
0x189c   :  { %v10129_v48 = vrot.slane %v10124_v30, %v18939_v23 }
0x189e   :  { %10407 = vmatpush1.bf16.msra.mxu1 %v17443_v60  ;;  %10448 = vmatpush1.bf16.msra.mxu0 %v17446_v25 }
0x189f   :  { %10408 = vmatprep.subr.bf16.mxu1 %v17451_v36  ;;  %10449 = vmatprep.subr.bf16.mxu0 %v17454_v41  ;;  %v10133_v36 = vrot.slane %v10124_v30, %v18944_v26 }
0x18a2   :  { %10409 = vmatpush1.bf16.msra.mxu1 %v17449_v4  ;;  %10450 = vmatpush1.bf16.msra.mxu0 %v17452_v1 }
0x18a3   :  { %10410 = vmatprep.subr.bf16.mxu1 %v17457_v9  ;;  %10451 = vmatprep.subr.bf16.mxu0 %v17460_v12 }
0x18a6   :  { %10411 = vmatpush1.bf16.msra.mxu1 %v17455_v18  ;;  %10452 = vmatpush1.bf16.msra.mxu0 %v17458_v38 }
0x18a7   :  { %10412 = vmatprep.subr.bf16.mxu1 %v17463_v5  ;;  %10453 = vmatprep.subr.bf16.mxu0 %v17466_v53 }
0x18aa   :  { %v22203_v14 = vpop.f32.mrb[140].mxu0  ;;  %10413 = vmatpush1.bf16.msra.mxu1 %v17461_v8  ;;  %10454 = vmatpush1.bf16.msra.mxu0 %v17464_v21  ;;  %v10137_v8 = vrot.slane %v10124_v30, %v18947_v29 }
0x18ab   :  { %v22205_v50 = vpop.f32.mrb[141].mxu0  ;;  %10640 = vmatprep.subr.bf16.mxu1 %v17469_v54  ;;  %10681 = vmatprep.subr.bf16.mxu0 %v17472_v16 }
0x18ac   :  { %v9879_v0 = vpop.f32.mrb[142].mxu0 }
0x18ad   :  { %v9880_v32 = vpop.f32.mrb[143].mxu0  ;;  %10431 = vmatmul.mubr.bf16.vlgmr.msra.gmra.mrb[136].mxu1 %v21865_v49  ;;  %10472 = vmatmul.mubr.bf16.vlgmr.msra.gmra.mrb[148].mxu0 %v21865_v49  ;;  %v17470_v49 = vld [vmem:[%s23420_s9 + $0x108] ss:$16 sps:$4 sm:$0xff]  }
0x18ae   :  { %10672 = vmatprep.mubr.bf16.mxu1 %v23533_v19  ;;  %10713 = vmatprep.mubr.bf16.mxu0 %v23533_v19 }
0x18af   :  { %10641 = vmatpush1.bf16.msra.mxu1 %v17467_v46  ;;  %10682 = vmatpush1.bf16.msra.mxu0 %v17470_v49 }
0x18b0   :  { %10642 = vmatprep.subr.bf16.mxu1 %v17475_v42  ;;  %10683 = vmatprep.subr.bf16.mxu0 %v17478_v59 }
0x18b3   :  { %10643 = vmatpush1.bf16.msra.mxu1 %v17473_v61  ;;  %10684 = vmatpush1.bf16.msra.mxu0 %v17476_v63 }
0x18b4   :  { %10644 = vmatprep.subr.bf16.mxu1 %v17481_v13  ;;  %10685 = vmatprep.subr.bf16.mxu0 %v17484_v7 }
0x18b7   :  { %10645 = vmatpush1.bf16.msra.mxu1 %v17479_v37  ;;  %10686 = vmatpush1.bf16.msra.mxu0 %v17482_v28 }
0x18b8   :  { %10646 = vmatprep.subr.bf16.mxu1 %v17487_v24  ;;  %10687 = vmatprep.subr.bf16.mxu0 %v17490_v17 }
0x18bb   :  { %10647 = vmatpush1.bf16.msra.mxu1 %v17485_v33  ;;  %10688 = vmatpush1.bf16.msra.mxu0 %v17488_v51 }
0x18bc   :  { %10648 = vmatprep.subr.bf16.mxu1 %v17493_v47  ;;  %10689 = vmatprep.subr.bf16.mxu0 %v17496_v62 }
0x18bf   :  { %10649 = vmatpush1.bf16.msra.mxu1 %v17491_v22  ;;  %10690 = vmatpush1.bf16.msra.mxu0 %v17494_v45 }
0x18c0   :  { %10650 = vmatprep.subr.bf16.mxu1 %v17499_v43  ;;  %10691 = vmatprep.subr.bf16.mxu0 %v17502_v31 }
0x18c3   :  { %10651 = vmatpush1.bf16.msra.mxu1 %v17497_v40  ;;  %10692 = vmatpush1.bf16.msra.mxu0 %v17500_v56 }
0x18c4   :  { %10652 = vmatprep.subr.bf16.mxu1 %v17505_v52  ;;  %10693 = vmatprep.subr.bf16.mxu0 %v17508_v10 }
0x18c7   :  { %10653 = vmatpush1.bf16.msra.mxu1 %v17503_v6  ;;  %10694 = vmatpush1.bf16.msra.mxu0 %v17506_v55  ;;  %v17516_v6 = vld [vmem:[%s23423_s12 + $0x8] sm:$0xff]   ;;  %v17517_v55 = vld [vmem:[%s23423_s12 + $0x10] sm:$0xff]  }
0x18c8   :  { %10654 = vmatprep.subr.bf16.mxu1 %v17511_v39  ;;  %10695 = vmatprep.subr.bf16.mxu0 %v17514_v11  ;;  %v17518_v39 = vld [vmem:[%s23423_s12 + $0x18] sm:$0xff]   ;;  %v17521_v11 = vld [vmem:[%s23423_s12 + $0x30] sm:$0xff]  }
0x18cb   :  { %10655 = vmatpush1.bf16.msra.mxu1 %v17509_v27  ;;  %10696 = vmatpush1.bf16.msra.mxu0 %v17512_v57  ;;  %v17519_v27 = vld [vmem:[%s23423_s12 + $0x20] sm:$0xff]   ;;  %v17520_v57 = vld [vmem:[%s23423_s12 + $0x28] sm:$0xff]  }
0x18cc   :  { %16157 = vmatprep.subr.bf16.mxu1 %v18270_v15  ;;  %16177 = vmatprep.subr.bf16.mxu0 %v18270_v15 }
0x1960   :  { %v10076_v60 = vpop.f32.mrb[132].mxu1  ;;  %v10117_v25 = vpop.f32.mrb[144].mxu0 }
0x1961   :  { %v10077_v41 = vadd.f32 %v10076_v60, %v21916_v34  ;;  %v10118_v4 = vadd.f32 %v10117_v25, %v22203_v14  ;;  %v10078_v1 = vpop.f32.mrb[133].mxu1  ;;  %v10119_v9 = vpop.f32.mrb[145].mxu0  ;;  %v10141_v14 = vrot.slane %v10124_v30, %v18955_v44  ;;  %v17522_v30 = vld [vmem:[%s23423_s12 + $0x38] sm:$0xff]   ;;  %v15467_v60 = vld [vmem:[%s23422_s11 + $0x4] sm:$0xf] }
0x1962   :  { %v10079_v12 = vadd.f32 %v10078_v1, %v21918_v35  ;;  %v10120_v18 = vadd.f32 %v10119_v9, %v22205_v50  ;;  %v10080_v38 = vpop.f32.mrb[134].mxu1  ;;  %v10121_v5 = vpop.f32.mrb[146].mxu0  ;;  %v10727_v25 = vrot.slane %v15467_v60, %v18939_v23 }
0x1963   :  { %v10146_v53 = vadd.f32 %v10129_v48, %v10077_v41  ;;  %v10081_v21 = vpop.f32.mrb[135].mxu1  ;;  %v10122_v0 = vpop.f32.mrb[147].mxu0  ;;  %v10148_v34 = vadd.f32 %v10137_v8, %v10118_v4  ;;  %v17525_v48 = vld [vmem:[%s23421_s10 + $0x4] ss:$16 sps:$4 sm:$0xff]   ;;  %v10731_v4 = vrot.slane %v15467_v60, %v18944_v26 }
0x1964   :  { %v10147_v32 = vadd.f32 %v10133_v36, %v10079_v12  ;;  %v10149_v46 = vadd.f32 %v10141_v14, %v10120_v18  ;;  %v10735_v0 = vrot.slane %v15467_v60, %v18947_v29 }
0x1965   :  { %v10150_v54 = vmul.f32 0.5, %v10146_v53 }
0x1966   :  { %v10154_v16 = vmul.f32 0.5, %v10147_v32  ;;  %v10159_v35 = vmul.f32 0.5, %v10149_v46 }
0x1967   :  { %18079 = vtanh.f32 %v10150_v54 }
0x1968   :  { %18081 = vtanh.f32 %v10154_v16 }
0x1969   :  { %18083 = vtanh.f32 %v10148_v34 }
0x196a   :  { %18085 = vtanh.f32 %v10159_v35  ;;  %v10739_v35 = vrot.slane %v15467_v60, %v18955_v44  ;;  %v17544_v60 = vld [vmem:[%s23421_s10 + $0xe0] ss:$16 sps:$4 sm:$0xff]  }
0x1971   :  { %v18080_v49 = vpop.eup %18079 }
0x1972   :  { %v18082_v50 = vpop.eup %18081  ;;  %v10152_v42 = vmul.f32 0.5, %v18080_v49 }
0x1973   :  { %v10156_v59 = vmul.f32 0.5, %v18082_v50  ;;  %v18084_v63 = vpop.eup %18083 }
0x1974   :  { %v10153_v61 = vadd.f32 0.5, %v10152_v42  ;;  %v18086_v24 = vpop.eup %18085 }
0x1975   :  { %v10157_v13 = vadd.f32 0.5, %v10156_v59  ;;  %v10161_v17 = vmul.f32 0.5, %v18086_v24 }
0x1976   :  { %v10164_v7 = vmul.f32 %v18084_v63, %v10153_v61 }
0x1977   :  { %v10163_v37 = vmul.f32 %v10157_v13, %v21806_v2  ;;  %v10162_v56 = vadd.f32 0.5, %v10161_v17  ;;  %v17515_v2 = vld [vmem:[%s23423_s12] sm:$0xff]  }
0x1979   :  { %v22321_v28 = vadd.f32 %v10164_v7, %v10163_v37 }
0x197b   :  { %18087 = vtanh.f32 %v22321_v28 }
0x1980   :  { %v10432_v33 = vpop.f32.mrb[136].mxu1  ;;  %v10473_v51 = vpop.f32.mrb[148].mxu0 }
0x1981   :  { %v10434_v47 = vpop.f32.mrb[137].mxu1  ;;  %v10475_v62 = vpop.f32.mrb[149].mxu0 }
0x1982   :  { %v10436_v22 = vpop.f32.mrb[138].mxu1  ;;  %v10477_v45 = vpop.f32.mrb[150].mxu0 }
0x1983   :  { %v10437_v43 = vpop.f32.mrb[139].mxu1  ;;  %v10478_v40 = vpop.f32.mrb[151].mxu0 }
0x1984   :  { %v17523_v43 = vld [vmem:[%s23421_s10] ss:$16 sps:$4 sm:$0xff]  }
0x1985   :  { %v18088_v31 = vpop.eup %18087 }
0x1986   :  { %v10167_v52 = vmul.f32 %v18088_v31, %v10162_v56  ;;  %v17528_v56 = vld [vmem:[%s23421_s10 + $0x24] ss:$16 sps:$4 sm:$0xff]  }
0x1987   :  { %v17531_v31 = vld [vmem:[%s23421_s10 + $0x44] ss:$16 sps:$4 sm:$0xff]  }
0x1988   :  { %v22324_v10 = vpack.c.bf16 %v10167_v52, %v10167_v52  ;;  %v17529_v52 = vld [vmem:[%s23421_s10 + $0x40] ss:$16 sps:$4 sm:$0xff]  }
0x198a   :  { %10673 = vmatmul.mubr.bf16.vlgmr.msra.gmra.mrb[140].mxu1 %v22324_v10  ;;  %10714 = vmatmul.mubr.bf16.vlgmr.msra.gmra.mrb[152].mxu0 %v22324_v10 }
0x198b   :  { %16173 = vmatprep.mubr.msk.bf16.mxu1 %vm18271_vm2, %v18270_v15  ;;  %16193 = vmatprep.mubr.msk.bf16.mxu0 %vm18271_vm2, %v18270_v15 }
0x198c   :  { %16158 = vmatpush3.bf16.msra.mxu1 %v17515_v2  ;;  %v17534_v2 = vld [vmem:[%s23421_s10 + $0x64] ss:$16 sps:$4 sm:$0xff]  }
0x198d   :  { %16159 = vmatprep.subr.bf16.mxu1 %v18270_v15 }
0x1990   :  { %16160 = vmatpush3.bf16.msra.mxu1 %v17516_v6  ;;  %v17532_v6 = vld [vmem:[%s23421_s10 + $0x60] ss:$16 sps:$4 sm:$0xff]  }
0x1991   :  { %16161 = vmatprep.subr.bf16.mxu1 %v18270_v15 }
0x1994   :  { %16162 = vmatpush3.bf16.msra.mxu1 %v17517_v55  ;;  %v17537_v55 = vld [vmem:[%s23421_s10 + $0x84] ss:$16 sps:$4 sm:$0xff]  }
0x1995   :  { %16163 = vmatprep.subr.bf16.mxu1 %v18270_v15 }
0x1998   :  { %16164 = vmatpush3.bf16.msra.mxu1 %v17518_v39  ;;  %v17535_v39 = vld [vmem:[%s23421_s10 + $0x80] ss:$16 sps:$4 sm:$0xff]  }
0x1999   :  { %16165 = vmatprep.subr.bf16.mxu1 %v18270_v15 }
0x199c   :  { %16166 = vmatpush3.bf16.msra.mxu1 %v17519_v27  ;;  %v17540_v27 = vld [vmem:[%s23421_s10 + $0xa4] ss:$16 sps:$4 sm:$0xff]  }
0x199d   :  { %16167 = vmatprep.subr.bf16.mxu1 %v18270_v15 }
0x19a0   :  { %16168 = vmatpush3.bf16.msra.mxu1 %v17520_v57  ;;  %v17538_v57 = vld [vmem:[%s23421_s10 + $0xa0] ss:$16 sps:$4 sm:$0xff]  }
0x19a1   :  { %16169 = vmatprep.subr.bf16.mxu1 %v18270_v15 }
0x19a4   :  { %16170 = vmatpush3.bf16.msra.mxu1 %v17521_v11  ;;  %v17543_v11 = vld [vmem:[%s23421_s10 + $0xc4] ss:$16 sps:$4 sm:$0xff]  }
0x19a5   :  { %16171 = vmatprep.subr.bf16.mxu1 %v18270_v15 }
0x19a8   :  { %16172 = vmatpush3.bf16.msra.mxu1 %v17522_v30  ;;  %v17541_v30 = vld [vmem:[%s23421_s10 + $0xc0] ss:$16 sps:$4 sm:$0xff]  }
0x19a9   :  { %11249 = vmatprep.subr.bf16.mxu1 %v17525_v48  ;;  %v17546_v48 = vld [vmem:[%s23421_s10 + $0xe4] ss:$16 sps:$4 sm:$0xff]  }
0x1a5d   :  { %v10674_v36 = vpop.f32.mrb[140].mxu1  ;;  %v10715_v41 = vpop.f32.mrb[152].mxu0 }
0x1a5e   :  { %v10675_v1 = vadd.f32 %v10674_v36, %v10432_v33  ;;  %v10716_v9 = vadd.f32 %v10715_v41, %v10473_v51  ;;  %v10676_v12 = vpop.f32.mrb[141].mxu1  ;;  %v10717_v18 = vpop.f32.mrb[153].mxu0 }
0x1a5f   :  { %v10677_v38 = vadd.f32 %v10676_v12, %v10434_v47  ;;  %v10718_v5 = vadd.f32 %v10717_v18, %v10475_v62  ;;  %v10678_v53 = vpop.f32.mrb[142].mxu1  ;;  %v10719_v8 = vpop.f32.mrb[154].mxu0 }
0x1a60   :  { %v10744_v21 = vadd.f32 %v10727_v25, %v10675_v1  ;;  %v10679_v32 = vpop.f32.mrb[143].mxu1  ;;  %v10720_v54 = vpop.f32.mrb[155].mxu0  ;;  %v10746_v46 = vadd.f32 %v10735_v0, %v10716_v9  ;;  %v15468_v25 = vld [vmem:[%s23424_s13] ss:$0 sm:$0xff] }
0x1a61   :  { %v10745_v16 = vadd.f32 %v10731_v4, %v10677_v38  ;;  %v10747_v49 = vadd.f32 %v10739_v35, %v10718_v5  ;;  %v17549_v35 = vld [vmem:[%s23419_s8 + $0x10] sm:$0xff]  }
0x1a62   :  { %v10748_v34 = vmul.f32 0.5, %v10744_v21 }
0x1a63   :  { %v10752_v14 = vmul.f32 0.5, %v10745_v16  ;;  %v10757_v50 = vmul.f32 0.5, %v10747_v49  ;;  %v17550_v49 = vld [vmem:[%s23419_s8 + $0x18] sm:$0xff]  }
0x1a64   :  { %18089 = vtanh.f32 %v10748_v34 }
0x1a65   :  { %18091 = vtanh.f32 %v10752_v14  ;;  %v17547_v14 = vld [vmem:[%s23419_s8] sm:$0xff]  }
0x1a66   :  { %18093 = vtanh.f32 %v10746_v46  ;;  %16178 = vmatpush3.bf16.msra.mxu0 %v17547_v14  ;;  %v17548_v46 = vld [vmem:[%s23419_s8 + $0x8] sm:$0xff]  }
0x1a67   :  { %18095 = vtanh.f32 %v10757_v50  ;;  %16179 = vmatprep.subr.bf16.mxu0 %v18270_v15  ;;  %v17551_v50 = vld [vmem:[%s23419_s8 + $0x20] sm:$0xff]   ;;  %v17584_v14 = vld [vmem:[%s23420_s9 + $0xc] ss:$16 sps:$4 sm:$0xff]  }
0x1a6a   :  { %16180 = vmatpush3.bf16.msra.mxu0 %v17548_v46  ;;  %v17582_v46 = vld [vmem:[%s23420_s9 + $0x8] ss:$16 sps:$4 sm:$0xff]  }
0x1a6b   :  { %16181 = vmatprep.subr.bf16.mxu0 %v18270_v15 }
0x1a6e   :  { %v18090_v42 = vpop.eup %18089  ;;  %16182 = vmatpush3.bf16.msra.mxu0 %v17549_v35  ;;  %v17590_v35 = vld [vmem:[%s23420_s9 + $0x2c] ss:$16 sps:$4 sm:$0xff]  }
0x1a6f   :  { %v18092_v59 = vpop.eup %18091  ;;  %v10750_v61 = vmul.f32 0.5, %v18090_v42  ;;  %16183 = vmatprep.subr.bf16.mxu0 %v18270_v15  ;;  %v17552_v42 = vld [vmem:[%s23419_s8 + $0x28] sm:$0xff]  }
0x1a70   :  { %v10754_v63 = vmul.f32 0.5, %v18092_v59  ;;  %v18094_v7 = vpop.eup %18093  ;;  %v17553_v59 = vld [vmem:[%s23419_s8 + $0x30] sm:$0xff]  }
0x1a71   :  { %v10751_v13 = vadd.f32 0.5, %v10750_v61  ;;  %v18096_v51 = vpop.eup %18095  ;;  %v17554_v61 = vld [vmem:[%s23419_s8 + $0x38] sm:$0xff]  }
0x1a72   :  { %v10755_v37 = vadd.f32 0.5, %v10754_v63  ;;  %v10759_v47 = vmul.f32 0.5, %v18096_v51  ;;  %16184 = vmatpush3.bf16.msra.mxu0 %v17550_v49  ;;  %v17588_v49 = vld [vmem:[%s23420_s9 + $0x28] ss:$16 sps:$4 sm:$0xff]  }
0x1a73   :  { %v10762_v24 = vmul.f32 %v18094_v7, %v10751_v13  ;;  %16185 = vmatprep.subr.bf16.mxu0 %v18270_v15  ;;  %v10905_v13 = vstv %s10904_s24 }
0x1a74   :  { %v10761_v17 = vmul.f32 %v10755_v37, %v21859_v20  ;;  %v10760_v62 = vadd.f32 0.5, %v10759_v47  ;;  %v17526_v20 = vld [vmem:[%s23421_s10 + $0x20] ss:$16 sps:$4 sm:$0xff]   ;;  %vm10906_vm8 = vcmp.eq.s32.totalorder %v10905_v13, 1  ;;  %v17614_v13 = vld [vmem:[%s23420_s9 + $0xac] ss:$16 sps:$4 sm:$0xff]  }
0x1a76   :  { %v22374_v33 = vadd.f32 %v10762_v24, %v10761_v17  ;;  %16186 = vmatpush3.bf16.msra.mxu0 %v17551_v50  ;;  %v15478_v17 = vld [vmem:[%s23412_s1 + $0x18] sm:$0xff] }
0x1a77   :  { %16187 = vmatprep.subr.bf16.mxu0 %v18270_v15  ;;  %v17596_v50 = vld [vmem:[%s23420_s9 + $0x4c] ss:$16 sps:$4 sm:$0xff]  }
0x1a78   :  { %18097 = vtanh.f32 %v22374_v33 }
0x1a7a   :  { %16188 = vmatpush3.bf16.msra.mxu0 %v17552_v42  ;;  %v17594_v42 = vld [vmem:[%s23420_s9 + $0x48] ss:$16 sps:$4 sm:$0xff]  }
0x1a7b   :  { %16189 = vmatprep.subr.bf16.mxu0 %v18270_v15 }
0x1a7e   :  { %16190 = vmatpush3.bf16.msra.mxu0 %v17553_v59  ;;  %v17600_v59 = vld [vmem:[%s23420_s9 + $0x68] ss:$16 sps:$4 sm:$0xff]  }
0x1a7f   :  { %16191 = vmatprep.subr.bf16.mxu0 %v18270_v15 }
0x1a82   :  { %v18098_v22 = vpop.eup %18097  ;;  %16192 = vmatpush3.bf16.msra.mxu0 %v17554_v61  ;;  %v17608_v61 = vld [vmem:[%s23420_s9 + $0x8c] ss:$16 sps:$4 sm:$0xff]  }
0x1a83   :  { %v10765_v45 = vmul.f32 %v18098_v22, %v10760_v62  ;;  %v17557_v22 = vld [vmem:[%s23421_s10 + $0xc] ss:$16 sps:$4 sm:$0xff]  }
0x1a84   :  { %11290 = vmatprep.subr.bf16.mxu0 %v17557_v22 }
0x1a85   :  { %v22380_v40 = vpack.c.bf16 %v10765_v45, %v10765_v45  ;;  %v17579_v45 = vld [vmem:[%s23420_s9] ss:$16 sps:$4 sm:$0xff]  }
0x1a87   :  { %16174 = vmatmul.mubr.bf16.vlgmr.msra.gmra.mrb[144].mxu1 %v22380_v40 }
0x1a88   :  { %11250 = vmatpush1.bf16.msra.mxu1 %v17523_v43  ;;  %11281 = vmatprep.mubr.bf16.mxu1 %v23533_v19  ;;  %v17581_v43 = vld [vmem:[%s23420_s9 + $0x4] ss:$16 sps:$4 sm:$0xff]  }
0x1a89   :  { %11251 = vmatprep.subr.bf16.mxu1 %v17528_v56  ;;  %v17587_v56 = vld [vmem:[%s23420_s9 + $0x24] ss:$16 sps:$4 sm:$0xff]  }
0x1a8c   :  { %11252 = vmatpush1.bf16.msra.mxu1 %v17526_v20  ;;  %v17585_v20 = vld [vmem:[%s23420_s9 + $0x20] ss:$16 sps:$4 sm:$0xff]  }
0x1a8d   :  { %11253 = vmatprep.subr.bf16.mxu1 %v17531_v31  ;;  %v17593_v31 = vld [vmem:[%s23420_s9 + $0x44] ss:$16 sps:$4 sm:$0xff]  }
0x1a90   :  { %11254 = vmatpush1.bf16.msra.mxu1 %v17529_v52  ;;  %v17591_v52 = vld [vmem:[%s23420_s9 + $0x40] ss:$16 sps:$4 sm:$0xff]  }
0x1a91   :  { %11255 = vmatprep.subr.bf16.mxu1 %v17534_v2  ;;  %v17599_v2 = vld [vmem:[%s23420_s9 + $0x64] ss:$16 sps:$4 sm:$0xff]  }
0x1a94   :  { %11256 = vmatpush1.bf16.msra.mxu1 %v17532_v6  ;;  %v17597_v6 = vld [vmem:[%s23420_s9 + $0x60] ss:$16 sps:$4 sm:$0xff]  }
0x1a95   :  { %11257 = vmatprep.subr.bf16.mxu1 %v17537_v55  ;;  %v17605_v55 = vld [vmem:[%s23420_s9 + $0x84] ss:$16 sps:$4 sm:$0xff]  }
0x1a98   :  { %11258 = vmatpush1.bf16.msra.mxu1 %v17535_v39  ;;  %v17603_v39 = vld [vmem:[%s23420_s9 + $0x80] ss:$16 sps:$4 sm:$0xff]  }
0x1a99   :  { %11259 = vmatprep.subr.bf16.mxu1 %v17540_v27  ;;  %v17611_v27 = vld [vmem:[%s23420_s9 + $0xa4] ss:$16 sps:$4 sm:$0xff]  }
0x1a9c   :  { %11260 = vmatpush1.bf16.msra.mxu1 %v17538_v57  ;;  %v17609_v57 = vld [vmem:[%s23420_s9 + $0xa0] ss:$16 sps:$4 sm:$0xff]  }
0x1a9d   :  { %11261 = vmatprep.subr.bf16.mxu1 %v17543_v11  ;;  %v17617_v11 = vld [vmem:[%s23420_s9 + $0xc4] ss:$16 sps:$4 sm:$0xff]  }
0x1aa0   :  { %11262 = vmatpush1.bf16.msra.mxu1 %v17541_v30  ;;  %v17615_v30 = vld [vmem:[%s23420_s9 + $0xc0] ss:$16 sps:$4 sm:$0xff]  }
0x1aa1   :  { %11263 = vmatprep.subr.bf16.mxu1 %v17546_v48  ;;  %v17623_v48 = vld [vmem:[%s23420_s9 + $0xe4] ss:$16 sps:$4 sm:$0xff]  }
0x1aa4   :  { %11264 = vmatpush1.bf16.msra.mxu1 %v17544_v60  ;;  %v17621_v60 = vld [vmem:[%s23420_s9 + $0xe0] ss:$16 sps:$4 sm:$0xff]  }
0x1aa5   :  { %11491 = vmatprep.subr.bf16.mxu1 %v17581_v43  ;;  %v17630_v43 = vld [vmem:[%s23421_s10 + $0x108] ss:$16 sps:$4 sm:$0xff]  }
0x1aa7   :  { %11282 = vmatmul.mubr.bf16.vlgmr.msra.gmra.mrb[148].mxu1 %v22324_v10 }
0x1aa8   :  { %11523 = vmatprep.mubr.bf16.mxu1 %v23533_v19  ;;  %11492 = vmatpush1.bf16.msra.mxu1 %v17579_v45  ;;  %v17627_v45 = vld [vmem:[%s23421_s10 + $0x100] ss:$16 sps:$4 sm:$0xff]  }
0x1aa9   :  { %11493 = vmatprep.subr.bf16.mxu1 %v17587_v56 }
0x1aac   :  { %11494 = vmatpush1.bf16.msra.mxu1 %v17585_v20 }
0x1aad   :  { %11495 = vmatprep.subr.bf16.mxu1 %v17593_v31  ;;  %v17635_v31 = vld [vmem:[%s23421_s10 + $0x124] ss:$16 sps:$4 sm:$0xff]  }
0x1ab0   :  { %11496 = vmatpush1.bf16.msra.mxu1 %v17591_v52  ;;  %v17638_v52 = vld [vmem:[%s23421_s10 + $0x12c] ss:$16 sps:$4 sm:$0xff]  }
0x1ab1   :  { %11497 = vmatprep.subr.bf16.mxu1 %v17599_v2 }
0x1ab4   :  { %11498 = vmatpush1.bf16.msra.mxu1 %v17597_v6 }
0x1ab5   :  { %11499 = vmatprep.subr.bf16.mxu1 %v17605_v55  ;;  %v17633_v55 = vld [vmem:[%s23421_s10 + $0x120] ss:$16 sps:$4 sm:$0xff]  }
0x1ab8   :  { %11500 = vmatpush1.bf16.msra.mxu1 %v17603_v39  ;;  %v17636_v39 = vld [vmem:[%s23421_s10 + $0x128] ss:$16 sps:$4 sm:$0xff]  }
0x1ab9   :  { %11501 = vmatprep.subr.bf16.mxu1 %v17611_v27  ;;  %v17641_v27 = vld [vmem:[%s23421_s10 + $0x144] ss:$16 sps:$4 sm:$0xff]  }
0x1abc   :  { %11502 = vmatpush1.bf16.msra.mxu1 %v17609_v57  ;;  %v17644_v57 = vld [vmem:[%s23421_s10 + $0x14c] ss:$16 sps:$4 sm:$0xff]  }
0x1abd   :  { %11503 = vmatprep.subr.bf16.mxu1 %v17617_v11  ;;  %v17639_v11 = vld [vmem:[%s23421_s10 + $0x140] ss:$16 sps:$4 sm:$0xff]  }
0x1ac0   :  { %11504 = vmatpush1.bf16.msra.mxu1 %v17615_v30  ;;  %v17642_v30 = vld [vmem:[%s23421_s10 + $0x148] ss:$16 sps:$4 sm:$0xff]  }
0x1ac1   :  { %11505 = vmatprep.subr.bf16.mxu1 %v17623_v48  ;;  %v17647_v48 = vld [vmem:[%s23421_s10 + $0x164] ss:$16 sps:$4 sm:$0xff]  }
0x1ac4   :  { %11506 = vmatpush1.bf16.msra.mxu1 %v17621_v60  ;;  %v17650_v60 = vld [vmem:[%s23421_s10 + $0x16c] ss:$16 sps:$4 sm:$0xff]  }
0x1b5a   :  { %v10874_v36 = vpop.f32.mrb[144].mxu1 }
0x1b5b   :  { %v10875_v41 = vadd.f32 %v15468_v25, %v10874_v36  ;;  %v16175_v4 = vpop.f32.mrb[145].mxu1  ;;  %v17555_v36 = vld [vmem:[%s23421_s10 + $0x8] ss:$16 sps:$4 sm:$0xff]  }
0x1b5c   :  { %v10877_v1 = vpop.f32.mrb[146].mxu1  ;;  %v17558_v4 = vld [vmem:[%s23421_s10 + $0x28] ss:$16 sps:$4 sm:$0xff]  }
0x1b5d   :  { %10881 = vst [vmem:[#allocation9 + $0x18] sm:$0xff] %v10875_v41  ;;  %10882 = vmax.xlane.f32.xlu1 %v10875_v41  ;;  %v16176_v9 = vpop.f32.mrb[147].mxu1  ;;  %v17563_v1 = vld [vmem:[%s23421_s10 + $0x4c] ss:$16 sps:$4 sm:$0xff]  }
0x1b5e   :  { %v17561_v9 = vld [vmem:[%s23421_s10 + $0x48] ss:$16 sps:$4 sm:$0xff]  }
0x1b7a   :  { %v22431_v12 = vpop.f32.mrb[148].mxu1 }
0x1b7b   :  { %v22433_v18 = vpop.f32.mrb[149].mxu1 }
0x1b7c   :  { %v11287_v38 = vpop.f32.mrb[150].mxu1 }
0x1b7d   :  { %v11288_v5 = vpop.f32.mrb[151].mxu1  ;;  %v17566_v38 = vld [vmem:[%s23421_s10 + $0x6c] ss:$16 sps:$4 sm:$0xff]  }
0x1b7e   :  { %v17564_v5 = vld [vmem:[%s23421_s10 + $0x68] ss:$16 sps:$4 sm:$0xff]  }
0x1bea   :  { %v10883_v53 = vpop.xlane.xlu1 %10882 }
0x1beb   :  { %vm10884_vm6 = vcmp.eq.f32.partialorder %v10875_v41, %v10883_v53  ;;  %v17560_v41 = vld [vmem:[%s23421_s10 + $0x2c] ss:$16 sps:$4 sm:$0xff]  }
0x1bec   :  { %v10885_v8 = vsel %vm10884_vm6, %v20387_v58, 128  ;;  %v17569_v53 = vld [vmem:[%s23421_s10 + $0x8c] ss:$16 sps:$4 sm:$0xff]  }
0x1bed   :  { %v10887_v21 = vshra.s32 %v10885_v8, 16  ;;  %v10886_v32 = vand.u32 65535, %v10885_v8  ;;  %v17567_v8 = vld [vmem:[%s23421_s10 + $0x88] ss:$16 sps:$4 sm:$0xff]  }
0x1bef   :  { %v10889_v0 = vcvt.s32.f32 %v10887_v21  ;;  %v10888_v16 = vcvt.s32.f32 %v10886_v32  ;;  %v17572_v21 = vld [vmem:[%s23421_s10 + $0xac] ss:$16 sps:$4 sm:$0xff]  }
0x1bf0   :  { %v17575_v32 = vld [vmem:[%s23421_s10 + $0xcc] ss:$16 sps:$4 sm:$0xff]  }
0x1bf1   :  { %10890 = vmin.xlane.f32.xlu0 %v10889_v0 }
0x1c7e   :  { %v10891_v54 = vpop.xlane.xlu0 %10890 }
0x1c7f   :  { %vm10892_vm7 = vcmp.eq.f32.partialorder %v10889_v0, %v10891_v54  ;;  %v10897_v63 = vcvt.f32.s32 %v10891_v54  ;;  %v17570_v0 = vld [vmem:[%s23421_s10 + $0xa8] ss:$16 sps:$4 sm:$0xff]  }
0x1c80   :  { %v10893_v34 = vsel %vm10892_vm7, %v10888_v16, inf  ;;  %v17573_v54 = vld [vmem:[%s23421_s10 + $0xc8] ss:$16 sps:$4 sm:$0xff]   ;;  %v17578_v16 = vld [vmem:[%s23421_s10 + $0xec] ss:$16 sps:$4 sm:$0xff]  }
0x1c81   :  { %10894 = vmin.xlane.f32.xlu0 %v10893_v34  ;;  %v10898_v37 = vshll.u32 %v10897_v63, 16  ;;  %v17576_v34 = vld [vmem:[%s23421_s10 + $0xe8] ss:$16 sps:$4 sm:$0xff]  }
0x1c82   :  { %v17606_v63 = vld [vmem:[%s23420_s9 + $0x88] ss:$16 sps:$4 sm:$0xff]  }
0x1d0e   :  { %v10895_v7 = vpop.xlane.xlu0 %10894 }
0x1d0f   :  { %v10896_v24 = vcvt.f32.s32 %v10895_v7  ;;  %v17612_v7 = vld [vmem:[%s23420_s9 + $0xa8] ss:$16 sps:$4 sm:$0xff]  }
0x1d11   :  { %v10899_v51 = vadd.s32 %v10898_v37, %v10896_v24  ;;  %v17620_v37 = vld [vmem:[%s23420_s9 + $0xcc] ss:$16 sps:$4 sm:$0xff]   ;;  %v17618_v24 = vld [vmem:[%s23420_s9 + $0xc8] ss:$16 sps:$4 sm:$0xff]  }
0x1d13   :  { %v10907_v47 = vsel %vm10906_vm8, %v15478_v17, %v10899_v51  ;;  %v17626_v17 = vld [vmem:[%s23420_s9 + $0xec] ss:$16 sps:$4 sm:$0xff]   ;;  %v17624_v51 = vld [vmem:[%s23420_s9 + $0xe8] ss:$16 sps:$4 sm:$0xff]  }
0x1d14   :  { %10908 = vst.msk [vmem:[#allocation4] sm:$0xff] %vm5108_vm1, %v10907_v47  ;;  %v17629_v47 = vld [vmem:[%s23421_s10 + $0x104] ss:$16 sps:$4 sm:$0xff]  }
0x1d15   :  { %11847 = vmatprep.subr.bf16.mxu1 %v17629_v47  ;;  %v17690_v47 = vld [vmem:[%s23420_s9 + $0x148] ss:$16 sps:$4 sm:$0xff]  }
0x1d1b   :  { %v10909_v62 = vld [vmem:[#allocation4] sm:$0xff] }
0x1d1c   :  { %10911 = vperm.xlu0 %16266, %v10909_v62   ;;  %v17632_v62 = vld [vmem:[%s23421_s10 + $0x10c] ss:$16 sps:$4 sm:$0xff]  }
0x1d9b   :  { %v10912_v25 = vpop.permute.xlu0 %10911 }
0x1d9c   :  { %vm10913_vm9 = vcmp.eq.s32.totalorder %v20387_v58, %v10912_v25  ;;  %v17645_v25 = vld [vmem:[%s23421_s10 + $0x160] ss:$16 sps:$4 sm:$0xff]  }
0x1d9d   :  { %vm15488_vm10 = vmpackc.low %vm10913_vm9, %vm10913_vm9 }
0x1d9e   :  { %16194 = vmatmul.mubr.msk.bf16.vlgmr.msra.gmra.mrb[156].mxu0 %vm15488_vm10, %v18272_v3 }
0x1d9f   :  { %11291 = vmatpush1.bf16.msra.mxu0 %v17555_v36  ;;  %11322 = vmatprep.mubr.bf16.mxu0 %v23533_v19  ;;  %v17648_v36 = vld [vmem:[%s23421_s10 + $0x168] ss:$16 sps:$4 sm:$0xff]  }
0x1da0   :  { %11292 = vmatprep.subr.bf16.mxu0 %v17560_v41  ;;  %v17653_v41 = vld [vmem:[%s23421_s10 + $0x184] ss:$16 sps:$4 sm:$0xff]  }
0x1da3   :  { %11293 = vmatpush1.bf16.msra.mxu0 %v17558_v4  ;;  %v17656_v4 = vld [vmem:[%s23421_s10 + $0x18c] ss:$16 sps:$4 sm:$0xff]  }
0x1da4   :  { %11294 = vmatprep.subr.bf16.mxu0 %v17563_v1  ;;  %v17651_v1 = vld [vmem:[%s23421_s10 + $0x180] ss:$16 sps:$4 sm:$0xff]  }
0x1da7   :  { %11295 = vmatpush1.bf16.msra.mxu0 %v17561_v9  ;;  %v17654_v9 = vld [vmem:[%s23421_s10 + $0x188] ss:$16 sps:$4 sm:$0xff]  }
0x1da8   :  { %11296 = vmatprep.subr.bf16.mxu0 %v17566_v38  ;;  %v17659_v38 = vld [vmem:[%s23421_s10 + $0x1a4] ss:$16 sps:$4 sm:$0xff]  }
0x1dab   :  { %11297 = vmatpush1.bf16.msra.mxu0 %v17564_v5  ;;  %v17662_v5 = vld [vmem:[%s23421_s10 + $0x1ac] ss:$16 sps:$4 sm:$0xff]  }
0x1dac   :  { %11298 = vmatprep.subr.bf16.mxu0 %v17569_v53  ;;  %v17657_v53 = vld [vmem:[%s23421_s10 + $0x1a0] ss:$16 sps:$4 sm:$0xff]  }
0x1daf   :  { %11299 = vmatpush1.bf16.msra.mxu0 %v17567_v8  ;;  %v17660_v8 = vld [vmem:[%s23421_s10 + $0x1a8] ss:$16 sps:$4 sm:$0xff]  }
0x1db0   :  { %11300 = vmatprep.subr.bf16.mxu0 %v17572_v21  ;;  %v17665_v21 = vld [vmem:[%s23421_s10 + $0x1c4] ss:$16 sps:$4 sm:$0xff]  }
0x1db3   :  { %11301 = vmatpush1.bf16.msra.mxu0 %v17570_v0  ;;  %v17668_v0 = vld [vmem:[%s23421_s10 + $0x1cc] ss:$16 sps:$4 sm:$0xff]  }
0x1db4   :  { %11302 = vmatprep.subr.bf16.mxu0 %v17575_v32  ;;  %v17663_v32 = vld [vmem:[%s23421_s10 + $0x1c0] ss:$16 sps:$4 sm:$0xff]  }
0x1db7   :  { %11303 = vmatpush1.bf16.msra.mxu0 %v17573_v54  ;;  %v17666_v54 = vld [vmem:[%s23421_s10 + $0x1c8] ss:$16 sps:$4 sm:$0xff]  }
0x1db8   :  { %11304 = vmatprep.subr.bf16.mxu0 %v17578_v16  ;;  %v17671_v16 = vld [vmem:[%s23421_s10 + $0x1e4] ss:$16 sps:$4 sm:$0xff]  }
0x1dbb   :  { %11305 = vmatpush1.bf16.msra.mxu0 %v17576_v34  ;;  %v17674_v34 = vld [vmem:[%s23421_s10 + $0x1ec] ss:$16 sps:$4 sm:$0xff]  }
0x1dbc   :  { %11532 = vmatprep.subr.bf16.mxu0 %v17584_v14  ;;  %v17669_v14 = vld [vmem:[%s23421_s10 + $0x1e0] ss:$16 sps:$4 sm:$0xff]  }
0x1dbe   :  { %11323 = vmatmul.mubr.bf16.vlgmr.msra.gmra.mrb[160].mxu0 %v22324_v10  ;;  %v17602_v10 = vld [vmem:[%s23420_s9 + $0x6c] ss:$16 sps:$4 sm:$0xff]  }
0x1dbf   :  { %11533 = vmatpush1.bf16.msra.mxu0 %v17582_v46  ;;  %11564 = vmatprep.mubr.bf16.mxu0 %v23533_v19  ;;  %v17672_v46 = vld [vmem:[%s23421_s10 + $0x1e8] ss:$16 sps:$4 sm:$0xff]  }
0x1dc0   :  { %11534 = vmatprep.subr.bf16.mxu0 %v17590_v35 }
0x1dc3   :  { %11535 = vmatpush1.bf16.msra.mxu0 %v17588_v49 }
0x1dc4   :  { %11536 = vmatprep.subr.bf16.mxu0 %v17596_v50 }
0x1dc7   :  { %11537 = vmatpush1.bf16.msra.mxu0 %v17594_v42 }
0x1dc8   :  { %11538 = vmatprep.subr.bf16.mxu0 %v17602_v10  ;;  %v17677_v10 = vld [vmem:[%s23420_s9 + $0x104] ss:$16 sps:$4 sm:$0xff]  }
0x1dcb   :  { %11539 = vmatpush1.bf16.msra.mxu0 %v17600_v59  ;;  %v17680_v59 = vld [vmem:[%s23420_s9 + $0x10c] ss:$16 sps:$4 sm:$0xff]  }
0x1dcc   :  { %11540 = vmatprep.subr.bf16.mxu0 %v17608_v61  ;;  %v17675_v61 = vld [vmem:[%s23420_s9 + $0x100] ss:$16 sps:$4 sm:$0xff]  }
0x1dcf   :  { %11541 = vmatpush1.bf16.msra.mxu0 %v17606_v63  ;;  %v17683_v63 = vld [vmem:[%s23420_s9 + $0x124] ss:$16 sps:$4 sm:$0xff]  }
0x1dd0   :  { %11542 = vmatprep.subr.bf16.mxu0 %v17614_v13  ;;  %v17686_v13 = vld [vmem:[%s23420_s9 + $0x12c] ss:$16 sps:$4 sm:$0xff]  }
0x1dd3   :  { %11543 = vmatpush1.bf16.msra.mxu0 %v17612_v7  ;;  %v17681_v7 = vld [vmem:[%s23420_s9 + $0x120] ss:$16 sps:$4 sm:$0xff]  }
0x1dd4   :  { %11544 = vmatprep.subr.bf16.mxu0 %v17620_v37  ;;  %v17684_v37 = vld [vmem:[%s23420_s9 + $0x128] ss:$16 sps:$4 sm:$0xff]  }
0x1dd7   :  { %11545 = vmatpush1.bf16.msra.mxu0 %v17618_v24  ;;  %v17689_v24 = vld [vmem:[%s23420_s9 + $0x144] ss:$16 sps:$4 sm:$0xff]  }
0x1dd8   :  { %11546 = vmatprep.subr.bf16.mxu0 %v17626_v17  ;;  %v17692_v17 = vld [vmem:[%s23420_s9 + $0x14c] ss:$16 sps:$4 sm:$0xff]  }
0x1ddb   :  { %11547 = vmatpush1.bf16.msra.mxu0 %v17624_v51  ;;  %v17687_v51 = vld [vmem:[%s23420_s9 + $0x140] ss:$16 sps:$4 sm:$0xff]  }
0x1ddc   :  { %11888 = vmatprep.subr.bf16.mxu0 %v17632_v62  ;;  %v17695_v62 = vld [vmem:[%s23420_s9 + $0x164] ss:$16 sps:$4 sm:$0xff]  }
0x1e71   :  { %v11015_v22 = vpop.f32.mrb[156].mxu0 }
0x1e72   :  { %v11023_v56 = vpack.c.bf16 %v11015_v22, %v11015_v22  ;;  %v16195_v20 = vpop.f32.mrb[157].mxu0  ;;  %v17698_v22 = vld [vmem:[%s23420_s9 + $0x16c] ss:$16 sps:$4 sm:$0xff]  }
0x1e73   :  { %v11018_v2 = vpop.f32.mrb[158].mxu0  ;;  %v17704_v20 = vld [vmem:[%s23420_s9 + $0x18c] ss:$16 sps:$4 sm:$0xff]  }
0x1e74   :  { %v16196_v6 = vpop.f32.mrb[159].mxu0  ;;  %11524 = vmatmul.mubr.bf16.vlgmr.msra.gmra.mrb[152].mxu1 %v11023_v56  ;;  %11565 = vmatmul.mubr.bf16.vlgmr.msra.gmra.mrb[164].mxu0 %v11023_v56  ;;  %v17701_v56 = vld [vmem:[%s23420_s9 + $0x184] ss:$16 sps:$4 sm:$0xff]  }
0x1e75   :  { %11848 = vmatpush1.bf16.msra.mxu1 %v17627_v45  ;;  %11889 = vmatpush1.bf16.msra.mxu0 %v17630_v43  ;;  %v17693_v45 = vld [vmem:[%s23420_s9 + $0x160] ss:$16 sps:$4 sm:$0xff]   ;;  %v17696_v43 = vld [vmem:[%s23420_s9 + $0x168] ss:$16 sps:$4 sm:$0xff]   ;;  %v17707_v2 = vld [vmem:[%s23420_s9 + $0x1a4] ss:$16 sps:$4 sm:$0xff]  }
0x1e76   :  { %11849 = vmatprep.subr.bf16.mxu1 %v17635_v31  ;;  %11890 = vmatprep.subr.bf16.mxu0 %v17638_v52  ;;  %v17699_v31 = vld [vmem:[%s23420_s9 + $0x180] ss:$16 sps:$4 sm:$0xff]   ;;  %v17702_v52 = vld [vmem:[%s23420_s9 + $0x188] ss:$16 sps:$4 sm:$0xff]  }
0x1e77   :  { %11879 = vmatprep.mubr.bf16.mxu1 %v23533_v19  ;;  %11920 = vmatprep.mubr.bf16.mxu0 %v23533_v19  ;;  %v17705_v6 = vld [vmem:[%s23420_s9 + $0x1a0] ss:$16 sps:$4 sm:$0xff]  }
0x1e79   :  { %11850 = vmatpush1.bf16.msra.mxu1 %v17633_v55  ;;  %11891 = vmatpush1.bf16.msra.mxu0 %v17636_v39  ;;  %v17708_v55 = vld [vmem:[%s23420_s9 + $0x1a8] ss:$16 sps:$4 sm:$0xff]   ;;  %v17710_v39 = vld [vmem:[%s23420_s9 + $0x1ac] ss:$16 sps:$4 sm:$0xff]  }
0x1e7a   :  { %11851 = vmatprep.subr.bf16.mxu1 %v17641_v27  ;;  %11892 = vmatprep.subr.bf16.mxu0 %v17644_v57  ;;  %v17713_v27 = vld [vmem:[%s23420_s9 + $0x1c4] ss:$16 sps:$4 sm:$0xff]   ;;  %v17716_v57 = vld [vmem:[%s23420_s9 + $0x1cc] ss:$16 sps:$4 sm:$0xff]  }
0x1e7d   :  { %11852 = vmatpush1.bf16.msra.mxu1 %v17639_v11  ;;  %11893 = vmatpush1.bf16.msra.mxu0 %v17642_v30  ;;  %v17711_v11 = vld [vmem:[%s23420_s9 + $0x1c0] ss:$16 sps:$4 sm:$0xff]   ;;  %v17714_v30 = vld [vmem:[%s23420_s9 + $0x1c8] ss:$16 sps:$4 sm:$0xff]  }
0x1e7e   :  { %11853 = vmatprep.subr.bf16.mxu1 %v17647_v48  ;;  %11894 = vmatprep.subr.bf16.mxu0 %v17650_v60  ;;  %v17719_v48 = vld [vmem:[%s23420_s9 + $0x1e4] ss:$16 sps:$4 sm:$0xff]   ;;  %v17717_v60 = vld [vmem:[%s23420_s9 + $0x1e0] ss:$16 sps:$4 sm:$0xff]  }
0x1e81   :  { %11854 = vmatpush1.bf16.msra.mxu1 %v17645_v25  ;;  %11895 = vmatpush1.bf16.msra.mxu0 %v17648_v36  ;;  %v17720_v25 = vld [vmem:[%s23420_s9 + $0x1e8] ss:$16 sps:$4 sm:$0xff]   ;;  %v17722_v36 = vld [vmem:[%s23420_s9 + $0x1ec] ss:$16 sps:$4 sm:$0xff]  }
0x1e82   :  { %11855 = vmatprep.subr.bf16.mxu1 %v17653_v41  ;;  %11896 = vmatprep.subr.bf16.mxu0 %v17656_v4  ;;  %v11573_v41 = vld [vmem:[%s23422_s11] sm:$0xf] }
0x1e83   :  { %v11578_v4 = vrot.slane %v11573_v41, %v18939_v23 }
0x1e85   :  { %11856 = vmatpush1.bf16.msra.mxu1 %v17651_v1  ;;  %11897 = vmatpush1.bf16.msra.mxu0 %v17654_v9 }
0x1e86   :  { %11857 = vmatprep.subr.bf16.mxu1 %v17659_v38  ;;  %11898 = vmatprep.subr.bf16.mxu0 %v17662_v5  ;;  %v11582_v38 = vrot.slane %v11573_v41, %v18944_v26 }
0x1e89   :  { %11858 = vmatpush1.bf16.msra.mxu1 %v17657_v53  ;;  %11899 = vmatpush1.bf16.msra.mxu0 %v17660_v8 }
0x1e8a   :  { %11859 = vmatprep.subr.bf16.mxu1 %v17665_v21  ;;  %11900 = vmatprep.subr.bf16.mxu0 %v17668_v0 }
0x1e8d   :  { %11860 = vmatpush1.bf16.msra.mxu1 %v17663_v32  ;;  %11901 = vmatpush1.bf16.msra.mxu0 %v17666_v54 }
0x1e8e   :  { %11861 = vmatprep.subr.bf16.mxu1 %v17671_v16  ;;  %11902 = vmatprep.subr.bf16.mxu0 %v17674_v34 }
0x1e91   :  { %v22718_v35 = vpop.f32.mrb[160].mxu0  ;;  %11862 = vmatpush1.bf16.msra.mxu1 %v17669_v14  ;;  %11903 = vmatpush1.bf16.msra.mxu0 %v17672_v46  ;;  %v11586_v14 = vrot.slane %v11573_v41, %v18947_v29 }
0x1e92   :  { %v22720_v49 = vpop.f32.mrb[161].mxu0  ;;  %12089 = vmatprep.subr.bf16.mxu1 %v17677_v10  ;;  %12130 = vmatprep.subr.bf16.mxu0 %v17680_v59 }
0x1e93   :  { %v11328_v50 = vpop.f32.mrb[162].mxu0 }
0x1e94   :  { %v11329_v42 = vpop.f32.mrb[163].mxu0  ;;  %11880 = vmatmul.mubr.bf16.vlgmr.msra.gmra.mrb[156].mxu1 %v22380_v40  ;;  %11921 = vmatmul.mubr.bf16.vlgmr.msra.gmra.mrb[168].mxu0 %v22380_v40  ;;  %v17678_v40 = vld [vmem:[%s23420_s9 + $0x108] ss:$16 sps:$4 sm:$0xff]  }
0x1e95   :  { %12121 = vmatprep.mubr.bf16.mxu1 %v23533_v19  ;;  %12162 = vmatprep.mubr.bf16.mxu0 %v23533_v19 }
0x1e96   :  { %12090 = vmatpush1.bf16.msra.mxu1 %v17675_v61  ;;  %12131 = vmatpush1.bf16.msra.mxu0 %v17678_v40 }
0x1e97   :  { %12091 = vmatprep.subr.bf16.mxu1 %v17683_v63  ;;  %12132 = vmatprep.subr.bf16.mxu0 %v17686_v13 }
0x1e9a   :  { %12092 = vmatpush1.bf16.msra.mxu1 %v17681_v7  ;;  %12133 = vmatpush1.bf16.msra.mxu0 %v17684_v37 }
0x1e9b   :  { %12093 = vmatprep.subr.bf16.mxu1 %v17689_v24  ;;  %12134 = vmatprep.subr.bf16.mxu0 %v17692_v17 }
0x1e9e   :  { %12094 = vmatpush1.bf16.msra.mxu1 %v17687_v51  ;;  %12135 = vmatpush1.bf16.msra.mxu0 %v17690_v47 }
0x1e9f   :  { %12095 = vmatprep.subr.bf16.mxu1 %v17695_v62  ;;  %12136 = vmatprep.subr.bf16.mxu0 %v17698_v22 }
0x1ea2   :  { %12096 = vmatpush1.bf16.msra.mxu1 %v17693_v45  ;;  %12137 = vmatpush1.bf16.msra.mxu0 %v17696_v43 }
0x1ea3   :  { %12097 = vmatprep.subr.bf16.mxu1 %v17701_v56  ;;  %12138 = vmatprep.subr.bf16.mxu0 %v17704_v20 }
0x1ea6   :  { %12098 = vmatpush1.bf16.msra.mxu1 %v17699_v31  ;;  %12139 = vmatpush1.bf16.msra.mxu0 %v17702_v52 }
0x1ea7   :  { %12099 = vmatprep.subr.bf16.mxu1 %v17707_v2  ;;  %12140 = vmatprep.subr.bf16.mxu0 %v17710_v39 }
0x1eaa   :  { %12100 = vmatpush1.bf16.msra.mxu1 %v17705_v6  ;;  %12141 = vmatpush1.bf16.msra.mxu0 %v17708_v55 }
0x1eab   :  { %12101 = vmatprep.subr.bf16.mxu1 %v17713_v27  ;;  %12142 = vmatprep.subr.bf16.mxu0 %v17716_v57 }
0x1eae   :  { %12102 = vmatpush1.bf16.msra.mxu1 %v17711_v11  ;;  %12143 = vmatpush1.bf16.msra.mxu0 %v17714_v30  ;;  %v17724_v11 = vld [vmem:[%s23423_s12 + $0x8] sm:$0xff]   ;;  %v17725_v30 = vld [vmem:[%s23423_s12 + $0x10] sm:$0xff]  }
0x1eaf   :  { %12103 = vmatprep.subr.bf16.mxu1 %v17719_v48  ;;  %12144 = vmatprep.subr.bf16.mxu0 %v17722_v36  ;;  %v17726_v48 = vld [vmem:[%s23423_s12 + $0x18] sm:$0xff]   ;;  %v17729_v36 = vld [vmem:[%s23423_s12 + $0x30] sm:$0xff]  }
0x1eb2   :  { %12104 = vmatpush1.bf16.msra.mxu1 %v17717_v60  ;;  %12145 = vmatpush1.bf16.msra.mxu0 %v17720_v25  ;;  %v17727_v60 = vld [vmem:[%s23423_s12 + $0x20] sm:$0xff]   ;;  %v17728_v25 = vld [vmem:[%s23423_s12 + $0x28] sm:$0xff]  }
0x1eb3   :  { %16197 = vmatprep.subr.bf16.mxu1 %v18270_v15  ;;  %16217 = vmatprep.subr.bf16.mxu0 %v18270_v15 }
0x1f47   :  { %v11525_v1 = vpop.f32.mrb[152].mxu1  ;;  %v11566_v9 = vpop.f32.mrb[164].mxu0 }
0x1f48   :  { %v11526_v5 = vadd.f32 %v11525_v1, %v22431_v12  ;;  %v11567_v53 = vadd.f32 %v11566_v9, %v22718_v35  ;;  %v11527_v8 = vpop.f32.mrb[153].mxu1  ;;  %v11568_v21 = vpop.f32.mrb[165].mxu0  ;;  %v11590_v35 = vrot.slane %v11573_v41, %v18955_v44  ;;  %v17730_v41 = vld [vmem:[%s23423_s12 + $0x38] sm:$0xff]   ;;  %v15682_v1 = vld [vmem:[%s23422_s11 + $0x4] sm:$0xf] }
0x1f49   :  { %v11528_v0 = vadd.f32 %v11527_v8, %v22433_v18  ;;  %v11569_v32 = vadd.f32 %v11568_v21, %v22720_v49  ;;  %v11529_v54 = vpop.f32.mrb[154].mxu1  ;;  %v11570_v16 = vpop.f32.mrb[166].mxu0  ;;  %v12176_v9 = vrot.slane %v15682_v1, %v18939_v23 }
0x1f4a   :  { %v11595_v34 = vadd.f32 %v11578_v4, %v11526_v5  ;;  %v11530_v46 = vpop.f32.mrb[155].mxu1  ;;  %v11571_v50 = vpop.f32.mrb[167].mxu0  ;;  %v11597_v12 = vadd.f32 %v11586_v14, %v11567_v53  ;;  %v17733_v4 = vld [vmem:[%s23421_s10 + $0x4] ss:$16 sps:$4 sm:$0xff]   ;;  %v12180_v53 = vrot.slane %v15682_v1, %v18944_v26 }
0x1f4b   :  { %v11596_v42 = vadd.f32 %v11582_v38, %v11528_v0  ;;  %v11598_v61 = vadd.f32 %v11590_v35, %v11569_v32  ;;  %v12184_v50 = vrot.slane %v15682_v1, %v18947_v29 }
0x1f4c   :  { %v11599_v10 = vmul.f32 0.5, %v11595_v34 }
0x1f4d   :  { %v11603_v59 = vmul.f32 0.5, %v11596_v42  ;;  %v11608_v18 = vmul.f32 0.5, %v11598_v61 }
0x1f4e   :  { %18099 = vtanh.f32 %v11599_v10 }
0x1f4f   :  { %18101 = vtanh.f32 %v11603_v59 }
0x1f50   :  { %18103 = vtanh.f32 %v11597_v12 }
0x1f51   :  { %18105 = vtanh.f32 %v11608_v18  ;;  %v12188_v18 = vrot.slane %v15682_v1, %v18955_v44  ;;  %v17752_v1 = vld [vmem:[%s23421_s10 + $0xe0] ss:$16 sps:$4 sm:$0xff]  }
0x1f58   :  { %v18100_v40 = vpop.eup %18099 }
0x1f59   :  { %v18102_v49 = vpop.eup %18101  ;;  %v11601_v63 = vmul.f32 0.5, %v18100_v40 }
0x1f5a   :  { %v11605_v13 = vmul.f32 0.5, %v18102_v49  ;;  %v18104_v37 = vpop.eup %18103 }
0x1f5b   :  { %v11602_v7 = vadd.f32 0.5, %v11601_v63  ;;  %v18106_v62 = vpop.eup %18105 }
0x1f5c   :  { %v11606_v24 = vadd.f32 0.5, %v11605_v13  ;;  %v11610_v22 = vmul.f32 0.5, %v18106_v62 }
0x1f5d   :  { %v11613_v17 = vmul.f32 %v18104_v37, %v11602_v7 }
0x1f5e   :  { %v11612_v51 = vmul.f32 %v11606_v24, %v22321_v28  ;;  %v11611_v55 = vadd.f32 0.5, %v11610_v22  ;;  %v17723_v28 = vld [vmem:[%s23423_s12] sm:$0xff]  }
0x1f60   :  { %v22836_v47 = vadd.f32 %v11613_v17, %v11612_v51 }
0x1f62   :  { %18107 = vtanh.f32 %v22836_v47 }
0x1f67   :  { %v11881_v45 = vpop.f32.mrb[156].mxu1  ;;  %v11922_v43 = vpop.f32.mrb[168].mxu0 }
0x1f68   :  { %v11883_v56 = vpop.f32.mrb[157].mxu1  ;;  %v11924_v20 = vpop.f32.mrb[169].mxu0 }
0x1f69   :  { %v11885_v31 = vpop.f32.mrb[158].mxu1  ;;  %v11926_v52 = vpop.f32.mrb[170].mxu0 }
0x1f6a   :  { %v11886_v2 = vpop.f32.mrb[159].mxu1  ;;  %v11927_v6 = vpop.f32.mrb[171].mxu0 }
0x1f6b   :  { %v17731_v2 = vld [vmem:[%s23421_s10] ss:$16 sps:$4 sm:$0xff]  }
0x1f6c   :  { %v18108_v39 = vpop.eup %18107 }
0x1f6d   :  { %v11616_v27 = vmul.f32 %v18108_v39, %v11611_v55  ;;  %v17736_v55 = vld [vmem:[%s23421_s10 + $0x24] ss:$16 sps:$4 sm:$0xff]  }
0x1f6e   :  { %v17739_v39 = vld [vmem:[%s23421_s10 + $0x44] ss:$16 sps:$4 sm:$0xff]  }
0x1f6f   :  { %v22839_v57 = vpack.c.bf16 %v11616_v27, %v11616_v27  ;;  %v17737_v27 = vld [vmem:[%s23421_s10 + $0x40] ss:$16 sps:$4 sm:$0xff]  }
0x1f71   :  { %12122 = vmatmul.mubr.bf16.vlgmr.msra.gmra.mrb[160].mxu1 %v22839_v57  ;;  %12163 = vmatmul.mubr.bf16.vlgmr.msra.gmra.mrb[172].mxu0 %v22839_v57 }
0x1f72   :  { %16213 = vmatprep.mubr.msk.bf16.mxu1 %vm18271_vm2, %v18270_v15  ;;  %16233 = vmatprep.mubr.msk.bf16.mxu0 %vm18271_vm2, %v18270_v15 }
0x1f73   :  { %16198 = vmatpush3.bf16.msra.mxu1 %v17723_v28  ;;  %v17742_v28 = vld [vmem:[%s23421_s10 + $0x64] ss:$16 sps:$4 sm:$0xff]  }
0x1f74   :  { %16199 = vmatprep.subr.bf16.mxu1 %v18270_v15 }
0x1f77   :  { %16200 = vmatpush3.bf16.msra.mxu1 %v17724_v11  ;;  %v17740_v11 = vld [vmem:[%s23421_s10 + $0x60] ss:$16 sps:$4 sm:$0xff]  }
0x1f78   :  { %16201 = vmatprep.subr.bf16.mxu1 %v18270_v15 }
0x1f7b   :  { %16202 = vmatpush3.bf16.msra.mxu1 %v17725_v30  ;;  %v17745_v30 = vld [vmem:[%s23421_s10 + $0x84] ss:$16 sps:$4 sm:$0xff]  }
0x1f7c   :  { %16203 = vmatprep.subr.bf16.mxu1 %v18270_v15 }
0x1f7f   :  { %16204 = vmatpush3.bf16.msra.mxu1 %v17726_v48  ;;  %v17743_v48 = vld [vmem:[%s23421_s10 + $0x80] ss:$16 sps:$4 sm:$0xff]  }
0x1f80   :  { %16205 = vmatprep.subr.bf16.mxu1 %v18270_v15 }
0x1f83   :  { %16206 = vmatpush3.bf16.msra.mxu1 %v17727_v60  ;;  %v17748_v60 = vld [vmem:[%s23421_s10 + $0xa4] ss:$16 sps:$4 sm:$0xff]  }
0x1f84   :  { %16207 = vmatprep.subr.bf16.mxu1 %v18270_v15 }
0x1f87   :  { %16208 = vmatpush3.bf16.msra.mxu1 %v17728_v25  ;;  %v17746_v25 = vld [vmem:[%s23421_s10 + $0xa0] ss:$16 sps:$4 sm:$0xff]  }
0x1f88   :  { %16209 = vmatprep.subr.bf16.mxu1 %v18270_v15 }
0x1f8b   :  { %16210 = vmatpush3.bf16.msra.mxu1 %v17729_v36  ;;  %v17751_v36 = vld [vmem:[%s23421_s10 + $0xc4] ss:$16 sps:$4 sm:$0xff]  }
0x1f8c   :  { %16211 = vmatprep.subr.bf16.mxu1 %v18270_v15 }
0x1f8f   :  { %16212 = vmatpush3.bf16.msra.mxu1 %v17730_v41  ;;  %v17749_v41 = vld [vmem:[%s23421_s10 + $0xc0] ss:$16 sps:$4 sm:$0xff]  }
0x1f90   :  { %12698 = vmatprep.subr.bf16.mxu1 %v17733_v4  ;;  %v17754_v4 = vld [vmem:[%s23421_s10 + $0xe4] ss:$16 sps:$4 sm:$0xff]  }
0x2044   :  { %v12123_v38 = vpop.f32.mrb[160].mxu1  ;;  %v12164_v5 = vpop.f32.mrb[172].mxu0 }
0x2045   :  { %v12124_v8 = vadd.f32 %v12123_v38, %v11881_v45  ;;  %v12165_v21 = vadd.f32 %v12164_v5, %v11922_v43  ;;  %v12125_v0 = vpop.f32.mrb[161].mxu1  ;;  %v12166_v32 = vpop.f32.mrb[173].mxu0 }
0x2046   :  { %v12126_v54 = vadd.f32 %v12125_v0, %v11883_v56  ;;  %v12167_v16 = vadd.f32 %v12166_v32, %v11924_v20  ;;  %v12127_v34 = vpop.f32.mrb[162].mxu1  ;;  %v12168_v14 = vpop.f32.mrb[174].mxu0 }
0x2047   :  { %v12193_v46 = vadd.f32 %v12176_v9, %v12124_v8  ;;  %v12128_v42 = vpop.f32.mrb[163].mxu1  ;;  %v12169_v10 = vpop.f32.mrb[175].mxu0  ;;  %v12195_v61 = vadd.f32 %v12184_v50, %v12165_v21  ;;  %v15683_v9 = vld [vmem:[%s23424_s13] ss:$0 sm:$0xff] }
0x2048   :  { %v12194_v59 = vadd.f32 %v12180_v53, %v12126_v54  ;;  %v12196_v40 = vadd.f32 %v12188_v18, %v12167_v16  ;;  %v17757_v18 = vld [vmem:[%s23419_s8 + $0x10] sm:$0xff]  }
0x2049   :  { %v12197_v12 = vmul.f32 0.5, %v12193_v46 }
0x204a   :  { %v12201_v35 = vmul.f32 0.5, %v12194_v59  ;;  %v12206_v49 = vmul.f32 0.5, %v12196_v40  ;;  %v17758_v40 = vld [vmem:[%s23419_s8 + $0x18] sm:$0xff]  }
0x204b   :  { %18109 = vtanh.f32 %v12197_v12 }
0x204c   :  { %18111 = vtanh.f32 %v12201_v35  ;;  %v17755_v35 = vld [vmem:[%s23419_s8] sm:$0xff]  }
0x204d   :  { %18113 = vtanh.f32 %v12195_v61  ;;  %16218 = vmatpush3.bf16.msra.mxu0 %v17755_v35  ;;  %v17756_v61 = vld [vmem:[%s23419_s8 + $0x8] sm:$0xff]  }
0x204e   :  { %18115 = vtanh.f32 %v12206_v49  ;;  %16219 = vmatprep.subr.bf16.mxu0 %v18270_v15  ;;  %v17759_v49 = vld [vmem:[%s23419_s8 + $0x20] sm:$0xff]   ;;  %v17790_v35 = vld [vmem:[%s23420_s9 + $0x8] ss:$16 sps:$4 sm:$0xff]  }
0x2051   :  { %16220 = vmatpush3.bf16.msra.mxu0 %v17756_v61  ;;  %v17798_v61 = vld [vmem:[%s23420_s9 + $0x2c] ss:$16 sps:$4 sm:$0xff]  }
0x2052   :  { %16221 = vmatprep.subr.bf16.mxu0 %v18270_v15 }
0x2055   :  { %v18110_v63 = vpop.eup %18109  ;;  %16222 = vmatpush3.bf16.msra.mxu0 %v17757_v18  ;;  %v17796_v18 = vld [vmem:[%s23420_s9 + $0x28] ss:$16 sps:$4 sm:$0xff]  }
0x2056   :  { %v18112_v13 = vpop.eup %18111  ;;  %v12199_v7 = vmul.f32 0.5, %v18110_v63  ;;  %16223 = vmatprep.subr.bf16.mxu0 %v18270_v15  ;;  %v17760_v63 = vld [vmem:[%s23419_s8 + $0x28] sm:$0xff]  }
0x2057   :  { %v12203_v37 = vmul.f32 0.5, %v18112_v13  ;;  %v18114_v17 = vpop.eup %18113  ;;  %v17761_v13 = vld [vmem:[%s23419_s8 + $0x30] sm:$0xff]  }
0x2058   :  { %v12200_v24 = vadd.f32 0.5, %v12199_v7  ;;  %v18116_v43 = vpop.eup %18115  ;;  %v17762_v7 = vld [vmem:[%s23419_s8 + $0x38] sm:$0xff]  }
0x2059   :  { %v12204_v51 = vadd.f32 0.5, %v12203_v37  ;;  %v12208_v56 = vmul.f32 0.5, %v18116_v43  ;;  %16224 = vmatpush3.bf16.msra.mxu0 %v17758_v40  ;;  %v17804_v40 = vld [vmem:[%s23420_s9 + $0x4c] ss:$16 sps:$4 sm:$0xff]  }
0x205a   :  { %v12211_v62 = vmul.f32 %v18114_v17, %v12200_v24  ;;  %16225 = vmatprep.subr.bf16.mxu0 %v18270_v15  ;;  %v12354_v24 = vstv %s12353_s23 }
0x205b   :  { %v12210_v22 = vmul.f32 %v12204_v51, %v22374_v33  ;;  %v12209_v20 = vadd.f32 0.5, %v12208_v56  ;;  %v17734_v33 = vld [vmem:[%s23421_s10 + $0x20] ss:$16 sps:$4 sm:$0xff]   ;;  %vm12355_vm13 = vcmp.eq.s32.totalorder %v12354_v24, 1  ;;  %v17820_v24 = vld [vmem:[%s23420_s9 + $0xa8] ss:$16 sps:$4 sm:$0xff]  }
0x205d   :  { %v22889_v45 = vadd.f32 %v12211_v62, %v12210_v22  ;;  %16226 = vmatpush3.bf16.msra.mxu0 %v17759_v49  ;;  %v15693_v22 = vld [vmem:[%s23412_s1 + $0x20] sm:$0xff]  ;;  %v17802_v49 = vld [vmem:[%s23420_s9 + $0x48] ss:$16 sps:$4 sm:$0xff]  }
0x205e   :  { %16227 = vmatprep.subr.bf16.mxu0 %v18270_v15 }
0x205f   :  { %18117 = vtanh.f32 %v22889_v45 }
0x2061   :  { %16228 = vmatpush3.bf16.msra.mxu0 %v17760_v63  ;;  %v17808_v63 = vld [vmem:[%s23420_s9 + $0x68] ss:$16 sps:$4 sm:$0xff]  }
0x2062   :  { %16229 = vmatprep.subr.bf16.mxu0 %v18270_v15 }
0x2065   :  { %16230 = vmatpush3.bf16.msra.mxu0 %v17761_v13  ;;  %v17816_v13 = vld [vmem:[%s23420_s9 + $0x8c] ss:$16 sps:$4 sm:$0xff]  }
0x2066   :  { %16231 = vmatprep.subr.bf16.mxu0 %v18270_v15 }
0x2069   :  { %v18118_v31 = vpop.eup %18117  ;;  %16232 = vmatpush3.bf16.msra.mxu0 %v17762_v7  ;;  %v17814_v7 = vld [vmem:[%s23420_s9 + $0x88] ss:$16 sps:$4 sm:$0xff]  }
0x206a   :  { %v12214_v52 = vmul.f32 %v18118_v31, %v12209_v20  ;;  %v17765_v31 = vld [vmem:[%s23421_s10 + $0xc] ss:$16 sps:$4 sm:$0xff]  }
0x206b   :  { %12739 = vmatprep.subr.bf16.mxu0 %v17765_v31  ;;  %v17835_v31 = vld [vmem:[%s23421_s10 + $0x100] ss:$16 sps:$4 sm:$0xff]  }
0x206c   :  { %v22895_v6 = vpack.c.bf16 %v12214_v52, %v12214_v52  ;;  %v17787_v52 = vld [vmem:[%s23420_s9] ss:$16 sps:$4 sm:$0xff]  }
0x206e   :  { %16214 = vmatmul.mubr.bf16.vlgmr.msra.gmra.mrb[164].mxu1 %v22895_v6 }
0x206f   :  { %12699 = vmatpush1.bf16.msra.mxu1 %v17731_v2  ;;  %12730 = vmatprep.mubr.bf16.mxu1 %v23533_v19  ;;  %v17789_v2 = vld [vmem:[%s23420_s9 + $0x4] ss:$16 sps:$4 sm:$0xff]  }
0x2070   :  { %12700 = vmatprep.subr.bf16.mxu1 %v17736_v55  ;;  %v17795_v55 = vld [vmem:[%s23420_s9 + $0x24] ss:$16 sps:$4 sm:$0xff]  }
0x2073   :  { %12701 = vmatpush1.bf16.msra.mxu1 %v17734_v33  ;;  %v17793_v33 = vld [vmem:[%s23420_s9 + $0x20] ss:$16 sps:$4 sm:$0xff]  }
0x2074   :  { %12702 = vmatprep.subr.bf16.mxu1 %v17739_v39  ;;  %v17801_v39 = vld [vmem:[%s23420_s9 + $0x44] ss:$16 sps:$4 sm:$0xff]  }
0x2077   :  { %12703 = vmatpush1.bf16.msra.mxu1 %v17737_v27  ;;  %v17799_v27 = vld [vmem:[%s23420_s9 + $0x40] ss:$16 sps:$4 sm:$0xff]  }
0x2078   :  { %12704 = vmatprep.subr.bf16.mxu1 %v17742_v28  ;;  %v17807_v28 = vld [vmem:[%s23420_s9 + $0x64] ss:$16 sps:$4 sm:$0xff]  }
0x207b   :  { %12705 = vmatpush1.bf16.msra.mxu1 %v17740_v11  ;;  %v17805_v11 = vld [vmem:[%s23420_s9 + $0x60] ss:$16 sps:$4 sm:$0xff]  }
0x207c   :  { %12706 = vmatprep.subr.bf16.mxu1 %v17745_v30  ;;  %v17813_v30 = vld [vmem:[%s23420_s9 + $0x84] ss:$16 sps:$4 sm:$0xff]  }
0x207f   :  { %12707 = vmatpush1.bf16.msra.mxu1 %v17743_v48  ;;  %v17811_v48 = vld [vmem:[%s23420_s9 + $0x80] ss:$16 sps:$4 sm:$0xff]  }
0x2080   :  { %12708 = vmatprep.subr.bf16.mxu1 %v17748_v60  ;;  %v17819_v60 = vld [vmem:[%s23420_s9 + $0xa4] ss:$16 sps:$4 sm:$0xff]  }
0x2083   :  { %12709 = vmatpush1.bf16.msra.mxu1 %v17746_v25  ;;  %v17817_v25 = vld [vmem:[%s23420_s9 + $0xa0] ss:$16 sps:$4 sm:$0xff]  }
0x2084   :  { %12710 = vmatprep.subr.bf16.mxu1 %v17751_v36  ;;  %v17825_v36 = vld [vmem:[%s23420_s9 + $0xc4] ss:$16 sps:$4 sm:$0xff]  }
0x2087   :  { %12711 = vmatpush1.bf16.msra.mxu1 %v17749_v41  ;;  %v17823_v41 = vld [vmem:[%s23420_s9 + $0xc0] ss:$16 sps:$4 sm:$0xff]  }
0x2088   :  { %12712 = vmatprep.subr.bf16.mxu1 %v17754_v4  ;;  %v17831_v4 = vld [vmem:[%s23420_s9 + $0xe4] ss:$16 sps:$4 sm:$0xff]  }
0x208b   :  { %12713 = vmatpush1.bf16.msra.mxu1 %v17752_v1  ;;  %v17829_v1 = vld [vmem:[%s23420_s9 + $0xe0] ss:$16 sps:$4 sm:$0xff]  }
0x208c   :  { %12940 = vmatprep.subr.bf16.mxu1 %v17789_v2 }
0x208e   :  { %12731 = vmatmul.mubr.bf16.vlgmr.msra.gmra.mrb[168].mxu1 %v22839_v57 }
0x208f   :  { %12972 = vmatprep.mubr.bf16.mxu1 %v23533_v19  ;;  %12941 = vmatpush1.bf16.msra.mxu1 %v17787_v52  ;;  %v17838_v52 = vld [vmem:[%s23421_s10 + $0x108] ss:$16 sps:$4 sm:$0xff]  }
0x2090   :  { %12942 = vmatprep.subr.bf16.mxu1 %v17795_v55 }
0x2093   :  { %12943 = vmatpush1.bf16.msra.mxu1 %v17793_v33  ;;  %v17843_v33 = vld [vmem:[%s23421_s10 + $0x124] ss:$16 sps:$4 sm:$0xff]  }
0x2094   :  { %12944 = vmatprep.subr.bf16.mxu1 %v17801_v39  ;;  %v17846_v39 = vld [vmem:[%s23421_s10 + $0x12c] ss:$16 sps:$4 sm:$0xff]  }
0x2097   :  { %12945 = vmatpush1.bf16.msra.mxu1 %v17799_v27 }
0x2098   :  { %12946 = vmatprep.subr.bf16.mxu1 %v17807_v28 }
0x209b   :  { %12947 = vmatpush1.bf16.msra.mxu1 %v17805_v11  ;;  %v17841_v11 = vld [vmem:[%s23421_s10 + $0x120] ss:$16 sps:$4 sm:$0xff]  }
0x209c   :  { %12948 = vmatprep.subr.bf16.mxu1 %v17813_v30  ;;  %v17844_v30 = vld [vmem:[%s23421_s10 + $0x128] ss:$16 sps:$4 sm:$0xff]  }
0x209f   :  { %12949 = vmatpush1.bf16.msra.mxu1 %v17811_v48  ;;  %v17849_v48 = vld [vmem:[%s23421_s10 + $0x144] ss:$16 sps:$4 sm:$0xff]  }
0x20a0   :  { %12950 = vmatprep.subr.bf16.mxu1 %v17819_v60  ;;  %v17852_v60 = vld [vmem:[%s23421_s10 + $0x14c] ss:$16 sps:$4 sm:$0xff]  }
0x20a3   :  { %12951 = vmatpush1.bf16.msra.mxu1 %v17817_v25  ;;  %v17847_v25 = vld [vmem:[%s23421_s10 + $0x140] ss:$16 sps:$4 sm:$0xff]  }
0x20a4   :  { %12952 = vmatprep.subr.bf16.mxu1 %v17825_v36  ;;  %v17850_v36 = vld [vmem:[%s23421_s10 + $0x148] ss:$16 sps:$4 sm:$0xff]  }
0x20a7   :  { %12953 = vmatpush1.bf16.msra.mxu1 %v17823_v41  ;;  %v17855_v41 = vld [vmem:[%s23421_s10 + $0x164] ss:$16 sps:$4 sm:$0xff]  }
0x20a8   :  { %12954 = vmatprep.subr.bf16.mxu1 %v17831_v4  ;;  %v17858_v4 = vld [vmem:[%s23421_s10 + $0x16c] ss:$16 sps:$4 sm:$0xff]  }
0x20ab   :  { %12955 = vmatpush1.bf16.msra.mxu1 %v17829_v1  ;;  %v17853_v1 = vld [vmem:[%s23421_s10 + $0x160] ss:$16 sps:$4 sm:$0xff]  }
0x2141   :  { %v12323_v38 = vpop.f32.mrb[164].mxu1 }
0x2142   :  { %v12324_v5 = vadd.f32 %v15683_v9, %v12323_v38  ;;  %v16215_v53 = vpop.f32.mrb[165].mxu1  ;;  %v17763_v38 = vld [vmem:[%s23421_s10 + $0x8] ss:$16 sps:$4 sm:$0xff]  }
0x2143   :  { %v12326_v8 = vpop.f32.mrb[166].mxu1  ;;  %v17766_v53 = vld [vmem:[%s23421_s10 + $0x28] ss:$16 sps:$4 sm:$0xff]  }
0x2144   :  { %12330 = vst [vmem:[#allocation9 + $0x20] sm:$0xff] %v12324_v5  ;;  %12331 = vmax.xlane.f32.xlu1 %v12324_v5  ;;  %v16216_v21 = vpop.f32.mrb[167].mxu1  ;;  %v17771_v8 = vld [vmem:[%s23421_s10 + $0x4c] ss:$16 sps:$4 sm:$0xff]  }
0x2145   :  { %v17769_v21 = vld [vmem:[%s23421_s10 + $0x48] ss:$16 sps:$4 sm:$0xff]  }
0x2161   :  { %v22946_v0 = vpop.f32.mrb[168].mxu1 }
0x2162   :  { %v22948_v32 = vpop.f32.mrb[169].mxu1 }
0x2163   :  { %v12736_v54 = vpop.f32.mrb[170].mxu1 }
0x2164   :  { %v12737_v16 = vpop.f32.mrb[171].mxu1  ;;  %v17772_v54 = vld [vmem:[%s23421_s10 + $0x68] ss:$16 sps:$4 sm:$0xff]  }
0x2165   :  { %v17777_v16 = vld [vmem:[%s23421_s10 + $0x8c] ss:$16 sps:$4 sm:$0xff]  }
0x21d1   :  { %v12332_v34 = vpop.xlane.xlu1 %12331 }
0x21d2   :  { %vm12333_vm11 = vcmp.eq.f32.partialorder %v12324_v5, %v12332_v34  ;;  %v17768_v5 = vld [vmem:[%s23421_s10 + $0x2c] ss:$16 sps:$4 sm:$0xff]   ;;  %v17775_v34 = vld [vmem:[%s23421_s10 + $0x88] ss:$16 sps:$4 sm:$0xff]  }
0x21d3   :  { %v12334_v14 = vsel %vm12333_vm11, %v20387_v58, 128 }
0x21d4   :  { %v12336_v46 = vshra.s32 %v12334_v14, 16  ;;  %v12335_v42 = vand.u32 65535, %v12334_v14  ;;  %v17780_v14 = vld [vmem:[%s23421_s10 + $0xac] ss:$16 sps:$4 sm:$0xff]  }
0x21d6   :  { %v12338_v50 = vcvt.s32.f32 %v12336_v46  ;;  %v12337_v59 = vcvt.s32.f32 %v12335_v42  ;;  %v17778_v46 = vld [vmem:[%s23421_s10 + $0xa8] ss:$16 sps:$4 sm:$0xff]  }
0x21d7   :  { %v17781_v42 = vld [vmem:[%s23421_s10 + $0xc8] ss:$16 sps:$4 sm:$0xff]  }
0x21d8   :  { %12339 = vmin.xlane.f32.xlu0 %v12338_v50 }
0x2265   :  { %v12340_v10 = vpop.xlane.xlu0 %12339 }
0x2266   :  { %vm12341_vm12 = vcmp.eq.f32.partialorder %v12338_v50, %v12340_v10  ;;  %v12346_v37 = vcvt.f32.s32 %v12340_v10  ;;  %v17783_v50 = vld [vmem:[%s23421_s10 + $0xcc] ss:$16 sps:$4 sm:$0xff]  }
0x2267   :  { %v12342_v12 = vsel %vm12341_vm12, %v12337_v59, inf  ;;  %v17786_v10 = vld [vmem:[%s23421_s10 + $0xec] ss:$16 sps:$4 sm:$0xff]   ;;  %v17784_v59 = vld [vmem:[%s23421_s10 + $0xe8] ss:$16 sps:$4 sm:$0xff]  }
0x2268   :  { %12343 = vmin.xlane.f32.xlu1 %v12342_v12  ;;  %v12347_v51 = vshll.u32 %v12346_v37, 16  ;;  %v17792_v12 = vld [vmem:[%s23420_s9 + $0xc] ss:$16 sps:$4 sm:$0xff]  }
0x2269   :  { %v17822_v37 = vld [vmem:[%s23420_s9 + $0xac] ss:$16 sps:$4 sm:$0xff]  }
0x22f5   :  { %v12344_v17 = vpop.xlane.xlu1 %12343 }
0x22f6   :  { %v12345_v62 = vcvt.f32.s32 %v12344_v17  ;;  %v17828_v17 = vld [vmem:[%s23420_s9 + $0xcc] ss:$16 sps:$4 sm:$0xff]  }
0x22f8   :  { %v12348_v43 = vadd.s32 %v12347_v51, %v12345_v62  ;;  %v17826_v51 = vld [vmem:[%s23420_s9 + $0xc8] ss:$16 sps:$4 sm:$0xff]   ;;  %v17834_v62 = vld [vmem:[%s23420_s9 + $0xec] ss:$16 sps:$4 sm:$0xff]  }
0x22fa   :  { %v12356_v56 = vsel %vm12355_vm13, %v15693_v22, %v12348_v43  ;;  %v17832_v22 = vld [vmem:[%s23420_s9 + $0xe8] ss:$16 sps:$4 sm:$0xff]   ;;  %v17837_v43 = vld [vmem:[%s23421_s10 + $0x104] ss:$16 sps:$4 sm:$0xff]  }
0x22fb   :  { %12357 = vst.msk [vmem:[#allocation4] sm:$0xff] %vm5108_vm1, %v12356_v56  ;;  %v17840_v56 = vld [vmem:[%s23421_s10 + $0x10c] ss:$16 sps:$4 sm:$0xff]   ;;  %13296 = vmatprep.subr.bf16.mxu1 %v17837_v43 }
0x22fc   :  { %v17906_v43 = vld [vmem:[%s23420_s9 + $0x16c] ss:$16 sps:$4 sm:$0xff]  }
0x2302   :  { %v12358_v20 = vld [vmem:[#allocation4] sm:$0xff] }
0x2303   :  { %12360 = vperm.xlu1 %16267, %v12358_v20  }
0x2382   :  { %v12361_v9 = vpop.permute.xlu1 %12360 }
0x2383   :  { %vm12362_vm14 = vcmp.eq.s32.totalorder %v20387_v58, %v12361_v9  ;;  %v17856_v9 = vld [vmem:[%s23421_s10 + $0x168] ss:$16 sps:$4 sm:$0xff]  }
0x2384   :  { %vm15703_vm15 = vmpackc.low %vm12362_vm14, %vm12362_vm14 }
0x2385   :  { %16234 = vmatmul.mubr.msk.bf16.vlgmr.msra.gmra.mrb[176].mxu0 %vm15703_vm15, %v18272_v3  ;;  %v17774_v3 = vld [vmem:[%s23421_s10 + $0x6c] ss:$16 sps:$4 sm:$0xff]  }
0x2386   :  { %12740 = vmatpush1.bf16.msra.mxu0 %v17763_v38  ;;  %12771 = vmatprep.mubr.bf16.mxu0 %v23533_v19  ;;  %v17861_v38 = vld [vmem:[%s23421_s10 + $0x184] ss:$16 sps:$4 sm:$0xff]  }
0x2387   :  { %12741 = vmatprep.subr.bf16.mxu0 %v17768_v5  ;;  %v17864_v5 = vld [vmem:[%s23421_s10 + $0x18c] ss:$16 sps:$4 sm:$0xff]  }
0x238a   :  { %12742 = vmatpush1.bf16.msra.mxu0 %v17766_v53  ;;  %v17859_v53 = vld [vmem:[%s23421_s10 + $0x180] ss:$16 sps:$4 sm:$0xff]  }
0x238b   :  { %12743 = vmatprep.subr.bf16.mxu0 %v17771_v8  ;;  %v17862_v8 = vld [vmem:[%s23421_s10 + $0x188] ss:$16 sps:$4 sm:$0xff]  }
0x238e   :  { %12744 = vmatpush1.bf16.msra.mxu0 %v17769_v21  ;;  %v17867_v21 = vld [vmem:[%s23421_s10 + $0x1a4] ss:$16 sps:$4 sm:$0xff]  }
0x238f   :  { %12745 = vmatprep.subr.bf16.mxu0 %v17774_v3  ;;  %v17870_v3 = vld [vmem:[%s23421_s10 + $0x1ac] ss:$16 sps:$4 sm:$0xff]  }
0x2392   :  { %12746 = vmatpush1.bf16.msra.mxu0 %v17772_v54  ;;  %v17865_v54 = vld [vmem:[%s23421_s10 + $0x1a0] ss:$16 sps:$4 sm:$0xff]  }
0x2393   :  { %12747 = vmatprep.subr.bf16.mxu0 %v17777_v16  ;;  %v17868_v16 = vld [vmem:[%s23421_s10 + $0x1a8] ss:$16 sps:$4 sm:$0xff]  }
0x2396   :  { %12748 = vmatpush1.bf16.msra.mxu0 %v17775_v34  ;;  %v17873_v34 = vld [vmem:[%s23421_s10 + $0x1c4] ss:$16 sps:$4 sm:$0xff]  }
0x2397   :  { %12749 = vmatprep.subr.bf16.mxu0 %v17780_v14  ;;  %v17876_v14 = vld [vmem:[%s23421_s10 + $0x1cc] ss:$16 sps:$4 sm:$0xff]  }
0x239a   :  { %12750 = vmatpush1.bf16.msra.mxu0 %v17778_v46  ;;  %v17871_v46 = vld [vmem:[%s23421_s10 + $0x1c0] ss:$16 sps:$4 sm:$0xff]  }
0x239b   :  { %12751 = vmatprep.subr.bf16.mxu0 %v17783_v50  ;;  %v17874_v50 = vld [vmem:[%s23421_s10 + $0x1c8] ss:$16 sps:$4 sm:$0xff]  }
0x239e   :  { %12752 = vmatpush1.bf16.msra.mxu0 %v17781_v42  ;;  %v17879_v42 = vld [vmem:[%s23421_s10 + $0x1e4] ss:$16 sps:$4 sm:$0xff]  }
0x239f   :  { %12753 = vmatprep.subr.bf16.mxu0 %v17786_v10  ;;  %v17882_v10 = vld [vmem:[%s23421_s10 + $0x1ec] ss:$16 sps:$4 sm:$0xff]  }
0x23a2   :  { %12754 = vmatpush1.bf16.msra.mxu0 %v17784_v59  ;;  %v17877_v59 = vld [vmem:[%s23421_s10 + $0x1e0] ss:$16 sps:$4 sm:$0xff]  }
0x23a3   :  { %12981 = vmatprep.subr.bf16.mxu0 %v17792_v12  ;;  %v17880_v12 = vld [vmem:[%s23421_s10 + $0x1e8] ss:$16 sps:$4 sm:$0xff]  }
0x23a5   :  { %12772 = vmatmul.mubr.bf16.vlgmr.msra.gmra.mrb[180].mxu0 %v22839_v57  ;;  %v17810_v57 = vld [vmem:[%s23420_s9 + $0x6c] ss:$16 sps:$4 sm:$0xff]  }
0x23a6   :  { %12982 = vmatpush1.bf16.msra.mxu0 %v17790_v35  ;;  %13013 = vmatprep.mubr.bf16.mxu0 %v23533_v19 }
0x23a7   :  { %12983 = vmatprep.subr.bf16.mxu0 %v17798_v61 }
0x23aa   :  { %12984 = vmatpush1.bf16.msra.mxu0 %v17796_v18 }
0x23ab   :  { %12985 = vmatprep.subr.bf16.mxu0 %v17804_v40 }
0x23ae   :  { %12986 = vmatpush1.bf16.msra.mxu0 %v17802_v49  ;;  %v17885_v49 = vld [vmem:[%s23420_s9 + $0x104] ss:$16 sps:$4 sm:$0xff]  }
0x23af   :  { %12987 = vmatprep.subr.bf16.mxu0 %v17810_v57  ;;  %v17888_v57 = vld [vmem:[%s23420_s9 + $0x10c] ss:$16 sps:$4 sm:$0xff]  }
0x23b2   :  { %12988 = vmatpush1.bf16.msra.mxu0 %v17808_v63  ;;  %v17883_v63 = vld [vmem:[%s23420_s9 + $0x100] ss:$16 sps:$4 sm:$0xff]  }
0x23b3   :  { %12989 = vmatprep.subr.bf16.mxu0 %v17816_v13  ;;  %v17894_v13 = vld [vmem:[%s23420_s9 + $0x12c] ss:$16 sps:$4 sm:$0xff]  }
0x23b6   :  { %12990 = vmatpush1.bf16.msra.mxu0 %v17814_v7  ;;  %v17889_v7 = vld [vmem:[%s23420_s9 + $0x120] ss:$16 sps:$4 sm:$0xff]  }
0x23b7   :  { %12991 = vmatprep.subr.bf16.mxu0 %v17822_v37  ;;  %v17892_v37 = vld [vmem:[%s23420_s9 + $0x128] ss:$16 sps:$4 sm:$0xff]  }
0x23ba   :  { %12992 = vmatpush1.bf16.msra.mxu0 %v17820_v24  ;;  %v17897_v24 = vld [vmem:[%s23420_s9 + $0x144] ss:$16 sps:$4 sm:$0xff]  }
0x23bb   :  { %12993 = vmatprep.subr.bf16.mxu0 %v17828_v17  ;;  %v17900_v17 = vld [vmem:[%s23420_s9 + $0x14c] ss:$16 sps:$4 sm:$0xff]  }
0x23be   :  { %12994 = vmatpush1.bf16.msra.mxu0 %v17826_v51  ;;  %v17895_v51 = vld [vmem:[%s23420_s9 + $0x140] ss:$16 sps:$4 sm:$0xff]  }
0x23bf   :  { %12995 = vmatprep.subr.bf16.mxu0 %v17834_v62  ;;  %v17898_v62 = vld [vmem:[%s23420_s9 + $0x148] ss:$16 sps:$4 sm:$0xff]  }
0x23c2   :  { %12996 = vmatpush1.bf16.msra.mxu0 %v17832_v22  ;;  %v17903_v22 = vld [vmem:[%s23420_s9 + $0x164] ss:$16 sps:$4 sm:$0xff]  }
0x23c3   :  { %13337 = vmatprep.subr.bf16.mxu0 %v17840_v56  ;;  %v17901_v56 = vld [vmem:[%s23420_s9 + $0x160] ss:$16 sps:$4 sm:$0xff]  }
0x2458   :  { %v12464_v20 = vpop.f32.mrb[176].mxu0 }
0x2459   :  { %v12472_v2 = vpack.c.bf16 %v12464_v20, %v12464_v20  ;;  %v16235_v55 = vpop.f32.mrb[177].mxu0  ;;  %v17904_v20 = vld [vmem:[%s23420_s9 + $0x168] ss:$16 sps:$4 sm:$0xff]  }
0x245a   :  { %v12467_v27 = vpop.f32.mrb[178].mxu0  ;;  %v17910_v55 = vld [vmem:[%s23420_s9 + $0x188] ss:$16 sps:$4 sm:$0xff]  }
0x245b   :  { %v16236_v28 = vpop.f32.mrb[179].mxu0  ;;  %12973 = vmatmul.mubr.bf16.vlgmr.msra.gmra.mrb[172].mxu1 %v12472_v2  ;;  %13014 = vmatmul.mubr.bf16.vlgmr.msra.gmra.mrb[184].mxu0 %v12472_v2  ;;  %v17907_v2 = vld [vmem:[%s23420_s9 + $0x180] ss:$16 sps:$4 sm:$0xff]   ;;  %v17916_v27 = vld [vmem:[%s23420_s9 + $0x1a8] ss:$16 sps:$4 sm:$0xff]  }
0x245c   :  { %13297 = vmatpush1.bf16.msra.mxu1 %v17835_v31  ;;  %13338 = vmatpush1.bf16.msra.mxu0 %v17838_v52  ;;  %v17909_v31 = vld [vmem:[%s23420_s9 + $0x184] ss:$16 sps:$4 sm:$0xff]   ;;  %v17912_v52 = vld [vmem:[%s23420_s9 + $0x18c] ss:$16 sps:$4 sm:$0xff]  }
0x245d   :  { %13298 = vmatprep.subr.bf16.mxu1 %v17843_v33  ;;  %13339 = vmatprep.subr.bf16.mxu0 %v17846_v39  ;;  %v17915_v33 = vld [vmem:[%s23420_s9 + $0x1a4] ss:$16 sps:$4 sm:$0xff]   ;;  %v17913_v39 = vld [vmem:[%s23420_s9 + $0x1a0] ss:$16 sps:$4 sm:$0xff]   ;;  %v17918_v28 = vld [vmem:[%s23420_s9 + $0x1ac] ss:$16 sps:$4 sm:$0xff]  }
0x245e   :  { %13328 = vmatprep.mubr.bf16.mxu1 %v23533_v19  ;;  %13369 = vmatprep.mubr.bf16.mxu0 %v23533_v19 }
0x2460   :  { %13299 = vmatpush1.bf16.msra.mxu1 %v17841_v11  ;;  %13340 = vmatpush1.bf16.msra.mxu0 %v17844_v30  ;;  %v17921_v11 = vld [vmem:[%s23420_s9 + $0x1c4] ss:$16 sps:$4 sm:$0xff]   ;;  %v17924_v30 = vld [vmem:[%s23420_s9 + $0x1cc] ss:$16 sps:$4 sm:$0xff]  }
0x2461   :  { %13300 = vmatprep.subr.bf16.mxu1 %v17849_v48  ;;  %13341 = vmatprep.subr.bf16.mxu0 %v17852_v60  ;;  %v17919_v48 = vld [vmem:[%s23420_s9 + $0x1c0] ss:$16 sps:$4 sm:$0xff]   ;;  %v17922_v60 = vld [vmem:[%s23420_s9 + $0x1c8] ss:$16 sps:$4 sm:$0xff]  }
0x2464   :  { %13301 = vmatpush1.bf16.msra.mxu1 %v17847_v25  ;;  %13342 = vmatpush1.bf16.msra.mxu0 %v17850_v36  ;;  %v17927_v25 = vld [vmem:[%s23420_s9 + $0x1e4] ss:$16 sps:$4 sm:$0xff]   ;;  %v17925_v36 = vld [vmem:[%s23420_s9 + $0x1e0] ss:$16 sps:$4 sm:$0xff]  }
0x2465   :  { %13302 = vmatprep.subr.bf16.mxu1 %v17855_v41  ;;  %13343 = vmatprep.subr.bf16.mxu0 %v17858_v4  ;;  %v17928_v41 = vld [vmem:[%s23420_s9 + $0x1e8] ss:$16 sps:$4 sm:$0xff]   ;;  %v17930_v4 = vld [vmem:[%s23420_s9 + $0x1ec] ss:$16 sps:$4 sm:$0xff]  }
0x2468   :  { %13303 = vmatpush1.bf16.msra.mxu1 %v17853_v1  ;;  %13344 = vmatpush1.bf16.msra.mxu0 %v17856_v9  ;;  %v13022_v1 = vld [vmem:[%s23422_s11] sm:$0xf] }
0x2469   :  { %13304 = vmatprep.subr.bf16.mxu1 %v17861_v38  ;;  %13345 = vmatprep.subr.bf16.mxu0 %v17864_v5  ;;  %v13027_v9 = vrot.slane %v13022_v1, %v18939_v23 }
0x246c   :  { %13305 = vmatpush1.bf16.msra.mxu1 %v17859_v53  ;;  %13346 = vmatpush1.bf16.msra.mxu0 %v17862_v8  ;;  %v13031_v53 = vrot.slane %v13022_v1, %v18944_v26 }
0x246d   :  { %13306 = vmatprep.subr.bf16.mxu1 %v17867_v21  ;;  %13347 = vmatprep.subr.bf16.mxu0 %v17870_v3 }
0x2470   :  { %13307 = vmatpush1.bf16.msra.mxu1 %v17865_v54  ;;  %13348 = vmatpush1.bf16.msra.mxu0 %v17868_v16 }
0x2471   :  { %13308 = vmatprep.subr.bf16.mxu1 %v17873_v34  ;;  %13349 = vmatprep.subr.bf16.mxu0 %v17876_v14 }
0x2474   :  { %13309 = vmatpush1.bf16.msra.mxu1 %v17871_v46  ;;  %13350 = vmatpush1.bf16.msra.mxu0 %v17874_v50 }
0x2475   :  { %13310 = vmatprep.subr.bf16.mxu1 %v17879_v42  ;;  %13351 = vmatprep.subr.bf16.mxu0 %v17882_v10  ;;  %v13035_v42 = vrot.slane %v13022_v1, %v18947_v29 }
0x2478   :  { %v23233_v35 = vpop.f32.mrb[180].mxu0  ;;  %13311 = vmatpush1.bf16.msra.mxu1 %v17877_v59  ;;  %13352 = vmatpush1.bf16.msra.mxu0 %v17880_v12 }
0x2479   :  { %v23235_v61 = vpop.f32.mrb[181].mxu0  ;;  %13538 = vmatprep.subr.bf16.mxu1 %v17885_v49  ;;  %13579 = vmatprep.subr.bf16.mxu0 %v17888_v57 }
0x247a   :  { %v12777_v18 = vpop.f32.mrb[182].mxu0 }
0x247b   :  { %v12778_v40 = vpop.f32.mrb[183].mxu0  ;;  %13329 = vmatmul.mubr.bf16.vlgmr.msra.gmra.mrb[176].mxu1 %v22895_v6  ;;  %13370 = vmatmul.mubr.bf16.vlgmr.msra.gmra.mrb[188].mxu0 %v22895_v6  ;;  %v17886_v6 = vld [vmem:[%s23420_s9 + $0x108] ss:$16 sps:$4 sm:$0xff]  }
0x247c   :  { %13570 = vmatprep.mubr.bf16.mxu1 %v23533_v19  ;;  %13611 = vmatprep.mubr.bf16.mxu0 %v23533_v19  ;;  %v17891_v19 = vld [vmem:[%s23420_s9 + $0x124] ss:$16 sps:$4 sm:$0xff]  }
0x247d   :  { %13539 = vmatpush1.bf16.msra.mxu1 %v17883_v63  ;;  %13580 = vmatpush1.bf16.msra.mxu0 %v17886_v6 }
0x247e   :  { %13540 = vmatprep.subr.bf16.mxu1 %v17891_v19  ;;  %13581 = vmatprep.subr.bf16.mxu0 %v17894_v13 }
0x2481   :  { %13541 = vmatpush1.bf16.msra.mxu1 %v17889_v7  ;;  %13582 = vmatpush1.bf16.msra.mxu0 %v17892_v37 }
0x2482   :  { %13542 = vmatprep.subr.bf16.mxu1 %v17897_v24  ;;  %13583 = vmatprep.subr.bf16.mxu0 %v17900_v17 }
0x2485   :  { %13543 = vmatpush1.bf16.msra.mxu1 %v17895_v51  ;;  %13584 = vmatpush1.bf16.msra.mxu0 %v17898_v62 }
0x2486   :  { %13544 = vmatprep.subr.bf16.mxu1 %v17903_v22  ;;  %13585 = vmatprep.subr.bf16.mxu0 %v17906_v43 }
0x2489   :  { %13545 = vmatpush1.bf16.msra.mxu1 %v17901_v56  ;;  %13586 = vmatpush1.bf16.msra.mxu0 %v17904_v20 }
0x248a   :  { %13546 = vmatprep.subr.bf16.mxu1 %v17909_v31  ;;  %13587 = vmatprep.subr.bf16.mxu0 %v17912_v52 }
0x248d   :  { %13547 = vmatpush1.bf16.msra.mxu1 %v17907_v2  ;;  %13588 = vmatpush1.bf16.msra.mxu0 %v17910_v55 }
0x248e   :  { %13548 = vmatprep.subr.bf16.mxu1 %v17915_v33  ;;  %13589 = vmatprep.subr.bf16.mxu0 %v17918_v28 }
0x2491   :  { %13549 = vmatpush1.bf16.msra.mxu1 %v17913_v39  ;;  %13590 = vmatpush1.bf16.msra.mxu0 %v17916_v27 }
0x2492   :  { %13550 = vmatprep.subr.bf16.mxu1 %v17921_v11  ;;  %13591 = vmatprep.subr.bf16.mxu0 %v17924_v30  ;;  %v17932_v11 = vld [vmem:[%s23423_s12 + $0x8] sm:$0xff]   ;;  %v17933_v30 = vld [vmem:[%s23423_s12 + $0x10] sm:$0xff]  }
0x2495   :  { %13551 = vmatpush1.bf16.msra.mxu1 %v17919_v48  ;;  %13592 = vmatpush1.bf16.msra.mxu0 %v17922_v60  ;;  %v17934_v48 = vld [vmem:[%s23423_s12 + $0x18] sm:$0xff]   ;;  %v17935_v60 = vld [vmem:[%s23423_s12 + $0x20] sm:$0xff]  }
0x2496   :  { %13552 = vmatprep.subr.bf16.mxu1 %v17927_v25  ;;  %13593 = vmatprep.subr.bf16.mxu0 %v17930_v4  ;;  %v17936_v25 = vld [vmem:[%s23423_s12 + $0x28] sm:$0xff]   ;;  %v15897_v4 = vld [vmem:[%s23422_s11 + $0x4] sm:$0xf] }
0x2499   :  { %13553 = vmatpush1.bf16.msra.mxu1 %v17925_v36  ;;  %13594 = vmatpush1.bf16.msra.mxu0 %v17928_v41  ;;  %v17937_v36 = vld [vmem:[%s23423_s12 + $0x30] sm:$0xff]   ;;  %v17938_v41 = vld [vmem:[%s23423_s12 + $0x38] sm:$0xff]  }
0x249a   :  { %16237 = vmatprep.subr.bf16.mxu1 %v18270_v15 }
0x252e   :  { %v12974_v38 = vpop.f32.mrb[172].mxu1  ;;  %v13015_v5 = vpop.f32.mrb[184].mxu0 }
0x252f   :  { %v12975_v8 = vadd.f32 %v12974_v38, %v22946_v0  ;;  %v13016_v21 = vadd.f32 %v13015_v5, %v23233_v35  ;;  %v12976_v3 = vpop.f32.mrb[173].mxu1  ;;  %v13017_v54 = vpop.f32.mrb[185].mxu0  ;;  %v13039_v35 = vrot.slane %v13022_v1, %v18955_v44  ;;  %v13625_v1 = vrot.slane %v15897_v4, %v18939_v23 }
0x2530   :  { %v12977_v16 = vadd.f32 %v12976_v3, %v22948_v32  ;;  %v13018_v34 = vadd.f32 %v13017_v54, %v23235_v61  ;;  %v12978_v14 = vpop.f32.mrb[174].mxu1  ;;  %v13019_v46 = vpop.f32.mrb[186].mxu0  ;;  %v13629_v5 = vrot.slane %v15897_v4, %v18944_v26  ;;  %v13637_v26 = vrot.slane %v15897_v4, %v18955_v44 }
0x2531   :  { %v13044_v50 = vadd.f32 %v13027_v9, %v12975_v8  ;;  %v12979_v10 = vpop.f32.mrb[175].mxu1  ;;  %v13020_v59 = vpop.f32.mrb[187].mxu0  ;;  %v13046_v0 = vadd.f32 %v13035_v42, %v13016_v21  ;;  %v13633_v46 = vrot.slane %v15897_v4, %v18947_v29 }
0x2532   :  { %v13045_v12 = vadd.f32 %v13031_v53, %v12977_v16  ;;  %v13047_v49 = vadd.f32 %v13039_v35, %v13018_v34 }
0x2533   :  { %v13048_v18 = vmul.f32 0.5, %v13044_v50 }
0x2534   :  { %v13052_v40 = vmul.f32 0.5, %v13045_v12  ;;  %v13057_v32 = vmul.f32 0.5, %v13047_v49 }
0x2535   :  { %18119 = vtanh.f32 %v13048_v18 }
0x2536   :  { %18121 = vtanh.f32 %v13052_v40 }
0x2537   :  { %18123 = vtanh.f32 %v13046_v0 }
0x2538   :  { %18125 = vtanh.f32 %v13057_v32 }
0x253f   :  { %v18120_v57 = vpop.eup %18119 }
0x2540   :  { %v18122_v61 = vpop.eup %18121  ;;  %v13050_v63 = vmul.f32 0.5, %v18120_v57 }
0x2541   :  { %v13054_v6 = vmul.f32 0.5, %v18122_v61  ;;  %v18124_v13 = vpop.eup %18123 }
0x2542   :  { %v13051_v19 = vadd.f32 0.5, %v13050_v63  ;;  %v18126_v51 = vpop.eup %18125 }
0x2543   :  { %v13055_v7 = vadd.f32 0.5, %v13054_v6  ;;  %v13059_v62 = vmul.f32 0.5, %v18126_v51  ;;  %v15898_v51 = vld [vmem:[%s23424_s13] ss:$0 sm:$0xff]  ;;  %s18273_s13 = smov [#allocation9]  }
0x2544   :  { %v13062_v37 = vmul.f32 %v18124_v13, %v13051_v19  ;;  %s13812_s25 = sshll.u32 %s18273_s13, 4  ;;  %s13813_s25 = int_to_ptr.vmem [resolvable:$true] %s13812_s25 }
0x2545   :  { %v13061_v24 = vmul.f32 %v13055_v7, %v22836_v47  ;;  %v13060_v33 = vadd.f32 0.5, %v13059_v62  ;;  %v17931_v47 = vld [vmem:[%s23423_s12] sm:$0xff]   ;;  %s18241_s8 = scalar_lea.vmem %s13813_s25, 768  ;;  %p18246_p11 = scmp.lt.s32.totalorder %s13813_s25, %s13813_s25 }
0x2546   :  { %p18242_p10 = scmp.ne.s32.totalorder %s13813_s25, %s18241_s8  ;;  %p18247_p12 = scmp.lt.s32.totalorder %s18241_s8, %s18241_s8 }
0x2547   :  { %v13063_v17 = vadd.f32 %v13062_v37, %v13061_v24 }
0x2548   :  { %p18248_p13 = por %p18247_p12, %p18246_p11 }
0x2549   :  { %18127 = vtanh.f32 %v13063_v17 }
0x254a   :  { %p18249_p0 = pnand %p18248_p13, %p18242_p10 }
0x254e   :  { %v13330_v22 = vpop.f32.mrb[176].mxu1  ;;  %v13371_v43 = vpop.f32.mrb[188].mxu0 }
0x254f   :  { %v13332_v56 = vpop.f32.mrb[177].mxu1  ;;  %v13373_v20 = vpop.f32.mrb[189].mxu0 }
0x2550   :  { %v13334_v31 = vpop.f32.mrb[178].mxu1  ;;  %v13375_v52 = vpop.f32.mrb[190].mxu0 }
0x2551   :  { %v13335_v2 = vpop.f32.mrb[179].mxu1  ;;  %v13376_v55 = vpop.f32.mrb[191].mxu0 }
0x2553   :  { %v18128_v39 = vpop.eup %18127 }
0x2554   :  { %v13065_v27 = vmul.f32 %v18128_v39, %v13060_v33 }
0x2556   :  { %v13070_v28 = vpack.c.bf16 %v13065_v27, %v13065_v27 }
0x2558   :  { %13571 = vmatmul.mubr.bf16.vlgmr.msra.gmra.mrb[180].mxu1 %v13070_v28  ;;  %13612 = vmatmul.mubr.bf16.vlgmr.msra.gmra.mrb[192].mxu0 %v13070_v28 }
0x2559   :  { %16253 = vmatprep.mubr.msk.bf16.mxu1 %vm18271_vm2, %v18270_v15  ;;  %16238 = vmatpush3.bf16.msra.mxu1 %v17931_v47 }
0x255a   :  { %16239 = vmatprep.subr.bf16.mxu1 %v18270_v15 }
0x255d   :  { %16240 = vmatpush3.bf16.msra.mxu1 %v17932_v11 }
0x255e   :  { %16241 = vmatprep.subr.bf16.mxu1 %v18270_v15 }
0x2561   :  { %16242 = vmatpush3.bf16.msra.mxu1 %v17933_v30 }
0x2562   :  { %16243 = vmatprep.subr.bf16.mxu1 %v18270_v15 }
0x2565   :  { %16244 = vmatpush3.bf16.msra.mxu1 %v17934_v48 }
0x2566   :  { %16245 = vmatprep.subr.bf16.mxu1 %v18270_v15 }
0x2569   :  { %16246 = vmatpush3.bf16.msra.mxu1 %v17935_v60 }
0x256a   :  { %16247 = vmatprep.subr.bf16.mxu1 %v18270_v15 }
0x256d   :  { %16248 = vmatpush3.bf16.msra.mxu1 %v17936_v25 }
0x256e   :  { %16249 = vmatprep.subr.bf16.mxu1 %v18270_v15 }
0x2571   :  { %16250 = vmatpush3.bf16.msra.mxu1 %v17937_v36 }
0x2572   :  { %16251 = vmatprep.subr.bf16.mxu1 %v18270_v15 }
0x2575   :  { %16252 = vmatpush3.bf16.msra.mxu1 %v17938_v41 }
0x262b   :  { %v13572_v9 = vpop.f32.mrb[180].mxu1  ;;  %v13613_v38 = vpop.f32.mrb[192].mxu0 }
0x262c   :  { %v13573_v53 = vadd.f32 %v13572_v9, %v13330_v22  ;;  %v13614_v8 = vadd.f32 %v13613_v38, %v13371_v43  ;;  %v13574_v21 = vpop.f32.mrb[181].mxu1  ;;  %v13615_v3 = vpop.f32.mrb[193].mxu0 }
0x262d   :  { %v13575_v54 = vadd.f32 %v13574_v21, %v13332_v56  ;;  %v13616_v16 = vadd.f32 %v13615_v3, %v13373_v20  ;;  %v13576_v34 = vpop.f32.mrb[182].mxu1  ;;  %v13617_v14 = vpop.f32.mrb[194].mxu0 }
0x262e   :  { %v13642_v15 = vadd.f32 %v13625_v1, %v13573_v53  ;;  %v13577_v50 = vpop.f32.mrb[183].mxu1  ;;  %v13618_v42 = vpop.f32.mrb[195].mxu0  ;;  %v13644_v12 = vadd.f32 %v13633_v46, %v13614_v8 }
0x262f   :  { %v13643_v10 = vadd.f32 %v13629_v5, %v13575_v54  ;;  %v13645_v18 = vadd.f32 %v13637_v26, %v13616_v16 }
0x2630   :  { %v13646_v59 = vmul.f32 0.5, %v13642_v15 }
0x2631   :  { %v13650_v23 = vmul.f32 0.5, %v13643_v10  ;;  %v13655_v40 = vmul.f32 0.5, %v13645_v18 }
0x2632   :  { %18129 = vtanh.f32 %v13646_v59 }
0x2633   :  { %18131 = vtanh.f32 %v13650_v23 }
0x2634   :  { %18133 = vtanh.f32 %v13644_v12 }
0x2635   :  { %18135 = vtanh.f32 %v13655_v40 }
0x263c   :  { %v18130_v0 = vpop.eup %18129 }
0x263d   :  { %v18132_v35 = vpop.eup %18131  ;;  %v13648_v49 = vmul.f32 0.5, %v18130_v0 }
0x263e   :  { %v13652_v32 = vmul.f32 0.5, %v18132_v35  ;;  %v18134_v29 = vpop.eup %18133 }
0x263f   :  { %v13649_v57 = vadd.f32 0.5, %v13648_v49  ;;  %v18136_v13 = vpop.eup %18135 }
0x2640   :  { %v13653_v61 = vadd.f32 0.5, %v13652_v32  ;;  %v13657_v7 = vmul.f32 0.5, %v18136_v13 }
0x2641   :  { %v13660_v63 = vmul.f32 %v18134_v29, %v13649_v57 }
0x2642   :  { %v13659_v6 = vmul.f32 %v13653_v61, %v22889_v45  ;;  %v13658_v44 = vadd.f32 0.5, %v13657_v7 }
0x2644   :  { %v13661_v19 = vadd.f32 %v13660_v63, %v13659_v6 }
0x2646   :  { %18137 = vtanh.f32 %v13661_v19 }
0x2650   :  { %v18138_v37 = vpop.eup %18137 }
0x2651   :  { %v13663_v24 = vmul.f32 %v18138_v37, %v13658_v44 }
0x2653   :  { %v13666_v17 = vpack.c.bf16 %v13663_v24, %v13663_v24 }
0x2655   :  { %16254 = vmatmul.mubr.bf16.vlgmr.msra.gmra.mrb[184].mxu1 %v13666_v17 }
0x2728   :  { %v13772_v62 = vpop.f32.mrb[184].mxu1 }
0x2729   :  { %v13773_v22 = vadd.f32 %v15898_v51, %v13772_v62  ;;  %v16255_v43 = vpop.f32.mrb[185].mxu1 }
0x272a   :  { %v13775_v56 = vpop.f32.mrb[186].mxu1 }
0x272b   :  { %13779 = vst [vmem:[#allocation9 + $0x28] sm:$0xff] %v13773_v22  ;;  %13780 = vmax.xlane.f32.xlu1 %v13773_v22  ;;  %v16256_v45 = vpop.f32.mrb[187].mxu1 }
0x27b8   :  { %v13781_v20 = vpop.xlane.xlu1 %13780 }
0x27b9   :  { %vm13782_vm2 = vcmp.eq.f32.partialorder %v13773_v22, %v13781_v20 }
0x27ba   :  { %v13783_v31 = vsel %vm13782_vm2, %v20387_v58, 128 }
0x27bb   :  { %v13785_v52 = vshra.s32 %v13783_v31, 16  ;;  %v13784_v55 = vand.u32 65535, %v13783_v31 }
0x27bd   :  { %v13787_v2 = vcvt.s32.f32 %v13785_v52  ;;  %v13786_v39 = vcvt.s32.f32 %v13784_v55 }
0x27bf   :  { %13788 = vmin.xlane.f32.xlu0 %v13787_v2 }
0x284c   :  { %v13789_v33 = vpop.xlane.xlu0 %13788 }
0x284d   :  { %vm13790_vm0 = vcmp.eq.f32.partialorder %v13787_v2, %v13789_v33 }
0x284e   :  { %v13791_v27 = vsel %vm13790_vm0, %v13786_v39, inf }
0x284f   :  { %13792 = vmin.xlane.f32.xlu0 %v13791_v27 }
0x2850   :  { %18252 = shalt.err (!%p18249_p0)
}
0x2851   :  { %s18253_s4 = scalar_lea.hbm %s23425_s14, 768 }
0x2852   :  { %p18254_p1 = scmp.ne.s32.totalorder %s23425_s14, %s18253_s4  ;;  %p18257_p2 = scmp.lt.u32.totalorder %s18253_s4, %s23425_s14 }
0x2854   :  { %p18259_p3 = pnand %p18257_p2, %p18254_p1 }
0x2856   :  { %18262 = shalt.err (!%p18259_p3)
}
0x2857   :  { %s18274_s30 = smov 128   ;;  %s18275_s15 = smov 8   ;;  %v13795_v58 = vcvt.f32.s32 %v13789_v33  ;;  %v15908_v48 = vld [vmem:[%s23412_s1 + $0x28] sm:$0xff] }
0x2858   :  { %13818 = dma.vmem_to_hbm [thread:$0]  %s13813_s25, 768, %s23425_s14, [#allocation7], %s18274_s30, %s18274_s30, %s18275_s15  }
0x2859   :  { %s15907_s18 = sld [smem:[#allocation6 + $0x5]]  ;;  %v13796_v11 = vshll.u32 %v13795_v58, 16 }
0x285f   :  { %p13799_p4 = scmp.gt.s32.totalorder %s15907_s18, 0 }
0x2861   :  { %s13802_s6 = scalar_select %p13799_p4, 1, 0 }
0x2863   :  { %v13803_v28 = vstv %s13802_s6 }
0x2864   :  { %vm13804_vm3 = vcmp.eq.s32.totalorder %v13803_v28, 1 }
0x28dc   :  { %v13793_v47 = vpop.xlane.xlu0 %13792 }
0x28dd   :  { %v13794_v30 = vcvt.f32.s32 %v13793_v47 }
0x28df   :  { %v13797_v60 = vadd.s32 %v13796_v11, %v13794_v30 }
0x28e1   :  { %v13805_v25 = vsel %vm13804_vm3, %v15908_v48, %v13797_v60 }
0x28e2   :  { %13806 = vst.msk [vmem:[#allocation4] sm:$0xff] %vm5108_vm1, %v13805_v25 }
0x28e3   :  { %18265 = dma.done.wait [#allocation7], 768  }
0x28e4   :  { %18266 = vsyncadd [#allocation7], 4294966528 }
0x28e5   :  { %13822 = vsyncpa [#allocation7], 1 }
0x28e6   :  { %13823 = vsyncpa [#allocation8], 1 }

</bundles_post_ra>
